<compile_context>
chip_gen: v5e
topology: v5e:2x2
jax: 0.10.0
libtpu: 0.0.40
codegen_flags: <defaults>
</compile_context>

<pallas_src>
import functools

import jax
import jax.numpy as jnp
from jax.experimental import pallas as pl
from jax.experimental.pallas import tpu as pltpu


def _round_up(x, m):
    return (x + m - 1) // m * m


# ------------------------------- tiling rules --------------------------------

def _k_tiles(K):
    """(tk, Kp): contraction tile (256-deep for the 256x256 MXU) + padded K."""
    Kp = _round_up(K, 128)
    if Kp <= 256:
        return Kp, Kp
    return 256, _round_up(K, 256)


def _n_tiles(N):
    """(tn, Np): output-channel tile (lane-dense, >=128) + padded N."""
    Np = _round_up(N, 128)
    return (256 if Np % 256 == 0 else 128), Np


def _m_tiles(M):
    """(tm, Mp): row tile + padded row count."""
    if M >= 256:
        return 256, _round_up(M, 256)
    tm = _round_up(M, 16)
    return tm, tm


def _row_tile(Mp):
    for tr in (1024, 512, 256, 128, 64, 32, 16, 8):
        if Mp % tr == 0:
            return tr
    return Mp


# ----------------------------- Pallas kernels --------------------------------

def _matmul_stats_kernel(a_ref, b_ref, o_ref, stat_ref, acc_ref):
    """bf16 x bf16 matmul tile with f32 scratch accumulation.  The epilogue also
    emits per-channel sum / sum-of-squares of this (tm, tn) tile (rows 0/1 of an
    (8, tn) stats block) so BatchNorm statistics need no extra HBM pass."""
    k = pl.program_id(2)

    @pl.when(k == 0)
    def _():
        acc_ref[...] = jnp.zeros_like(acc_ref)

    acc_ref[...] += jnp.dot(a_ref[...], b_ref[...],
                            preferred_element_type=jnp.float32)

    @pl.when(k == pl.num_programs(2) - 1)
    def _():
        y = acc_ref[...]
        o_ref[...] = y.astype(o_ref.dtype)
        s = jnp.sum(y, axis=0, keepdims=True)         # (1, tn)
        sq = jnp.sum(y * y, axis=0, keepdims=True)    # (1, tn)
        row = jax.lax.broadcasted_iota(jnp.int32, stat_ref.shape, 0)
        stat_ref[...] = jnp.where(row == 0, s, jnp.where(row == 1, sq, 0.0))


def _matmul_stats(a, b, tm, tk, tn):
    """a:(Mp,Kp) bf16, b:(Kp,Np) bf16 -> (y:(Mp,Np) bf16, stats:(8*mt,Np) f32)."""
    Mp, Kp = a.shape
    Kp2, Np = b.shape
    assert Kp == Kp2 and Mp % tm == 0 and Kp % tk == 0 and Np % tn == 0
    mt, nt, kt = Mp // tm, Np // tn, Kp // tk
    return pl.pallas_call(
        _matmul_stats_kernel,
        out_shape=(jax.ShapeDtypeStruct((Mp, Np), jnp.bfloat16),
                   jax.ShapeDtypeStruct((8 * mt, Np), jnp.float32)),
        grid_spec=pltpu.PrefetchScalarGridSpec(
            num_scalar_prefetch=0,
            grid=(mt, nt, kt),
            in_specs=[pl.BlockSpec((tm, tk), lambda i, j, k: (i, k)),
                      pl.BlockSpec((tk, tn), lambda i, j, k: (k, j))],
            out_specs=[pl.BlockSpec((tm, tn), lambda i, j, k: (i, j)),
                       pl.BlockSpec((8, tn), lambda i, j, k: (i, j))],
            scratch_shapes=[pltpu.VMEM((tm, tn), jnp.float32)]),
        compiler_params=pltpu.CompilerParams(
            dimension_semantics=("parallel", "parallel", "arbitrary"),
            vmem_limit_bytes=32 * 1024 * 1024),
    )(a, b)


def _bn_apply_kernel(y_ref, sc_ref, sh_ref, o_ref, *, relu):
    out = y_ref[...].astype(jnp.float32) * sc_ref[...] + sh_ref[...]
    if relu:
        out = jnp.maximum(out, 0.0)
    o_ref[...] = out.astype(o_ref.dtype)


def _bn_apply_res_kernel(y_ref, sc_ref, sh_ref, r_ref, o_ref, *, relu):
    out = (y_ref[...].astype(jnp.float32) * sc_ref[...] + sh_ref[...]
           + r_ref[...].astype(jnp.float32))
    if relu:
        out = jnp.maximum(out, 0.0)
    o_ref[...] = out.astype(o_ref.dtype)


def _bn_apply_mask_kernel(y_ref, sc_ref, sh_ref, m_ref, o_ref):
    out = y_ref[...].astype(jnp.float32) * sc_ref[...] + sh_ref[...]
    out = jnp.where(m_ref[...] > 0.0, jnp.maximum(out, 0.0), out)
    o_ref[...] = out.astype(o_ref.dtype)


def _bn_apply(y2d, scale, shift, *, residual2d=None, relu=False, relu_mask=None):
    """Row-tiled BN normalize (+residual)(+ReLU / channel-masked ReLU)."""
    Mp, Np = y2d.shape
    tr = _row_tile(Mp)
    row_spec = pl.BlockSpec((tr, Np), lambda i: (i, 0))
    vec_spec = pl.BlockSpec((1, Np), lambda i: (0, 0))
    if relu_mask is not None:
        kernel = _bn_apply_mask_kernel
        in_specs = [row_spec, vec_spec, vec_spec, vec_spec]
        args = (y2d, scale, shift, relu_mask)
    elif residual2d is not None:
        assert residual2d.shape == y2d.shape
        kernel = functools.partial(_bn_apply_res_kernel, relu=relu)
        in_specs = [row_spec, vec_spec, vec_spec, row_spec]
        args = (y2d, scale, shift, residual2d)
    else:
        kernel = functools.partial(_bn_apply_kernel, relu=relu)
        in_specs = [row_spec, vec_spec, vec_spec]
        args = (y2d, scale, shift)
    return pl.pallas_call(
        kernel,
        out_shape=jax.ShapeDtypeStruct((Mp, Np), jnp.bfloat16),
        grid_spec=pltpu.PrefetchScalarGridSpec(
            num_scalar_prefetch=0,
            grid=(Mp // tr,),
            in_specs=in_specs,
            out_specs=row_spec),
        compiler_params=pltpu.CompilerParams(
            dimension_semantics=("parallel",)),
    )(*args)


def _head_kernel(x_ref, w1_ref, b1_ref, w2_ref, b2_ref, o_ref, *, inv_hw):
    """Fused AdaptiveAvgPool2d((1,1)) + fc + fc2."""
    pooled = jnp.sum(x_ref[...].astype(jnp.float32), axis=1) * inv_hw   # (Nb, C)
    y1 = jnp.dot(pooled.astype(jnp.bfloat16), w1_ref[...],
                 preferred_element_type=jnp.float32) + b1_ref[...]
    y2 = jnp.dot(y1.astype(jnp.bfloat16), w2_ref[...],
                 preferred_element_type=jnp.float32) + b2_ref[...]
    o_ref[...] = y2


def pallas_head(x3, fc_arr, fc2_arr, inv_hw):
    """x3:(Nb, HW, C) bf16 -> (Nb, Np2) f32 logits (padded)."""
    Nb, HW, C = x3.shape
    Np2 = fc2_arr["w"].shape[1]

    def full(shape):
        return pl.BlockSpec(shape, lambda i, _s=shape: (0,) * len(_s))

    return pl.pallas_call(
        functools.partial(_head_kernel, inv_hw=inv_hw),
        out_shape=jax.ShapeDtypeStruct((Nb, Np2), jnp.float32),
        grid_spec=pltpu.PrefetchScalarGridSpec(
            num_scalar_prefetch=0,
            grid=(1,),
            in_specs=[full((Nb, HW, C)),
                      full(fc_arr["w"].shape), full(fc_arr["b"].shape),
                      full(fc2_arr["w"].shape), full(fc2_arr["b"].shape)],
            out_specs=full((Nb, Np2))),
    )(x3, fc_arr["w"], fc_arr["b"], fc2_arr["w"], fc2_arr["b"])


# ------------------------------- glue (JAX) ----------------------------------

def _im2col(x, kh, kw, stride, padding, Mp, Kp):
    """NHWC (bf16) -> zero-padded (Mp, Kp) bf16 patch matrix (kh, kw, C order)."""
    N, H, W, C = x.shape
    Ho = (H + 2 * padding - kh) // stride + 1
    Wo = (W + 2 * padding - kw) // stride + 1
    xp = jnp.pad(x, ((0, 0), (padding, padding), (padding, padding), (0, 0)))
    cols = [xp[:, i:i + stride * Ho:stride, j:j + stride * Wo:stride, :]
            for i in range(kh) for j in range(kw)]
    patches = jnp.concatenate(cols, axis=-1).reshape(N * Ho * Wo, kh * kw * C)
    M, K = patches.shape
    return jnp.pad(patches, ((0, Mp - M), (0, Kp - K))).astype(jnp.bfloat16)


def _bn_scale_shift(stats, m_true, gamma_p, beta_p, eps=1e-5):
    """Fold fused per-tile sums into per-channel affine scale/shift (tiny op)."""
    Np = stats.shape[1]
    s = stats.reshape(-1, 8, Np)
    mean = jnp.sum(s[:, 0, :], axis=0) / m_true
    var = jnp.maximum(jnp.sum(s[:, 1, :], axis=0) / m_true - mean * mean, 0.0)
    scale = gamma_p * jax.lax.rsqrt(var + eps)
    shift = beta_p - mean * scale
    return scale.reshape(1, Np), shift.reshape(1, Np)


def conv_bn(x_nhwc, arr, meta, relu, residual2d=None):
    """conv2d(bias=False) + BN(batch stats)(+residual)(+ReLU).
    Returns ((Mp, Np) bf16 activation, (N, Ho, Wo, Cout))."""
    N, H, W, _ = x_nhwc.shape
    kh, kw, st, pd = meta["kh"], meta["kw"], meta["stride"], meta["padding"]
    Ho = (H + 2 * pd - kh) // st + 1
    Wo = (W + 2 * pd - kw) // st + 1
    M = N * Ho * Wo
    tm, Mp = _m_tiles(M)
    patches = _im2col(x_nhwc, kh, kw, st, pd, Mp, meta["Kp"])
    y2d, stats = _matmul_stats(patches, arr["w"], tm, meta["tk"], meta["tn"])
    scale, shift = _bn_scale_shift(stats, M, arr["g"], arr["b"])
    out2d = _bn_apply(y2d, scale, shift, residual2d=residual2d, relu=relu)
    return out2d, (N, Ho, Wo, meta["cout"])


def conv_bn_fused_down(x_nhwc, arr, meta):
    """Downsample block entry: 3x3 main conv + 1x1 shortcut conv share one
    matmul (shortcut weights live at the center-tap K rows), one stats epilogue
    and one BN-apply (ReLU masked to the main half only).
    Returns (main (Mp,Np1) bf16 [ReLU'd], shortcut (Mp,Np1) bf16, dims)."""
    N, H, W, _ = x_nhwc.shape
    st = meta["stride"]
    Ho = (H + 2 - 3) // st + 1
    Wo = (W + 2 - 3) // st + 1
    M = N * Ho * Wo
    tm, Mp = _m_tiles(M)
    patches = _im2col(x_nhwc, 3, 3, st, 1, Mp, meta["Kp"])
    y2d, stats = _matmul_stats(patches, arr["w"], tm, meta["tk"], meta["tn"])
    scale, shift = _bn_scale_shift(stats, M, arr["g"], arr["b"])
    out2d = _bn_apply(y2d, scale, shift, relu_mask=arr["mask"])
    Np1 = meta["Np1"]
    o2d = out2d[:, :Np1]
    sc2d = out2d[:, Np1:2 * Np1]
    return o2d, sc2d, (N, Ho, Wo, meta["cout"])


def _un2d(x2d, dims):
    N, H, W, C = dims
    return x2d[:N * H * W, :C].reshape(N, H, W, C)


# --------------------------- parameters / prepare ----------------------------

def init_params(key, num_block=(1, 1, 1, 1), num_classes=50):
    keys = iter(jax.random.split(key, 256))

    def conv_w(cout, cin, kh, kw):
        std = (2.0 / (cout * kh * kw)) ** 0.5   # kaiming_normal, fan_out, relu
        return jax.random.normal(next(keys), (cout, cin, kh, kw), jnp.float32) * std

    def bn(c):
        return jnp.ones((c,), jnp.float32), jnp.zeros((c,), jnp.float32)

    def linear(cout, cin):
        bound = 1.0 / (cin ** 0.5)
        w = jax.random.uniform(next(keys), (cout, cin), jnp.float32, -bound, bound)
        b = jax.random.uniform(next(keys), (cout,), jnp.float32, -bound, bound)
        return w, b

    params = {}
    g1, b1 = bn(64)
    params["conv1"] = {"w": conv_w(64, 3, 3, 3), "g": g1, "b": b1}

    blocks = []
    in_c = 64
    for out_c, n, s in zip((64, 128, 256, 512), num_block, (1, 2, 2, 2)):
        strides = [s] + [1] * (n - 1)
        for st in strides:
            bp = {"stride": st,
                  "conv1_w": conv_w(out_c, in_c, 3, 3), "bn1": bn(out_c),
                  "conv2_w": conv_w(out_c, out_c, 3, 3), "bn2": bn(out_c)}
            if st != 1 or in_c != out_c:
                bp["sc_w"] = conv_w(out_c, in_c, 1, 1)
                bp["bn_sc"] = bn(out_c)
            blocks.append(bp)
            in_c = out_c
    params["blocks"] = blocks

    params["fc"] = linear(num_classes, 512)   # num_classes forced to 50 in __init__
    params["fc2"] = linear(1, num_classes)
    return params


def _prep_conv(w, gamma, beta, stride, padding):
    cout, cin, kh, kw = w.shape
    K = kh * kw * cin
    tk, Kp = _k_tiles(K)
    tn, Np = _n_tiles(cout)
    w2d = jnp.transpose(w, (2, 3, 1, 0)).reshape(K, cout)
    w2d = jnp.pad(w2d, ((0, Kp - K), (0, Np - cout))).astype(jnp.bfloat16)
    g = jnp.pad(gamma.astype(jnp.float32), (0, Np - cout), constant_values=1.0)
    b = jnp.pad(beta.astype(jnp.float32), (0, Np - cout))
    arr = {"w": w2d, "g": g, "b": b}
    meta = dict(kh=kh, kw=kw, stride=stride, padding=padding, cout=cout,
                Kp=Kp, tk=tk, tn=tn)
    return arr, meta


def _prep_fused_down(w1, bn1, wsc, bnsc, stride):
    """Pack 3x3 main-conv + 1x1 shortcut-conv weights into one (Kp, 2*Np1)
    matmul operand; 1x1 weights sit at the center-tap rows of the 3x3 K axis."""
    cout, cin, _, _ = w1.shape
    K = 9 * cin
    tk, Kp = _k_tiles(K)
    _, Np1 = _n_tiles(cout)
    Np_comb = 2 * Np1
    tn = 256 if Np_comb % 256 == 0 else 128
    w_main = jnp.transpose(w1, (2, 3, 1, 0)).reshape(K, cout)
    w_sc = jnp.transpose(wsc, (2, 3, 1, 0)).reshape(cin, cout)
    wc = jnp.zeros((Kp, Np_comb), jnp.float32)
    wc = wc.at[:K, :cout].set(w_main)
    wc = wc.at[4 * cin:5 * cin, Np1:Np1 + cout].set(w_sc)
    g = jnp.concatenate([
        jnp.pad(bn1[0].astype(jnp.float32), (0, Np1 - cout), constant_values=1.0),
        jnp.pad(bnsc[0].astype(jnp.float32), (0, Np1 - cout), constant_values=1.0)])
    b = jnp.concatenate([
        jnp.pad(bn1[1].astype(jnp.float32), (0, Np1 - cout)),
        jnp.pad(bnsc[1].astype(jnp.float32), (0, Np1 - cout))])
    mask = jnp.concatenate([jnp.ones((Np1,), jnp.float32),
                            jnp.zeros((Np1,), jnp.float32)]).reshape(1, Np_comb)
    arr = {"w": wc.astype(jnp.bfloat16), "g": g, "b": b, "mask": mask}
    meta = dict(stride=stride, cout=cout, Kp=Kp, tk=tk, tn=tn, Np1=Np1)
    return arr, meta


def prepare_params(params):
    """One-time conversion: padded bf16 matmul operands + f32 BN vectors."""
    arrs, meta = {}, {}
    arrs["stem"], meta["stem"] = _prep_conv(
        params["conv1"]["w"], params["conv1"]["g"], params["conv1"]["b"],
        stride=1, padding=1)

    barrs, bmetas = [], []
    for bp in params["blocks"]:
        st = bp["stride"]
        has_sc = "sc_w" in bp
        ba, bm = {}, {"fused": has_sc}
        if has_sc:
            ba["down"], bm["down"] = _prep_fused_down(
                bp["conv1_w"], bp["bn1"], bp["sc_w"], bp["bn_sc"], st)
        else:
            ba["conv1"], bm["conv1"] = _prep_conv(
                bp["conv1_w"], bp["bn1"][0], bp["bn1"][1], stride=st, padding=1)
        ba["conv2"], bm["conv2"] = _prep_conv(
            bp["conv2_w"], bp["bn2"][0], bp["bn2"][1], stride=1, padding=1)
        barrs.append(ba)
        bmetas.append(bm)
    arrs["blocks"], meta["blocks"] = barrs, bmetas

    fw, fb = params["fc"]                        # (50, 512), (50,)
    nc = fw.shape[0]
    Np1 = _round_up(nc, 128)
    arrs["fc"] = {"w": jnp.pad(fw.T, ((0, 0), (0, Np1 - nc))).astype(jnp.bfloat16),
                  "b": jnp.pad(fb, (0, Np1 - nc)).reshape(1, Np1).astype(jnp.float32)}
    f2w, f2b = params["fc2"]                     # (1, 50), (1,)
    no2, ni2 = f2w.shape
    Np2 = _round_up(no2, 128)
    arrs["fc2"] = {"w": jnp.pad(f2w.T, ((0, Np1 - ni2), (0, Np2 - no2))).astype(jnp.bfloat16),
                   "b": jnp.pad(f2b, (0, Np2 - no2)).reshape(1, Np2).astype(jnp.float32)}
    return arrs, meta


# --------------------------------- forward -----------------------------------

def resnet_forward(arrs, x_nchw, meta):
    # NCHW (PyTorch) -> NHWC, bf16 activations for the MXU.
    x_nhwc = jnp.transpose(x_nchw, (0, 2, 3, 1)).astype(jnp.bfloat16)

    x2d, dims = conv_bn(x_nhwc, arrs["stem"], meta["stem"], relu=True)

    for barr, bmeta in zip(arrs["blocks"], meta["blocks"]):
        blk_in = _un2d(x2d, dims)
        if bmeta["fused"]:
            o2d, sc2d, odims = conv_bn_fused_down(blk_in, barr["down"],
                                                  bmeta["down"])
        else:
            o2d, odims = conv_bn(blk_in, barr["conv1"], bmeta["conv1"], relu=True)
            sc2d = x2d
        # residual_function ends in BN; ReLU is applied AFTER adding the shortcut.
        x2d, dims = conv_bn(_un2d(o2d, odims), barr["conv2"], bmeta["conv2"],
                            relu=True, residual2d=sc2d)

    N, H, W, C = dims
    HW = H * W
    Nb = max(8, _round_up(N, 8))
    x3 = x2d[:N * HW, :C].reshape(N, HW, C)
    x3 = jnp.pad(x3, ((0, Nb - N), (0, 0), (0, 0)))
    y = pallas_head(x3, arrs["fc"], arrs["fc2"], inv_hw=1.0 / HW)  # (Nb, 128) f32
    return y[:N, :1]                                               # (N, 1) f32


if __name__ == "__main__":
    key = jax.random.PRNGKey(0)
    pkey, xkey = jax.random.split(key)
    params = init_params(pkey, num_block=(1, 1, 1, 1))  # BasicBlock, 1 block/stage
    arrs, meta = prepare_params(params)                 # one-time weight prep
    x = jax.random.normal(xkey, (2, 3, 16, 16), jnp.float32)  # NCHW input

    fwd = jax.jit(lambda a, xx: resnet_forward(a, xx, meta))
    out = jax.block_until_ready(fwd(arrs, x))
    assert out.shape == (2, 1) and out.dtype == jnp.float32
    print("KERNEL_OK")
</pallas_src>

<mosaic_0001>
module attributes {stable_mosaic.version = 11 : i64} {
  func.func @_matmul_stats_kernel(%arg0: i32, %arg1: i32, %arg2: i32, %arg3: memref<256x128xbf16, #tpu.memory_space<vmem>>, %arg4: memref<128x128xbf16, #tpu.memory_space<vmem>>, %arg5: memref<256x128xbf16, #tpu.memory_space<vmem>>, %arg6: memref<8x128xf32, #tpu.memory_space<vmem>>, %arg7: memref<256x128xf32, #tpu.memory_space<vmem>>) attributes {dimension_semantics = [#tpu.dimension_semantics<parallel>, #tpu.dimension_semantics<parallel>, #tpu.dimension_semantics<arbitrary>], iteration_bounds = array<i64: 2, 1, 1>, scalar_prefetch = 0 : i64, scratch_operands = 1 : i64, tpu.core_type = #tpu.core_type<tc>, window_params = [{transform_indices = @transform_0, window_bounds = array<i64: 256, 128>}, {transform_indices = @transform_1, window_bounds = array<i64: 128, 128>}, {transform_indices = @transform_2, window_bounds = array<i64: 256, 128>}, {transform_indices = @transform_3, window_bounds = array<i64: 8, 128>}]} {
    %c0_i32 = arith.constant 0 : i32
    %0 = arith.cmpi eq, %arg2, %c0_i32 : i32
    %1 = arith.extui %0 : i1 to i32
    %c0_i32_0 = arith.constant 0 : i32
    %2 = arith.cmpi ne, %1, %c0_i32_0 : i32
    scf.if %2 {
      %cst_10 = arith.constant 0.000000e+00 : f32
      %12 = vector.broadcast %cst_10 : f32 to vector<256x128xf32>
      %c0_11 = arith.constant 0 : index
      %c0_12 = arith.constant 0 : index
      %13 = vector.load %arg7[%c0_11, %c0_12] : memref<256x128xf32, #tpu.memory_space<vmem>>, vector<256x128xf32>
      tpu.vector_store %arg7[%c0_11, %c0_12], %12 {strides = array<i32>} : memref<256x128xf32, #tpu.memory_space<vmem>>, vector<256x128xf32>,
    } else {
    }
    %c0 = arith.constant 0 : index
    %c0_1 = arith.constant 0 : index
    %3 = vector.load %arg7[%c0, %c0_1] : memref<256x128xf32, #tpu.memory_space<vmem>>, vector<256x128xf32>
    %c0_2 = arith.constant 0 : index
    %c0_3 = arith.constant 0 : index
    %4 = vector.load %arg3[%c0_2, %c0_3] : memref<256x128xbf16, #tpu.memory_space<vmem>>, vector<256x128xbf16>
    %c0_4 = arith.constant 0 : index
    %c0_5 = arith.constant 0 : index
    %5 = vector.load %arg4[%c0_4, %c0_5] : memref<128x128xbf16, #tpu.memory_space<vmem>>, vector<128x128xbf16>
    %cst = arith.constant dense<0.000000e+00> : vector<256x128xf32>
    %6 = tpu.matmul %4, %5, %cst {dimension_numbers = #tpu.dot_dimension_numbers<[1], [0], [0], [1], [0, 0, 1, 1], [], []>} : vector<256x128xbf16>, vector<128x128xbf16>, vector<256x128xf32> -> vector<256x128xf32>
    %7 = arith.addf %3, %6 : vector<256x128xf32>
    %c0_6 = arith.constant 0 : index
    %c0_7 = arith.constant 0 : index
    %8 = vector.load %arg7[%c0_6, %c0_7] : memref<256x128xf32, #tpu.memory_space<vmem>>, vector<256x128xf32>
    tpu.vector_store %arg7[%c0_6, %c0_7], %7 {strides = array<i32>} : memref<256x128xf32, #tpu.memory_space<vmem>>, vector<256x128xf32>,
    %c0_i32_8 = arith.constant 0 : i32
    %9 = arith.cmpi eq, %arg2, %c0_i32_8 : i32
    %10 = arith.extui %9 : i1 to i32
    %c0_i32_9 = arith.constant 0 : i32
    %11 = arith.cmpi ne, %10, %c0_i32_9 : i32
    scf.if %11 {
      %c0_10 = arith.constant 0 : index
      %c0_11 = arith.constant 0 : index
      %12 = vector.load %arg7[%c0_10, %c0_11] : memref<256x128xf32, #tpu.memory_space<vmem>>, vector<256x128xf32>
      %13 = arith.truncf %12 : vector<256x128xf32> to vector<256x128xbf16>
      %c0_12 = arith.constant 0 : index
      %c0_13 = arith.constant 0 : index
      %14 = vector.load %arg5[%c0_12, %c0_13] : memref<256x128xbf16, #tpu.memory_space<vmem>>, vector<256x128xbf16>
      tpu.vector_store %arg5[%c0_12, %c0_13], %13 {strides = array<i32>} : memref<256x128xbf16, #tpu.memory_space<vmem>>, vector<256x128xbf16>,
      %cst_14 = arith.constant dense<0.000000e+00> : vector<128xf32>
      %15 = vector.multi_reduction <add>, %12, %cst_14 [0] : vector<256x128xf32> to vector<128xf32>
      %16 = vector.shape_cast %15 : vector<128xf32> to vector<1x128xf32>
      %17 = arith.mulf %12, %12 : vector<256x128xf32>
      %cst_15 = arith.constant dense<0.000000e+00> : vector<128xf32>
      %18 = vector.multi_reduction <add>, %17, %cst_15 [0] : vector<256x128xf32> to vector<128xf32>
      %19 = vector.shape_cast %18 : vector<128xf32> to vector<1x128xf32>
      %20 = tpu.iota {dimensions = array<i32: 0>} : vector<8x128xi32>
      %c0_i32_16 = arith.constant 0 : i32
      %21 = vector.broadcast %c0_i32_16 : i32 to vector<8x128xi32>
      %22 = arith.cmpi eq, %20, %21 : vector<8x128xi32>
      %c1_i32 = arith.constant 1 : i32
      %23 = vector.broadcast %c1_i32 : i32 to vector<8x128xi32>
      %24 = arith.cmpi eq, %20, %23 : vector<8x128xi32>
      %cst_17 = arith.constant 0.000000e+00 : f32
      %25 = vector.shape_cast %19 : vector<1x128xf32> to vector<1x128xf32>
      %26 = vector.broadcast %25 : vector<1x128xf32> to vector<8x128xf32>
      %27 = vector.broadcast %cst_17 : f32 to vector<8x128xf32>
      %28 = arith.select %24, %26, %27 : vector<8x128xi1>, vector<8x128xf32>
      %29 = vector.shape_cast %16 : vector<1x128xf32> to vector<1x128xf32>
      %30 = vector.broadcast %29 : vector<1x128xf32> to vector<8x128xf32>
      %31 = arith.select %22, %30, %28 : vector<8x128xi1>, vector<8x128xf32>
      %c0_18 = arith.constant 0 : index
      %c0_19 = arith.constant 0 : index
      %32 = vector.load %arg6[%c0_18, %c0_19] : memref<8x128xf32, #tpu.memory_space<vmem>>, vector<8x128xf32>
      tpu.vector_store %arg6[%c0_18, %c0_19], %31 {strides = array<i32>} : memref<8x128xf32, #tpu.memory_space<vmem>>, vector<8x128xf32>,
    } else {
    }
    return
  }
  func.func @transform_0(%arg0: i32, %arg1: i32, %arg2: i32) -> (i32, i32) {
    %c0_i32 = arith.constant 0 : i32
    return %arg0, %arg2 : i32, i32
  }
  func.func @transform_1(%arg0: i32, %arg1: i32, %arg2: i32) -> (i32, i32) {
    %c0_i32 = arith.constant 0 : i32
    return %arg2, %arg1 : i32, i32
  }
  func.func @transform_2(%arg0: i32, %arg1: i32, %arg2: i32) -> (i32, i32) {
    %c0_i32 = arith.constant 0 : i32
    return %arg0, %arg1 : i32, i32
  }
  func.func @transform_3(%arg0: i32, %arg1: i32, %arg2: i32) -> (i32, i32) {
    %c0_i32 = arith.constant 0 : i32
    return %arg0, %arg1 : i32, i32
  }
}

module attributes {stable_mosaic.version = 11 : i64} {
  func.func @_bn_apply_kernel(%arg0: i32, %arg1: memref<512x128xbf16, #tpu.memory_space<vmem>>, %arg2: memref<1x128xf32, #tpu.memory_space<vmem>>, %arg3: memref<1x128xf32, #tpu.memory_space<vmem>>, %arg4: memref<512x128xbf16, #tpu.memory_space<vmem>>) attributes {dimension_semantics = [#tpu.dimension_semantics<parallel>], iteration_bounds = array<i64: 1>, scalar_prefetch = 0 : i64, scratch_operands = 0 : i64, tpu.core_type = #tpu.core_type<tc>, window_params = [{transform_indices = @transform_0, window_bounds = array<i64: 512, 128>}, {pipeline_mode = #tpu.pipeline_mode<synchronous>, transform_indices = @transform_1, window_bounds = array<i64: 1, 128>}, {pipeline_mode = #tpu.pipeline_mode<synchronous>, transform_indices = @transform_2, window_bounds = array<i64: 1, 128>}, {transform_indices = @transform_3, window_bounds = array<i64: 512, 128>}]} {
    %c0 = arith.constant 0 : index
    %c0_0 = arith.constant 0 : index
    %0 = vector.load %arg1[%c0, %c0_0] : memref<512x128xbf16, #tpu.memory_space<vmem>>, vector<512x128xbf16>
    %1 = arith.extf %0 : vector<512x128xbf16> to vector<512x128xf32>
    %c0_1 = arith.constant 0 : index
    %c0_2 = arith.constant 0 : index
    %2 = vector.load %arg2[%c0_1, %c0_2] : memref<1x128xf32, #tpu.memory_space<vmem>>, vector<1x128xf32>
    %3 = vector.broadcast %2 : vector<1x128xf32> to vector<512x128xf32>
    %4 = arith.mulf %1, %3 : vector<512x128xf32>
    %c0_3 = arith.constant 0 : index
    %c0_4 = arith.constant 0 : index
    %5 = vector.load %arg3[%c0_3, %c0_4] : memref<1x128xf32, #tpu.memory_space<vmem>>, vector<1x128xf32>
    %6 = vector.broadcast %5 : vector<1x128xf32> to vector<512x128xf32>
    %7 = arith.addf %4, %6 : vector<512x128xf32>
    %cst = arith.constant 0.000000e+00 : f32
    %8 = vector.broadcast %cst : f32 to vector<512x128xf32>
    %9 = arith.maximumf %7, %8 : vector<512x128xf32>
    %10 = arith.truncf %9 : vector<512x128xf32> to vector<512x128xbf16>
    %c0_5 = arith.constant 0 : index
    %c0_6 = arith.constant 0 : index
    %11 = vector.load %arg4[%c0_5, %c0_6] : memref<512x128xbf16, #tpu.memory_space<vmem>>, vector<512x128xbf16>
    tpu.vector_store %arg4[%c0_5, %c0_6], %10 {strides = array<i32>} : memref<512x128xbf16, #tpu.memory_space<vmem>>, vector<512x128xbf16>,
    return
  }
  func.func @transform_0(%arg0: i32) -> (i32, i32) {
    %c0_i32 = arith.constant 0 : i32
    %c0_i32_0 = arith.constant 0 : i32
    return %arg0, %c0_i32 : i32, i32
  }
  func.func @transform_1(%arg0: i32) -> (i32, i32) {
    %c0_i32 = arith.constant 0 : i32
    %c0_i32_0 = arith.constant 0 : i32
    %c0_i32_1 = arith.constant 0 : i32
    return %c0_i32, %c0_i32_0 : i32, i32
  }
  func.func @transform_2(%arg0: i32) -> (i32, i32) {
    %c0_i32 = arith.constant 0 : i32
    %c0_i32_0 = arith.constant 0 : i32
    %c0_i32_1 = arith.constant 0 : i32
    return %c0_i32, %c0_i32_0 : i32, i32
  }
  func.func @transform_3(%arg0: i32) -> (i32, i32) {
    %c0_i32 = arith.constant 0 : i32
    %c0_i32_0 = arith.constant 0 : i32
    return %arg0, %c0_i32 : i32, i32
  }
}

module attributes {stable_mosaic.version = 11 : i64} {
  func.func @_matmul_stats_kernel(%arg0: i32, %arg1: i32, %arg2: i32, %arg3: memref<256x256xbf16, #tpu.memory_space<vmem>>, %arg4: memref<256x128xbf16, #tpu.memory_space<vmem>>, %arg5: memref<256x128xbf16, #tpu.memory_space<vmem>>, %arg6: memref<8x128xf32, #tpu.memory_space<vmem>>, %arg7: memref<256x128xf32, #tpu.memory_space<vmem>>) attributes {dimension_semantics = [#tpu.dimension_semantics<parallel>, #tpu.dimension_semantics<parallel>, #tpu.dimension_semantics<arbitrary>], iteration_bounds = array<i64: 2, 1, 3>, scalar_prefetch = 0 : i64, scratch_operands = 1 : i64, tpu.core_type = #tpu.core_type<tc>, window_params = [{transform_indices = @transform_0, window_bounds = array<i64: 256, 256>}, {transform_indices = @transform_1, window_bounds = array<i64: 256, 128>}, {transform_indices = @transform_2, window_bounds = array<i64: 256, 128>}, {transform_indices = @transform_3, window_bounds = array<i64: 8, 128>}]} {
    %c0_i32 = arith.constant 0 : i32
    %0 = arith.cmpi eq, %arg2, %c0_i32 : i32
    %1 = arith.extui %0 : i1 to i32
    %c0_i32_0 = arith.constant 0 : i32
    %2 = arith.cmpi ne, %1, %c0_i32_0 : i32
    scf.if %2 {
      %cst_9 = arith.constant 0.000000e+00 : f32
      %12 = vector.broadcast %cst_9 : f32 to vector<256x128xf32>
      %c0_10 = arith.constant 0 : index
      %c0_11 = arith.constant 0 : index
      %13 = vector.load %arg7[%c0_10, %c0_11] : memref<256x128xf32, #tpu.memory_space<vmem>>, vector<256x128xf32>
      tpu.vector_store %arg7[%c0_10, %c0_11], %12 {strides = array<i32>} : memref<256x128xf32, #tpu.memory_space<vmem>>, vector<256x128xf32>,
    } else {
    }
    %c0 = arith.constant 0 : index
    %c0_1 = arith.constant 0 : index
    %3 = vector.load %arg7[%c0, %c0_1] : memref<256x128xf32, #tpu.memory_space<vmem>>, vector<256x128xf32>
    %c0_2 = arith.constant 0 : index
    %c0_3 = arith.constant 0 : index
    %4 = vector.load %arg3[%c0_2, %c0_3] : memref<256x256xbf16, #tpu.memory_space<vmem>>, vector<256x256xbf16>
    %c0_4 = arith.constant 0 : index
    %c0_5 = arith.constant 0 : index
    %5 = vector.load %arg4[%c0_4, %c0_5] : memref<256x128xbf16, #tpu.memory_space<vmem>>, vector<256x128xbf16>
    %cst = arith.constant dense<0.000000e+00> : vector<256x128xf32>
    %6 = tpu.matmul %4, %5, %cst {dimension_numbers = #tpu.dot_dimension_numbers<[1], [0], [0], [1], [0, 0, 1, 1], [], []>} : vector<256x256xbf16>, vector<256x128xbf16>, vector<256x128xf32> -> vector<256x128xf32>
    %7 = arith.addf %3, %6 : vector<256x128xf32>
    %c0_6 = arith.constant 0 : index
    %c0_7 = arith.constant 0 : index
    %8 = vector.load %arg7[%c0_6, %c0_7] : memref<256x128xf32, #tpu.memory_space<vmem>>, vector<256x128xf32>
    tpu.vector_store %arg7[%c0_6, %c0_7], %7 {strides = array<i32>} : memref<256x128xf32, #tpu.memory_space<vmem>>, vector<256x128xf32>,
    %c2_i32 = arith.constant 2 : i32
    %9 = arith.cmpi eq, %arg2, %c2_i32 : i32
    %10 = arith.extui %9 : i1 to i32
    %c0_i32_8 = arith.constant 0 : i32
    %11 = arith.cmpi ne, %10, %c0_i32_8 : i32
    scf.if %11 {
      %c0_9 = arith.constant 0 : index
      %c0_10 = arith.constant 0 : index
      %12 = vector.load %arg7[%c0_9, %c0_10] : memref<256x128xf32, #tpu.memory_space<vmem>>, vector<256x128xf32>
      %13 = arith.truncf %12 : vector<256x128xf32> to vector<256x128xbf16>
      %c0_11 = arith.constant 0 : index
      %c0_12 = arith.constant 0 : index
      %14 = vector.load %arg5[%c0_11, %c0_12] : memref<256x128xbf16, #tpu.memory_space<vmem>>, vector<256x128xbf16>
      tpu.vector_store %arg5[%c0_11, %c0_12], %13 {strides = array<i32>} : memref<256x128xbf16, #tpu.memory_space<vmem>>, vector<256x128xbf16>,
      %cst_13 = arith.constant dense<0.000000e+00> : vector<128xf32>
      %15 = vector.multi_reduction <add>, %12, %cst_13 [0] : vector<256x128xf32> to vector<128xf32>
      %16 = vector.shape_cast %15 : vector<128xf32> to vector<1x128xf32>
      %17 = arith.mulf %12, %12 : vector<256x128xf32>
      %cst_14 = arith.constant dense<0.000000e+00> : vector<128xf32>
      %18 = vector.multi_reduction <add>, %17, %cst_14 [0] : vector<256x128xf32> to vector<128xf32>
      %19 = vector.shape_cast %18 : vector<128xf32> to vector<1x128xf32>
      %20 = tpu.iota {dimensions = array<i32: 0>} : vector<8x128xi32>
      %c0_i32_15 = arith.constant 0 : i32
      %21 = vector.broadcast %c0_i32_15 : i32 to vector<8x128xi32>
      %22 = arith.cmpi eq, %20, %21 : vector<8x128xi32>
      %c1_i32 = arith.constant 1 : i32
      %23 = vector.broadcast %c1_i32 : i32 to vector<8x128xi32>
      %24 = arith.cmpi eq, %20, %23 : vector<8x128xi32>
      %cst_16 = arith.constant 0.000000e+00 : f32
      %25 = vector.shape_cast %19 : vector<1x128xf32> to vector<1x128xf32>
      %26 = vector.broadcast %25 : vector<1x128xf32> to vector<8x128xf32>
      %27 = vector.broadcast %cst_16 : f32 to vector<8x128xf32>
      %28 = arith.select %24, %26, %27 : vector<8x128xi1>, vector<8x128xf32>
      %29 = vector.shape_cast %16 : vector<1x128xf32> to vector<1x128xf32>
      %30 = vector.broadcast %29 : vector<1x128xf32> to vector<8x128xf32>
      %31 = arith.select %22, %30, %28 : vector<8x128xi1>, vector<8x128xf32>
      %c0_17 = arith.constant 0 : index
      %c0_18 = arith.constant 0 : index
      %32 = vector.load %arg6[%c0_17, %c0_18] : memref<8x128xf32, #tpu.memory_space<vmem>>, vector<8x128xf32>
      tpu.vector_store %arg6[%c0_17, %c0_18], %31 {strides = array<i32>} : memref<8x128xf32, #tpu.memory_space<vmem>>, vector<8x128xf32>,
    } else {
    }
    return
  }
  func.func @transform_0(%arg0: i32, %arg1: i32, %arg2: i32) -> (i32, i32) {
    %c0_i32 = arith.constant 0 : i32
    return %arg0, %arg2 : i32, i32
  }
  func.func @transform_1(%arg0: i32, %arg1: i32, %arg2: i32) -> (i32, i32) {
    %c0_i32 = arith.constant 0 : i32
    return %arg2, %arg1 : i32, i32
  }
  func.func @transform_2(%arg0: i32, %arg1: i32, %arg2: i32) -> (i32, i32) {
    %c0_i32 = arith.constant 0 : i32
    return %arg0, %arg1 : i32, i32
  }
  func.func @transform_3(%arg0: i32, %arg1: i32, %arg2: i32) -> (i32, i32) {
    %c0_i32 = arith.constant 0 : i32
    return %arg0, %arg1 : i32, i32
  }
}

module attributes {stable_mosaic.version = 11 : i64} {
  func.func @_bn_apply_res_kernel(%arg0: i32, %arg1: memref<512x128xbf16, #tpu.memory_space<vmem>>, %arg2: memref<1x128xf32, #tpu.memory_space<vmem>>, %arg3: memref<1x128xf32, #tpu.memory_space<vmem>>, %arg4: memref<512x128xbf16, #tpu.memory_space<vmem>>, %arg5: memref<512x128xbf16, #tpu.memory_space<vmem>>) attributes {dimension_semantics = [#tpu.dimension_semantics<parallel>], iteration_bounds = array<i64: 1>, scalar_prefetch = 0 : i64, scratch_operands = 0 : i64, tpu.core_type = #tpu.core_type<tc>, window_params = [{transform_indices = @transform_0, window_bounds = array<i64: 512, 128>}, {pipeline_mode = #tpu.pipeline_mode<synchronous>, transform_indices = @transform_1, window_bounds = array<i64: 1, 128>}, {pipeline_mode = #tpu.pipeline_mode<synchronous>, transform_indices = @transform_2, window_bounds = array<i64: 1, 128>}, {transform_indices = @transform_3, window_bounds = array<i64: 512, 128>}, {transform_indices = @transform_4, window_bounds = array<i64: 512, 128>}]} {
    %c0 = arith.constant 0 : index
    %c0_0 = arith.constant 0 : index
    %0 = vector.load %arg1[%c0, %c0_0] : memref<512x128xbf16, #tpu.memory_space<vmem>>, vector<512x128xbf16>
    %1 = arith.extf %0 : vector<512x128xbf16> to vector<512x128xf32>
    %c0_1 = arith.constant 0 : index
    %c0_2 = arith.constant 0 : index
    %2 = vector.load %arg2[%c0_1, %c0_2] : memref<1x128xf32, #tpu.memory_space<vmem>>, vector<1x128xf32>
    %3 = vector.broadcast %2 : vector<1x128xf32> to vector<512x128xf32>
    %4 = arith.mulf %1, %3 : vector<512x128xf32>
    %c0_3 = arith.constant 0 : index
    %c0_4 = arith.constant 0 : index
    %5 = vector.load %arg3[%c0_3, %c0_4] : memref<1x128xf32, #tpu.memory_space<vmem>>, vector<1x128xf32>
    %6 = vector.broadcast %5 : vector<1x128xf32> to vector<512x128xf32>
    %7 = arith.addf %4, %6 : vector<512x128xf32>
    %c0_5 = arith.constant 0 : index
    %c0_6 = arith.constant 0 : index
    %8 = vector.load %arg4[%c0_5, %c0_6] : memref<512x128xbf16, #tpu.memory_space<vmem>>, vector<512x128xbf16>
    %9 = arith.extf %8 : vector<512x128xbf16> to vector<512x128xf32>
    %10 = arith.addf %7, %9 : vector<512x128xf32>
    %cst = arith.constant 0.000000e+00 : f32
    %11 = vector.broadcast %cst : f32 to vector<512x128xf32>
    %12 = arith.maximumf %10, %11 : vector<512x128xf32>
    %13 = arith.truncf %12 : vector<512x128xf32> to vector<512x128xbf16>
    %c0_7 = arith.constant 0 : index
    %c0_8 = arith.constant 0 : index
    %14 = vector.load %arg5[%c0_7, %c0_8] : memref<512x128xbf16, #tpu.memory_space<vmem>>, vector<512x128xbf16>
    tpu.vector_store %arg5[%c0_7, %c0_8], %13 {strides = array<i32>} : memref<512x128xbf16, #tpu.memory_space<vmem>>, vector<512x128xbf16>,
    return
  }
  func.func @transform_0(%arg0: i32) -> (i32, i32) {
    %c0_i32 = arith.constant 0 : i32
    %c0_i32_0 = arith.constant 0 : i32
    return %arg0, %c0_i32 : i32, i32
  }
  func.func @transform_1(%arg0: i32) -> (i32, i32) {
    %c0_i32 = arith.constant 0 : i32
    %c0_i32_0 = arith.constant 0 : i32
    %c0_i32_1 = arith.constant 0 : i32
    return %c0_i32, %c0_i32_0 : i32, i32
  }
  func.func @transform_2(%arg0: i32) -> (i32, i32) {
    %c0_i32 = arith.constant 0 : i32
    %c0_i32_0 = arith.constant 0 : i32
    %c0_i32_1 = arith.constant 0 : i32
    return %c0_i32, %c0_i32_0 : i32, i32
  }
  func.func @transform_3(%arg0: i32) -> (i32, i32) {
    %c0_i32 = arith.constant 0 : i32
    %c0_i32_0 = arith.constant 0 : i32
    return %arg0, %c0_i32 : i32, i32
  }
  func.func @transform_4(%arg0: i32) -> (i32, i32) {
    %c0_i32 = arith.constant 0 : i32
    %c0_i32_0 = arith.constant 0 : i32
    return %arg0, %c0_i32 : i32, i32
  }
}

module attributes {stable_mosaic.version = 11 : i64} {
  func.func @_bn_apply_mask_kernel(%arg0: i32, %arg1: memref<128x256xbf16, #tpu.memory_space<vmem>>, %arg2: memref<1x256xf32, #tpu.memory_space<vmem>>, %arg3: memref<1x256xf32, #tpu.memory_space<vmem>>, %arg4: memref<1x256xf32, #tpu.memory_space<vmem>>, %arg5: memref<128x256xbf16, #tpu.memory_space<vmem>>) attributes {dimension_semantics = [#tpu.dimension_semantics<parallel>], iteration_bounds = array<i64: 1>, scalar_prefetch = 0 : i64, scratch_operands = 0 : i64, tpu.core_type = #tpu.core_type<tc>, window_params = [{transform_indices = @transform_0, window_bounds = array<i64: 128, 256>}, {pipeline_mode = #tpu.pipeline_mode<synchronous>, transform_indices = @transform_1, window_bounds = array<i64: 1, 256>}, {pipeline_mode = #tpu.pipeline_mode<synchronous>, transform_indices = @transform_2, window_bounds = array<i64: 1, 256>}, {pipeline_mode = #tpu.pipeline_mode<synchronous>, transform_indices = @transform_3, window_bounds = array<i64: 1, 256>}, {transform_indices = @transform_4, window_bounds = array<i64: 128, 256>}]} {
    %c0 = arith.constant 0 : index
    %c0_0 = arith.constant 0 : index
    %0 = vector.load %arg1[%c0, %c0_0] : memref<128x256xbf16, #tpu.memory_space<vmem>>, vector<128x256xbf16>
    %1 = arith.extf %0 : vector<128x256xbf16> to vector<128x256xf32>
    %c0_1 = arith.constant 0 : index
    %c0_2 = arith.constant 0 : index
    %2 = vector.load %arg2[%c0_1, %c0_2] : memref<1x256xf32, #tpu.memory_space<vmem>>, vector<1x256xf32>
    %3 = vector.broadcast %2 : vector<1x256xf32> to vector<128x256xf32>
    %4 = arith.mulf %1, %3 : vector<128x256xf32>
    %c0_3 = arith.constant 0 : index
    %c0_4 = arith.constant 0 : index
    %5 = vector.load %arg3[%c0_3, %c0_4] : memref<1x256xf32, #tpu.memory_space<vmem>>, vector<1x256xf32>
    %6 = vector.broadcast %5 : vector<1x256xf32> to vector<128x256xf32>
    %7 = arith.addf %4, %6 : vector<128x256xf32>
    %c0_5 = arith.constant 0 : index
    %c0_6 = arith.constant 0 : index
    %8 = vector.load %arg4[%c0_5, %c0_6] : memref<1x256xf32, #tpu.memory_space<vmem>>, vector<1x256xf32>
    %cst = arith.constant 0.000000e+00 : f32
    %9 = vector.broadcast %cst : f32 to vector<1x256xf32>
    %10 = arith.cmpf ogt, %8, %9 : vector<1x256xf32>
    %cst_7 = arith.constant 0.000000e+00 : f32
    %11 = vector.broadcast %cst_7 : f32 to vector<128x256xf32>
    %12 = arith.maximumf %7, %11 : vector<128x256xf32>
    %13 = vector.shape_cast %10 : vector<1x256xi1> to vector<1x256xi1>
    %14 = vector.broadcast %13 : vector<1x256xi1> to vector<128x256xi1>
    %15 = arith.select %14, %12, %7 : vector<128x256xi1>, vector<128x256xf32>
    %16 = arith.truncf %15 : vector<128x256xf32> to vector<128x256xbf16>
    %c0_8 = arith.constant 0 : index
    %c0_9 = arith.constant 0 : index
    %17 = vector.load %arg5[%c0_8, %c0_9] : memref<128x256xbf16, #tpu.memory_space<vmem>>, vector<128x256xbf16>
    tpu.vector_store %arg5[%c0_8, %c0_9], %16 {strides = array<i32>} : memref<128x256xbf16, #tpu.memory_space<vmem>>, vector<128x256xbf16>,
    return
  }
  func.func @transform_0(%arg0: i32) -> (i32, i32) {
    %c0_i32 = arith.constant 0 : i32
    %c0_i32_0 = arith.constant 0 : i32
    return %arg0, %c0_i32 : i32, i32
  }
  func.func @transform_1(%arg0: i32) -> (i32, i32) {
    %c0_i32 = arith.constant 0 : i32
    %c0_i32_0 = arith.constant 0 : i32
    %c0_i32_1 = arith.constant 0 : i32
    return %c0_i32, %c0_i32_0 : i32, i32
  }
  func.func @transform_2(%arg0: i32) -> (i32, i32) {
    %c0_i32 = arith.constant 0 : i32
    %c0_i32_0 = arith.constant 0 : i32
    %c0_i32_1 = arith.constant 0 : i32
    return %c0_i32, %c0_i32_0 : i32, i32
  }
  func.func @transform_3(%arg0: i32) -> (i32, i32) {
    %c0_i32 = arith.constant 0 : i32
    %c0_i32_0 = arith.constant 0 : i32
    %c0_i32_1 = arith.constant 0 : i32
    return %c0_i32, %c0_i32_0 : i32, i32
  }
  func.func @transform_4(%arg0: i32) -> (i32, i32) {
    %c0_i32 = arith.constant 0 : i32
    %c0_i32_0 = arith.constant 0 : i32
    return %arg0, %c0_i32 : i32, i32
  }
}

module attributes {stable_mosaic.version = 11 : i64} {
  func.func @_matmul_stats_kernel(%arg0: i32, %arg1: i32, %arg2: i32, %arg3: memref<128x256xbf16, #tpu.memory_space<vmem>>, %arg4: memref<256x256xbf16, #tpu.memory_space<vmem>>, %arg5: memref<128x256xbf16, #tpu.memory_space<vmem>>, %arg6: memref<8x256xf32, #tpu.memory_space<vmem>>, %arg7: memref<128x256xf32, #tpu.memory_space<vmem>>) attributes {dimension_semantics = [#tpu.dimension_semantics<parallel>, #tpu.dimension_semantics<parallel>, #tpu.dimension_semantics<arbitrary>], iteration_bounds = array<i64: 1, 1, 3>, scalar_prefetch = 0 : i64, scratch_operands = 1 : i64, tpu.core_type = #tpu.core_type<tc>, window_params = [{transform_indices = @transform_0, window_bounds = array<i64: 128, 256>}, {transform_indices = @transform_1, window_bounds = array<i64: 256, 256>}, {transform_indices = @transform_2, window_bounds = array<i64: 128, 256>}, {transform_indices = @transform_3, window_bounds = array<i64: 8, 256>}]} {
    %c0_i32 = arith.constant 0 : i32
    %0 = arith.cmpi eq, %arg2, %c0_i32 : i32
    %1 = arith.extui %0 : i1 to i32
    %c0_i32_0 = arith.constant 0 : i32
    %2 = arith.cmpi ne, %1, %c0_i32_0 : i32
    scf.if %2 {
      %cst_9 = arith.constant 0.000000e+00 : f32
      %12 = vector.broadcast %cst_9 : f32 to vector<128x256xf32>
      %c0_10 = arith.constant 0 : index
      %c0_11 = arith.constant 0 : index
      %13 = vector.load %arg7[%c0_10, %c0_11] : memref<128x256xf32, #tpu.memory_space<vmem>>, vector<128x256xf32>
      tpu.vector_store %arg7[%c0_10, %c0_11], %12 {strides = array<i32>} : memref<128x256xf32, #tpu.memory_space<vmem>>, vector<128x256xf32>,
    } else {
    }
    %c0 = arith.constant 0 : index
    %c0_1 = arith.constant 0 : index
    %3 = vector.load %arg7[%c0, %c0_1] : memref<128x256xf32, #tpu.memory_space<vmem>>, vector<128x256xf32>
    %c0_2 = arith.constant 0 : index
    %c0_3 = arith.constant 0 : index
    %4 = vector.load %arg3[%c0_2, %c0_3] : memref<128x256xbf16, #tpu.memory_space<vmem>>, vector<128x256xbf16>
    %c0_4 = arith.constant 0 : index
    %c0_5 = arith.constant 0 : index
    %5 = vector.load %arg4[%c0_4, %c0_5] : memref<256x256xbf16, #tpu.memory_space<vmem>>, vector<256x256xbf16>
    %cst = arith.constant dense<0.000000e+00> : vector<128x256xf32>
    %6 = tpu.matmul %4, %5, %cst {dimension_numbers = #tpu.dot_dimension_numbers<[1], [0], [0], [1], [0, 0, 1, 1], [], []>} : vector<128x256xbf16>, vector<256x256xbf16>, vector<128x256xf32> -> vector<128x256xf32>
    %7 = arith.addf %3, %6 : vector<128x256xf32>
    %c0_6 = arith.constant 0 : index
    %c0_7 = arith.constant 0 : index
    %8 = vector.load %arg7[%c0_6, %c0_7] : memref<128x256xf32, #tpu.memory_space<vmem>>, vector<128x256xf32>
    tpu.vector_store %arg7[%c0_6, %c0_7], %7 {strides = array<i32>} : memref<128x256xf32, #tpu.memory_space<vmem>>, vector<128x256xf32>,
    %c2_i32 = arith.constant 2 : i32
    %9 = arith.cmpi eq, %arg2, %c2_i32 : i32
    %10 = arith.extui %9 : i1 to i32
    %c0_i32_8 = arith.constant 0 : i32
    %11 = arith.cmpi ne, %10, %c0_i32_8 : i32
    scf.if %11 {
      %c0_9 = arith.constant 0 : index
      %c0_10 = arith.constant 0 : index
      %12 = vector.load %arg7[%c0_9, %c0_10] : memref<128x256xf32, #tpu.memory_space<vmem>>, vector<128x256xf32>
      %13 = arith.truncf %12 : vector<128x256xf32> to vector<128x256xbf16>
      %c0_11 = arith.constant 0 : index
      %c0_12 = arith.constant 0 : index
      %14 = vector.load %arg5[%c0_11, %c0_12] : memref<128x256xbf16, #tpu.memory_space<vmem>>, vector<128x256xbf16>
      tpu.vector_store %arg5[%c0_11, %c0_12], %13 {strides = array<i32>} : memref<128x256xbf16, #tpu.memory_space<vmem>>, vector<128x256xbf16>,
      %cst_13 = arith.constant dense<0.000000e+00> : vector<256xf32>
      %15 = vector.multi_reduction <add>, %12, %cst_13 [0] : vector<128x256xf32> to vector<256xf32>
      %16 = vector.shape_cast %15 : vector<256xf32> to vector<1x256xf32>
      %17 = arith.mulf %12, %12 : vector<128x256xf32>
      %cst_14 = arith.constant dense<0.000000e+00> : vector<256xf32>
      %18 = vector.multi_reduction <add>, %17, %cst_14 [0] : vector<128x256xf32> to vector<256xf32>
      %19 = vector.shape_cast %18 : vector<256xf32> to vector<1x256xf32>
      %20 = tpu.iota {dimensions = array<i32: 0>} : vector<8x256xi32>
      %c0_i32_15 = arith.constant 0 : i32
      %21 = vector.broadcast %c0_i32_15 : i32 to vector<8x256xi32>
      %22 = arith.cmpi eq, %20, %21 : vector<8x256xi32>
      %c1_i32 = arith.constant 1 : i32
      %23 = vector.broadcast %c1_i32 : i32 to vector<8x256xi32>
      %24 = arith.cmpi eq, %20, %23 : vector<8x256xi32>
      %cst_16 = arith.constant 0.000000e+00 : f32
      %25 = vector.shape_cast %19 : vector<1x256xf32> to vector<1x256xf32>
      %26 = vector.broadcast %25 : vector<1x256xf32> to vector<8x256xf32>
      %27 = vector.broadcast %cst_16 : f32 to vector<8x256xf32>
      %28 = arith.select %24, %26, %27 : vector<8x256xi1>, vector<8x256xf32>
      %29 = vector.shape_cast %16 : vector<1x256xf32> to vector<1x256xf32>
      %30 = vector.broadcast %29 : vector<1x256xf32> to vector<8x256xf32>
      %31 = arith.select %22, %30, %28 : vector<8x256xi1>, vector<8x256xf32>
      %c0_17 = arith.constant 0 : index
      %c0_18 = arith.constant 0 : index
      %32 = vector.load %arg6[%c0_17, %c0_18] : memref<8x256xf32, #tpu.memory_space<vmem>>, vector<8x256xf32>
      tpu.vector_store %arg6[%c0_17, %c0_18], %31 {strides = array<i32>} : memref<8x256xf32, #tpu.memory_space<vmem>>, vector<8x256xf32>,
    } else {
    }
    return
  }
  func.func @transform_0(%arg0: i32, %arg1: i32, %arg2: i32) -> (i32, i32) {
    %c0_i32 = arith.constant 0 : i32
    return %arg0, %arg2 : i32, i32
  }
  func.func @transform_1(%arg0: i32, %arg1: i32, %arg2: i32) -> (i32, i32) {
    %c0_i32 = arith.constant 0 : i32
    return %arg2, %arg1 : i32, i32
  }
  func.func @transform_2(%arg0: i32, %arg1: i32, %arg2: i32) -> (i32, i32) {
    %c0_i32 = arith.constant 0 : i32
    return %arg0, %arg1 : i32, i32
  }
  func.func @transform_3(%arg0: i32, %arg1: i32, %arg2: i32) -> (i32, i32) {
    %c0_i32 = arith.constant 0 : i32
    return %arg0, %arg1 : i32, i32
  }
}

module attributes {stable_mosaic.version = 11 : i64} {
  func.func @_matmul_stats_kernel(%arg0: i32, %arg1: i32, %arg2: i32, %arg3: memref<128x256xbf16, #tpu.memory_space<vmem>>, %arg4: memref<256x128xbf16, #tpu.memory_space<vmem>>, %arg5: memref<128x128xbf16, #tpu.memory_space<vmem>>, %arg6: memref<8x128xf32, #tpu.memory_space<vmem>>, %arg7: memref<128x128xf32, #tpu.memory_space<vmem>>) attributes {dimension_semantics = [#tpu.dimension_semantics<parallel>, #tpu.dimension_semantics<parallel>, #tpu.dimension_semantics<arbitrary>], iteration_bounds = array<i64: 1, 1, 5>, scalar_prefetch = 0 : i64, scratch_operands = 1 : i64, tpu.core_type = #tpu.core_type<tc>, window_params = [{transform_indices = @transform_0, window_bounds = array<i64: 128, 256>}, {transform_indices = @transform_1, window_bounds = array<i64: 256, 128>}, {transform_indices = @transform_2, window_bounds = array<i64: 128, 128>}, {transform_indices = @transform_3, window_bounds = array<i64: 8, 128>}]} {
    %c0_i32 = arith.constant 0 : i32
    %0 = arith.cmpi eq, %arg2, %c0_i32 : i32
    %1 = arith.extui %0 : i1 to i32
    %c0_i32_0 = arith.constant 0 : i32
    %2 = arith.cmpi ne, %1, %c0_i32_0 : i32
    scf.if %2 {
      %cst_9 = arith.constant 0.000000e+00 : f32
      %12 = vector.broadcast %cst_9 : f32 to vector<128x128xf32>
      %c0_10 = arith.constant 0 : index
      %c0_11 = arith.constant 0 : index
      %13 = vector.load %arg7[%c0_10, %c0_11] : memref<128x128xf32, #tpu.memory_space<vmem>>, vector<128x128xf32>
      tpu.vector_store %arg7[%c0_10, %c0_11], %12 {strides = array<i32>} : memref<128x128xf32, #tpu.memory_space<vmem>>, vector<128x128xf32>,
    } else {
    }
    %c0 = arith.constant 0 : index
    %c0_1 = arith.constant 0 : index
    %3 = vector.load %arg7[%c0, %c0_1] : memref<128x128xf32, #tpu.memory_space<vmem>>, vector<128x128xf32>
    %c0_2 = arith.constant 0 : index
    %c0_3 = arith.constant 0 : index
    %4 = vector.load %arg3[%c0_2, %c0_3] : memref<128x256xbf16, #tpu.memory_space<vmem>>, vector<128x256xbf16>
    %c0_4 = arith.constant 0 : index
    %c0_5 = arith.constant 0 : index
    %5 = vector.load %arg4[%c0_4, %c0_5] : memref<256x128xbf16, #tpu.memory_space<vmem>>, vector<256x128xbf16>
    %cst = arith.constant dense<0.000000e+00> : vector<128x128xf32>
    %6 = tpu.matmul %4, %5, %cst {dimension_numbers = #tpu.dot_dimension_numbers<[1], [0], [0], [1], [0, 0, 1, 1], [], []>} : vector<128x256xbf16>, vector<256x128xbf16>, vector<128x128xf32> -> vector<128x128xf32>
    %7 = arith.addf %3, %6 : vector<128x128xf32>
    %c0_6 = arith.constant 0 : index
    %c0_7 = arith.constant 0 : index
    %8 = vector.load %arg7[%c0_6, %c0_7] : memref<128x128xf32, #tpu.memory_space<vmem>>, vector<128x128xf32>
    tpu.vector_store %arg7[%c0_6, %c0_7], %7 {strides = array<i32>} : memref<128x128xf32, #tpu.memory_space<vmem>>, vector<128x128xf32>,
    %c4_i32 = arith.constant 4 : i32
    %9 = arith.cmpi eq, %arg2, %c4_i32 : i32
    %10 = arith.extui %9 : i1 to i32
    %c0_i32_8 = arith.constant 0 : i32
    %11 = arith.cmpi ne, %10, %c0_i32_8 : i32
    scf.if %11 {
      %c0_9 = arith.constant 0 : index
      %c0_10 = arith.constant 0 : index
      %12 = vector.load %arg7[%c0_9, %c0_10] : memref<128x128xf32, #tpu.memory_space<vmem>>, vector<128x128xf32>
      %13 = arith.truncf %12 : vector<128x128xf32> to vector<128x128xbf16>
      %c0_11 = arith.constant 0 : index
      %c0_12 = arith.constant 0 : index
      %14 = vector.load %arg5[%c0_11, %c0_12] : memref<128x128xbf16, #tpu.memory_space<vmem>>, vector<128x128xbf16>
      tpu.vector_store %arg5[%c0_11, %c0_12], %13 {strides = array<i32>} : memref<128x128xbf16, #tpu.memory_space<vmem>>, vector<128x128xbf16>,
      %cst_13 = arith.constant dense<0.000000e+00> : vector<128xf32>
      %15 = vector.multi_reduction <add>, %12, %cst_13 [0] : vector<128x128xf32> to vector<128xf32>
      %16 = vector.shape_cast %15 : vector<128xf32> to vector<1x128xf32>
      %17 = arith.mulf %12, %12 : vector<128x128xf32>
      %cst_14 = arith.constant dense<0.000000e+00> : vector<128xf32>
      %18 = vector.multi_reduction <add>, %17, %cst_14 [0] : vector<128x128xf32> to vector<128xf32>
      %19 = vector.shape_cast %18 : vector<128xf32> to vector<1x128xf32>
      %20 = tpu.iota {dimensions = array<i32: 0>} : vector<8x128xi32>
      %c0_i32_15 = arith.constant 0 : i32
      %21 = vector.broadcast %c0_i32_15 : i32 to vector<8x128xi32>
      %22 = arith.cmpi eq, %20, %21 : vector<8x128xi32>
      %c1_i32 = arith.constant 1 : i32
      %23 = vector.broadcast %c1_i32 : i32 to vector<8x128xi32>
      %24 = arith.cmpi eq, %20, %23 : vector<8x128xi32>
      %cst_16 = arith.constant 0.000000e+00 : f32
      %25 = vector.shape_cast %19 : vector<1x128xf32> to vector<1x128xf32>
      %26 = vector.broadcast %25 : vector<1x128xf32> to vector<8x128xf32>
      %27 = vector.broadcast %cst_16 : f32 to vector<8x128xf32>
      %28 = arith.select %24, %26, %27 : vector<8x128xi1>, vector<8x128xf32>
      %29 = vector.shape_cast %16 : vector<1x128xf32> to vector<1x128xf32>
      %30 = vector.broadcast %29 : vector<1x128xf32> to vector<8x128xf32>
      %31 = arith.select %22, %30, %28 : vector<8x128xi1>, vector<8x128xf32>
      %c0_17 = arith.constant 0 : index
      %c0_18 = arith.constant 0 : index
      %32 = vector.load %arg6[%c0_17, %c0_18] : memref<8x128xf32, #tpu.memory_space<vmem>>, vector<8x128xf32>
      tpu.vector_store %arg6[%c0_17, %c0_18], %31 {strides = array<i32>} : memref<8x128xf32, #tpu.memory_space<vmem>>, vector<8x128xf32>,
    } else {
    }
    return
  }
  func.func @transform_0(%arg0: i32, %arg1: i32, %arg2: i32) -> (i32, i32) {
    %c0_i32 = arith.constant 0 : i32
    return %arg0, %arg2 : i32, i32
  }
  func.func @transform_1(%arg0: i32, %arg1: i32, %arg2: i32) -> (i32, i32) {
    %c0_i32 = arith.constant 0 : i32
    return %arg2, %arg1 : i32, i32
  }
  func.func @transform_2(%arg0: i32, %arg1: i32, %arg2: i32) -> (i32, i32) {
    %c0_i32 = arith.constant 0 : i32
    return %arg0, %arg1 : i32, i32
  }
  func.func @transform_3(%arg0: i32, %arg1: i32, %arg2: i32) -> (i32, i32) {
    %c0_i32 = arith.constant 0 : i32
    return %arg0, %arg1 : i32, i32
  }
}

module attributes {stable_mosaic.version = 11 : i64} {
  func.func @_bn_apply_res_kernel(%arg0: i32, %arg1: memref<128x128xbf16, #tpu.memory_space<vmem>>, %arg2: memref<1x128xf32, #tpu.memory_space<vmem>>, %arg3: memref<1x128xf32, #tpu.memory_space<vmem>>, %arg4: memref<128x128xbf16, #tpu.memory_space<vmem>>, %arg5: memref<128x128xbf16, #tpu.memory_space<vmem>>) attributes {dimension_semantics = [#tpu.dimension_semantics<parallel>], iteration_bounds = array<i64: 1>, scalar_prefetch = 0 : i64, scratch_operands = 0 : i64, tpu.core_type = #tpu.core_type<tc>, window_params = [{transform_indices = @transform_0, window_bounds = array<i64: 128, 128>}, {pipeline_mode = #tpu.pipeline_mode<synchronous>, transform_indices = @transform_1, window_bounds = array<i64: 1, 128>}, {pipeline_mode = #tpu.pipeline_mode<synchronous>, transform_indices = @transform_2, window_bounds = array<i64: 1, 128>}, {transform_indices = @transform_3, window_bounds = array<i64: 128, 128>}, {transform_indices = @transform_4, window_bounds = array<i64: 128, 128>}]} {
    %c0 = arith.constant 0 : index
    %c0_0 = arith.constant 0 : index
    %0 = vector.load %arg1[%c0, %c0_0] : memref<128x128xbf16, #tpu.memory_space<vmem>>, vector<128x128xbf16>
    %1 = arith.extf %0 : vector<128x128xbf16> to vector<128x128xf32>
    %c0_1 = arith.constant 0 : index
    %c0_2 = arith.constant 0 : index
    %2 = vector.load %arg2[%c0_1, %c0_2] : memref<1x128xf32, #tpu.memory_space<vmem>>, vector<1x128xf32>
    %3 = vector.broadcast %2 : vector<1x128xf32> to vector<128x128xf32>
    %4 = arith.mulf %1, %3 : vector<128x128xf32>
    %c0_3 = arith.constant 0 : index
    %c0_4 = arith.constant 0 : index
    %5 = vector.load %arg3[%c0_3, %c0_4] : memref<1x128xf32, #tpu.memory_space<vmem>>, vector<1x128xf32>
    %6 = vector.broadcast %5 : vector<1x128xf32> to vector<128x128xf32>
    %7 = arith.addf %4, %6 : vector<128x128xf32>
    %c0_5 = arith.constant 0 : index
    %c0_6 = arith.constant 0 : index
    %8 = vector.load %arg4[%c0_5, %c0_6] : memref<128x128xbf16, #tpu.memory_space<vmem>>, vector<128x128xbf16>
    %9 = arith.extf %8 : vector<128x128xbf16> to vector<128x128xf32>
    %10 = arith.addf %7, %9 : vector<128x128xf32>
    %cst = arith.constant 0.000000e+00 : f32
    %11 = vector.broadcast %cst : f32 to vector<128x128xf32>
    %12 = arith.maximumf %10, %11 : vector<128x128xf32>
    %13 = arith.truncf %12 : vector<128x128xf32> to vector<128x128xbf16>
    %c0_7 = arith.constant 0 : index
    %c0_8 = arith.constant 0 : index
    %14 = vector.load %arg5[%c0_7, %c0_8] : memref<128x128xbf16, #tpu.memory_space<vmem>>, vector<128x128xbf16>
    tpu.vector_store %arg5[%c0_7, %c0_8], %13 {strides = array<i32>} : memref<128x128xbf16, #tpu.memory_space<vmem>>, vector<128x128xbf16>,
    return
  }
  func.func @transform_0(%arg0: i32) -> (i32, i32) {
    %c0_i32 = arith.constant 0 : i32
    %c0_i32_0 = arith.constant 0 : i32
    return %arg0, %c0_i32 : i32, i32
  }
  func.func @transform_1(%arg0: i32) -> (i32, i32) {
    %c0_i32 = arith.constant 0 : i32
    %c0_i32_0 = arith.constant 0 : i32
    %c0_i32_1 = arith.constant 0 : i32
    return %c0_i32, %c0_i32_0 : i32, i32
  }
  func.func @transform_2(%arg0: i32) -> (i32, i32) {
    %c0_i32 = arith.constant 0 : i32
    %c0_i32_0 = arith.constant 0 : i32
    %c0_i32_1 = arith.constant 0 : i32
    return %c0_i32, %c0_i32_0 : i32, i32
  }
  func.func @transform_3(%arg0: i32) -> (i32, i32) {
    %c0_i32 = arith.constant 0 : i32
    %c0_i32_0 = arith.constant 0 : i32
    return %arg0, %c0_i32 : i32, i32
  }
  func.func @transform_4(%arg0: i32) -> (i32, i32) {
    %c0_i32 = arith.constant 0 : i32
    %c0_i32_0 = arith.constant 0 : i32
    return %arg0, %c0_i32 : i32, i32
  }
}

module attributes {stable_mosaic.version = 11 : i64} {
  func.func @_matmul_stats_kernel(%arg0: i32, %arg1: i32, %arg2: i32, %arg3: memref<32x256xbf16, #tpu.memory_space<vmem>>, %arg4: memref<256x256xbf16, #tpu.memory_space<vmem>>, %arg5: memref<32x256xbf16, #tpu.memory_space<vmem>>, %arg6: memref<8x256xf32, #tpu.memory_space<vmem>>, %arg7: memref<32x256xf32, #tpu.memory_space<vmem>>) attributes {dimension_semantics = [#tpu.dimension_semantics<parallel>, #tpu.dimension_semantics<parallel>, #tpu.dimension_semantics<arbitrary>], iteration_bounds = array<i64: 1, 2, 5>, scalar_prefetch = 0 : i64, scratch_operands = 1 : i64, tpu.core_type = #tpu.core_type<tc>, window_params = [{transform_indices = @transform_0, window_bounds = array<i64: 32, 256>}, {transform_indices = @transform_1, window_bounds = array<i64: 256, 256>}, {transform_indices = @transform_2, window_bounds = array<i64: 32, 256>}, {transform_indices = @transform_3, window_bounds = array<i64: 8, 256>}]} {
    %c0_i32 = arith.constant 0 : i32
    %0 = arith.cmpi eq, %arg2, %c0_i32 : i32
    %1 = arith.extui %0 : i1 to i32
    %c0_i32_0 = arith.constant 0 : i32
    %2 = arith.cmpi ne, %1, %c0_i32_0 : i32
    scf.if %2 {
      %cst_9 = arith.constant 0.000000e+00 : f32
      %12 = vector.broadcast %cst_9 : f32 to vector<32x256xf32>
      %c0_10 = arith.constant 0 : index
      %c0_11 = arith.constant 0 : index
      %13 = vector.load %arg7[%c0_10, %c0_11] : memref<32x256xf32, #tpu.memory_space<vmem>>, vector<32x256xf32>
      tpu.vector_store %arg7[%c0_10, %c0_11], %12 {strides = array<i32>} : memref<32x256xf32, #tpu.memory_space<vmem>>, vector<32x256xf32>,
    } else {
    }
    %c0 = arith.constant 0 : index
    %c0_1 = arith.constant 0 : index
    %3 = vector.load %arg7[%c0, %c0_1] : memref<32x256xf32, #tpu.memory_space<vmem>>, vector<32x256xf32>
    %c0_2 = arith.constant 0 : index
    %c0_3 = arith.constant 0 : index
    %4 = vector.load %arg3[%c0_2, %c0_3] : memref<32x256xbf16, #tpu.memory_space<vmem>>, vector<32x256xbf16>
    %c0_4 = arith.constant 0 : index
    %c0_5 = arith.constant 0 : index
    %5 = vector.load %arg4[%c0_4, %c0_5] : memref<256x256xbf16, #tpu.memory_space<vmem>>, vector<256x256xbf16>
    %cst = arith.constant dense<0.000000e+00> : vector<32x256xf32>
    %6 = tpu.matmul %4, %5, %cst {dimension_numbers = #tpu.dot_dimension_numbers<[1], [0], [0], [1], [0, 0, 1, 1], [], []>} : vector<32x256xbf16>, vector<256x256xbf16>, vector<32x256xf32> -> vector<32x256xf32>
    %7 = arith.addf %3, %6 : vector<32x256xf32>
    %c0_6 = arith.constant 0 : index
    %c0_7 = arith.constant 0 : index
    %8 = vector.load %arg7[%c0_6, %c0_7] : memref<32x256xf32, #tpu.memory_space<vmem>>, vector<32x256xf32>
    tpu.vector_store %arg7[%c0_6, %c0_7], %7 {strides = array<i32>} : memref<32x256xf32, #tpu.memory_space<vmem>>, vector<32x256xf32>,
    %c4_i32 = arith.constant 4 : i32
    %9 = arith.cmpi eq, %arg2, %c4_i32 : i32
    %10 = arith.extui %9 : i1 to i32
    %c0_i32_8 = arith.constant 0 : i32
    %11 = arith.cmpi ne, %10, %c0_i32_8 : i32
    scf.if %11 {
      %c0_9 = arith.constant 0 : index
      %c0_10 = arith.constant 0 : index
      %12 = vector.load %arg7[%c0_9, %c0_10] : memref<32x256xf32, #tpu.memory_space<vmem>>, vector<32x256xf32>
      %13 = arith.truncf %12 : vector<32x256xf32> to vector<32x256xbf16>
      %c0_11 = arith.constant 0 : index
      %c0_12 = arith.constant 0 : index
      %14 = vector.load %arg5[%c0_11, %c0_12] : memref<32x256xbf16, #tpu.memory_space<vmem>>, vector<32x256xbf16>
      tpu.vector_store %arg5[%c0_11, %c0_12], %13 {strides = array<i32>} : memref<32x256xbf16, #tpu.memory_space<vmem>>, vector<32x256xbf16>,
      %cst_13 = arith.constant dense<0.000000e+00> : vector<256xf32>
      %15 = vector.multi_reduction <add>, %12, %cst_13 [0] : vector<32x256xf32> to vector<256xf32>
      %16 = vector.shape_cast %15 : vector<256xf32> to vector<1x256xf32>
      %17 = arith.mulf %12, %12 : vector<32x256xf32>
      %cst_14 = arith.constant dense<0.000000e+00> : vector<256xf32>
      %18 = vector.multi_reduction <add>, %17, %cst_14 [0] : vector<32x256xf32> to vector<256xf32>
      %19 = vector.shape_cast %18 : vector<256xf32> to vector<1x256xf32>
      %20 = tpu.iota {dimensions = array<i32: 0>} : vector<8x256xi32>
      %c0_i32_15 = arith.constant 0 : i32
      %21 = vector.broadcast %c0_i32_15 : i32 to vector<8x256xi32>
      %22 = arith.cmpi eq, %20, %21 : vector<8x256xi32>
      %c1_i32 = arith.constant 1 : i32
      %23 = vector.broadcast %c1_i32 : i32 to vector<8x256xi32>
      %24 = arith.cmpi eq, %20, %23 : vector<8x256xi32>
      %cst_16 = arith.constant 0.000000e+00 : f32
      %25 = vector.shape_cast %19 : vector<1x256xf32> to vector<1x256xf32>
      %26 = vector.broadcast %25 : vector<1x256xf32> to vector<8x256xf32>
      %27 = vector.broadcast %cst_16 : f32 to vector<8x256xf32>
      %28 = arith.select %24, %26, %27 : vector<8x256xi1>, vector<8x256xf32>
      %29 = vector.shape_cast %16 : vector<1x256xf32> to vector<1x256xf32>
      %30 = vector.broadcast %29 : vector<1x256xf32> to vector<8x256xf32>
      %31 = arith.select %22, %30, %28 : vector<8x256xi1>, vector<8x256xf32>
      %c0_17 = arith.constant 0 : index
      %c0_18 = arith.constant 0 : index
      %32 = vector.load %arg6[%c0_17, %c0_18] : memref<8x256xf32, #tpu.memory_space<vmem>>, vector<8x256xf32>
      tpu.vector_store %arg6[%c0_17, %c0_18], %31 {strides = array<i32>} : memref<8x256xf32, #tpu.memory_space<vmem>>, vector<8x256xf32>,
    } else {
    }
    return
  }
  func.func @transform_0(%arg0: i32, %arg1: i32, %arg2: i32) -> (i32, i32) {
    %c0_i32 = arith.constant 0 : i32
    return %arg0, %arg2 : i32, i32
  }
  func.func @transform_1(%arg0: i32, %arg1: i32, %arg2: i32) -> (i32, i32) {
    %c0_i32 = arith.constant 0 : i32
    return %arg2, %arg1 : i32, i32
  }
  func.func @transform_2(%arg0: i32, %arg1: i32, %arg2: i32) -> (i32, i32) {
    %c0_i32 = arith.constant 0 : i32
    return %arg0, %arg1 : i32, i32
  }
  func.func @transform_3(%arg0: i32, %arg1: i32, %arg2: i32) -> (i32, i32) {
    %c0_i32 = arith.constant 0 : i32
    return %arg0, %arg1 : i32, i32
  }
}

module attributes {stable_mosaic.version = 11 : i64} {
  func.func @_bn_apply_mask_kernel(%arg0: i32, %arg1: memref<32x512xbf16, #tpu.memory_space<vmem>>, %arg2: memref<1x512xf32, #tpu.memory_space<vmem>>, %arg3: memref<1x512xf32, #tpu.memory_space<vmem>>, %arg4: memref<1x512xf32, #tpu.memory_space<vmem>>, %arg5: memref<32x512xbf16, #tpu.memory_space<vmem>>) attributes {dimension_semantics = [#tpu.dimension_semantics<parallel>], iteration_bounds = array<i64: 1>, scalar_prefetch = 0 : i64, scratch_operands = 0 : i64, tpu.core_type = #tpu.core_type<tc>, window_params = [{transform_indices = @transform_0, window_bounds = array<i64: 32, 512>}, {pipeline_mode = #tpu.pipeline_mode<synchronous>, transform_indices = @transform_1, window_bounds = array<i64: 1, 512>}, {pipeline_mode = #tpu.pipeline_mode<synchronous>, transform_indices = @transform_2, window_bounds = array<i64: 1, 512>}, {pipeline_mode = #tpu.pipeline_mode<synchronous>, transform_indices = @transform_3, window_bounds = array<i64: 1, 512>}, {transform_indices = @transform_4, window_bounds = array<i64: 32, 512>}]} {
    %c0 = arith.constant 0 : index
    %c0_0 = arith.constant 0 : index
    %0 = vector.load %arg1[%c0, %c0_0] : memref<32x512xbf16, #tpu.memory_space<vmem>>, vector<32x512xbf16>
    %1 = arith.extf %0 : vector<32x512xbf16> to vector<32x512xf32>
    %c0_1 = arith.constant 0 : index
    %c0_2 = arith.constant 0 : index
    %2 = vector.load %arg2[%c0_1, %c0_2] : memref<1x512xf32, #tpu.memory_space<vmem>>, vector<1x512xf32>
    %3 = vector.broadcast %2 : vector<1x512xf32> to vector<32x512xf32>
    %4 = arith.mulf %1, %3 : vector<32x512xf32>
    %c0_3 = arith.constant 0 : index
    %c0_4 = arith.constant 0 : index
    %5 = vector.load %arg3[%c0_3, %c0_4] : memref<1x512xf32, #tpu.memory_space<vmem>>, vector<1x512xf32>
    %6 = vector.broadcast %5 : vector<1x512xf32> to vector<32x512xf32>
    %7 = arith.addf %4, %6 : vector<32x512xf32>
    %c0_5 = arith.constant 0 : index
    %c0_6 = arith.constant 0 : index
    %8 = vector.load %arg4[%c0_5, %c0_6] : memref<1x512xf32, #tpu.memory_space<vmem>>, vector<1x512xf32>
    %cst = arith.constant 0.000000e+00 : f32
    %9 = vector.broadcast %cst : f32 to vector<1x512xf32>
    %10 = arith.cmpf ogt, %8, %9 : vector<1x512xf32>
    %cst_7 = arith.constant 0.000000e+00 : f32
    %11 = vector.broadcast %cst_7 : f32 to vector<32x512xf32>
    %12 = arith.maximumf %7, %11 : vector<32x512xf32>
    %13 = vector.shape_cast %10 : vector<1x512xi1> to vector<1x512xi1>
    %14 = vector.broadcast %13 : vector<1x512xi1> to vector<32x512xi1>
    %15 = arith.select %14, %12, %7 : vector<32x512xi1>, vector<32x512xf32>
    %16 = arith.truncf %15 : vector<32x512xf32> to vector<32x512xbf16>
    %c0_8 = arith.constant 0 : index
    %c0_9 = arith.constant 0 : index
    %17 = vector.load %arg5[%c0_8, %c0_9] : memref<32x512xbf16, #tpu.memory_space<vmem>>, vector<32x512xbf16>
    tpu.vector_store %arg5[%c0_8, %c0_9], %16 {strides = array<i32>} : memref<32x512xbf16, #tpu.memory_space<vmem>>, vector<32x512xbf16>,
    return
  }
  func.func @transform_0(%arg0: i32) -> (i32, i32) {
    %c0_i32 = arith.constant 0 : i32
    %c0_i32_0 = arith.constant 0 : i32
    return %arg0, %c0_i32 : i32, i32
  }
  func.func @transform_1(%arg0: i32) -> (i32, i32) {
    %c0_i32 = arith.constant 0 : i32
    %c0_i32_0 = arith.constant 0 : i32
    %c0_i32_1 = arith.constant 0 : i32
    return %c0_i32, %c0_i32_0 : i32, i32
  }
  func.func @transform_2(%arg0: i32) -> (i32, i32) {
    %c0_i32 = arith.constant 0 : i32
    %c0_i32_0 = arith.constant 0 : i32
    %c0_i32_1 = arith.constant 0 : i32
    return %c0_i32, %c0_i32_0 : i32, i32
  }
  func.func @transform_3(%arg0: i32) -> (i32, i32) {
    %c0_i32 = arith.constant 0 : i32
    %c0_i32_0 = arith.constant 0 : i32
    %c0_i32_1 = arith.constant 0 : i32
    return %c0_i32, %c0_i32_0 : i32, i32
  }
  func.func @transform_4(%arg0: i32) -> (i32, i32) {
    %c0_i32 = arith.constant 0 : i32
    %c0_i32_0 = arith.constant 0 : i32
    return %arg0, %c0_i32 : i32, i32
  }
}

module attributes {stable_mosaic.version = 11 : i64} {
  func.func @_matmul_stats_kernel(%arg0: i32, %arg1: i32, %arg2: i32, %arg3: memref<32x256xbf16, #tpu.memory_space<vmem>>, %arg4: memref<256x256xbf16, #tpu.memory_space<vmem>>, %arg5: memref<32x256xbf16, #tpu.memory_space<vmem>>, %arg6: memref<8x256xf32, #tpu.memory_space<vmem>>, %arg7: memref<32x256xf32, #tpu.memory_space<vmem>>) attributes {dimension_semantics = [#tpu.dimension_semantics<parallel>, #tpu.dimension_semantics<parallel>, #tpu.dimension_semantics<arbitrary>], iteration_bounds = array<i64: 1, 1, 9>, scalar_prefetch = 0 : i64, scratch_operands = 1 : i64, tpu.core_type = #tpu.core_type<tc>, window_params = [{transform_indices = @transform_0, window_bounds = array<i64: 32, 256>}, {transform_indices = @transform_1, window_bounds = array<i64: 256, 256>}, {transform_indices = @transform_2, window_bounds = array<i64: 32, 256>}, {transform_indices = @transform_3, window_bounds = array<i64: 8, 256>}]} {
    %c0_i32 = arith.constant 0 : i32
    %0 = arith.cmpi eq, %arg2, %c0_i32 : i32
    %1 = arith.extui %0 : i1 to i32
    %c0_i32_0 = arith.constant 0 : i32
    %2 = arith.cmpi ne, %1, %c0_i32_0 : i32
    scf.if %2 {
      %cst_9 = arith.constant 0.000000e+00 : f32
      %12 = vector.broadcast %cst_9 : f32 to vector<32x256xf32>
      %c0_10 = arith.constant 0 : index
      %c0_11 = arith.constant 0 : index
      %13 = vector.load %arg7[%c0_10, %c0_11] : memref<32x256xf32, #tpu.memory_space<vmem>>, vector<32x256xf32>
      tpu.vector_store %arg7[%c0_10, %c0_11], %12 {strides = array<i32>} : memref<32x256xf32, #tpu.memory_space<vmem>>, vector<32x256xf32>,
    } else {
    }
    %c0 = arith.constant 0 : index
    %c0_1 = arith.constant 0 : index
    %3 = vector.load %arg7[%c0, %c0_1] : memref<32x256xf32, #tpu.memory_space<vmem>>, vector<32x256xf32>
    %c0_2 = arith.constant 0 : index
    %c0_3 = arith.constant 0 : index
    %4 = vector.load %arg3[%c0_2, %c0_3] : memref<32x256xbf16, #tpu.memory_space<vmem>>, vector<32x256xbf16>
    %c0_4 = arith.constant 0 : index
    %c0_5 = arith.constant 0 : index
    %5 = vector.load %arg4[%c0_4, %c0_5] : memref<256x256xbf16, #tpu.memory_space<vmem>>, vector<256x256xbf16>
    %cst = arith.constant dense<0.000000e+00> : vector<32x256xf32>
    %6 = tpu.matmul %4, %5, %cst {dimension_numbers = #tpu.dot_dimension_numbers<[1], [0], [0], [1], [0, 0, 1, 1], [], []>} : vector<32x256xbf16>, vector<256x256xbf16>, vector<32x256xf32> -> vector<32x256xf32>
    %7 = arith.addf %3, %6 : vector<32x256xf32>
    %c0_6 = arith.constant 0 : index
    %c0_7 = arith.constant 0 : index
    %8 = vector.load %arg7[%c0_6, %c0_7] : memref<32x256xf32, #tpu.memory_space<vmem>>, vector<32x256xf32>
    tpu.vector_store %arg7[%c0_6, %c0_7], %7 {strides = array<i32>} : memref<32x256xf32, #tpu.memory_space<vmem>>, vector<32x256xf32>,
    %c8_i32 = arith.constant 8 : i32
    %9 = arith.cmpi eq, %arg2, %c8_i32 : i32
    %10 = arith.extui %9 : i1 to i32
    %c0_i32_8 = arith.constant 0 : i32
    %11 = arith.cmpi ne, %10, %c0_i32_8 : i32
    scf.if %11 {
      %c0_9 = arith.constant 0 : index
      %c0_10 = arith.constant 0 : index
      %12 = vector.load %arg7[%c0_9, %c0_10] : memref<32x256xf32, #tpu.memory_space<vmem>>, vector<32x256xf32>
      %13 = arith.truncf %12 : vector<32x256xf32> to vector<32x256xbf16>
      %c0_11 = arith.constant 0 : index
      %c0_12 = arith.constant 0 : index
      %14 = vector.load %arg5[%c0_11, %c0_12] : memref<32x256xbf16, #tpu.memory_space<vmem>>, vector<32x256xbf16>
      tpu.vector_store %arg5[%c0_11, %c0_12], %13 {strides = array<i32>} : memref<32x256xbf16, #tpu.memory_space<vmem>>, vector<32x256xbf16>,
      %cst_13 = arith.constant dense<0.000000e+00> : vector<256xf32>
      %15 = vector.multi_reduction <add>, %12, %cst_13 [0] : vector<32x256xf32> to vector<256xf32>
      %16 = vector.shape_cast %15 : vector<256xf32> to vector<1x256xf32>
      %17 = arith.mulf %12, %12 : vector<32x256xf32>
      %cst_14 = arith.constant dense<0.000000e+00> : vector<256xf32>
      %18 = vector.multi_reduction <add>, %17, %cst_14 [0] : vector<32x256xf32> to vector<256xf32>
      %19 = vector.shape_cast %18 : vector<256xf32> to vector<1x256xf32>
      %20 = tpu.iota {dimensions = array<i32: 0>} : vector<8x256xi32>
      %c0_i32_15 = arith.constant 0 : i32
      %21 = vector.broadcast %c0_i32_15 : i32 to vector<8x256xi32>
      %22 = arith.cmpi eq, %20, %21 : vector<8x256xi32>
      %c1_i32 = arith.constant 1 : i32
      %23 = vector.broadcast %c1_i32 : i32 to vector<8x256xi32>
      %24 = arith.cmpi eq, %20, %23 : vector<8x256xi32>
      %cst_16 = arith.constant 0.000000e+00 : f32
      %25 = vector.shape_cast %19 : vector<1x256xf32> to vector<1x256xf32>
      %26 = vector.broadcast %25 : vector<1x256xf32> to vector<8x256xf32>
      %27 = vector.broadcast %cst_16 : f32 to vector<8x256xf32>
      %28 = arith.select %24, %26, %27 : vector<8x256xi1>, vector<8x256xf32>
      %29 = vector.shape_cast %16 : vector<1x256xf32> to vector<1x256xf32>
      %30 = vector.broadcast %29 : vector<1x256xf32> to vector<8x256xf32>
      %31 = arith.select %22, %30, %28 : vector<8x256xi1>, vector<8x256xf32>
      %c0_17 = arith.constant 0 : index
      %c0_18 = arith.constant 0 : index
      %32 = vector.load %arg6[%c0_17, %c0_18] : memref<8x256xf32, #tpu.memory_space<vmem>>, vector<8x256xf32>
      tpu.vector_store %arg6[%c0_17, %c0_18], %31 {strides = array<i32>} : memref<8x256xf32, #tpu.memory_space<vmem>>, vector<8x256xf32>,
    } else {
    }
    return
  }
  func.func @transform_0(%arg0: i32, %arg1: i32, %arg2: i32) -> (i32, i32) {
    %c0_i32 = arith.constant 0 : i32
    return %arg0, %arg2 : i32, i32
  }
  func.func @transform_1(%arg0: i32, %arg1: i32, %arg2: i32) -> (i32, i32) {
    %c0_i32 = arith.constant 0 : i32
    return %arg2, %arg1 : i32, i32
  }
  func.func @transform_2(%arg0: i32, %arg1: i32, %arg2: i32) -> (i32, i32) {
    %c0_i32 = arith.constant 0 : i32
    return %arg0, %arg1 : i32, i32
  }
  func.func @transform_3(%arg0: i32, %arg1: i32, %arg2: i32) -> (i32, i32) {
    %c0_i32 = arith.constant 0 : i32
    return %arg0, %arg1 : i32, i32
  }
}

module attributes {stable_mosaic.version = 11 : i64} {
  func.func @_bn_apply_res_kernel(%arg0: i32, %arg1: memref<32x256xbf16, #tpu.memory_space<vmem>>, %arg2: memref<1x256xf32, #tpu.memory_space<vmem>>, %arg3: memref<1x256xf32, #tpu.memory_space<vmem>>, %arg4: memref<32x256xbf16, #tpu.memory_space<vmem>>, %arg5: memref<32x256xbf16, #tpu.memory_space<vmem>>) attributes {dimension_semantics = [#tpu.dimension_semantics<parallel>], iteration_bounds = array<i64: 1>, scalar_prefetch = 0 : i64, scratch_operands = 0 : i64, tpu.core_type = #tpu.core_type<tc>, window_params = [{transform_indices = @transform_0, window_bounds = array<i64: 32, 256>}, {pipeline_mode = #tpu.pipeline_mode<synchronous>, transform_indices = @transform_1, window_bounds = array<i64: 1, 256>}, {pipeline_mode = #tpu.pipeline_mode<synchronous>, transform_indices = @transform_2, window_bounds = array<i64: 1, 256>}, {transform_indices = @transform_3, window_bounds = array<i64: 32, 256>}, {transform_indices = @transform_4, window_bounds = array<i64: 32, 256>}]} {
    %c0 = arith.constant 0 : index
    %c0_0 = arith.constant 0 : index
    %0 = vector.load %arg1[%c0, %c0_0] : memref<32x256xbf16, #tpu.memory_space<vmem>>, vector<32x256xbf16>
    %1 = arith.extf %0 : vector<32x256xbf16> to vector<32x256xf32>
    %c0_1 = arith.constant 0 : index
    %c0_2 = arith.constant 0 : index
    %2 = vector.load %arg2[%c0_1, %c0_2] : memref<1x256xf32, #tpu.memory_space<vmem>>, vector<1x256xf32>
    %3 = vector.broadcast %2 : vector<1x256xf32> to vector<32x256xf32>
    %4 = arith.mulf %1, %3 : vector<32x256xf32>
    %c0_3 = arith.constant 0 : index
    %c0_4 = arith.constant 0 : index
    %5 = vector.load %arg3[%c0_3, %c0_4] : memref<1x256xf32, #tpu.memory_space<vmem>>, vector<1x256xf32>
    %6 = vector.broadcast %5 : vector<1x256xf32> to vector<32x256xf32>
    %7 = arith.addf %4, %6 : vector<32x256xf32>
    %c0_5 = arith.constant 0 : index
    %c0_6 = arith.constant 0 : index
    %8 = vector.load %arg4[%c0_5, %c0_6] : memref<32x256xbf16, #tpu.memory_space<vmem>>, vector<32x256xbf16>
    %9 = arith.extf %8 : vector<32x256xbf16> to vector<32x256xf32>
    %10 = arith.addf %7, %9 : vector<32x256xf32>
    %cst = arith.constant 0.000000e+00 : f32
    %11 = vector.broadcast %cst : f32 to vector<32x256xf32>
    %12 = arith.maximumf %10, %11 : vector<32x256xf32>
    %13 = arith.truncf %12 : vector<32x256xf32> to vector<32x256xbf16>
    %c0_7 = arith.constant 0 : index
    %c0_8 = arith.constant 0 : index
    %14 = vector.load %arg5[%c0_7, %c0_8] : memref<32x256xbf16, #tpu.memory_space<vmem>>, vector<32x256xbf16>
    tpu.vector_store %arg5[%c0_7, %c0_8], %13 {strides = array<i32>} : memref<32x256xbf16, #tpu.memory_space<vmem>>, vector<32x256xbf16>,
    return
  }
  func.func @transform_0(%arg0: i32) -> (i32, i32) {
    %c0_i32 = arith.constant 0 : i32
    %c0_i32_0 = arith.constant 0 : i32
    return %arg0, %c0_i32 : i32, i32
  }
  func.func @transform_1(%arg0: i32) -> (i32, i32) {
    %c0_i32 = arith.constant 0 : i32
    %c0_i32_0 = arith.constant 0 : i32
    %c0_i32_1 = arith.constant 0 : i32
    return %c0_i32, %c0_i32_0 : i32, i32
  }
  func.func @transform_2(%arg0: i32) -> (i32, i32) {
    %c0_i32 = arith.constant 0 : i32
    %c0_i32_0 = arith.constant 0 : i32
    %c0_i32_1 = arith.constant 0 : i32
    return %c0_i32, %c0_i32_0 : i32, i32
  }
  func.func @transform_3(%arg0: i32) -> (i32, i32) {
    %c0_i32 = arith.constant 0 : i32
    %c0_i32_0 = arith.constant 0 : i32
    return %arg0, %c0_i32 : i32, i32
  }
  func.func @transform_4(%arg0: i32) -> (i32, i32) {
    %c0_i32 = arith.constant 0 : i32
    %c0_i32_0 = arith.constant 0 : i32
    return %arg0, %c0_i32 : i32, i32
  }
}

module attributes {stable_mosaic.version = 11 : i64} {
  func.func @_matmul_stats_kernel(%arg0: i32, %arg1: i32, %arg2: i32, %arg3: memref<16x256xbf16, #tpu.memory_space<vmem>>, %arg4: memref<256x256xbf16, #tpu.memory_space<vmem>>, %arg5: memref<16x256xbf16, #tpu.memory_space<vmem>>, %arg6: memref<8x256xf32, #tpu.memory_space<vmem>>, %arg7: memref<16x256xf32, #tpu.memory_space<vmem>>) attributes {dimension_semantics = [#tpu.dimension_semantics<parallel>, #tpu.dimension_semantics<parallel>, #tpu.dimension_semantics<arbitrary>], iteration_bounds = array<i64: 1, 4, 9>, scalar_prefetch = 0 : i64, scratch_operands = 1 : i64, tpu.core_type = #tpu.core_type<tc>, window_params = [{transform_indices = @transform_0, window_bounds = array<i64: 16, 256>}, {transform_indices = @transform_1, window_bounds = array<i64: 256, 256>}, {transform_indices = @transform_2, window_bounds = array<i64: 16, 256>}, {transform_indices = @transform_3, window_bounds = array<i64: 8, 256>}]} {
    %c0_i32 = arith.constant 0 : i32
    %0 = arith.cmpi eq, %arg2, %c0_i32 : i32
    %1 = arith.extui %0 : i1 to i32
    %c0_i32_0 = arith.constant 0 : i32
    %2 = arith.cmpi ne, %1, %c0_i32_0 : i32
    scf.if %2 {
      %cst_9 = arith.constant 0.000000e+00 : f32
      %12 = vector.broadcast %cst_9 : f32 to vector<16x256xf32>
      %c0_10 = arith.constant 0 : index
      %c0_11 = arith.constant 0 : index
      %13 = vector.load %arg7[%c0_10, %c0_11] : memref<16x256xf32, #tpu.memory_space<vmem>>, vector<16x256xf32>
      tpu.vector_store %arg7[%c0_10, %c0_11], %12 {strides = array<i32>} : memref<16x256xf32, #tpu.memory_space<vmem>>, vector<16x256xf32>,
    } else {
    }
    %c0 = arith.constant 0 : index
    %c0_1 = arith.constant 0 : index
    %3 = vector.load %arg7[%c0, %c0_1] : memref<16x256xf32, #tpu.memory_space<vmem>>, vector<16x256xf32>
    %c0_2 = arith.constant 0 : index
    %c0_3 = arith.constant 0 : index
    %4 = vector.load %arg3[%c0_2, %c0_3] : memref<16x256xbf16, #tpu.memory_space<vmem>>, vector<16x256xbf16>
    %c0_4 = arith.constant 0 : index
    %c0_5 = arith.constant 0 : index
    %5 = vector.load %arg4[%c0_4, %c0_5] : memref<256x256xbf16, #tpu.memory_space<vmem>>, vector<256x256xbf16>
    %cst = arith.constant dense<0.000000e+00> : vector<16x256xf32>
    %6 = tpu.matmul %4, %5, %cst {dimension_numbers = #tpu.dot_dimension_numbers<[1], [0], [0], [1], [0, 0, 1, 1], [], []>} : vector<16x256xbf16>, vector<256x256xbf16>, vector<16x256xf32> -> vector<16x256xf32>
    %7 = arith.addf %3, %6 : vector<16x256xf32>
    %c0_6 = arith.constant 0 : index
    %c0_7 = arith.constant 0 : index
    %8 = vector.load %arg7[%c0_6, %c0_7] : memref<16x256xf32, #tpu.memory_space<vmem>>, vector<16x256xf32>
    tpu.vector_store %arg7[%c0_6, %c0_7], %7 {strides = array<i32>} : memref<16x256xf32, #tpu.memory_space<vmem>>, vector<16x256xf32>,
    %c8_i32 = arith.constant 8 : i32
    %9 = arith.cmpi eq, %arg2, %c8_i32 : i32
    %10 = arith.extui %9 : i1 to i32
    %c0_i32_8 = arith.constant 0 : i32
    %11 = arith.cmpi ne, %10, %c0_i32_8 : i32
    scf.if %11 {
      %c0_9 = arith.constant 0 : index
      %c0_10 = arith.constant 0 : index
      %12 = vector.load %arg7[%c0_9, %c0_10] : memref<16x256xf32, #tpu.memory_space<vmem>>, vector<16x256xf32>
      %13 = arith.truncf %12 : vector<16x256xf32> to vector<16x256xbf16>
      %c0_11 = arith.constant 0 : index
      %c0_12 = arith.constant 0 : index
      %14 = vector.load %arg5[%c0_11, %c0_12] : memref<16x256xbf16, #tpu.memory_space<vmem>>, vector<16x256xbf16>
      tpu.vector_store %arg5[%c0_11, %c0_12], %13 {strides = array<i32>} : memref<16x256xbf16, #tpu.memory_space<vmem>>, vector<16x256xbf16>,
      %cst_13 = arith.constant dense<0.000000e+00> : vector<256xf32>
      %15 = vector.multi_reduction <add>, %12, %cst_13 [0] : vector<16x256xf32> to vector<256xf32>
      %16 = vector.shape_cast %15 : vector<256xf32> to vector<1x256xf32>
      %17 = arith.mulf %12, %12 : vector<16x256xf32>
      %cst_14 = arith.constant dense<0.000000e+00> : vector<256xf32>
      %18 = vector.multi_reduction <add>, %17, %cst_14 [0] : vector<16x256xf32> to vector<256xf32>
      %19 = vector.shape_cast %18 : vector<256xf32> to vector<1x256xf32>
      %20 = tpu.iota {dimensions = array<i32: 0>} : vector<8x256xi32>
      %c0_i32_15 = arith.constant 0 : i32
      %21 = vector.broadcast %c0_i32_15 : i32 to vector<8x256xi32>
      %22 = arith.cmpi eq, %20, %21 : vector<8x256xi32>
      %c1_i32 = arith.constant 1 : i32
      %23 = vector.broadcast %c1_i32 : i32 to vector<8x256xi32>
      %24 = arith.cmpi eq, %20, %23 : vector<8x256xi32>
      %cst_16 = arith.constant 0.000000e+00 : f32
      %25 = vector.shape_cast %19 : vector<1x256xf32> to vector<1x256xf32>
      %26 = vector.broadcast %25 : vector<1x256xf32> to vector<8x256xf32>
      %27 = vector.broadcast %cst_16 : f32 to vector<8x256xf32>
      %28 = arith.select %24, %26, %27 : vector<8x256xi1>, vector<8x256xf32>
      %29 = vector.shape_cast %16 : vector<1x256xf32> to vector<1x256xf32>
      %30 = vector.broadcast %29 : vector<1x256xf32> to vector<8x256xf32>
      %31 = arith.select %22, %30, %28 : vector<8x256xi1>, vector<8x256xf32>
      %c0_17 = arith.constant 0 : index
      %c0_18 = arith.constant 0 : index
      %32 = vector.load %arg6[%c0_17, %c0_18] : memref<8x256xf32, #tpu.memory_space<vmem>>, vector<8x256xf32>
      tpu.vector_store %arg6[%c0_17, %c0_18], %31 {strides = array<i32>} : memref<8x256xf32, #tpu.memory_space<vmem>>, vector<8x256xf32>,
    } else {
    }
    return
  }
  func.func @transform_0(%arg0: i32, %arg1: i32, %arg2: i32) -> (i32, i32) {
    %c0_i32 = arith.constant 0 : i32
    return %arg0, %arg2 : i32, i32
  }
  func.func @transform_1(%arg0: i32, %arg1: i32, %arg2: i32) -> (i32, i32) {
    %c0_i32 = arith.constant 0 : i32
    return %arg2, %arg1 : i32, i32
  }
  func.func @transform_2(%arg0: i32, %arg1: i32, %arg2: i32) -> (i32, i32) {
    %c0_i32 = arith.constant 0 : i32
    return %arg0, %arg1 : i32, i32
  }
  func.func @transform_3(%arg0: i32, %arg1: i32, %arg2: i32) -> (i32, i32) {
    %c0_i32 = arith.constant 0 : i32
    return %arg0, %arg1 : i32, i32
  }
}

module attributes {stable_mosaic.version = 11 : i64} {
  func.func @_bn_apply_mask_kernel(%arg0: i32, %arg1: memref<16x1024xbf16, #tpu.memory_space<vmem>>, %arg2: memref<1x1024xf32, #tpu.memory_space<vmem>>, %arg3: memref<1x1024xf32, #tpu.memory_space<vmem>>, %arg4: memref<1x1024xf32, #tpu.memory_space<vmem>>, %arg5: memref<16x1024xbf16, #tpu.memory_space<vmem>>) attributes {dimension_semantics = [#tpu.dimension_semantics<parallel>], iteration_bounds = array<i64: 1>, scalar_prefetch = 0 : i64, scratch_operands = 0 : i64, tpu.core_type = #tpu.core_type<tc>, window_params = [{transform_indices = @transform_0, window_bounds = array<i64: 16, 1024>}, {pipeline_mode = #tpu.pipeline_mode<synchronous>, transform_indices = @transform_1, window_bounds = array<i64: 1, 1024>}, {pipeline_mode = #tpu.pipeline_mode<synchronous>, transform_indices = @transform_2, window_bounds = array<i64: 1, 1024>}, {pipeline_mode = #tpu.pipeline_mode<synchronous>, transform_indices = @transform_3, window_bounds = array<i64: 1, 1024>}, {transform_indices = @transform_4, window_bounds = array<i64: 16, 1024>}]} {
    %c0 = arith.constant 0 : index
    %c0_0 = arith.constant 0 : index
    %0 = vector.load %arg1[%c0, %c0_0] : memref<16x1024xbf16, #tpu.memory_space<vmem>>, vector<16x1024xbf16>
    %1 = arith.extf %0 : vector<16x1024xbf16> to vector<16x1024xf32>
    %c0_1 = arith.constant 0 : index
    %c0_2 = arith.constant 0 : index
    %2 = vector.load %arg2[%c0_1, %c0_2] : memref<1x1024xf32, #tpu.memory_space<vmem>>, vector<1x1024xf32>
    %3 = vector.broadcast %2 : vector<1x1024xf32> to vector<16x1024xf32>
    %4 = arith.mulf %1, %3 : vector<16x1024xf32>
    %c0_3 = arith.constant 0 : index
    %c0_4 = arith.constant 0 : index
    %5 = vector.load %arg3[%c0_3, %c0_4] : memref<1x1024xf32, #tpu.memory_space<vmem>>, vector<1x1024xf32>
    %6 = vector.broadcast %5 : vector<1x1024xf32> to vector<16x1024xf32>
    %7 = arith.addf %4, %6 : vector<16x1024xf32>
    %c0_5 = arith.constant 0 : index
    %c0_6 = arith.constant 0 : index
    %8 = vector.load %arg4[%c0_5, %c0_6] : memref<1x1024xf32, #tpu.memory_space<vmem>>, vector<1x1024xf32>
    %cst = arith.constant 0.000000e+00 : f32
    %9 = vector.broadcast %cst : f32 to vector<1x1024xf32>
    %10 = arith.cmpf ogt, %8, %9 : vector<1x1024xf32>
    %cst_7 = arith.constant 0.000000e+00 : f32
    %11 = vector.broadcast %cst_7 : f32 to vector<16x1024xf32>
    %12 = arith.maximumf %7, %11 : vector<16x1024xf32>
    %13 = vector.shape_cast %10 : vector<1x1024xi1> to vector<1x1024xi1>
    %14 = vector.broadcast %13 : vector<1x1024xi1> to vector<16x1024xi1>
    %15 = arith.select %14, %12, %7 : vector<16x1024xi1>, vector<16x1024xf32>
    %16 = arith.truncf %15 : vector<16x1024xf32> to vector<16x1024xbf16>
    %c0_8 = arith.constant 0 : index
    %c0_9 = arith.constant 0 : index
    %17 = vector.load %arg5[%c0_8, %c0_9] : memref<16x1024xbf16, #tpu.memory_space<vmem>>, vector<16x1024xbf16>
    tpu.vector_store %arg5[%c0_8, %c0_9], %16 {strides = array<i32>} : memref<16x1024xbf16, #tpu.memory_space<vmem>>, vector<16x1024xbf16>,
    return
  }
  func.func @transform_0(%arg0: i32) -> (i32, i32) {
    %c0_i32 = arith.constant 0 : i32
    %c0_i32_0 = arith.constant 0 : i32
    return %arg0, %c0_i32 : i32, i32
  }
  func.func @transform_1(%arg0: i32) -> (i32, i32) {
    %c0_i32 = arith.constant 0 : i32
    %c0_i32_0 = arith.constant 0 : i32
    %c0_i32_1 = arith.constant 0 : i32
    return %c0_i32, %c0_i32_0 : i32, i32
  }
  func.func @transform_2(%arg0: i32) -> (i32, i32) {
    %c0_i32 = arith.constant 0 : i32
    %c0_i32_0 = arith.constant 0 : i32
    %c0_i32_1 = arith.constant 0 : i32
    return %c0_i32, %c0_i32_0 : i32, i32
  }
  func.func @transform_3(%arg0: i32) -> (i32, i32) {
    %c0_i32 = arith.constant 0 : i32
    %c0_i32_0 = arith.constant 0 : i32
    %c0_i32_1 = arith.constant 0 : i32
    return %c0_i32, %c0_i32_0 : i32, i32
  }
  func.func @transform_4(%arg0: i32) -> (i32, i32) {
    %c0_i32 = arith.constant 0 : i32
    %c0_i32_0 = arith.constant 0 : i32
    return %arg0, %c0_i32 : i32, i32
  }
}

module attributes {stable_mosaic.version = 11 : i64} {
  func.func @_bn_apply_res_kernel(%arg0: i32, %arg1: memref<16x512xbf16, #tpu.memory_space<vmem>>, %arg2: memref<1x512xf32, #tpu.memory_space<vmem>>, %arg3: memref<1x512xf32, #tpu.memory_space<vmem>>, %arg4: memref<16x512xbf16, #tpu.memory_space<vmem>>, %arg5: memref<16x512xbf16, #tpu.memory_space<vmem>>) attributes {dimension_semantics = [#tpu.dimension_semantics<parallel>], iteration_bounds = array<i64: 1>, scalar_prefetch = 0 : i64, scratch_operands = 0 : i64, tpu.core_type = #tpu.core_type<tc>, window_params = [{transform_indices = @transform_0, window_bounds = array<i64: 16, 512>}, {pipeline_mode = #tpu.pipeline_mode<synchronous>, transform_indices = @transform_1, window_bounds = array<i64: 1, 512>}, {pipeline_mode = #tpu.pipeline_mode<synchronous>, transform_indices = @transform_2, window_bounds = array<i64: 1, 512>}, {transform_indices = @transform_3, window_bounds = array<i64: 16, 512>}, {transform_indices = @transform_4, window_bounds = array<i64: 16, 512>}]} {
    %c0 = arith.constant 0 : index
    %c0_0 = arith.constant 0 : index
    %0 = vector.load %arg1[%c0, %c0_0] : memref<16x512xbf16, #tpu.memory_space<vmem>>, vector<16x512xbf16>
    %1 = arith.extf %0 : vector<16x512xbf16> to vector<16x512xf32>
    %c0_1 = arith.constant 0 : index
    %c0_2 = arith.constant 0 : index
    %2 = vector.load %arg2[%c0_1, %c0_2] : memref<1x512xf32, #tpu.memory_space<vmem>>, vector<1x512xf32>
    %3 = vector.broadcast %2 : vector<1x512xf32> to vector<16x512xf32>
    %4 = arith.mulf %1, %3 : vector<16x512xf32>
    %c0_3 = arith.constant 0 : index
    %c0_4 = arith.constant 0 : index
    %5 = vector.load %arg3[%c0_3, %c0_4] : memref<1x512xf32, #tpu.memory_space<vmem>>, vector<1x512xf32>
    %6 = vector.broadcast %5 : vector<1x512xf32> to vector<16x512xf32>
    %7 = arith.addf %4, %6 : vector<16x512xf32>
    %c0_5 = arith.constant 0 : index
    %c0_6 = arith.constant 0 : index
    %8 = vector.load %arg4[%c0_5, %c0_6] : memref<16x512xbf16, #tpu.memory_space<vmem>>, vector<16x512xbf16>
    %9 = arith.extf %8 : vector<16x512xbf16> to vector<16x512xf32>
    %10 = arith.addf %7, %9 : vector<16x512xf32>
    %cst = arith.constant 0.000000e+00 : f32
    %11 = vector.broadcast %cst : f32 to vector<16x512xf32>
    %12 = arith.maximumf %10, %11 : vector<16x512xf32>
    %13 = arith.truncf %12 : vector<16x512xf32> to vector<16x512xbf16>
    %c0_7 = arith.constant 0 : index
    %c0_8 = arith.constant 0 : index
    %14 = vector.load %arg5[%c0_7, %c0_8] : memref<16x512xbf16, #tpu.memory_space<vmem>>, vector<16x512xbf16>
    tpu.vector_store %arg5[%c0_7, %c0_8], %13 {strides = array<i32>} : memref<16x512xbf16, #tpu.memory_space<vmem>>, vector<16x512xbf16>,
    return
  }
  func.func @transform_0(%arg0: i32) -> (i32, i32) {
    %c0_i32 = arith.constant 0 : i32
    %c0_i32_0 = arith.constant 0 : i32
    return %arg0, %c0_i32 : i32, i32
  }
  func.func @transform_1(%arg0: i32) -> (i32, i32) {
    %c0_i32 = arith.constant 0 : i32
    %c0_i32_0 = arith.constant 0 : i32
    %c0_i32_1 = arith.constant 0 : i32
    return %c0_i32, %c0_i32_0 : i32, i32
  }
  func.func @transform_2(%arg0: i32) -> (i32, i32) {
    %c0_i32 = arith.constant 0 : i32
    %c0_i32_0 = arith.constant 0 : i32
    %c0_i32_1 = arith.constant 0 : i32
    return %c0_i32, %c0_i32_0 : i32, i32
  }
  func.func @transform_3(%arg0: i32) -> (i32, i32) {
    %c0_i32 = arith.constant 0 : i32
    %c0_i32_0 = arith.constant 0 : i32
    return %arg0, %c0_i32 : i32, i32
  }
  func.func @transform_4(%arg0: i32) -> (i32, i32) {
    %c0_i32 = arith.constant 0 : i32
    %c0_i32_0 = arith.constant 0 : i32
    return %arg0, %c0_i32 : i32, i32
  }
}

module attributes {stable_mosaic.version = 11 : i64} {
  func.func @_matmul_stats_kernel(%arg0: i32, %arg1: i32, %arg2: i32, %arg3: memref<16x256xbf16, #tpu.memory_space<vmem>>, %arg4: memref<256x256xbf16, #tpu.memory_space<vmem>>, %arg5: memref<16x256xbf16, #tpu.memory_space<vmem>>, %arg6: memref<8x256xf32, #tpu.memory_space<vmem>>, %arg7: memref<16x256xf32, #tpu.memory_space<vmem>>) attributes {dimension_semantics = [#tpu.dimension_semantics<parallel>, #tpu.dimension_semantics<parallel>, #tpu.dimension_semantics<arbitrary>], iteration_bounds = array<i64: 1, 2, 18>, scalar_prefetch = 0 : i64, scratch_operands = 1 : i64, tpu.core_type = #tpu.core_type<tc>, window_params = [{transform_indices = @transform_0, window_bounds = array<i64: 16, 256>}, {transform_indices = @transform_1, window_bounds = array<i64: 256, 256>}, {transform_indices = @transform_2, window_bounds = array<i64: 16, 256>}, {transform_indices = @transform_3, window_bounds = array<i64: 8, 256>}]} {
    %c0_i32 = arith.constant 0 : i32
    %0 = arith.cmpi eq, %arg2, %c0_i32 : i32
    %1 = arith.extui %0 : i1 to i32
    %c0_i32_0 = arith.constant 0 : i32
    %2 = arith.cmpi ne, %1, %c0_i32_0 : i32
    scf.if %2 {
      %cst_9 = arith.constant 0.000000e+00 : f32
      %12 = vector.broadcast %cst_9 : f32 to vector<16x256xf32>
      %c0_10 = arith.constant 0 : index
      %c0_11 = arith.constant 0 : index
      %13 = vector.load %arg7[%c0_10, %c0_11] : memref<16x256xf32, #tpu.memory_space<vmem>>, vector<16x256xf32>
      tpu.vector_store %arg7[%c0_10, %c0_11], %12 {strides = array<i32>} : memref<16x256xf32, #tpu.memory_space<vmem>>, vector<16x256xf32>,
    } else {
    }
    %c0 = arith.constant 0 : index
    %c0_1 = arith.constant 0 : index
    %3 = vector.load %arg7[%c0, %c0_1] : memref<16x256xf32, #tpu.memory_space<vmem>>, vector<16x256xf32>
    %c0_2 = arith.constant 0 : index
    %c0_3 = arith.constant 0 : index
    %4 = vector.load %arg3[%c0_2, %c0_3] : memref<16x256xbf16, #tpu.memory_space<vmem>>, vector<16x256xbf16>
    %c0_4 = arith.constant 0 : index
    %c0_5 = arith.constant 0 : index
    %5 = vector.load %arg4[%c0_4, %c0_5] : memref<256x256xbf16, #tpu.memory_space<vmem>>, vector<256x256xbf16>
    %cst = arith.constant dense<0.000000e+00> : vector<16x256xf32>
    %6 = tpu.matmul %4, %5, %cst {dimension_numbers = #tpu.dot_dimension_numbers<[1], [0], [0], [1], [0, 0, 1, 1], [], []>} : vector<16x256xbf16>, vector<256x256xbf16>, vector<16x256xf32> -> vector<16x256xf32>
    %7 = arith.addf %3, %6 : vector<16x256xf32>
    %c0_6 = arith.constant 0 : index
    %c0_7 = arith.constant 0 : index
    %8 = vector.load %arg7[%c0_6, %c0_7] : memref<16x256xf32, #tpu.memory_space<vmem>>, vector<16x256xf32>
    tpu.vector_store %arg7[%c0_6, %c0_7], %7 {strides = array<i32>} : memref<16x256xf32, #tpu.memory_space<vmem>>, vector<16x256xf32>,
    %c17_i32 = arith.constant 17 : i32
    %9 = arith.cmpi eq, %arg2, %c17_i32 : i32
    %10 = arith.extui %9 : i1 to i32
    %c0_i32_8 = arith.constant 0 : i32
    %11 = arith.cmpi ne, %10, %c0_i32_8 : i32
    scf.if %11 {
      %c0_9 = arith.constant 0 : index
      %c0_10 = arith.constant 0 : index
      %12 = vector.load %arg7[%c0_9, %c0_10] : memref<16x256xf32, #tpu.memory_space<vmem>>, vector<16x256xf32>
      %13 = arith.truncf %12 : vector<16x256xf32> to vector<16x256xbf16>
      %c0_11 = arith.constant 0 : index
      %c0_12 = arith.constant 0 : index
      %14 = vector.load %arg5[%c0_11, %c0_12] : memref<16x256xbf16, #tpu.memory_space<vmem>>, vector<16x256xbf16>
      tpu.vector_store %arg5[%c0_11, %c0_12], %13 {strides = array<i32>} : memref<16x256xbf16, #tpu.memory_space<vmem>>, vector<16x256xbf16>,
      %cst_13 = arith.constant dense<0.000000e+00> : vector<256xf32>
      %15 = vector.multi_reduction <add>, %12, %cst_13 [0] : vector<16x256xf32> to vector<256xf32>
      %16 = vector.shape_cast %15 : vector<256xf32> to vector<1x256xf32>
      %17 = arith.mulf %12, %12 : vector<16x256xf32>
      %cst_14 = arith.constant dense<0.000000e+00> : vector<256xf32>
      %18 = vector.multi_reduction <add>, %17, %cst_14 [0] : vector<16x256xf32> to vector<256xf32>
      %19 = vector.shape_cast %18 : vector<256xf32> to vector<1x256xf32>
      %20 = tpu.iota {dimensions = array<i32: 0>} : vector<8x256xi32>
      %c0_i32_15 = arith.constant 0 : i32
      %21 = vector.broadcast %c0_i32_15 : i32 to vector<8x256xi32>
      %22 = arith.cmpi eq, %20, %21 : vector<8x256xi32>
      %c1_i32 = arith.constant 1 : i32
      %23 = vector.broadcast %c1_i32 : i32 to vector<8x256xi32>
      %24 = arith.cmpi eq, %20, %23 : vector<8x256xi32>
      %cst_16 = arith.constant 0.000000e+00 : f32
      %25 = vector.shape_cast %19 : vector<1x256xf32> to vector<1x256xf32>
      %26 = vector.broadcast %25 : vector<1x256xf32> to vector<8x256xf32>
      %27 = vector.broadcast %cst_16 : f32 to vector<8x256xf32>
      %28 = arith.select %24, %26, %27 : vector<8x256xi1>, vector<8x256xf32>
      %29 = vector.shape_cast %16 : vector<1x256xf32> to vector<1x256xf32>
      %30 = vector.broadcast %29 : vector<1x256xf32> to vector<8x256xf32>
      %31 = arith.select %22, %30, %28 : vector<8x256xi1>, vector<8x256xf32>
      %c0_17 = arith.constant 0 : index
      %c0_18 = arith.constant 0 : index
      %32 = vector.load %arg6[%c0_17, %c0_18] : memref<8x256xf32, #tpu.memory_space<vmem>>, vector<8x256xf32>
      tpu.vector_store %arg6[%c0_17, %c0_18], %31 {strides = array<i32>} : memref<8x256xf32, #tpu.memory_space<vmem>>, vector<8x256xf32>,
    } else {
    }
    return
  }
  func.func @transform_0(%arg0: i32, %arg1: i32, %arg2: i32) -> (i32, i32) {
    %c0_i32 = arith.constant 0 : i32
    return %arg0, %arg2 : i32, i32
  }
  func.func @transform_1(%arg0: i32, %arg1: i32, %arg2: i32) -> (i32, i32) {
    %c0_i32 = arith.constant 0 : i32
    return %arg2, %arg1 : i32, i32
  }
  func.func @transform_2(%arg0: i32, %arg1: i32, %arg2: i32) -> (i32, i32) {
    %c0_i32 = arith.constant 0 : i32
    return %arg0, %arg1 : i32, i32
  }
  func.func @transform_3(%arg0: i32, %arg1: i32, %arg2: i32) -> (i32, i32) {
    %c0_i32 = arith.constant 0 : i32
    return %arg0, %arg1 : i32, i32
  }
}

module attributes {stable_mosaic.version = 11 : i64} {
  func.func @_head_kernel(%arg0: i32, %arg1: memref<8x4x512xbf16, #tpu.memory_space<vmem>>, %arg2: memref<512x128xbf16, #tpu.memory_space<vmem>>, %arg3: memref<1x128xf32, #tpu.memory_space<vmem>>, %arg4: memref<128x128xbf16, #tpu.memory_space<vmem>>, %arg5: memref<1x128xf32, #tpu.memory_space<vmem>>, %arg6: memref<8x128xf32, #tpu.memory_space<vmem>>) attributes {dimension_semantics = [#tpu.dimension_semantics<arbitrary>], iteration_bounds = array<i64: 1>, scalar_prefetch = 0 : i64, scratch_operands = 0 : i64, tpu.core_type = #tpu.core_type<tc>, window_params = [{pipeline_mode = #tpu.pipeline_mode<synchronous>, transform_indices = @transform_0, window_bounds = array<i64: 8, 4, 512>}, {pipeline_mode = #tpu.pipeline_mode<synchronous>, transform_indices = @transform_1, window_bounds = array<i64: 512, 128>}, {pipeline_mode = #tpu.pipeline_mode<synchronous>, transform_indices = @transform_2, window_bounds = array<i64: 1, 128>}, {pipeline_mode = #tpu.pipeline_mode<synchronous>, transform_indices = @transform_3, window_bounds = array<i64: 128, 128>}, {pipeline_mode = #tpu.pipeline_mode<synchronous>, transform_indices = @transform_4, window_bounds = array<i64: 1, 128>}, {pipeline_mode = #tpu.pipeline_mode<synchronous>, transform_indices = @transform_5, window_bounds = array<i64: 8, 128>}]} {
    %c0 = arith.constant 0 : index
    %c0_0 = arith.constant 0 : index
    %c0_1 = arith.constant 0 : index
    %0 = vector.load %arg1[%c0, %c0_0, %c0_1] : memref<8x4x512xbf16, #tpu.memory_space<vmem>>, vector<8x4x512xbf16>
    %1 = arith.extf %0 : vector<8x4x512xbf16> to vector<8x4x512xf32>
    %cst = arith.constant dense<0.000000e+00> : vector<8x512xf32>
    %2 = vector.multi_reduction <add>, %1, %cst [1] : vector<8x4x512xf32> to vector<8x512xf32>
    %cst_2 = arith.constant 2.500000e-01 : f32
    %3 = vector.broadcast %cst_2 : f32 to vector<8x512xf32>
    %4 = arith.mulf %2, %3 : vector<8x512xf32>
    %5 = arith.truncf %4 : vector<8x512xf32> to vector<8x512xbf16>
    %c0_3 = arith.constant 0 : index
    %c0_4 = arith.constant 0 : index
    %6 = vector.load %arg2[%c0_3, %c0_4] : memref<512x128xbf16, #tpu.memory_space<vmem>>, vector<512x128xbf16>
    %cst_5 = arith.constant dense<0.000000e+00> : vector<8x128xf32>
    %7 = tpu.matmul %5, %6, %cst_5 {dimension_numbers = #tpu.dot_dimension_numbers<[1], [0], [0], [1], [0, 0, 1, 1], [], []>} : vector<8x512xbf16>, vector<512x128xbf16>, vector<8x128xf32> -> vector<8x128xf32>
    %c0_6 = arith.constant 0 : index
    %c0_7 = arith.constant 0 : index
    %8 = vector.load %arg3[%c0_6, %c0_7] : memref<1x128xf32, #tpu.memory_space<vmem>>, vector<1x128xf32>
    %9 = vector.broadcast %8 : vector<1x128xf32> to vector<8x128xf32>
    %10 = arith.addf %7, %9 : vector<8x128xf32>
    %11 = arith.truncf %10 : vector<8x128xf32> to vector<8x128xbf16>
    %c0_8 = arith.constant 0 : index
    %c0_9 = arith.constant 0 : index
    %12 = vector.load %arg4[%c0_8, %c0_9] : memref<128x128xbf16, #tpu.memory_space<vmem>>, vector<128x128xbf16>
    %cst_10 = arith.constant dense<0.000000e+00> : vector<8x128xf32>
    %13 = tpu.matmul %11, %12, %cst_10 {dimension_numbers = #tpu.dot_dimension_numbers<[1], [0], [0], [1], [0, 0, 1, 1], [], []>} : vector<8x128xbf16>, vector<128x128xbf16>, vector<8x128xf32> -> vector<8x128xf32>
    %c0_11 = arith.constant 0 : index
    %c0_12 = arith.constant 0 : index
    %14 = vector.load %arg5[%c0_11, %c0_12] : memref<1x128xf32, #tpu.memory_space<vmem>>, vector<1x128xf32>
    %15 = vector.broadcast %14 : vector<1x128xf32> to vector<8x128xf32>
    %16 = arith.addf %13, %15 : vector<8x128xf32>
    %c0_13 = arith.constant 0 : index
    %c0_14 = arith.constant 0 : index
    %17 = vector.load %arg6[%c0_13, %c0_14] : memref<8x128xf32, #tpu.memory_space<vmem>>, vector<8x128xf32>
    tpu.vector_store %arg6[%c0_13, %c0_14], %16 {strides = array<i32>} : memref<8x128xf32, #tpu.memory_space<vmem>>, vector<8x128xf32>,
    return
  }
  func.func @transform_0(%arg0: i32) -> (i32, i32, i32) {
    %c0_i32 = arith.constant 0 : i32
    %c0_i32_0 = arith.constant 0 : i32
    %c0_i32_1 = arith.constant 0 : i32
    %c0_i32_2 = arith.constant 0 : i32
    return %c0_i32, %c0_i32_0, %c0_i32_1 : i32, i32, i32
  }
  func.func @transform_1(%arg0: i32) -> (i32, i32) {
    %c0_i32 = arith.constant 0 : i32
    %c0_i32_0 = arith.constant 0 : i32
    %c0_i32_1 = arith.constant 0 : i32
    return %c0_i32, %c0_i32_0 : i32, i32
  }
  func.func @transform_2(%arg0: i32) -> (i32, i32) {
    %c0_i32 = arith.constant 0 : i32
    %c0_i32_0 = arith.constant 0 : i32
    %c0_i32_1 = arith.constant 0 : i32
    return %c0_i32, %c0_i32_0 : i32, i32
  }
  func.func @transform_3(%arg0: i32) -> (i32, i32) {
    %c0_i32 = arith.constant 0 : i32
    %c0_i32_0 = arith.constant 0 : i32
    %c0_i32_1 = arith.constant 0 : i32
    return %c0_i32, %c0_i32_0 : i32, i32
  }
  func.func @transform_4(%arg0: i32) -> (i32, i32) {
    %c0_i32 = arith.constant 0 : i32
    %c0_i32_0 = arith.constant 0 : i32
    %c0_i32_1 = arith.constant 0 : i32
    return %c0_i32, %c0_i32_0 : i32, i32
  }
  func.func @transform_5(%arg0: i32) -> (i32, i32) {
    %c0_i32 = arith.constant 0 : i32
    %c0_i32_0 = arith.constant 0 : i32
    %c0_i32_1 = arith.constant 0 : i32
    return %c0_i32, %c0_i32_0 : i32, i32
  }
}

</mosaic_0001>

<bundles_post_ra>
// kernel: _lambda_.20
= control target key start
LH: loop header
LB: loop body
LE: loop exit
PB: predicated region body
PF: predicated region fallthrough
CT: control target
= control target key end

     0   :  { %s1176_s0 = inlined_call_operand.vmem [shape: bf16[512,128], index: 0, kind: input, shape index: {}]   ;;  %s1177_s1 = inlined_call_operand.vmem [shape: f32[1,128], index: 1, kind: input, shape index: {}]   ;;  %s1178_s2 = inlined_call_operand.vmem [shape: f32[1,128], index: 2, kind: input, shape index: {}]   ;;  %s1179_s3 = inlined_call_operand.vmem [shape: bf16[512,128], index: 3, kind: output, shape index: {}]  }
   0x1   :  { %v475_v0 = vld [vmem:[%s1176_s0] sm:$0xff]   ;;  %v762_v5 = vld [vmem:[%s1176_s0 + $0x8] sm:$0xff]   ;;  %v763_v8 = vld [vmem:[%s1176_s0 + $0x10] sm:$0xff]  }
   0x2   :  { %v852_v1 = vld [vmem:[%s1177_s1] ss:$0 sm:$0xff]  ;;  %v476_v2 = vunpack.c.l.bf16 %v475_v0  ;;  %v477_v3 = vunpack.c.h.bf16 %v475_v0  ;;  %v480_v6 = vunpack.c.l.bf16 %v762_v5  ;;  %v481_v7 = vunpack.c.h.bf16 %v762_v5  ;;  %v764_v9 = vld [vmem:[%s1176_s0 + $0x18] sm:$0xff]   ;;  %v766_v35 = vld [vmem:[%s1176_s0 + $0x28] sm:$0xff]  }
   0x3   :  { %v857_v4 = vld [vmem:[%s1178_s2] ss:$0 sm:$0xff]  ;;  %v484_v12 = vunpack.c.l.bf16 %v763_v8  ;;  %v485_v13 = vunpack.c.h.bf16 %v763_v8  ;;  %v488_v16 = vunpack.c.l.bf16 %v764_v9  ;;  %v489_v17 = vunpack.c.h.bf16 %v764_v9  ;;  %v767_v40 = vld [vmem:[%s1176_s0 + $0x30] sm:$0xff]   ;;  %v768_v45 = vld [vmem:[%s1176_s0 + $0x38] sm:$0xff]  }
   0x4   :  { %v146_v10 = vmul.f32 %v852_v1, %v476_v2  ;;  %v147_v11 = vmul.f32 %v852_v1, %v477_v3  ;;  %v148_v14 = vmul.f32 %v852_v1, %v480_v6  ;;  %v149_v15 = vmul.f32 %v852_v1, %v481_v7  ;;  %v765_v26 = vld [vmem:[%s1176_s0 + $0x20] sm:$0xff]  }
   0x5   :  { %v150_v20 = vmul.f32 %v852_v1, %v484_v12  ;;  %v151_v21 = vmul.f32 %v852_v1, %v485_v13  ;;  %v152_v24 = vmul.f32 %v852_v1, %v488_v16  ;;  %v153_v25 = vmul.f32 %v852_v1, %v489_v17  ;;  %v769_v62 = vld [vmem:[%s1176_s0 + $0x40] sm:$0xff]   ;;  %v770_v13 = vld [vmem:[%s1176_s0 + $0x48] sm:$0xff]  }
   0x6   :  { %v214_v18 = vadd.f32 %v857_v4, %v146_v10  ;;  %v215_v19 = vadd.f32 %v857_v4, %v147_v11  ;;  %v216_v22 = vadd.f32 %v857_v4, %v148_v14  ;;  %v217_v23 = vadd.f32 %v857_v4, %v149_v15 }
   0x7   :  { %v218_v29 = vadd.f32 %v857_v4, %v150_v20  ;;  %v219_v30 = vadd.f32 %v857_v4, %v151_v21  ;;  %v220_v33 = vadd.f32 %v857_v4, %v152_v24  ;;  %v221_v34 = vadd.f32 %v857_v4, %v153_v25 }
   0x8   :  { %v278_v27 = vmax.f32 %v214_v18, 0.0  ;;  %v279_v28 = vmax.f32 %v215_v19, 0.0  ;;  %v280_v31 = vmax.f32 %v216_v22, 0.0  ;;  %v281_v32 = vmax.f32 %v217_v23, 0.0  ;;  %v771_v18 = vld [vmem:[%s1176_s0 + $0x50] sm:$0xff]   ;;  %v772_v23 = vld [vmem:[%s1176_s0 + $0x58] sm:$0xff]  }
   0x9   :  { %v282_v37 = vmax.f32 %v218_v29, 0.0  ;;  %v283_v38 = vmax.f32 %v219_v30, 0.0  ;;  %v492_v39 = vunpack.c.l.bf16 %v765_v26  ;;  %v284_v42 = vmax.f32 %v220_v33, 0.0 }
   0xa   :  { %v605_v36 = vpack.c.bf16 %v279_v28, %v278_v27  ;;  %v610_v41 = vpack.c.bf16 %v281_v32, %v280_v31  ;;  %v285_v43 = vmax.f32 %v221_v34, 0.0  ;;  %v493_v44 = vunpack.c.h.bf16 %v765_v26 }
   0xb   :  { %v615_v46 = vpack.c.bf16 %v283_v38, %v282_v37  ;;  %v154_v47 = vmul.f32 %v852_v1, %v492_v39  ;;  %v496_v48 = vunpack.c.l.bf16 %v766_v35  ;;  %v497_v49 = vunpack.c.h.bf16 %v766_v35 }
   0xc   :  { %606 = vst [vmem:[%s1179_s3] sm:$0xff] %v605_v36   ;;  %v620_v50 = vpack.c.bf16 %v285_v43, %v284_v42  ;;  %v155_v51 = vmul.f32 %v852_v1, %v493_v44  ;;  %v500_v52 = vunpack.c.l.bf16 %v767_v40  ;;  %v501_v53 = vunpack.c.h.bf16 %v767_v40  ;;  %v773_v36 = vld [vmem:[%s1176_s0 + $0x60] sm:$0xff]  }
   0xd   :  { %793 = vst [vmem:[%s1179_s3 + $0x8] sm:$0xff] %v610_v41   ;;  %v222_v54 = vadd.f32 %v857_v4, %v154_v47  ;;  %v156_v55 = vmul.f32 %v852_v1, %v496_v48  ;;  %v157_v56 = vmul.f32 %v852_v1, %v497_v49  ;;  %v504_v57 = vunpack.c.l.bf16 %v768_v45 }
   0xe   :  { %794 = vst [vmem:[%s1179_s3 + $0x10] sm:$0xff] %v615_v46   ;;  %v223_v58 = vadd.f32 %v857_v4, %v155_v51  ;;  %v158_v59 = vmul.f32 %v852_v1, %v500_v52  ;;  %v159_v60 = vmul.f32 %v852_v1, %v501_v53  ;;  %v505_v61 = vunpack.c.h.bf16 %v768_v45  ;;  %v774_v53 = vld [vmem:[%s1176_s0 + $0x68] sm:$0xff]  }
   0xf   :  { %795 = vst [vmem:[%s1179_s3 + $0x18] sm:$0xff] %v620_v50   ;;  %v286_v63 = vmax.f32 %v222_v54, 0.0  ;;  %v224_v0 = vadd.f32 %v857_v4, %v156_v55  ;;  %v225_v2 = vadd.f32 %v857_v4, %v157_v56  ;;  %v160_v3 = vmul.f32 %v852_v1, %v504_v57 }
  0x10   :  { %v287_v5 = vmax.f32 %v223_v58, 0.0  ;;  %v226_v6 = vadd.f32 %v857_v4, %v158_v59  ;;  %v227_v7 = vadd.f32 %v857_v4, %v159_v60  ;;  %v161_v8 = vmul.f32 %v852_v1, %v505_v61  ;;  %v775_v58 = vld [vmem:[%s1176_s0 + $0x70] sm:$0xff]  }
  0x11   :  { %v288_v9 = vmax.f32 %v224_v0, 0.0  ;;  %v289_v10 = vmax.f32 %v225_v2, 0.0  ;;  %v228_v11 = vadd.f32 %v857_v4, %v160_v3  ;;  %v508_v12 = vunpack.c.l.bf16 %v769_v62 }
  0x12   :  { %v625_v14 = vpack.c.bf16 %v287_v5, %v286_v63  ;;  %v290_v15 = vmax.f32 %v226_v6, 0.0  ;;  %v291_v16 = vmax.f32 %v227_v7, 0.0  ;;  %v229_v17 = vadd.f32 %v857_v4, %v161_v8  ;;  %v776_v63 = vld [vmem:[%s1176_s0 + $0x78] sm:$0xff]  }
  0x13   :  { %v630_v19 = vpack.c.bf16 %v289_v10, %v288_v9  ;;  %v292_v20 = vmax.f32 %v228_v11, 0.0  ;;  %v509_v21 = vunpack.c.h.bf16 %v769_v62  ;;  %v162_v22 = vmul.f32 %v852_v1, %v508_v12 }
  0x14   :  { %796 = vst [vmem:[%s1179_s3 + $0x20] sm:$0xff] %v625_v14   ;;  %v635_v24 = vpack.c.bf16 %v291_v16, %v290_v15  ;;  %v293_v25 = vmax.f32 %v229_v17, 0.0  ;;  %v512_v26 = vunpack.c.l.bf16 %v770_v13  ;;  %v513_v27 = vunpack.c.h.bf16 %v770_v13  ;;  %v777_v14 = vld [vmem:[%s1176_s0 + $0x80] sm:$0xff]  }
  0x15   :  { %797 = vst [vmem:[%s1179_s3 + $0x28] sm:$0xff] %v630_v19   ;;  %v163_v28 = vmul.f32 %v852_v1, %v509_v21  ;;  %v230_v29 = vadd.f32 %v857_v4, %v162_v22  ;;  %v516_v30 = vunpack.c.l.bf16 %v771_v18  ;;  %v517_v31 = vunpack.c.h.bf16 %v771_v18 }
  0x16   :  { %798 = vst [vmem:[%s1179_s3 + $0x30] sm:$0xff] %v635_v24   ;;  %v640_v32 = vpack.c.bf16 %v293_v25, %v292_v20  ;;  %v164_v33 = vmul.f32 %v852_v1, %v512_v26  ;;  %v165_v34 = vmul.f32 %v852_v1, %v513_v27  ;;  %v520_v35 = vunpack.c.l.bf16 %v772_v23  ;;  %v778_v27 = vld [vmem:[%s1176_s0 + $0x88] sm:$0xff]  }
  0x17   :  { %v231_v37 = vadd.f32 %v857_v4, %v163_v28  ;;  %v294_v38 = vmax.f32 %v230_v29, 0.0  ;;  %v166_v39 = vmul.f32 %v852_v1, %v516_v30  ;;  %v167_v40 = vmul.f32 %v852_v1, %v517_v31 }
  0x18   :  { %799 = vst [vmem:[%s1179_s3 + $0x38] sm:$0xff] %v640_v32   ;;  %v232_v41 = vadd.f32 %v857_v4, %v164_v33  ;;  %v233_v42 = vadd.f32 %v857_v4, %v165_v34  ;;  %v521_v43 = vunpack.c.h.bf16 %v772_v23  ;;  %v168_v44 = vmul.f32 %v852_v1, %v520_v35 }
  0x19   :  { %v295_v45 = vmax.f32 %v231_v37, 0.0  ;;  %v234_v46 = vadd.f32 %v857_v4, %v166_v39  ;;  %v235_v47 = vadd.f32 %v857_v4, %v167_v40  ;;  %v524_v48 = vunpack.c.l.bf16 %v773_v36 }
  0x1a   :  { %v296_v49 = vmax.f32 %v232_v41, 0.0  ;;  %v297_v50 = vmax.f32 %v233_v42, 0.0  ;;  %v169_v51 = vmul.f32 %v852_v1, %v521_v43  ;;  %v236_v52 = vadd.f32 %v857_v4, %v168_v44  ;;  %v780_v41 = vld [vmem:[%s1176_s0 + $0x98] sm:$0xff]  }
  0x1b   :  { %v645_v54 = vpack.c.bf16 %v295_v45, %v294_v38  ;;  %v298_v55 = vmax.f32 %v234_v46, 0.0  ;;  %v299_v56 = vmax.f32 %v235_v47, 0.0  ;;  %v525_v57 = vunpack.c.h.bf16 %v773_v36  ;;  %v779_v36 = vld [vmem:[%s1176_s0 + $0x90] sm:$0xff]  }
  0x1c   :  { %v650_v59 = vpack.c.bf16 %v297_v50, %v296_v49  ;;  %v237_v60 = vadd.f32 %v857_v4, %v169_v51  ;;  %v300_v61 = vmax.f32 %v236_v52, 0.0  ;;  %v170_v62 = vmul.f32 %v852_v1, %v524_v48 }
  0x1d   :  { %800 = vst [vmem:[%s1179_s3 + $0x40] sm:$0xff] %v645_v54   ;;  %v655_v0 = vpack.c.bf16 %v299_v56, %v298_v55  ;;  %v171_v2 = vmul.f32 %v852_v1, %v525_v57  ;;  %v528_v3 = vunpack.c.l.bf16 %v774_v53  ;;  %v529_v5 = vunpack.c.h.bf16 %v774_v53  ;;  %v781_v54 = vld [vmem:[%s1176_s0 + $0xa0] sm:$0xff]  }
  0x1e   :  { %801 = vst [vmem:[%s1179_s3 + $0x48] sm:$0xff] %v650_v59   ;;  %v301_v6 = vmax.f32 %v237_v60, 0.0  ;;  %v238_v7 = vadd.f32 %v857_v4, %v170_v62  ;;  %v532_v8 = vunpack.c.l.bf16 %v775_v58  ;;  %v533_v9 = vunpack.c.h.bf16 %v775_v58 }
  0x1f   :  { %802 = vst [vmem:[%s1179_s3 + $0x50] sm:$0xff] %v655_v0   ;;  %v239_v10 = vadd.f32 %v857_v4, %v171_v2  ;;  %v172_v11 = vmul.f32 %v852_v1, %v528_v3  ;;  %v173_v12 = vmul.f32 %v852_v1, %v529_v5  ;;  %v536_v13 = vunpack.c.l.bf16 %v776_v63  ;;  %v782_v5 = vld [vmem:[%s1176_s0 + $0xa8] sm:$0xff]  }
  0x20   :  { %v660_v15 = vpack.c.bf16 %v301_v6, %v300_v61  ;;  %v302_v16 = vmax.f32 %v238_v7, 0.0  ;;  %v174_v17 = vmul.f32 %v852_v1, %v532_v8  ;;  %v175_v18 = vmul.f32 %v852_v1, %v533_v9 }
  0x21   :  { %v303_v19 = vmax.f32 %v239_v10, 0.0  ;;  %v240_v20 = vadd.f32 %v857_v4, %v172_v11  ;;  %v241_v21 = vadd.f32 %v857_v4, %v173_v12  ;;  %v537_v22 = vunpack.c.h.bf16 %v776_v63 }
  0x22   :  { %803 = vst [vmem:[%s1179_s3 + $0x58] sm:$0xff] %v660_v15   ;;  %v242_v23 = vadd.f32 %v857_v4, %v174_v17  ;;  %v243_v24 = vadd.f32 %v857_v4, %v175_v18  ;;  %v176_v25 = vmul.f32 %v852_v1, %v536_v13  ;;  %v540_v26 = vunpack.c.l.bf16 %v777_v14 }
  0x23   :  { %v665_v28 = vpack.c.bf16 %v303_v19, %v302_v16  ;;  %v304_v29 = vmax.f32 %v240_v20, 0.0  ;;  %v305_v30 = vmax.f32 %v241_v21, 0.0  ;;  %v177_v31 = vmul.f32 %v852_v1, %v537_v22 }
  0x24   :  { %v306_v32 = vmax.f32 %v242_v23, 0.0  ;;  %v307_v33 = vmax.f32 %v243_v24, 0.0  ;;  %v244_v34 = vadd.f32 %v857_v4, %v176_v25  ;;  %v541_v35 = vunpack.c.h.bf16 %v777_v14  ;;  %v783_v14 = vld [vmem:[%s1176_s0 + $0xb0] sm:$0xff]   ;;  %v784_v23 = vld [vmem:[%s1176_s0 + $0xb8] sm:$0xff]  }
  0x25   :  { %804 = vst [vmem:[%s1179_s3 + $0x60] sm:$0xff] %v665_v28   ;;  %v670_v37 = vpack.c.bf16 %v305_v30, %v304_v29  ;;  %v245_v38 = vadd.f32 %v857_v4, %v177_v31  ;;  %v178_v39 = vmul.f32 %v852_v1, %v540_v26  ;;  %v544_v40 = vunpack.c.l.bf16 %v778_v27 }
  0x26   :  { %v675_v42 = vpack.c.bf16 %v307_v33, %v306_v32  ;;  %v308_v43 = vmax.f32 %v244_v34, 0.0  ;;  %v179_v44 = vmul.f32 %v852_v1, %v541_v35  ;;  %v545_v45 = vunpack.c.h.bf16 %v778_v27  ;;  %v785_v32 = vld [vmem:[%s1176_s0 + $0xc0] sm:$0xff]  }
  0x27   :  { %805 = vst [vmem:[%s1179_s3 + $0x68] sm:$0xff] %v670_v37   ;;  %v309_v46 = vmax.f32 %v245_v38, 0.0  ;;  %v246_v47 = vadd.f32 %v857_v4, %v178_v39  ;;  %v180_v48 = vmul.f32 %v852_v1, %v544_v40  ;;  %v548_v49 = vunpack.c.l.bf16 %v779_v36 }
  0x28   :  { %806 = vst [vmem:[%s1179_s3 + $0x70] sm:$0xff] %v675_v42   ;;  %v247_v50 = vadd.f32 %v857_v4, %v179_v44  ;;  %v181_v51 = vmul.f32 %v852_v1, %v545_v45  ;;  %v549_v52 = vunpack.c.h.bf16 %v779_v36  ;;  %v552_v53 = vunpack.c.l.bf16 %v780_v41  ;;  %v786_v45 = vld [vmem:[%s1176_s0 + $0xc8] sm:$0xff]  }
  0x29   :  { %v680_v55 = vpack.c.bf16 %v309_v46, %v308_v43  ;;  %v310_v56 = vmax.f32 %v246_v47, 0.0  ;;  %v248_v57 = vadd.f32 %v857_v4, %v180_v48  ;;  %v182_v58 = vmul.f32 %v852_v1, %v548_v49 }
  0x2a   :  { %v311_v59 = vmax.f32 %v247_v50, 0.0  ;;  %v249_v60 = vadd.f32 %v857_v4, %v181_v51  ;;  %v183_v61 = vmul.f32 %v852_v1, %v549_v52  ;;  %v553_v62 = vunpack.c.h.bf16 %v780_v41 }
  0x2b   :  { %807 = vst [vmem:[%s1179_s3 + $0x78] sm:$0xff] %v680_v55   ;;  %v312_v63 = vmax.f32 %v248_v57, 0.0  ;;  %v250_v0 = vadd.f32 %v857_v4, %v182_v58  ;;  %v184_v2 = vmul.f32 %v852_v1, %v552_v53  ;;  %v556_v3 = vunpack.c.l.bf16 %v781_v54 }
  0x2c   :  { %v685_v6 = vpack.c.bf16 %v311_v59, %v310_v56  ;;  %v313_v7 = vmax.f32 %v249_v60, 0.0  ;;  %v251_v8 = vadd.f32 %v857_v4, %v183_v61  ;;  %v185_v9 = vmul.f32 %v852_v1, %v553_v62 }
  0x2d   :  { %v314_v10 = vmax.f32 %v250_v0, 0.0  ;;  %v252_v11 = vadd.f32 %v857_v4, %v184_v2  ;;  %v557_v12 = vunpack.c.h.bf16 %v781_v54  ;;  %v186_v13 = vmul.f32 %v852_v1, %v556_v3  ;;  %v787_v54 = vld [vmem:[%s1176_s0 + $0xd0] sm:$0xff]  }
  0x2e   :  { %808 = vst [vmem:[%s1179_s3 + $0x80] sm:$0xff] %v685_v6   ;;  %v690_v15 = vpack.c.bf16 %v313_v7, %v312_v63  ;;  %v315_v16 = vmax.f32 %v251_v8, 0.0  ;;  %v253_v17 = vadd.f32 %v857_v4, %v185_v9  ;;  %v560_v18 = vunpack.c.l.bf16 %v782_v5  ;;  %v788_v63 = vld [vmem:[%s1176_s0 + $0xd8] sm:$0xff]  }
  0x2f   :  { %v316_v19 = vmax.f32 %v252_v11, 0.0  ;;  %v187_v20 = vmul.f32 %v852_v1, %v557_v12  ;;  %v254_v21 = vadd.f32 %v857_v4, %v186_v13  ;;  %v561_v22 = vunpack.c.h.bf16 %v782_v5 }
  0x30   :  { %809 = vst [vmem:[%s1179_s3 + $0x88] sm:$0xff] %v690_v15   ;;  %v695_v24 = vpack.c.bf16 %v315_v16, %v314_v10  ;;  %v317_v25 = vmax.f32 %v253_v17, 0.0  ;;  %v188_v26 = vmul.f32 %v852_v1, %v560_v18  ;;  %v564_v27 = vunpack.c.l.bf16 %v783_v14  ;;  %v789_v10 = vld [vmem:[%s1176_s0 + $0xe0] sm:$0xff]  }
  0x31   :  { %v255_v28 = vadd.f32 %v857_v4, %v187_v20  ;;  %v318_v29 = vmax.f32 %v254_v21, 0.0  ;;  %v189_v30 = vmul.f32 %v852_v1, %v561_v22  ;;  %v565_v31 = vunpack.c.h.bf16 %v783_v14 }
  0x32   :  { %810 = vst [vmem:[%s1179_s3 + $0x90] sm:$0xff] %v695_v24   ;;  %v700_v33 = vpack.c.bf16 %v317_v25, %v316_v19  ;;  %v256_v34 = vadd.f32 %v857_v4, %v188_v26  ;;  %v190_v35 = vmul.f32 %v852_v1, %v564_v27  ;;  %v568_v36 = vunpack.c.l.bf16 %v784_v23 }
  0x33   :  { %v319_v37 = vmax.f32 %v255_v28, 0.0  ;;  %v257_v38 = vadd.f32 %v857_v4, %v189_v30  ;;  %v191_v39 = vmul.f32 %v852_v1, %v565_v31  ;;  %v569_v40 = vunpack.c.h.bf16 %v784_v23  ;;  %v790_v23 = vld [vmem:[%s1176_s0 + $0xe8] sm:$0xff]  }
  0x34   :  { %811 = vst [vmem:[%s1179_s3 + $0x98] sm:$0xff] %v700_v33   ;;  %v320_v41 = vmax.f32 %v256_v34, 0.0  ;;  %v258_v42 = vadd.f32 %v857_v4, %v190_v35  ;;  %v192_v43 = vmul.f32 %v852_v1, %v568_v36  ;;  %v572_v44 = vunpack.c.l.bf16 %v785_v32 }
  0x35   :  { %v705_v46 = vpack.c.bf16 %v319_v37, %v318_v29  ;;  %v321_v47 = vmax.f32 %v257_v38, 0.0  ;;  %v259_v48 = vadd.f32 %v857_v4, %v191_v39  ;;  %v193_v49 = vmul.f32 %v852_v1, %v569_v40 }
  0x36   :  { %v322_v50 = vmax.f32 %v258_v42, 0.0  ;;  %v260_v51 = vadd.f32 %v857_v4, %v192_v43  ;;  %v573_v52 = vunpack.c.h.bf16 %v785_v32  ;;  %v194_v53 = vmul.f32 %v852_v1, %v572_v44  ;;  %v791_v32 = vld [vmem:[%s1176_s0 + $0xf0] sm:$0xff]  }
  0x37   :  { %812 = vst [vmem:[%s1179_s3 + $0xa0] sm:$0xff] %v705_v46   ;;  %v710_v55 = vpack.c.bf16 %v321_v47, %v320_v41  ;;  %v323_v56 = vmax.f32 %v259_v48, 0.0  ;;  %v261_v57 = vadd.f32 %v857_v4, %v193_v49  ;;  %v576_v58 = vunpack.c.l.bf16 %v786_v45  ;;  %v792_v41 = vld [vmem:[%s1176_s0 + $0xf8] sm:$0xff]  }
  0x38   :  { %v324_v59 = vmax.f32 %v260_v51, 0.0  ;;  %v195_v60 = vmul.f32 %v852_v1, %v573_v52  ;;  %v262_v61 = vadd.f32 %v857_v4, %v194_v53  ;;  %v577_v62 = vunpack.c.h.bf16 %v786_v45 }
  0x39   :  { %813 = vst [vmem:[%s1179_s3 + $0xa8] sm:$0xff] %v710_v55   ;;  %v715_v0 = vpack.c.bf16 %v323_v56, %v322_v50  ;;  %v325_v2 = vmax.f32 %v261_v57, 0.0  ;;  %v196_v3 = vmul.f32 %v852_v1, %v576_v58  ;;  %v580_v5 = vunpack.c.l.bf16 %v787_v54 }
  0x3a   :  { %v263_v6 = vadd.f32 %v857_v4, %v195_v60  ;;  %v326_v7 = vmax.f32 %v262_v61, 0.0  ;;  %v197_v8 = vmul.f32 %v852_v1, %v577_v62  ;;  %v581_v9 = vunpack.c.h.bf16 %v787_v54 }
  0x3b   :  { %814 = vst [vmem:[%s1179_s3 + $0xb0] sm:$0xff] %v715_v0   ;;  %v720_v11 = vpack.c.bf16 %v325_v2, %v324_v59  ;;  %v264_v12 = vadd.f32 %v857_v4, %v196_v3  ;;  %v198_v13 = vmul.f32 %v852_v1, %v580_v5  ;;  %v584_v14 = vunpack.c.l.bf16 %v788_v63 }
  0x3c   :  { %v327_v15 = vmax.f32 %v263_v6, 0.0  ;;  %v265_v16 = vadd.f32 %v857_v4, %v197_v8  ;;  %v199_v17 = vmul.f32 %v852_v1, %v581_v9  ;;  %v585_v18 = vunpack.c.h.bf16 %v788_v63 }
  0x3d   :  { %815 = vst [vmem:[%s1179_s3 + $0xb8] sm:$0xff] %v720_v11   ;;  %v328_v19 = vmax.f32 %v264_v12, 0.0  ;;  %v266_v20 = vadd.f32 %v857_v4, %v198_v13  ;;  %v200_v21 = vmul.f32 %v852_v1, %v584_v14  ;;  %v588_v22 = vunpack.c.l.bf16 %v789_v10 }
  0x3e   :  { %v725_v24 = vpack.c.bf16 %v327_v15, %v326_v7  ;;  %v329_v25 = vmax.f32 %v265_v16, 0.0  ;;  %v267_v26 = vadd.f32 %v857_v4, %v199_v17  ;;  %v201_v27 = vmul.f32 %v852_v1, %v585_v18 }
  0x3f   :  { %v330_v28 = vmax.f32 %v266_v20, 0.0  ;;  %v268_v29 = vadd.f32 %v857_v4, %v200_v21  ;;  %v589_v30 = vunpack.c.h.bf16 %v789_v10  ;;  %v202_v31 = vmul.f32 %v852_v1, %v588_v22 }
  0x40   :  { %816 = vst [vmem:[%s1179_s3 + $0xc0] sm:$0xff] %v725_v24   ;;  %v730_v33 = vpack.c.bf16 %v329_v25, %v328_v19  ;;  %v331_v34 = vmax.f32 %v267_v26, 0.0  ;;  %v269_v35 = vadd.f32 %v857_v4, %v201_v27  ;;  %v592_v36 = vunpack.c.l.bf16 %v790_v23 }
  0x41   :  { %v332_v37 = vmax.f32 %v268_v29, 0.0  ;;  %v203_v38 = vmul.f32 %v852_v1, %v589_v30  ;;  %v270_v39 = vadd.f32 %v857_v4, %v202_v31  ;;  %v593_v40 = vunpack.c.h.bf16 %v790_v23 }
  0x42   :  { %817 = vst [vmem:[%s1179_s3 + $0xc8] sm:$0xff] %v730_v33   ;;  %v735_v42 = vpack.c.bf16 %v331_v34, %v330_v28  ;;  %v333_v43 = vmax.f32 %v269_v35, 0.0  ;;  %v204_v44 = vmul.f32 %v852_v1, %v592_v36  ;;  %v596_v45 = vunpack.c.l.bf16 %v791_v32 }
  0x43   :  { %v271_v46 = vadd.f32 %v857_v4, %v203_v38  ;;  %v334_v47 = vmax.f32 %v270_v39, 0.0  ;;  %v205_v48 = vmul.f32 %v852_v1, %v593_v40  ;;  %v597_v49 = vunpack.c.h.bf16 %v791_v32 }
  0x44   :  { %818 = vst [vmem:[%s1179_s3 + $0xd0] sm:$0xff] %v735_v42   ;;  %v740_v50 = vpack.c.bf16 %v333_v43, %v332_v37  ;;  %v272_v51 = vadd.f32 %v857_v4, %v204_v44  ;;  %v206_v52 = vmul.f32 %v852_v1, %v596_v45  ;;  %v600_v53 = vunpack.c.l.bf16 %v792_v41 }
  0x45   :  { %v335_v54 = vmax.f32 %v271_v46, 0.0  ;;  %v273_v55 = vadd.f32 %v857_v4, %v205_v48  ;;  %v207_v56 = vmul.f32 %v852_v1, %v597_v49  ;;  %v601_v57 = vunpack.c.h.bf16 %v792_v41 }
  0x46   :  { %819 = vst [vmem:[%s1179_s3 + $0xd8] sm:$0xff] %v740_v50   ;;  %v336_v58 = vmax.f32 %v272_v51, 0.0  ;;  %v274_v59 = vadd.f32 %v857_v4, %v206_v52  ;;  %v208_v60 = vmul.f32 %v852_v1, %v600_v53 }
  0x47   :  { %v745_v61 = vpack.c.bf16 %v335_v54, %v334_v47  ;;  %v337_v62 = vmax.f32 %v273_v55, 0.0  ;;  %v275_v63 = vadd.f32 %v857_v4, %v207_v56  ;;  %v209_v0 = vmul.f32 %v852_v1, %v601_v57 }
  0x48   :  { %v338_v2 = vmax.f32 %v274_v59, 0.0  ;;  %v276_v3 = vadd.f32 %v857_v4, %v208_v60 }
  0x49   :  { %820 = vst [vmem:[%s1179_s3 + $0xe0] sm:$0xff] %v745_v61   ;;  %v750_v5 = vpack.c.bf16 %v337_v62, %v336_v58  ;;  %v339_v6 = vmax.f32 %v275_v63, 0.0  ;;  %v277_v7 = vadd.f32 %v857_v4, %v209_v0 }
  0x4a   :  { %v340_v8 = vmax.f32 %v276_v3, 0.0 }
  0x4b   :  { %821 = vst [vmem:[%s1179_s3 + $0xe8] sm:$0xff] %v750_v5   ;;  %v755_v9 = vpack.c.bf16 %v339_v6, %v338_v2  ;;  %v341_v10 = vmax.f32 %v277_v7, 0.0 }
  0x4d   :  { %822 = vst [vmem:[%s1179_s3 + $0xf0] sm:$0xff] %v755_v9   ;;  %v760_v1 = vpack.c.bf16 %v341_v10, %v340_v8 }
  0x4f   :  { %823 = vst [vmem:[%s1179_s3 + $0xf8] sm:$0xff] %v760_v1  }

// kernel: _lambda_.19
= control target key start
LH: loop header
LB: loop body
LE: loop exit
PB: predicated region body
PF: predicated region fallthrough
CT: control target
= control target key end

     0   :  { %9 = vsyncpa [#allocation4], 0  ;;  %s1394_s12 = smov 0   ;;  %s1396_s13 = smov 0   ;;  %s1596_s0 = inlined_call_operand.vmem [shape: bf16[512,128], index: 0, kind: input, shape index: {}]   ;;  %s1597_s1 = inlined_call_operand.hbm [shape: bf16[128,128], index: 1, kind: input, shape index: {}]   ;;  %s1598_s2 = inlined_call_operand.vmem [shape: bf16[512,128], index: 2, kind: output, shape index: {0}]   ;;  %s1599_s3 = inlined_call_operand.vmem [shape: f32[16,128], index: 3, kind: output, shape index: {1}]  }
   0x1   :  { %s1398_s14 = smov 0  }
   0x2 LB: > { %s1023_s15 = sadd.s32 4294967295, %s1369_s14   ;;  %s34_s16 = sadd.s32 1, %s1365_s13  ;;  %s1369_s14 = sphi %s1398_s14, %s15_s14   ;;  %s1365_s13 = sphi %s1396_s13, %s1601_s13   ;;  %s1361_s12 = sphi %s1394_s12, %s1600_s12  }
   0x3   : > { %p36_p0 = scmp.ge.s32.totalorder %s34_s16, 2  ;;  %p1025_p1 = scmp.ge.s32.totalorder %s1369_s14, 1 }
   0x4   : > { %p151_p2 = scmp.lt.s32.totalorder %s1369_s14, 3  ;;  %p1284_p4 = scmp.eq.s32.totalorder %s1023_s15, 0 }
   0x5   : > { %s1603_s16 = smov (%p36_p0, %s34_s16), 0  ;;  %s166_s19 = sshll.u32 %s1597_s1, 4  ;;  %s167_s19 = int_to_ptr.hbm [resolvable:$true] %s166_s19 }
   0x6   : > { %p152_p3 = pnand %p1025_p1, %p151_p2  ;;  %s1371_s20 = smov [#allocation3]  }
   0x7   : > { %s168_s21 = sshll.u32 %s1371_s20, 4  ;;  %s1372_s22 = smov 64   ;;  %s169_s21 = int_to_ptr.vmem [resolvable:$true] %s168_s21 }
   0x8   : > { %p1280_p5 = pneg %p152_p3  ;;  %s1373_s23 = smov 4  }
   0x9   : > { %196 = sbr.rel (%p152_p3) target bundleno = 296 (0x128), region = 28 }
   0xa   : > { %p1281_p6 = pnand %p1284_p4, %p1280_p5 }
   0xc   : > { %1283 = dma.hbm_to_vmem [thread:$0]  (!%p1281_p6), %s167_s19, 1024, %s169_s21, [#allocation4], %s1372_s22, %s1372_s22, %s1373_s23  }
   0xe   : > { %1356 = dma.done.wait (%p1284_p4), [#allocation4], 1024  }
   0xf   : > { %1358 = vsyncadd (%p1284_p4), [#allocation4], 4294966272  ;;  %v1156_v0 = vld [vmem:[#allocation3 + $0x38] sm:$0xff]  ;;  %v1155_v1 = vld [vmem:[#allocation3 + $0x30] sm:$0xff]  ;;  %s1030_s24 = sshll.u32 %s1361_s12, 5  ;;  %p253_p8 = scmp.lt.s32.totalorder %s1361_s12, 1 }
  0x10   : > { %520 = vmatpush.bf16.msra.mxu0 %v1156_v0  ;;  %1252 = vmatpush.bf16.msra.mxu1 %v1156_v0  ;;  %v1154_v2 = vld [vmem:[#allocation3 + $0x28] sm:$0xff]  ;;  %v1153_v3 = vld [vmem:[#allocation3 + $0x20] sm:$0xff]  ;;  %v1152_v4 = vld [vmem:[#allocation3 + $0x18] sm:$0xff]  ;;  %p235_p7 = scmp.lt.s32.totalorder %s1030_s24, 63 }
  0x11   : > { %1253 = vmatpush.bf16.msra.mxu2 %v1156_v0  ;;  %1254 = vmatpush.bf16.msra.mxu3 %v1156_v0  ;;  %v1151_v5 = vld [vmem:[#allocation3 + $0x10] sm:$0xff]  ;;  %v1150_v6 = vld [vmem:[#allocation3 + $0x8] sm:$0xff]  ;;  %v1149_v7 = vld [vmem:[#allocation3] sm:$0xff]  ;;  %s1607_s12 = smov (!%p253_p8, %s1361_s12), 1 }
  0x12   : > { %s1605_s24 = smov (!%p235_p7, %s1030_s24), 63  ;;  %s1034_s5 = sshll.u32 %s1607_s12, 3 }
  0x13   : > { %s1031_s25 = sshll.u32 %s1605_s24, 2  ;;  %s259_s8 = scalar_lea.vmem %s1599_s3, %s1034_s5 }
  0x14   : > { %521 = vmatpush.bf16.msra.mxu0 %v1155_v1  ;;  %1255 = vmatpush.bf16.msra.mxu1 %v1155_v1  ;;  %s1427_s28 = scalar_lea.vmem %s1596_s0, %s1031_s25  ;;  %s1454_s4 = scalar_lea.vmem %s1598_s2, %s1031_s25 }
  0x15   : > { %1256 = vmatpush.bf16.msra.mxu2 %v1155_v1  ;;  %1257 = vmatpush.bf16.msra.mxu3 %v1155_v1  ;;  %v1133_v8 = vld [vmem:[%s1427_s28] sm:$0xff]  ;;  %v1134_v12 = vld [vmem:[%s1427_s28 + $0x8] sm:$0xff]  ;;  %v1135_v16 = vld [vmem:[%s1427_s28 + $0x10] sm:$0xff] }
  0x16   : > { %v1137_v9 = vld [vmem:[%s1427_s28 + $0x20] sm:$0xff]  ;;  %v1138_v13 = vld [vmem:[%s1427_s28 + $0x28] sm:$0xff]  ;;  %v1139_v17 = vld [vmem:[%s1427_s28 + $0x30] sm:$0xff] }
  0x17   : > { %v1141_v10 = vld [vmem:[%s1427_s28 + $0x40] sm:$0xff]  ;;  %v1142_v14 = vld [vmem:[%s1427_s28 + $0x48] sm:$0xff]  ;;  %v1143_v18 = vld [vmem:[%s1427_s28 + $0x50] sm:$0xff] }
  0x18   : > { %522 = vmatpush.bf16.msra.mxu0 %v1154_v2  ;;  %1258 = vmatpush.bf16.msra.mxu1 %v1154_v2  ;;  %v1145_v11 = vld [vmem:[%s1427_s28 + $0x60] sm:$0xff]  ;;  %v1146_v15 = vld [vmem:[%s1427_s28 + $0x68] sm:$0xff]  ;;  %v1147_v19 = vld [vmem:[%s1427_s28 + $0x70] sm:$0xff] }
  0x19   : > { %1259 = vmatpush.bf16.msra.mxu2 %v1154_v2  ;;  %1260 = vmatpush.bf16.msra.mxu3 %v1154_v2  ;;  %v1136_v20 = vld [vmem:[%s1427_s28 + $0x18] sm:$0xff] }
  0x1a   : > { %v1140_v21 = vld [vmem:[%s1427_s28 + $0x38] sm:$0xff] }
  0x1b   : > { %v1144_v22 = vld [vmem:[%s1427_s28 + $0x58] sm:$0xff] }
  0x1c   : > { %523 = vmatpush.bf16.msra.mxu0 %v1153_v3  ;;  %1261 = vmatpush.bf16.msra.mxu1 %v1153_v3  ;;  %v1148_v23 = vld [vmem:[%s1427_s28 + $0x78] sm:$0xff] }
  0x1d   : > { %1262 = vmatpush.bf16.msra.mxu2 %v1153_v3  ;;  %1263 = vmatpush.bf16.msra.mxu3 %v1153_v3 }
  0x20   : > { %524 = vmatpush.bf16.msra.mxu0 %v1152_v4  ;;  %1264 = vmatpush.bf16.msra.mxu1 %v1152_v4 }
  0x21   : > { %1265 = vmatpush.bf16.msra.mxu2 %v1152_v4  ;;  %1266 = vmatpush.bf16.msra.mxu3 %v1152_v4 }
  0x24   : > { %525 = vmatpush.bf16.msra.mxu0 %v1151_v5  ;;  %1267 = vmatpush.bf16.msra.mxu1 %v1151_v5 }
  0x25   : > { %1268 = vmatpush.bf16.msra.mxu2 %v1151_v5  ;;  %1269 = vmatpush.bf16.msra.mxu3 %v1151_v5 }
  0x28   : > { %526 = vmatpush.bf16.msra.mxu0 %v1150_v6  ;;  %1270 = vmatpush.bf16.msra.mxu1 %v1150_v6 }
  0x29   : > { %1271 = vmatpush.bf16.msra.mxu2 %v1150_v6  ;;  %1272 = vmatpush.bf16.msra.mxu3 %v1150_v6 }
  0x2c   : > { %527 = vmatpush.bf16.msra.mxu0 %v1149_v7  ;;  %1273 = vmatpush.bf16.msra.mxu1 %v1149_v7 }
  0x2d   : > { %1274 = vmatpush.bf16.msra.mxu2 %v1149_v7  ;;  %1275 = vmatpush.bf16.msra.mxu3 %v1149_v7 }
  0x2f   : > { %528 = vmatmul.bf16.vlgmr.msra.gmra.mxu0 %v1133_v8  ;;  %548 = vmatmul.bf16.vlgmr.msra.gmra.mxu1 %v1137_v9 }
  0x30   : > { %568 = vmatmul.bf16.vlgmr.msra.gmra.mxu2 %v1141_v10  ;;  %588 = vmatmul.bf16.vlgmr.msra.gmra.mxu3 %v1145_v11 }
  0x3f   : > { %533 = vmatmul.bf16.gmra.mxu0 %v1134_v12  ;;  %553 = vmatmul.bf16.gmra.mxu1 %v1138_v13 }
  0x40   : > { %573 = vmatmul.bf16.gmra.mxu2 %v1142_v14  ;;  %593 = vmatmul.bf16.gmra.mxu3 %v1146_v15 }
  0x4f   : > { %538 = vmatmul.bf16.gmra.mxu0 %v1135_v16  ;;  %558 = vmatmul.bf16.gmra.mxu1 %v1139_v17 }
  0x50   : > { %578 = vmatmul.bf16.gmra.mxu2 %v1143_v18  ;;  %598 = vmatmul.bf16.gmra.mxu3 %v1147_v19 }
  0x5f   : > { %543 = vmatmul.bf16.gmra.mxu0 %v1136_v20  ;;  %563 = vmatmul.bf16.gmra.mxu1 %v1140_v21 }
  0x60   : > { %583 = vmatmul.bf16.gmra.mxu2 %v1144_v22  ;;  %603 = vmatmul.bf16.gmra.mxu3 %v1148_v23 }
  0xac   : > { %v529_v24 = vpop.f32.mrf.mxu0  ;;  %v1445_v25 = vpop.f32.mrf.mxu1 }
  0xad   : > { %v809_v57 = vmul.f32 %v529_v24, %v529_v24 }
  0xb3   : > { %v1447_v26 = vpop.f32.mrf.mxu2  ;;  %v1460_v31 = vpop.f32.mrf.mxu3 }
  0xb4   : > { %v531_v27 = vpop.f32.mrf.mxu0  ;;  %v1456_v28 = vpop.f32.mrf.mxu1 }
  0xb5   : > { %v1160_v29 = vpack.c.bf16 %v531_v27, %v529_v24  ;;  %v1180_v30 = vpack.c.bf16 %v1456_v28, %v1445_v25  ;;  %v810_v56 = vmul.f32 %v531_v27, %v531_v27  ;;  %v772_v59 = vadd.f32 %v531_v27, %v529_v24 }
  0xb6   : > { %v817_v27 = vmul.f32 %v1445_v25, %v1445_v25 }
  0xb7   : > { %1161 = vst [vmem:[%s1454_s4] sm:$0xff] %v1160_v29   ;;  %v841_v60 = vadd.f32 %v810_v56, %v809_v57 }
  0xb8   : > { %1240 = vst [vmem:[%s1454_s4 + $0x20] sm:$0xff] %v1180_v30  }
  0xbb   : > { %v1464_v32 = vpop.f32.mrf.mxu2  ;;  %v1470_v36 = vpop.f32.mrf.mxu3 }
  0xbc   : > { %v534_v33 = vpop.f32.mrf.mxu0  ;;  %v1466_v34 = vpop.f32.mrf.mxu1  ;;  %v1200_v35 = vpack.c.bf16 %v1464_v32, %v1447_v26  ;;  %v1220_v37 = vpack.c.bf16 %v1470_v36, %v1460_v31 }
  0xbd   : > { %v811_v58 = vmul.f32 %v534_v33, %v534_v33  ;;  %v773_v62 = vadd.f32 %v772_v59, %v534_v33 }
  0xbe   : > { %1244 = vst [vmem:[%s1454_s4 + $0x40] sm:$0xff] %v1200_v35  }
  0xbf   : > { %1248 = vst [vmem:[%s1454_s4 + $0x60] sm:$0xff] %v1220_v37   ;;  %v842_v0 = vadd.f32 %v841_v60, %v811_v58 }
  0xc3   : > { %v1476_v38 = vpop.f32.mrf.mxu2  ;;  %v1482_v43 = vpop.f32.mrf.mxu3 }
  0xc4   : > { %v536_v39 = vpop.f32.mrf.mxu0  ;;  %v1478_v40 = vpop.f32.mrf.mxu1 }
  0xc5   : > { %v1165_v41 = vpack.c.bf16 %v536_v39, %v534_v33  ;;  %v1185_v42 = vpack.c.bf16 %v1478_v40, %v1466_v34  ;;  %v812_v61 = vmul.f32 %v536_v39, %v536_v39  ;;  %v774_v5 = vadd.f32 %v773_v62, %v536_v39 }
  0xc6   : > { %v818_v33 = vmul.f32 %v1456_v28, %v1456_v28  ;;  %v819_v39 = vmul.f32 %v1466_v34, %v1466_v34 }
  0xc7   : > { %1237 = vst [vmem:[%s1454_s4 + $0x8] sm:$0xff] %v1165_v41   ;;  %v843_v7 = vadd.f32 %v842_v0, %v812_v61 }
  0xc8   : > { %1241 = vst [vmem:[%s1454_s4 + $0x28] sm:$0xff] %v1185_v42  }
  0xcb   : > { %v1486_v44 = vpop.f32.mrf.mxu2  ;;  %v1492_v48 = vpop.f32.mrf.mxu3 }
  0xcc   : > { %v539_v45 = vpop.f32.mrf.mxu0  ;;  %v1488_v46 = vpop.f32.mrf.mxu1  ;;  %v1205_v47 = vpack.c.bf16 %v1486_v44, %v1476_v38  ;;  %v1225_v49 = vpack.c.bf16 %v1492_v48, %v1482_v43 }
  0xcd   : > { %v813_v1 = vmul.f32 %v539_v45, %v539_v45  ;;  %v775_v10 = vadd.f32 %v774_v5, %v539_v45  ;;  %v826_v5 = vmul.f32 %v1464_v32, %v1464_v32 }
  0xce   : > { %1245 = vst [vmem:[%s1454_s4 + $0x48] sm:$0xff] %v1205_v47  }
  0xcf   : > { %1249 = vst [vmem:[%s1454_s4 + $0x68] sm:$0xff] %v1225_v49   ;;  %v844_v11 = vadd.f32 %v843_v7, %v813_v1 }
  0xd3   : > { %v1498_v50 = vpop.f32.mrf.mxu2  ;;  %v1504_v55 = vpop.f32.mrf.mxu3 }
  0xd4   : > { %v541_v51 = vpop.f32.mrf.mxu0  ;;  %v1500_v52 = vpop.f32.mrf.mxu1 }
  0xd5   : > { %v1170_v53 = vpack.c.bf16 %v541_v51, %v539_v45  ;;  %v1190_v54 = vpack.c.bf16 %v1500_v52, %v1488_v46  ;;  %v814_v8 = vmul.f32 %v541_v51, %v541_v51  ;;  %v776_v13 = vadd.f32 %v775_v10, %v541_v51 }
  0xd6   : > { %v828_v10 = vmul.f32 %v1486_v44, %v1486_v44 }
  0xd7   : > { %1238 = vst [vmem:[%s1454_s4 + $0x10] sm:$0xff] %v1170_v53   ;;  %v845_v14 = vadd.f32 %v844_v11, %v814_v8 }
  0xd8   : > { %1242 = vst [vmem:[%s1454_s4 + $0x30] sm:$0xff] %v1190_v54   ;;  %v821_v54 = vmul.f32 %v1488_v46, %v1488_v46 }
  0xdb   : > { %v1508_v63 = vpop.f32.mrf.mxu2  ;;  %v1512_v6 = vpop.f32.mrf.mxu3 }
  0xdc   : > { %v544_v2 = vpop.f32.mrf.mxu0  ;;  %v564_v3 = vpop.f32.mrf.mxu1  ;;  %v1210_v4 = vpack.c.bf16 %v1508_v63, %v1498_v50  ;;  %v1230_v9 = vpack.c.bf16 %v1512_v6, %v1504_v55 }
  0xdd   : > { %v815_v12 = vmul.f32 %v544_v2, %v544_v2  ;;  %v777_v15 = vadd.f32 %v776_v13, %v544_v2  ;;  %v823_v61 = vmul.f32 %v564_v3, %v564_v3 }
  0xde   : > { %1246 = vst [vmem:[%s1454_s4 + $0x50] sm:$0xff] %v1210_v4  }
  0xdf   : > { %1250 = vst [vmem:[%s1454_s4 + $0x70] sm:$0xff] %v1230_v9   ;;  %v846_v17 = vadd.f32 %v845_v14, %v815_v12 }
  0xe3   : > { %v584_v16 = vpop.f32.mrf.mxu2  ;;  %v1518_v24 = vpop.f32.mrf.mxu3 }
  0xe4   : > { %v546_v18 = vpop.f32.mrf.mxu0  ;;  %v566_v19 = vpop.f32.mrf.mxu1 }
  0xe5   : > { %v1175_v20 = vpack.c.bf16 %v546_v18, %v544_v2  ;;  %v778_v21 = vadd.f32 %v777_v15, %v546_v18  ;;  %v816_v22 = vmul.f32 %v546_v18, %v546_v18  ;;  %v1195_v23 = vpack.c.bf16 %v566_v19, %v564_v3 }
  0xe6   : > { %v824_v1 = vmul.f32 %v566_v19, %v566_v19  ;;  %v825_v2 = vmul.f32 %v1447_v26, %v1447_v26  ;;  %v830_v15 = vmul.f32 %v1508_v63, %v1508_v63 }
  0xe7   : > { %1239 = vst [vmem:[%s1454_s4 + $0x18] sm:$0xff] %v1175_v20   ;;  %v779_v29 = vadd.f32 %v778_v21, %v1445_v25  ;;  %v847_v30 = vadd.f32 %v846_v17, %v816_v22  ;;  %v820_v25 = vmul.f32 %v1478_v40, %v1478_v40 }
  0xe8   : > { %1243 = vst [vmem:[%s1454_s4 + $0x38] sm:$0xff] %v1195_v23  }
  0xe9   : > { %v780_v35 = vadd.f32 %v779_v29, %v1456_v28  ;;  %v848_v37 = vadd.f32 %v847_v30, %v817_v27 }
  0xeb   : > { %v781_v41 = vadd.f32 %v780_v35, %v1466_v34  ;;  %v849_v42 = vadd.f32 %v848_v37, %v818_v33  ;;  %v586_v45 = vpop.f32.mrf.mxu2  ;;  %v606_v53 = vpop.f32.mrf.mxu3  ;;  %v822_v34 = vmul.f32 %v1500_v52, %v1500_v52  ;;  %v836_v35 = vmul.f32 %v1492_v48, %v1492_v48 }
  0xec   : > { %v1215_v47 = vpack.c.bf16 %v586_v45, %v584_v16  ;;  %v1235_v28 = vpack.c.bf16 %v606_v53, %v1518_v24  ;;  %v832_v22 = vmul.f32 %v586_v45, %v586_v45 }
  0xed   : > { %v850_v49 = vadd.f32 %v849_v42, %v819_v39  ;;  %v782_v51 = vadd.f32 %v781_v41, %v1478_v40  ;;  %v837_v39 = vmul.f32 %v1504_v55, %v1504_v55 }
  0xee   : > { %1247 = vst [vmem:[%s1454_s4 + $0x58] sm:$0xff] %v1215_v47  }
  0xef   : > { %v783_v56 = vadd.f32 %v782_v51, %v1488_v46  ;;  %v851_v57 = vadd.f32 %v850_v49, %v820_v25  ;;  %1251 = vst [vmem:[%s1454_s4 + $0x78] sm:$0xff] %v1235_v28   ;;  %v839_v49 = vmul.f32 %v1518_v24, %v1518_v24  ;;  %v840_v28 = vmul.f32 %v606_v53, %v606_v53 }
  0xf1   : > { %v784_v58 = vadd.f32 %v783_v56, %v1500_v52  ;;  %v852_v59 = vadd.f32 %v851_v57, %v821_v54  ;;  %v827_v52 = vmul.f32 %v1476_v38, %v1476_v38 }
  0xf3   : > { %v785_v60 = vadd.f32 %v784_v58, %v564_v3  ;;  %v853_v40 = vadd.f32 %v852_v59, %v822_v34  ;;  %v878_v34 = vlaneseq }
  0xf5   : > { %v854_v62 = vadd.f32 %v853_v40, %v823_v61  ;;  %v786_v0 = vadd.f32 %v785_v60, %v566_v19  ;;  %v831_v19 = vmul.f32 %v584_v16, %v584_v16  ;;  %v879_v61 = vshrl.u32 %v878_v34, 7 }
  0xf7   : > { %v787_v4 = vadd.f32 %v786_v0, %v1447_v26  ;;  %v855_v46 = vadd.f32 %v854_v62, %v824_v1  ;;  %v829_v26 = vmul.f32 %v1498_v50, %v1498_v50  ;;  %vm881_vm0 = vcmp.eq.s32.totalorder %v879_v61, 1 }
  0xf8   : > { %vm880_vm1 = vcmp.eq.s32.totalorder %v879_v61, 0 }
  0xf9   : > { %v788_v7 = vadd.f32 %v787_v4, %v1464_v32  ;;  %v856_v8 = vadd.f32 %v855_v46, %v825_v2 }
  0xfb   : > { %v789_v3 = vadd.f32 %v788_v7, %v1476_v38  ;;  %v857_v9 = vadd.f32 %v856_v8, %v826_v5 }
  0xfd   : > { %v858_v11 = vadd.f32 %v857_v9, %v827_v52  ;;  %v790_v12 = vadd.f32 %v789_v3, %v1486_v44  ;;  %v833_v44 = vmul.f32 %v1460_v31, %v1460_v31 }
  0xff   : > { %v791_v13 = vadd.f32 %v790_v12, %v1498_v50  ;;  %v859_v14 = vadd.f32 %v858_v11, %v828_v10  ;;  %v834_v50 = vmul.f32 %v1470_v36, %v1470_v36 }
 0x101   : > { %v792_v32 = vadd.f32 %v791_v13, %v1508_v63  ;;  %v860_v17 = vadd.f32 %v859_v14, %v829_v26  ;;  %v835_v63 = vmul.f32 %v1482_v43, %v1482_v43 }
 0x103   : > { %v861_v38 = vadd.f32 %v860_v17, %v830_v15  ;;  %v793_v18 = vadd.f32 %v792_v32, %v584_v16 }
 0x105   : > { %v862_v20 = vadd.f32 %v861_v38, %v831_v19  ;;  %v794_v21 = vadd.f32 %v793_v18, %v586_v45  ;;  %v838_v45 = vmul.f32 %v1512_v6, %v1512_v6 }
 0x107   : > { %v795_v23 = vadd.f32 %v794_v21, %v1460_v31  ;;  %v863_v27 = vadd.f32 %v862_v20, %v832_v22 }
 0x109   : > { %v796_v29 = vadd.f32 %v795_v23, %v1470_v36  ;;  %v864_v30 = vadd.f32 %v863_v27, %v833_v44 }
 0x10b   : > { %v797_v16 = vadd.f32 %v796_v29, %v1482_v43  ;;  %v865_v33 = vadd.f32 %v864_v30, %v834_v50 }
 0x10d   : > { %v866_v37 = vadd.f32 %v865_v33, %v835_v63  ;;  %v798_v31 = vadd.f32 %v797_v16, %v1492_v48 }
 0x10f   : > { %v799_v41 = vadd.f32 %v798_v31, %v1504_v55  ;;  %v867_v36 = vadd.f32 %v866_v37, %v836_v35 }
 0x111   : > { %v800_v42 = vadd.f32 %v799_v41, %v1512_v6  ;;  %v868_v43 = vadd.f32 %v867_v36, %v837_v39 }
 0x113   : > { %v869_v47 = vadd.f32 %v868_v43, %v838_v45  ;;  %v801_v25 = vadd.f32 %v800_v42, %v1518_v24 }
 0x115   : > { %v870_v48 = vadd.f32 %v869_v47, %v839_v49  ;;  %v802_v51 = vadd.f32 %v801_v25, %v606_v53 }
 0x117   : > { %v803_v54 = vrot.slane %v802_v51, 4  ;;  %v871_v56 = vadd.f32 %v870_v48, %v840_v28 }
 0x119   : > { %v804_v55 = vadd.f32 %v803_v54, %v802_v51  ;;  %v872_v57 = vrot.slane %v871_v56, 4 }
 0x11b   : > { %v805_v58 = vrot.slane %v804_v55, 2  ;;  %v873_v59 = vadd.f32 %v872_v57, %v871_v56 }
 0x11d   : > { %v806_v6 = vadd.f32 %v805_v58, %v804_v55  ;;  %v874_v60 = vrot.slane %v873_v59, 2 }
 0x11f   : > { %v875_v40 = vadd.f32 %v874_v60, %v873_v59  ;;  %v807_v62 = vrot.slane %v806_v6, 1 }
 0x121   : > { %v876_v0 = vrot.slane %v875_v40, 1  ;;  %v808_v53 = vadd.f32 %v807_v62, %v806_v6 }
 0x123   : > { %v877_v24 = vadd.f32 %v876_v0, %v875_v40 }
 0x125   : > { %v882_v1 = vsel %vm881_vm0, %v877_v24, 0.0 }
 0x126   : > { %v883_v2 = vsel %vm880_vm1, %v808_v53, %v882_v1 }
 0x127   : > { %884 = vst [vmem:[%s259_s8] sm:$0xff] %v883_v2 }
 0x128 PF: > { %s15_s14 = sadd.s32 1, %s1369_s14   ;;  %s1600_s12 = smov %s1365_s13 }
 0x129   : > { %p12_p9 = scmp.ge.s32.totalorder %s15_s14, 4   ;;  %s1601_s13 = smov %s1603_s16 }
 0x12b   :  { %14 = sbr.rel (!%p12_p9) target bundleno = 2 (0x2), region = 84 }
 0x130   :  { %933 = vsyncpa [#allocation4], 1 }
 0x131   :  { %935 = vsyncpa [#allocation4 + $0x1], 1 }

// kernel: _lambda_.24
= control target key start
LH: loop header
LB: loop body
LE: loop exit
PB: predicated region body
PF: predicated region fallthrough
CT: control target
= control target key end

     0   :  { %s1631_s0 = inlined_call_operand.vmem [shape: bf16[512,128], index: 0, kind: input, shape index: {}]   ;;  %s1632_s1 = inlined_call_operand.vmem [shape: f32[1,128], index: 1, kind: input, shape index: {}]   ;;  %s1633_s2 = inlined_call_operand.vmem [shape: f32[1,128], index: 2, kind: input, shape index: {}]   ;;  %s1634_s3 = inlined_call_operand.vmem [shape: bf16[512,128], index: 3, kind: input, shape index: {}]   ;;  %s1635_s4 = inlined_call_operand.vmem [shape: bf16[512,128], index: 4, kind: output, shape index: {}]  }
   0x1   :  { %v670_v0 = vld [vmem:[%s1631_s0] sm:$0xff]   ;;  %v1085_v8 = vld [vmem:[%s1631_s0 + $0x8] sm:$0xff]   ;;  %v1086_v10 = vld [vmem:[%s1631_s0 + $0x10] sm:$0xff]  }
   0x2   :  { %v1211_v1 = vld [vmem:[%s1632_s1] ss:$0 sm:$0xff]  ;;  %v671_v2 = vunpack.c.l.bf16 %v670_v0  ;;  %v672_v3 = vunpack.c.h.bf16 %v670_v0  ;;  %v1116_v9 = vld [vmem:[%s1634_s3 + $0x8] sm:$0xff]   ;;  %v675_v13 = vunpack.c.l.bf16 %v1085_v8  ;;  %v676_v14 = vunpack.c.h.bf16 %v1085_v8  ;;  %v1117_v15 = vld [vmem:[%s1634_s3 + $0x10] sm:$0xff]  }
   0x3   :  { %v1216_v4 = vld [vmem:[%s1633_s2] ss:$0 sm:$0xff]  ;;  %v803_v16 = vunpack.c.l.bf16 %v1116_v9  ;;  %v804_v17 = vunpack.c.h.bf16 %v1116_v9  ;;  %v679_v18 = vunpack.c.l.bf16 %v1086_v10  ;;  %v680_v19 = vunpack.c.h.bf16 %v1086_v10  ;;  %v1087_v24 = vld [vmem:[%s1631_s0 + $0x18] sm:$0xff]   ;;  %v1089_v56 = vld [vmem:[%s1631_s0 + $0x28] sm:$0xff]  }
   0x4   :  { %v798_v5 = vld [vmem:[%s1634_s3] sm:$0xff]   ;;  %v149_v11 = vmul.f32 %v1211_v1, %v671_v2  ;;  %v150_v12 = vmul.f32 %v1211_v1, %v672_v3  ;;  %v151_v22 = vmul.f32 %v1211_v1, %v675_v13  ;;  %v152_v23 = vmul.f32 %v1211_v1, %v676_v14  ;;  %v1118_v37 = vld [vmem:[%s1634_s3 + $0x18] sm:$0xff]   ;;  %v1120_v61 = vld [vmem:[%s1634_s3 + $0x28] sm:$0xff]  }
   0x5   :  { %v799_v6 = vunpack.c.l.bf16 %v798_v5  ;;  %v800_v7 = vunpack.c.h.bf16 %v798_v5  ;;  %v153_v25 = vmul.f32 %v1211_v1, %v679_v18  ;;  %v154_v26 = vmul.f32 %v1211_v1, %v680_v19  ;;  %v1088_v46 = vld [vmem:[%s1631_s0 + $0x20] sm:$0xff]   ;;  %v1090_v8 = vld [vmem:[%s1631_s0 + $0x30] sm:$0xff]  }
   0x6   :  { %v217_v20 = vadd.f32 %v1216_v4, %v149_v11  ;;  %v218_v21 = vadd.f32 %v1216_v4, %v150_v12  ;;  %v807_v27 = vunpack.c.l.bf16 %v1117_v15  ;;  %v808_v28 = vunpack.c.h.bf16 %v1117_v15  ;;  %v1119_v51 = vld [vmem:[%s1634_s3 + $0x20] sm:$0xff]   ;;  %v1121_v9 = vld [vmem:[%s1634_s3 + $0x30] sm:$0xff]  }
   0x7   :  { %v219_v31 = vadd.f32 %v1216_v4, %v151_v22  ;;  %v220_v32 = vadd.f32 %v1216_v4, %v152_v23  ;;  %v221_v33 = vadd.f32 %v1216_v4, %v153_v25  ;;  %v222_v34 = vadd.f32 %v1216_v4, %v154_v26  ;;  %v1091_v22 = vld [vmem:[%s1631_s0 + $0x38] sm:$0xff]  }
   0x8   :  { %v409_v29 = vadd.f32 %v799_v6, %v217_v20  ;;  %v410_v30 = vadd.f32 %v800_v7, %v218_v21  ;;  %v683_v35 = vunpack.c.l.bf16 %v1087_v24  ;;  %v684_v36 = vunpack.c.h.bf16 %v1087_v24 }
   0x9   :  { %v411_v40 = vadd.f32 %v803_v16, %v219_v31  ;;  %v412_v41 = vadd.f32 %v804_v17, %v220_v32  ;;  %v413_v42 = vadd.f32 %v807_v27, %v221_v33  ;;  %v414_v43 = vadd.f32 %v808_v28, %v222_v34  ;;  %v1122_v31 = vld [vmem:[%s1634_s3 + $0x38] sm:$0xff]  }
   0xa   :  { %v473_v38 = vmax.f32 %v409_v29, 0.0  ;;  %v474_v39 = vmax.f32 %v410_v30, 0.0  ;;  %v155_v44 = vmul.f32 %v1211_v1, %v683_v35  ;;  %v156_v45 = vmul.f32 %v1211_v1, %v684_v36 }
   0xb   :  { %v475_v48 = vmax.f32 %v411_v40, 0.0  ;;  %v476_v49 = vmax.f32 %v412_v41, 0.0  ;;  %v811_v50 = vunpack.c.l.bf16 %v1118_v37  ;;  %v477_v52 = vmax.f32 %v413_v42, 0.0  ;;  %v1092_v40 = vld [vmem:[%s1631_s0 + $0x40] sm:$0xff]  }
   0xc   :  { %v928_v47 = vpack.c.bf16 %v474_v39, %v473_v38  ;;  %v478_v53 = vmax.f32 %v414_v43, 0.0  ;;  %v223_v54 = vadd.f32 %v1216_v4, %v155_v44  ;;  %v224_v55 = vadd.f32 %v1216_v4, %v156_v45 }
   0xd   :  { %v933_v57 = vpack.c.bf16 %v476_v49, %v475_v48  ;;  %v812_v58 = vunpack.c.h.bf16 %v1118_v37  ;;  %v687_v59 = vunpack.c.l.bf16 %v1088_v46  ;;  %v688_v60 = vunpack.c.h.bf16 %v1088_v46  ;;  %v1123_v49 = vld [vmem:[%s1634_s3 + $0x40] sm:$0xff]  }
   0xe   :  { %929 = vst [vmem:[%s1635_s4] sm:$0xff] %v928_v47   ;;  %v938_v62 = vpack.c.bf16 %v478_v53, %v477_v52  ;;  %v415_v63 = vadd.f32 %v811_v50, %v223_v54  ;;  %v815_v0 = vunpack.c.l.bf16 %v1119_v51  ;;  %v816_v2 = vunpack.c.h.bf16 %v1119_v51  ;;  %v1093_v54 = vld [vmem:[%s1631_s0 + $0x48] sm:$0xff]  }
   0xf   :  { %1147 = vst [vmem:[%s1635_s4 + $0x8] sm:$0xff] %v933_v57   ;;  %v416_v3 = vadd.f32 %v812_v58, %v224_v55  ;;  %v157_v5 = vmul.f32 %v1211_v1, %v687_v59  ;;  %v158_v6 = vmul.f32 %v1211_v1, %v688_v60  ;;  %v691_v7 = vunpack.c.l.bf16 %v1089_v56 }
  0x10   :  { %1148 = vst [vmem:[%s1635_s4 + $0x10] sm:$0xff] %v938_v62   ;;  %v479_v10 = vmax.f32 %v415_v63, 0.0  ;;  %v692_v11 = vunpack.c.h.bf16 %v1089_v56  ;;  %v819_v12 = vunpack.c.l.bf16 %v1120_v61  ;;  %v820_v13 = vunpack.c.h.bf16 %v1120_v61  ;;  %v1124_v63 = vld [vmem:[%s1634_s3 + $0x48] sm:$0xff]  }
  0x11   :  { %v480_v14 = vmax.f32 %v416_v3, 0.0  ;;  %v225_v15 = vadd.f32 %v1216_v4, %v157_v5  ;;  %v226_v16 = vadd.f32 %v1216_v4, %v158_v6  ;;  %v159_v17 = vmul.f32 %v1211_v1, %v691_v7  ;;  %v1094_v6 = vld [vmem:[%s1631_s0 + $0x50] sm:$0xff]  }
  0x12   :  { %v160_v18 = vmul.f32 %v1211_v1, %v692_v11  ;;  %v695_v19 = vunpack.c.l.bf16 %v1090_v8  ;;  %v696_v20 = vunpack.c.h.bf16 %v1090_v8  ;;  %v823_v21 = vunpack.c.l.bf16 %v1121_v9  ;;  %v1125_v11 = vld [vmem:[%s1634_s3 + $0x50] sm:$0xff]  }
  0x13   :  { %v943_v23 = vpack.c.bf16 %v480_v14, %v479_v10  ;;  %v417_v24 = vadd.f32 %v815_v0, %v225_v15  ;;  %v418_v25 = vadd.f32 %v816_v2, %v226_v16  ;;  %v227_v26 = vadd.f32 %v1216_v4, %v159_v17 }
  0x14   :  { %v228_v27 = vadd.f32 %v1216_v4, %v160_v18  ;;  %v161_v28 = vmul.f32 %v1211_v1, %v695_v19  ;;  %v162_v29 = vmul.f32 %v1211_v1, %v696_v20  ;;  %v824_v30 = vunpack.c.h.bf16 %v1121_v9  ;;  %v1095_v20 = vld [vmem:[%s1631_s0 + $0x58] sm:$0xff]  }
  0x15   :  { %1149 = vst [vmem:[%s1635_s4 + $0x18] sm:$0xff] %v943_v23   ;;  %v481_v32 = vmax.f32 %v417_v24, 0.0  ;;  %v482_v33 = vmax.f32 %v418_v25, 0.0  ;;  %v419_v34 = vadd.f32 %v819_v12, %v227_v26  ;;  %v699_v35 = vunpack.c.l.bf16 %v1091_v22 }
  0x16   :  { %v420_v36 = vadd.f32 %v820_v13, %v228_v27  ;;  %v229_v37 = vadd.f32 %v1216_v4, %v161_v28  ;;  %v230_v38 = vadd.f32 %v1216_v4, %v162_v29  ;;  %v700_v39 = vunpack.c.h.bf16 %v1091_v22  ;;  %v1126_v29 = vld [vmem:[%s1634_s3 + $0x58] sm:$0xff]  }
  0x17   :  { %v948_v41 = vpack.c.bf16 %v482_v33, %v481_v32  ;;  %v483_v42 = vmax.f32 %v419_v34, 0.0  ;;  %v163_v43 = vmul.f32 %v1211_v1, %v699_v35  ;;  %v827_v44 = vunpack.c.l.bf16 %v1122_v31 }
  0x18   :  { %v484_v45 = vmax.f32 %v420_v36, 0.0  ;;  %v421_v46 = vadd.f32 %v823_v21, %v229_v37  ;;  %v422_v47 = vadd.f32 %v824_v30, %v230_v38  ;;  %v164_v48 = vmul.f32 %v1211_v1, %v700_v39  ;;  %v1096_v38 = vld [vmem:[%s1631_s0 + $0x60] sm:$0xff]  }
  0x19   :  { %1150 = vst [vmem:[%s1635_s4 + $0x20] sm:$0xff] %v948_v41   ;;  %v231_v50 = vadd.f32 %v1216_v4, %v163_v43  ;;  %v828_v51 = vunpack.c.h.bf16 %v1122_v31  ;;  %v703_v52 = vunpack.c.l.bf16 %v1092_v40  ;;  %v704_v53 = vunpack.c.h.bf16 %v1092_v40  ;;  %v1127_v43 = vld [vmem:[%s1634_s3 + $0x60] sm:$0xff]  }
  0x1a   :  { %v953_v55 = vpack.c.bf16 %v484_v45, %v483_v42  ;;  %v485_v56 = vmax.f32 %v421_v46, 0.0  ;;  %v486_v57 = vmax.f32 %v422_v47, 0.0  ;;  %v232_v58 = vadd.f32 %v1216_v4, %v164_v48 }
  0x1b   :  { %v423_v59 = vadd.f32 %v827_v44, %v231_v50  ;;  %v165_v60 = vmul.f32 %v1211_v1, %v703_v52  ;;  %v166_v61 = vmul.f32 %v1211_v1, %v704_v53  ;;  %v831_v62 = vunpack.c.l.bf16 %v1123_v49  ;;  %v1097_v52 = vld [vmem:[%s1631_s0 + $0x68] sm:$0xff]  }
  0x1c   :  { %1151 = vst [vmem:[%s1635_s4 + $0x28] sm:$0xff] %v953_v55   ;;  %v958_v0 = vpack.c.bf16 %v486_v57, %v485_v56  ;;  %v424_v2 = vadd.f32 %v828_v51, %v232_v58  ;;  %v832_v3 = vunpack.c.h.bf16 %v1123_v49  ;;  %v707_v5 = vunpack.c.l.bf16 %v1093_v54 }
  0x1d   :  { %v487_v7 = vmax.f32 %v423_v59, 0.0  ;;  %v233_v8 = vadd.f32 %v1216_v4, %v165_v60  ;;  %v234_v9 = vadd.f32 %v1216_v4, %v166_v61  ;;  %v708_v10 = vunpack.c.h.bf16 %v1093_v54  ;;  %v1128_v61 = vld [vmem:[%s1634_s3 + $0x68] sm:$0xff]  }
  0x1e   :  { %1152 = vst [vmem:[%s1635_s4 + $0x30] sm:$0xff] %v958_v0   ;;  %v488_v12 = vmax.f32 %v424_v2, 0.0  ;;  %v167_v13 = vmul.f32 %v1211_v1, %v707_v5  ;;  %v835_v14 = vunpack.c.l.bf16 %v1124_v63  ;;  %v836_v15 = vunpack.c.h.bf16 %v1124_v63 }
  0x1f   :  { %v425_v16 = vadd.f32 %v831_v62, %v233_v8  ;;  %v426_v17 = vadd.f32 %v832_v3, %v234_v9  ;;  %v168_v18 = vmul.f32 %v1211_v1, %v708_v10  ;;  %v711_v19 = vunpack.c.l.bf16 %v1094_v6  ;;  %v1098_v3 = vld [vmem:[%s1631_s0 + $0x70] sm:$0xff]  }
  0x20   :  { %v963_v21 = vpack.c.bf16 %v488_v12, %v487_v7  ;;  %v235_v22 = vadd.f32 %v1216_v4, %v167_v13  ;;  %v712_v23 = vunpack.c.h.bf16 %v1094_v6  ;;  %v839_v24 = vunpack.c.l.bf16 %v1125_v11  ;;  %v1129_v13 = vld [vmem:[%s1634_s3 + $0x70] sm:$0xff]  }
  0x21   :  { %v489_v25 = vmax.f32 %v425_v16, 0.0  ;;  %v490_v26 = vmax.f32 %v426_v17, 0.0  ;;  %v236_v27 = vadd.f32 %v1216_v4, %v168_v18  ;;  %v169_v28 = vmul.f32 %v1211_v1, %v711_v19 }
  0x22   :  { %1153 = vst [vmem:[%s1635_s4 + $0x38] sm:$0xff] %v963_v21   ;;  %v427_v30 = vadd.f32 %v835_v14, %v235_v22  ;;  %v170_v31 = vmul.f32 %v1211_v1, %v712_v23  ;;  %v840_v32 = vunpack.c.h.bf16 %v1125_v11  ;;  %v715_v33 = vunpack.c.l.bf16 %v1095_v20  ;;  %v1099_v22 = vld [vmem:[%s1631_s0 + $0x78] sm:$0xff]  }
  0x23   :  { %v968_v34 = vpack.c.bf16 %v490_v26, %v489_v25  ;;  %v428_v35 = vadd.f32 %v836_v15, %v236_v27  ;;  %v237_v36 = vadd.f32 %v1216_v4, %v169_v28  ;;  %v716_v37 = vunpack.c.h.bf16 %v1095_v20  ;;  %v1130_v27 = vld [vmem:[%s1634_s3 + $0x78] sm:$0xff]  }
  0x24   :  { %v491_v39 = vmax.f32 %v427_v30, 0.0  ;;  %v238_v40 = vadd.f32 %v1216_v4, %v170_v31  ;;  %v171_v41 = vmul.f32 %v1211_v1, %v715_v33  ;;  %v843_v42 = vunpack.c.l.bf16 %v1126_v29 }
  0x25   :  { %1154 = vst [vmem:[%s1635_s4 + $0x40] sm:$0xff] %v968_v34   ;;  %v492_v44 = vmax.f32 %v428_v35, 0.0  ;;  %v429_v45 = vadd.f32 %v839_v24, %v237_v36  ;;  %v172_v46 = vmul.f32 %v1211_v1, %v716_v37  ;;  %v844_v47 = vunpack.c.h.bf16 %v1126_v29  ;;  %v1100_v36 = vld [vmem:[%s1631_s0 + $0x80] sm:$0xff]  }
  0x26   :  { %v430_v48 = vadd.f32 %v840_v32, %v238_v40  ;;  %v239_v49 = vadd.f32 %v1216_v4, %v171_v41  ;;  %v719_v50 = vunpack.c.l.bf16 %v1096_v38  ;;  %v720_v51 = vunpack.c.h.bf16 %v1096_v38  ;;  %v1131_v41 = vld [vmem:[%s1634_s3 + $0x80] sm:$0xff]  }
  0x27   :  { %v973_v53 = vpack.c.bf16 %v492_v44, %v491_v39  ;;  %v493_v54 = vmax.f32 %v429_v45, 0.0  ;;  %v240_v55 = vadd.f32 %v1216_v4, %v172_v46  ;;  %v847_v56 = vunpack.c.l.bf16 %v1127_v43 }
  0x28   :  { %v494_v57 = vmax.f32 %v430_v48, 0.0  ;;  %v431_v58 = vadd.f32 %v843_v42, %v239_v49  ;;  %v173_v59 = vmul.f32 %v1211_v1, %v719_v50  ;;  %v174_v60 = vmul.f32 %v1211_v1, %v720_v51  ;;  %v1101_v50 = vld [vmem:[%s1631_s0 + $0x88] sm:$0xff]  }
  0x29   :  { %1155 = vst [vmem:[%s1635_s4 + $0x48] sm:$0xff] %v973_v53   ;;  %v432_v62 = vadd.f32 %v844_v47, %v240_v55  ;;  %v848_v63 = vunpack.c.h.bf16 %v1127_v43  ;;  %v723_v0 = vunpack.c.l.bf16 %v1097_v52  ;;  %v724_v2 = vunpack.c.h.bf16 %v1097_v52  ;;  %v1132_v55 = vld [vmem:[%s1634_s3 + $0x88] sm:$0xff]  }
  0x2a   :  { %v978_v5 = vpack.c.bf16 %v494_v57, %v493_v54  ;;  %v495_v6 = vmax.f32 %v431_v58, 0.0  ;;  %v241_v7 = vadd.f32 %v1216_v4, %v173_v59  ;;  %v242_v8 = vadd.f32 %v1216_v4, %v174_v60 }
  0x2b   :  { %v496_v9 = vmax.f32 %v432_v62, 0.0  ;;  %v175_v10 = vmul.f32 %v1211_v1, %v723_v0  ;;  %v176_v11 = vmul.f32 %v1211_v1, %v724_v2  ;;  %v851_v12 = vunpack.c.l.bf16 %v1128_v61  ;;  %v1102_v0 = vld [vmem:[%s1631_s0 + $0x90] sm:$0xff]  }
  0x2c   :  { %1156 = vst [vmem:[%s1635_s4 + $0x50] sm:$0xff] %v978_v5   ;;  %v433_v14 = vadd.f32 %v847_v56, %v241_v7  ;;  %v434_v15 = vadd.f32 %v848_v63, %v242_v8  ;;  %v852_v16 = vunpack.c.h.bf16 %v1128_v61  ;;  %v727_v17 = vunpack.c.l.bf16 %v1098_v3 }
  0x2d   :  { %v983_v18 = vpack.c.bf16 %v496_v9, %v495_v6  ;;  %v243_v19 = vadd.f32 %v1216_v4, %v175_v10  ;;  %v244_v20 = vadd.f32 %v1216_v4, %v176_v11  ;;  %v728_v21 = vunpack.c.h.bf16 %v1098_v3  ;;  %v1133_v11 = vld [vmem:[%s1634_s3 + $0x90] sm:$0xff]  }
  0x2e   :  { %v497_v23 = vmax.f32 %v433_v14, 0.0  ;;  %v498_v24 = vmax.f32 %v434_v15, 0.0  ;;  %v177_v25 = vmul.f32 %v1211_v1, %v727_v17  ;;  %v855_v26 = vunpack.c.l.bf16 %v1129_v13 }
  0x2f   :  { %1157 = vst [vmem:[%s1635_s4 + $0x58] sm:$0xff] %v983_v18   ;;  %v435_v28 = vadd.f32 %v851_v12, %v243_v19  ;;  %v436_v29 = vadd.f32 %v852_v16, %v244_v20  ;;  %v178_v30 = vmul.f32 %v1211_v1, %v728_v21  ;;  %v856_v31 = vunpack.c.h.bf16 %v1129_v13  ;;  %v1103_v20 = vld [vmem:[%s1631_s0 + $0x98] sm:$0xff]  }
  0x30   :  { %v988_v32 = vpack.c.bf16 %v498_v24, %v497_v23  ;;  %v245_v33 = vadd.f32 %v1216_v4, %v177_v25  ;;  %v731_v34 = vunpack.c.l.bf16 %v1099_v22  ;;  %v732_v35 = vunpack.c.h.bf16 %v1099_v22  ;;  %v1134_v25 = vld [vmem:[%s1634_s3 + $0x98] sm:$0xff]  }
  0x31   :  { %v499_v37 = vmax.f32 %v435_v28, 0.0  ;;  %v500_v38 = vmax.f32 %v436_v29, 0.0  ;;  %v246_v39 = vadd.f32 %v1216_v4, %v178_v30  ;;  %v859_v40 = vunpack.c.l.bf16 %v1130_v27 }
  0x32   :  { %1158 = vst [vmem:[%s1635_s4 + $0x60] sm:$0xff] %v988_v32   ;;  %v437_v42 = vadd.f32 %v855_v26, %v245_v33  ;;  %v179_v43 = vmul.f32 %v1211_v1, %v731_v34  ;;  %v180_v44 = vmul.f32 %v1211_v1, %v732_v35  ;;  %v860_v45 = vunpack.c.h.bf16 %v1130_v27  ;;  %v1104_v34 = vld [vmem:[%s1631_s0 + $0xa0] sm:$0xff]  }
  0x33   :  { %v993_v46 = vpack.c.bf16 %v500_v38, %v499_v37  ;;  %v438_v47 = vadd.f32 %v856_v31, %v246_v39  ;;  %v735_v48 = vunpack.c.l.bf16 %v1100_v36  ;;  %v736_v49 = vunpack.c.h.bf16 %v1100_v36  ;;  %v1135_v39 = vld [vmem:[%s1634_s3 + $0xa0] sm:$0xff]  }
  0x34   :  { %v501_v51 = vmax.f32 %v437_v42, 0.0  ;;  %v247_v52 = vadd.f32 %v1216_v4, %v179_v43  ;;  %v248_v53 = vadd.f32 %v1216_v4, %v180_v44  ;;  %v863_v54 = vunpack.c.l.bf16 %v1131_v41 }
  0x35   :  { %1159 = vst [vmem:[%s1635_s4 + $0x68] sm:$0xff] %v993_v46   ;;  %v502_v56 = vmax.f32 %v438_v47, 0.0  ;;  %v181_v57 = vmul.f32 %v1211_v1, %v735_v48  ;;  %v182_v58 = vmul.f32 %v1211_v1, %v736_v49  ;;  %v864_v59 = vunpack.c.h.bf16 %v1131_v41  ;;  %v1105_v48 = vld [vmem:[%s1631_s0 + $0xa8] sm:$0xff]  }
  0x36   :  { %v439_v60 = vadd.f32 %v859_v40, %v247_v52  ;;  %v440_v61 = vadd.f32 %v860_v45, %v248_v53  ;;  %v739_v62 = vunpack.c.l.bf16 %v1101_v50  ;;  %v740_v63 = vunpack.c.h.bf16 %v1101_v50  ;;  %v1136_v53 = vld [vmem:[%s1634_s3 + $0xa8] sm:$0xff]  }
  0x37   :  { %v998_v2 = vpack.c.bf16 %v502_v56, %v501_v51  ;;  %v249_v3 = vadd.f32 %v1216_v4, %v181_v57  ;;  %v250_v5 = vadd.f32 %v1216_v4, %v182_v58  ;;  %v867_v6 = vunpack.c.l.bf16 %v1132_v55 }
  0x38   :  { %v503_v7 = vmax.f32 %v439_v60, 0.0  ;;  %v504_v8 = vmax.f32 %v440_v61, 0.0  ;;  %v183_v9 = vmul.f32 %v1211_v1, %v739_v62  ;;  %v184_v10 = vmul.f32 %v1211_v1, %v740_v63  ;;  %v1106_v62 = vld [vmem:[%s1631_s0 + $0xb0] sm:$0xff]  }
  0x39   :  { %1160 = vst [vmem:[%s1635_s4 + $0x70] sm:$0xff] %v998_v2   ;;  %v441_v12 = vadd.f32 %v863_v54, %v249_v3  ;;  %v442_v13 = vadd.f32 %v864_v59, %v250_v5  ;;  %v868_v14 = vunpack.c.h.bf16 %v1132_v55  ;;  %v743_v15 = vunpack.c.l.bf16 %v1102_v0 }
  0x3a   :  { %v1003_v16 = vpack.c.bf16 %v504_v8, %v503_v7  ;;  %v251_v17 = vadd.f32 %v1216_v4, %v183_v9  ;;  %v252_v18 = vadd.f32 %v1216_v4, %v184_v10  ;;  %v744_v19 = vunpack.c.h.bf16 %v1102_v0  ;;  %v1137_v9 = vld [vmem:[%s1634_s3 + $0xb0] sm:$0xff]  }
  0x3b   :  { %v505_v21 = vmax.f32 %v441_v12, 0.0  ;;  %v506_v22 = vmax.f32 %v442_v13, 0.0  ;;  %v185_v23 = vmul.f32 %v1211_v1, %v743_v15  ;;  %v871_v24 = vunpack.c.l.bf16 %v1133_v11 }
  0x3c   :  { %1161 = vst [vmem:[%s1635_s4 + $0x78] sm:$0xff] %v1003_v16   ;;  %v443_v26 = vadd.f32 %v867_v6, %v251_v17  ;;  %v444_v27 = vadd.f32 %v868_v14, %v252_v18  ;;  %v186_v28 = vmul.f32 %v1211_v1, %v744_v19  ;;  %v872_v29 = vunpack.c.h.bf16 %v1133_v11  ;;  %v1107_v18 = vld [vmem:[%s1631_s0 + $0xb8] sm:$0xff]  }
  0x3d   :  { %v1008_v30 = vpack.c.bf16 %v506_v22, %v505_v21  ;;  %v253_v31 = vadd.f32 %v1216_v4, %v185_v23  ;;  %v747_v32 = vunpack.c.l.bf16 %v1103_v20  ;;  %v748_v33 = vunpack.c.h.bf16 %v1103_v20  ;;  %v1138_v23 = vld [vmem:[%s1634_s3 + $0xb8] sm:$0xff]  }
  0x3e   :  { %v507_v35 = vmax.f32 %v443_v26, 0.0  ;;  %v508_v36 = vmax.f32 %v444_v27, 0.0  ;;  %v254_v37 = vadd.f32 %v1216_v4, %v186_v28  ;;  %v875_v38 = vunpack.c.l.bf16 %v1134_v25 }
  0x3f   :  { %1162 = vst [vmem:[%s1635_s4 + $0x80] sm:$0xff] %v1008_v30   ;;  %v445_v40 = vadd.f32 %v871_v24, %v253_v31  ;;  %v187_v41 = vmul.f32 %v1211_v1, %v747_v32  ;;  %v188_v42 = vmul.f32 %v1211_v1, %v748_v33  ;;  %v876_v43 = vunpack.c.h.bf16 %v1134_v25  ;;  %v1108_v32 = vld [vmem:[%s1631_s0 + $0xc0] sm:$0xff]  }
  0x40   :  { %v1013_v44 = vpack.c.bf16 %v508_v36, %v507_v35  ;;  %v446_v45 = vadd.f32 %v872_v29, %v254_v37  ;;  %v751_v46 = vunpack.c.l.bf16 %v1104_v34  ;;  %v752_v47 = vunpack.c.h.bf16 %v1104_v34  ;;  %v1139_v37 = vld [vmem:[%s1634_s3 + $0xc0] sm:$0xff]  }
  0x41   :  { %v509_v49 = vmax.f32 %v445_v40, 0.0  ;;  %v255_v50 = vadd.f32 %v1216_v4, %v187_v41  ;;  %v256_v51 = vadd.f32 %v1216_v4, %v188_v42  ;;  %v879_v52 = vunpack.c.l.bf16 %v1135_v39 }
  0x42   :  { %1163 = vst [vmem:[%s1635_s4 + $0x88] sm:$0xff] %v1013_v44   ;;  %v510_v54 = vmax.f32 %v446_v45, 0.0  ;;  %v189_v55 = vmul.f32 %v1211_v1, %v751_v46  ;;  %v190_v56 = vmul.f32 %v1211_v1, %v752_v47  ;;  %v880_v57 = vunpack.c.h.bf16 %v1135_v39  ;;  %v1109_v46 = vld [vmem:[%s1631_s0 + $0xc8] sm:$0xff]  }
  0x43   :  { %v447_v58 = vadd.f32 %v875_v38, %v255_v50  ;;  %v448_v59 = vadd.f32 %v876_v43, %v256_v51  ;;  %v755_v60 = vunpack.c.l.bf16 %v1105_v48  ;;  %v756_v61 = vunpack.c.h.bf16 %v1105_v48  ;;  %v1140_v51 = vld [vmem:[%s1634_s3 + $0xc8] sm:$0xff]  }
  0x44   :  { %v1018_v63 = vpack.c.bf16 %v510_v54, %v509_v49  ;;  %v257_v0 = vadd.f32 %v1216_v4, %v189_v55  ;;  %v258_v2 = vadd.f32 %v1216_v4, %v190_v56  ;;  %v883_v3 = vunpack.c.l.bf16 %v1136_v53 }
  0x45   :  { %v511_v5 = vmax.f32 %v447_v58, 0.0  ;;  %v512_v6 = vmax.f32 %v448_v59, 0.0  ;;  %v191_v7 = vmul.f32 %v1211_v1, %v755_v60  ;;  %v192_v8 = vmul.f32 %v1211_v1, %v756_v61  ;;  %v1110_v60 = vld [vmem:[%s1631_s0 + $0xd0] sm:$0xff]  }
  0x46   :  { %1164 = vst [vmem:[%s1635_s4 + $0x90] sm:$0xff] %v1018_v63   ;;  %v449_v10 = vadd.f32 %v879_v52, %v257_v0  ;;  %v450_v11 = vadd.f32 %v880_v57, %v258_v2  ;;  %v884_v12 = vunpack.c.h.bf16 %v1136_v53  ;;  %v759_v13 = vunpack.c.l.bf16 %v1106_v62 }
  0x47   :  { %v1023_v14 = vpack.c.bf16 %v512_v6, %v511_v5  ;;  %v259_v15 = vadd.f32 %v1216_v4, %v191_v7  ;;  %v260_v16 = vadd.f32 %v1216_v4, %v192_v8  ;;  %v760_v17 = vunpack.c.h.bf16 %v1106_v62  ;;  %v1141_v7 = vld [vmem:[%s1634_s3 + $0xd0] sm:$0xff]  }
  0x48   :  { %v513_v19 = vmax.f32 %v449_v10, 0.0  ;;  %v514_v20 = vmax.f32 %v450_v11, 0.0  ;;  %v193_v21 = vmul.f32 %v1211_v1, %v759_v13  ;;  %v887_v22 = vunpack.c.l.bf16 %v1137_v9 }
  0x49   :  { %1165 = vst [vmem:[%s1635_s4 + $0x98] sm:$0xff] %v1023_v14   ;;  %v451_v24 = vadd.f32 %v883_v3, %v259_v15  ;;  %v452_v25 = vadd.f32 %v884_v12, %v260_v16  ;;  %v194_v26 = vmul.f32 %v1211_v1, %v760_v17  ;;  %v888_v27 = vunpack.c.h.bf16 %v1137_v9  ;;  %v1111_v16 = vld [vmem:[%s1631_s0 + $0xd8] sm:$0xff]  }
  0x4a   :  { %v1028_v28 = vpack.c.bf16 %v514_v20, %v513_v19  ;;  %v261_v29 = vadd.f32 %v1216_v4, %v193_v21  ;;  %v763_v30 = vunpack.c.l.bf16 %v1107_v18  ;;  %v764_v31 = vunpack.c.h.bf16 %v1107_v18  ;;  %v1142_v21 = vld [vmem:[%s1634_s3 + $0xd8] sm:$0xff]  }
  0x4b   :  { %v515_v33 = vmax.f32 %v451_v24, 0.0  ;;  %v516_v34 = vmax.f32 %v452_v25, 0.0  ;;  %v262_v35 = vadd.f32 %v1216_v4, %v194_v26  ;;  %v891_v36 = vunpack.c.l.bf16 %v1138_v23 }
  0x4c   :  { %1166 = vst [vmem:[%s1635_s4 + $0xa0] sm:$0xff] %v1028_v28   ;;  %v453_v38 = vadd.f32 %v887_v22, %v261_v29  ;;  %v195_v39 = vmul.f32 %v1211_v1, %v763_v30  ;;  %v196_v40 = vmul.f32 %v1211_v1, %v764_v31  ;;  %v892_v41 = vunpack.c.h.bf16 %v1138_v23  ;;  %v1112_v30 = vld [vmem:[%s1631_s0 + $0xe0] sm:$0xff]  }
  0x4d   :  { %v1033_v42 = vpack.c.bf16 %v516_v34, %v515_v33  ;;  %v454_v43 = vadd.f32 %v888_v27, %v262_v35  ;;  %v767_v44 = vunpack.c.l.bf16 %v1108_v32  ;;  %v768_v45 = vunpack.c.h.bf16 %v1108_v32  ;;  %v1143_v35 = vld [vmem:[%s1634_s3 + $0xe0] sm:$0xff]  }
  0x4e   :  { %v517_v47 = vmax.f32 %v453_v38, 0.0  ;;  %v263_v48 = vadd.f32 %v1216_v4, %v195_v39  ;;  %v264_v49 = vadd.f32 %v1216_v4, %v196_v40  ;;  %v895_v50 = vunpack.c.l.bf16 %v1139_v37 }
  0x4f   :  { %1167 = vst [vmem:[%s1635_s4 + $0xa8] sm:$0xff] %v1033_v42   ;;  %v518_v52 = vmax.f32 %v454_v43, 0.0  ;;  %v197_v53 = vmul.f32 %v1211_v1, %v767_v44  ;;  %v198_v54 = vmul.f32 %v1211_v1, %v768_v45  ;;  %v896_v55 = vunpack.c.h.bf16 %v1139_v37  ;;  %v1113_v44 = vld [vmem:[%s1631_s0 + $0xe8] sm:$0xff]  }
  0x50   :  { %v455_v56 = vadd.f32 %v891_v36, %v263_v48  ;;  %v456_v57 = vadd.f32 %v892_v41, %v264_v49  ;;  %v771_v58 = vunpack.c.l.bf16 %v1109_v46  ;;  %v772_v59 = vunpack.c.h.bf16 %v1109_v46  ;;  %v1144_v49 = vld [vmem:[%s1634_s3 + $0xe8] sm:$0xff]  }
  0x51   :  { %v1038_v61 = vpack.c.bf16 %v518_v52, %v517_v47  ;;  %v265_v62 = vadd.f32 %v1216_v4, %v197_v53  ;;  %v266_v63 = vadd.f32 %v1216_v4, %v198_v54  ;;  %v899_v0 = vunpack.c.l.bf16 %v1140_v51 }
  0x52   :  { %v519_v2 = vmax.f32 %v455_v56, 0.0  ;;  %v520_v3 = vmax.f32 %v456_v57, 0.0  ;;  %v199_v5 = vmul.f32 %v1211_v1, %v771_v58  ;;  %v200_v6 = vmul.f32 %v1211_v1, %v772_v59  ;;  %v1114_v58 = vld [vmem:[%s1631_s0 + $0xf0] sm:$0xff]  }
  0x53   :  { %1168 = vst [vmem:[%s1635_s4 + $0xb0] sm:$0xff] %v1038_v61   ;;  %v457_v8 = vadd.f32 %v895_v50, %v265_v62  ;;  %v458_v9 = vadd.f32 %v896_v55, %v266_v63  ;;  %v900_v10 = vunpack.c.h.bf16 %v1140_v51  ;;  %v775_v11 = vunpack.c.l.bf16 %v1110_v60 }
  0x54   :  { %v1043_v12 = vpack.c.bf16 %v520_v3, %v519_v2  ;;  %v267_v13 = vadd.f32 %v1216_v4, %v199_v5  ;;  %v268_v14 = vadd.f32 %v1216_v4, %v200_v6  ;;  %v776_v15 = vunpack.c.h.bf16 %v1110_v60  ;;  %v1145_v5 = vld [vmem:[%s1634_s3 + $0xf0] sm:$0xff]  }
  0x55   :  { %v521_v17 = vmax.f32 %v457_v8, 0.0  ;;  %v522_v18 = vmax.f32 %v458_v9, 0.0  ;;  %v201_v19 = vmul.f32 %v1211_v1, %v775_v11  ;;  %v903_v20 = vunpack.c.l.bf16 %v1141_v7 }
  0x56   :  { %1169 = vst [vmem:[%s1635_s4 + $0xb8] sm:$0xff] %v1043_v12   ;;  %v459_v22 = vadd.f32 %v899_v0, %v267_v13  ;;  %v460_v23 = vadd.f32 %v900_v10, %v268_v14  ;;  %v202_v24 = vmul.f32 %v1211_v1, %v776_v15  ;;  %v904_v25 = vunpack.c.h.bf16 %v1141_v7  ;;  %v1115_v14 = vld [vmem:[%s1631_s0 + $0xf8] sm:$0xff]  }
  0x57   :  { %v1048_v26 = vpack.c.bf16 %v522_v18, %v521_v17  ;;  %v269_v27 = vadd.f32 %v1216_v4, %v201_v19  ;;  %v779_v28 = vunpack.c.l.bf16 %v1111_v16  ;;  %v780_v29 = vunpack.c.h.bf16 %v1111_v16  ;;  %v1146_v19 = vld [vmem:[%s1634_s3 + $0xf8] sm:$0xff]  }
  0x58   :  { %v523_v31 = vmax.f32 %v459_v22, 0.0  ;;  %v524_v32 = vmax.f32 %v460_v23, 0.0  ;;  %v270_v33 = vadd.f32 %v1216_v4, %v202_v24  ;;  %v907_v34 = vunpack.c.l.bf16 %v1142_v21 }
  0x59   :  { %1170 = vst [vmem:[%s1635_s4 + $0xc0] sm:$0xff] %v1048_v26   ;;  %v461_v36 = vadd.f32 %v903_v20, %v269_v27  ;;  %v203_v37 = vmul.f32 %v1211_v1, %v779_v28  ;;  %v204_v38 = vmul.f32 %v1211_v1, %v780_v29  ;;  %v908_v39 = vunpack.c.h.bf16 %v1142_v21 }
  0x5a   :  { %v1053_v40 = vpack.c.bf16 %v524_v32, %v523_v31  ;;  %v462_v41 = vadd.f32 %v904_v25, %v270_v33  ;;  %v783_v42 = vunpack.c.l.bf16 %v1112_v30  ;;  %v784_v43 = vunpack.c.h.bf16 %v1112_v30 }
  0x5b   :  { %v525_v45 = vmax.f32 %v461_v36, 0.0  ;;  %v271_v46 = vadd.f32 %v1216_v4, %v203_v37  ;;  %v272_v47 = vadd.f32 %v1216_v4, %v204_v38  ;;  %v911_v48 = vunpack.c.l.bf16 %v1143_v35 }
  0x5c   :  { %1171 = vst [vmem:[%s1635_s4 + $0xc8] sm:$0xff] %v1053_v40   ;;  %v526_v50 = vmax.f32 %v462_v41, 0.0  ;;  %v205_v51 = vmul.f32 %v1211_v1, %v783_v42  ;;  %v206_v52 = vmul.f32 %v1211_v1, %v784_v43  ;;  %v912_v53 = vunpack.c.h.bf16 %v1143_v35 }
  0x5d   :  { %v463_v54 = vadd.f32 %v907_v34, %v271_v46  ;;  %v464_v55 = vadd.f32 %v908_v39, %v272_v47  ;;  %v787_v56 = vunpack.c.l.bf16 %v1113_v44  ;;  %v788_v57 = vunpack.c.h.bf16 %v1113_v44 }
  0x5e   :  { %v1058_v59 = vpack.c.bf16 %v526_v50, %v525_v45  ;;  %v273_v60 = vadd.f32 %v1216_v4, %v205_v51  ;;  %v274_v61 = vadd.f32 %v1216_v4, %v206_v52  ;;  %v915_v62 = vunpack.c.l.bf16 %v1144_v49 }
  0x5f   :  { %v527_v63 = vmax.f32 %v463_v54, 0.0  ;;  %v528_v0 = vmax.f32 %v464_v55, 0.0  ;;  %v207_v2 = vmul.f32 %v1211_v1, %v787_v56  ;;  %v208_v3 = vmul.f32 %v1211_v1, %v788_v57 }
  0x60   :  { %1172 = vst [vmem:[%s1635_s4 + $0xd0] sm:$0xff] %v1058_v59   ;;  %v465_v6 = vadd.f32 %v911_v48, %v273_v60  ;;  %v466_v7 = vadd.f32 %v912_v53, %v274_v61  ;;  %v916_v8 = vunpack.c.h.bf16 %v1144_v49  ;;  %v791_v9 = vunpack.c.l.bf16 %v1114_v58 }
  0x61   :  { %v1063_v10 = vpack.c.bf16 %v528_v0, %v527_v63  ;;  %v275_v11 = vadd.f32 %v1216_v4, %v207_v2  ;;  %v276_v12 = vadd.f32 %v1216_v4, %v208_v3  ;;  %v792_v13 = vunpack.c.h.bf16 %v1114_v58 }
  0x62   :  { %v529_v15 = vmax.f32 %v465_v6, 0.0  ;;  %v530_v16 = vmax.f32 %v466_v7, 0.0  ;;  %v209_v17 = vmul.f32 %v1211_v1, %v791_v9  ;;  %v919_v18 = vunpack.c.l.bf16 %v1145_v5 }
  0x63   :  { %1173 = vst [vmem:[%s1635_s4 + $0xd8] sm:$0xff] %v1063_v10   ;;  %v467_v20 = vadd.f32 %v915_v62, %v275_v11  ;;  %v468_v21 = vadd.f32 %v916_v8, %v276_v12  ;;  %v210_v22 = vmul.f32 %v1211_v1, %v792_v13  ;;  %v920_v23 = vunpack.c.h.bf16 %v1145_v5 }
  0x64   :  { %v1068_v24 = vpack.c.bf16 %v530_v16, %v529_v15  ;;  %v277_v25 = vadd.f32 %v1216_v4, %v209_v17  ;;  %v795_v26 = vunpack.c.l.bf16 %v1115_v14  ;;  %v796_v27 = vunpack.c.h.bf16 %v1115_v14 }
  0x65   :  { %v531_v28 = vmax.f32 %v467_v20, 0.0  ;;  %v532_v29 = vmax.f32 %v468_v21, 0.0  ;;  %v278_v30 = vadd.f32 %v1216_v4, %v210_v22  ;;  %v923_v31 = vunpack.c.l.bf16 %v1146_v19 }
  0x66   :  { %1174 = vst [vmem:[%s1635_s4 + $0xe0] sm:$0xff] %v1068_v24   ;;  %v469_v32 = vadd.f32 %v919_v18, %v277_v25  ;;  %v211_v33 = vmul.f32 %v1211_v1, %v795_v26  ;;  %v212_v34 = vmul.f32 %v1211_v1, %v796_v27  ;;  %v924_v35 = vunpack.c.h.bf16 %v1146_v19 }
  0x67   :  { %v1073_v36 = vpack.c.bf16 %v532_v29, %v531_v28  ;;  %v470_v37 = vadd.f32 %v920_v23, %v278_v30 }
  0x68   :  { %v533_v38 = vmax.f32 %v469_v32, 0.0  ;;  %v279_v39 = vadd.f32 %v1216_v4, %v211_v33  ;;  %v280_v40 = vadd.f32 %v1216_v4, %v212_v34 }
  0x69   :  { %1175 = vst [vmem:[%s1635_s4 + $0xe8] sm:$0xff] %v1073_v36   ;;  %v534_v41 = vmax.f32 %v470_v37, 0.0 }
  0x6a   :  { %v471_v42 = vadd.f32 %v923_v31, %v279_v39  ;;  %v472_v43 = vadd.f32 %v924_v35, %v280_v40 }
  0x6b   :  { %v1078_v44 = vpack.c.bf16 %v534_v41, %v533_v38 }
  0x6c   :  { %v535_v45 = vmax.f32 %v471_v42, 0.0  ;;  %v536_v46 = vmax.f32 %v472_v43, 0.0 }
  0x6d   :  { %1176 = vst [vmem:[%s1635_s4 + $0xf0] sm:$0xff] %v1078_v44  }
  0x6e   :  { %v1083_v1 = vpack.c.bf16 %v536_v46, %v535_v45 }
  0x70   :  { %1177 = vst [vmem:[%s1635_s4 + $0xf8] sm:$0xff] %v1083_v1  }

// kernel: _lambda_.21
= control target key start
LH: loop header
LB: loop body
LE: loop exit
PB: predicated region body
PF: predicated region fallthrough
CT: control target
= control target key end

     0   :  { %s1913_s12 = smov 0   ;;  %s1915_s13 = smov 0   ;;  %s2257_s0 = inlined_call_operand.vmem [shape: bf16[512,768], index: 0, kind: input, shape index: {}]   ;;  %s2258_s1 = inlined_call_operand.vmem [shape: bf16[768,128], index: 1, kind: input, shape index: {}]   ;;  %s2259_s2 = inlined_call_operand.vmem [shape: bf16[512,128], index: 2, kind: output, shape index: {0}]   ;;  %s2260_s3 = inlined_call_operand.vmem [shape: f32[16,128], index: 3, kind: output, shape index: {1}]  }
   0x1   :  { %s1917_s14 = smov 0   ;;  %s1919_s15 = smov 0  }
   0x2   :  { %s1921_s16 = smov 0   ;;  %s1923_s17 = smov 0  }
   0x3   :  { %s1925_s18 = smov 0  }
   0x4 LB: > { %s26_s19 = sadd.s32 1, %s1882_s16  ;;  %s33_s20 = sadd.s32 1, %s1886_s17  ;;  %s1890_s18 = sphi %s1925_s18, %s14_s18   ;;  %s1886_s17 = sphi %s1923_s17, %s2266_s17   ;;  %s1882_s16 = sphi %s1921_s16, %s2265_s16   ;;  %s1878_s15 = sphi %s1919_s15, %s2264_s15   ;;  %s1874_s14 = sphi %s1917_s14, %s2263_s14   ;;  %s1870_s13 = sphi %s1915_s13, %s2262_s13   ;;  %s1866_s12 = sphi %s1913_s12, %s2261_s12  }
   0x5   : > { %p27_p0 = scmp.ge.s32.totalorder %s26_s19, 3  ;;  %p49_p1 = scmp.ne.s32.totalorder %s1870_s13, %s1866_s12 }
   0x6   : > { %p50_p2 = scmp.eq.s32.totalorder %s1890_s18, 0  ;;  %s42_s24 = sadd.s32 1, %s1870_s13 }
   0x7   : > { %s2268_s19 = smov (%p27_p0, %s26_s19), 0  ;;  %s2270_s20 = smov (!%p27_p0, %s33_s20), %s1886_s17 }
   0x8   : > { %p51_p3 = por %p50_p2, %p49_p1  ;;  %p35_p4 = scmp.ge.s32.totalorder %s2270_s20, 2 }
   0x9   : > { %s38_s21 = ssub.s32 %s1882_s16, %s2268_s19  ;;  %p1410_p6 = scmp.ge.s32.totalorder %s1890_s18, 6 }
   0xa   : > { %s2272_s20 = smov (%p35_p4, %s2270_s20), 0 }
   0xb   : > { %s37_s22 = ssub.s32 %s1886_s17, %s2272_s20  ;;  %159 = sbr.rel (%p1410_p6) target bundleno = 56 (0x38), region = 16 }
   0xc   : > { %s39_s23 = sor.u32 %s38_s21, %s37_s22 }
   0xd   : > { %p40_p5 = scmp.eq.s32.totalorder %s39_s23, 0 }
   0xf   : > { %s1964_s25 = scalar_select %p40_p5, %s1870_s13, %s42_s24  }
  0x10   : > { %162 = sbr.rel (!%p51_p3) target bundleno = 56 (0x38), region = 20  ;;  %s164_s26 = sand.u32 (%p51_p3), 1, %s1870_s13  }
  0x11   : > { %s1413_s27 = sshll.u32 (%p51_p3), %s1882_s16, 1  ;;  %s1411_s28 = sshll.u32 (%p51_p3), %s164_s26, 8 }
  0x12   : > { %s1778_s29 = smul.u32 (%p51_p3), 192, %s1886_s17  ;;  %s1978_s8 = scalar_lea.vmem (%p51_p3), [#allocation3], %s1411_s28 }
  0x14   : > { %s170_s30 = sadd.s32 (%p51_p3), %s1778_s29, %s1413_s27 }
  0x15   : > { %s1415_s4 = sshll.u32 %s170_s30, 2 }
  0x16   : > { %s1973_s7 = scalar_lea.vmem %s2257_s0, %s1415_s4 }
  0x17   : > { %v263_v0 = vld [vmem:[%s1973_s7] sm:$0xff]  ;;  %v265_v1 = vld [vmem:[%s1973_s7 + $0x18] sm:$0xff]  ;;  %v267_v2 = vld [vmem:[%s1973_s7 + $0x30] sm:$0xff] }
  0x18   : > { %264 = vst [vmem:[%s1978_s8] sm:$0xff] %v263_v0  ;;  %v269_v3 = vld [vmem:[%s1973_s7 + $0x48] sm:$0xff]  ;;  %v271_v4 = vld [vmem:[%s1973_s7 + $0x60] sm:$0xff]  ;;  %v273_v5 = vld [vmem:[%s1973_s7 + $0x78] sm:$0xff] }
  0x19   : > { %266 = vst [vmem:[%s1978_s8 + $0x8] sm:$0xff] %v265_v1  ;;  %v275_v6 = vld [vmem:[%s1973_s7 + $0x90] sm:$0xff]  ;;  %v277_v7 = vld [vmem:[%s1973_s7 + $0xa8] sm:$0xff]  ;;  %v279_v8 = vld [vmem:[%s1973_s7 + $0xc0] sm:$0xff] }
  0x1a   : > { %268 = vst [vmem:[%s1978_s8 + $0x10] sm:$0xff] %v267_v2  ;;  %v281_v9 = vld [vmem:[%s1973_s7 + $0xd8] sm:$0xff]  ;;  %v283_v10 = vld [vmem:[%s1973_s7 + $0xf0] sm:$0xff]  ;;  %v285_v11 = vld [vmem:[%s1973_s7 + $0x108] sm:$0xff] }
  0x1b   : > { %270 = vst [vmem:[%s1978_s8 + $0x18] sm:$0xff] %v269_v3  ;;  %v287_v12 = vld [vmem:[%s1973_s7 + $0x120] sm:$0xff]  ;;  %v289_v13 = vld [vmem:[%s1973_s7 + $0x138] sm:$0xff]  ;;  %v291_v14 = vld [vmem:[%s1973_s7 + $0x150] sm:$0xff] }
  0x1c   : > { %272 = vst [vmem:[%s1978_s8 + $0x20] sm:$0xff] %v271_v4  ;;  %v293_v15 = vld [vmem:[%s1973_s7 + $0x168] sm:$0xff]  ;;  %v295_v16 = vld [vmem:[%s1973_s7 + $0x180] sm:$0xff]  ;;  %v297_v17 = vld [vmem:[%s1973_s7 + $0x198] sm:$0xff] }
  0x1d   : > { %274 = vst [vmem:[%s1978_s8 + $0x28] sm:$0xff] %v273_v5  ;;  %v299_v18 = vld [vmem:[%s1973_s7 + $0x1b0] sm:$0xff]  ;;  %v301_v19 = vld [vmem:[%s1973_s7 + $0x1c8] sm:$0xff]  ;;  %v303_v20 = vld [vmem:[%s1973_s7 + $0x1e0] sm:$0xff] }
  0x1e   : > { %276 = vst [vmem:[%s1978_s8 + $0x30] sm:$0xff] %v275_v6  ;;  %v305_v21 = vld [vmem:[%s1973_s7 + $0x1f8] sm:$0xff]  ;;  %v307_v22 = vld [vmem:[%s1973_s7 + $0x210] sm:$0xff]  ;;  %v309_v23 = vld [vmem:[%s1973_s7 + $0x228] sm:$0xff] }
  0x1f   : > { %278 = vst [vmem:[%s1978_s8 + $0x38] sm:$0xff] %v277_v7  ;;  %v311_v24 = vld [vmem:[%s1973_s7 + $0x240] sm:$0xff]  ;;  %v313_v25 = vld [vmem:[%s1973_s7 + $0x258] sm:$0xff]  ;;  %v315_v26 = vld [vmem:[%s1973_s7 + $0x270] sm:$0xff] }
  0x20   : > { %280 = vst [vmem:[%s1978_s8 + $0x40] sm:$0xff] %v279_v8  ;;  %v317_v27 = vld [vmem:[%s1973_s7 + $0x288] sm:$0xff]  ;;  %v319_v28 = vld [vmem:[%s1973_s7 + $0x2a0] sm:$0xff]  ;;  %v321_v29 = vld [vmem:[%s1973_s7 + $0x2b8] sm:$0xff] }
  0x21   : > { %282 = vst [vmem:[%s1978_s8 + $0x48] sm:$0xff] %v281_v9  ;;  %v323_v30 = vld [vmem:[%s1973_s7 + $0x2d0] sm:$0xff]  ;;  %v325_v31 = vld [vmem:[%s1973_s7 + $0x2e8] sm:$0xff] }
  0x22   : > { %284 = vst [vmem:[%s1978_s8 + $0x50] sm:$0xff] %v283_v10 }
  0x23   : > { %286 = vst [vmem:[%s1978_s8 + $0x58] sm:$0xff] %v285_v11 }
  0x24   : > { %288 = vst [vmem:[%s1978_s8 + $0x60] sm:$0xff] %v287_v12 }
  0x25   : > { %290 = vst [vmem:[%s1978_s8 + $0x68] sm:$0xff] %v289_v13 }
  0x26   : > { %292 = vst [vmem:[%s1978_s8 + $0x70] sm:$0xff] %v291_v14 }
  0x27   : > { %294 = vst [vmem:[%s1978_s8 + $0x78] sm:$0xff] %v293_v15 }
  0x28   : > { %296 = vst [vmem:[%s1978_s8 + $0x80] sm:$0xff] %v295_v16 }
  0x29   : > { %298 = vst [vmem:[%s1978_s8 + $0x88] sm:$0xff] %v297_v17 }
  0x2a   : > { %300 = vst [vmem:[%s1978_s8 + $0x90] sm:$0xff] %v299_v18 }
  0x2b   : > { %302 = vst [vmem:[%s1978_s8 + $0x98] sm:$0xff] %v301_v19 }
  0x2c   : > { %304 = vst [vmem:[%s1978_s8 + $0xa0] sm:$0xff] %v303_v20 }
  0x2d   : > { %306 = vst [vmem:[%s1978_s8 + $0xa8] sm:$0xff] %v305_v21 }
  0x2e   : > { %308 = vst [vmem:[%s1978_s8 + $0xb0] sm:$0xff] %v307_v22 }
  0x2f   : > { %310 = vst [vmem:[%s1978_s8 + $0xb8] sm:$0xff] %v309_v23 }
  0x30   : > { %312 = vst [vmem:[%s1978_s8 + $0xc0] sm:$0xff] %v311_v24 }
  0x31   : > { %314 = vst [vmem:[%s1978_s8 + $0xc8] sm:$0xff] %v313_v25 }
  0x32   : > { %316 = vst [vmem:[%s1978_s8 + $0xd0] sm:$0xff] %v315_v26 }
  0x33   : > { %318 = vst [vmem:[%s1978_s8 + $0xd8] sm:$0xff] %v317_v27 }
  0x34   : > { %320 = vst [vmem:[%s1978_s8 + $0xe0] sm:$0xff] %v319_v28 }
  0x35   : > { %322 = vst [vmem:[%s1978_s8 + $0xe8] sm:$0xff] %v321_v29 }
  0x36   : > { %324 = vst [vmem:[%s1978_s8 + $0xf0] sm:$0xff] %v323_v30 }
  0x37   : > { %326 = vst [vmem:[%s1978_s8 + $0xf8] sm:$0xff] %v325_v31 }
  0x38 PF: > { %p1416_p7 = scmp.ge.s32.totalorder %s1890_s18, 1  ;;  %p343_p8 = scmp.lt.s32.totalorder %s1890_s18, 7 }
  0x3a   : > { %p344_p9 = pnand %p1416_p7, %p343_p8 }
  0x3b   : > { %s350_s9 = sand.u32 (!%p344_p9), 1, %s1866_s12   ;;  %s1418_s10 = sshll.u32 (!%p344_p9), %s1874_s14, 5 }
  0x3c   : > { %347 = sbr.rel (%p344_p9) target bundleno = 477 (0x1dd), region = 62  ;;  %s1417_s11 = sshll.u32 (!%p344_p9), %s350_s9, 8 }
  0x3d   : > { %p394_p10 = scmp.lt.s32.totalorder (!%p344_p9), %s1418_s10, 95  ;;  %s1420_s21 = sshll.u32 (!%p344_p9), %s1878_s15, 5 }
  0x3e   : > { %p403_p11 = scmp.lt.s32.totalorder (!%p344_p9), %s1420_s21, 63  ;;  %p411_p12 = scmp.lt.s32.totalorder (!%p344_p9), %s1878_s15, 1 }
  0x3f   : > { %s2063_s7 = scalar_lea.vmem (!%p344_p9), [#allocation3], %s1417_s11  ;;  %p1423_p13 = scmp.ne.s32.totalorder (!%p344_p9), %s1874_s14, 0 }
  0x41   : > { %s2274_s10 = smov (!%p394_p10, %s1418_s10), 95  ;;  %s2276_s21 = smov (!%p403_p11, %s1420_s21), 63 }
  0x42   : > { %s1419_s22 = sshll.u32 %s2274_s10, 2  ;;  %s2278_s15 = smov (!%p411_p12, %s1878_s15), 1 }
  0x43   : > { %s2050_s26 = scalar_lea.vmem %s2258_s1, %s1419_s22  ;;  %s1421_s27 = sshll.u32 %s2276_s21, 2 }
  0x44   : > { %s2056_s12 = scalar_lea.vmem %s2259_s2, %s1421_s27  ;;  %s1422_s30 = sshll.u32 %s2278_s15, 3 }
  0x45   : > { %s2061_s6 = scalar_lea.vmem %s2260_s3, %s1422_s30  ;;  %421 = sbr.rel (%p1423_p13) target bundleno = 107 (0x6b), region = 70 }
  0x4a   : > { %v1892_v32 = vmov 0.0  }
  0x4b   : > { %422 = vst [vmem:[#allocation2 + $0xb0] sm:$0xff] %v1892_v32 }
  0x4c   : > { %423 = vst [vmem:[#allocation2] sm:$0xff] %v1892_v32 }
  0x4d   : > { %424 = vst [vmem:[#allocation2 + $0xd8] sm:$0xff] %v1892_v32 }
  0x4e   : > { %425 = vst [vmem:[#allocation2 + $0x18] sm:$0xff] %v1892_v32 }
  0x4f   : > { %426 = vst [vmem:[#allocation2 + $0x50] sm:$0xff] %v1892_v32 }
  0x50   : > { %427 = vst [vmem:[#allocation2 + $0x68] sm:$0xff] %v1892_v32 }
  0x51   : > { %428 = vst [vmem:[#allocation2 + $0x30] sm:$0xff] %v1892_v32 }
  0x52   : > { %429 = vst [vmem:[#allocation2 + $0x48] sm:$0xff] %v1892_v32 }
  0x53   : > { %430 = vst [vmem:[#allocation2 + $0x80] sm:$0xff] %v1892_v32 }
  0x54   : > { %431 = vst [vmem:[#allocation2 + $0x88] sm:$0xff] %v1892_v32 }
  0x55   : > { %432 = vst [vmem:[#allocation2 + $0xe8] sm:$0xff] %v1892_v32 }
  0x56   : > { %433 = vst [vmem:[#allocation2 + $0xb8] sm:$0xff] %v1892_v32 }
  0x57   : > { %434 = vst [vmem:[#allocation2 + $0x60] sm:$0xff] %v1892_v32 }
  0x58   : > { %435 = vst [vmem:[#allocation2 + $0xf0] sm:$0xff] %v1892_v32 }
  0x59   : > { %436 = vst [vmem:[#allocation2 + $0x8] sm:$0xff] %v1892_v32 }
  0x5a   : > { %437 = vst [vmem:[#allocation2 + $0x78] sm:$0xff] %v1892_v32 }
  0x5b   : > { %438 = vst [vmem:[#allocation2 + $0x38] sm:$0xff] %v1892_v32 }
  0x5c   : > { %439 = vst [vmem:[#allocation2 + $0x58] sm:$0xff] %v1892_v32 }
  0x5d   : > { %440 = vst [vmem:[#allocation2 + $0x40] sm:$0xff] %v1892_v32 }
  0x5e   : > { %441 = vst [vmem:[#allocation2 + $0xc8] sm:$0xff] %v1892_v32 }
  0x5f   : > { %442 = vst [vmem:[#allocation2 + $0xe0] sm:$0xff] %v1892_v32 }
  0x60   : > { %443 = vst [vmem:[#allocation2 + $0x90] sm:$0xff] %v1892_v32 }
  0x61   : > { %444 = vst [vmem:[#allocation2 + $0x70] sm:$0xff] %v1892_v32 }
  0x62   : > { %445 = vst [vmem:[#allocation2 + $0xc0] sm:$0xff] %v1892_v32 }
  0x63   : > { %446 = vst [vmem:[#allocation2 + $0xa8] sm:$0xff] %v1892_v32 }
  0x64   : > { %447 = vst [vmem:[#allocation2 + $0xd0] sm:$0xff] %v1892_v32 }
  0x65   : > { %448 = vst [vmem:[#allocation2 + $0x10] sm:$0xff] %v1892_v32 }
  0x66   : > { %449 = vst [vmem:[#allocation2 + $0x28] sm:$0xff] %v1892_v32 }
  0x67   : > { %450 = vst [vmem:[#allocation2 + $0xa0] sm:$0xff] %v1892_v32 }
  0x68   : > { %451 = vst [vmem:[#allocation2 + $0xf8] sm:$0xff] %v1892_v32 }
  0x69   : > { %452 = vst [vmem:[#allocation2 + $0x20] sm:$0xff] %v1892_v32 }
  0x6a   : > { %453 = vst [vmem:[#allocation2 + $0x98] sm:$0xff] %v1892_v32 }
  0x6b PF: > { %v1658_v33 = vld [vmem:[%s2050_s26 + $0x38] sm:$0xff]  ;;  %v1657_v35 = vld [vmem:[%s2050_s26 + $0x30] sm:$0xff]  ;;  %v1656_v37 = vld [vmem:[%s2050_s26 + $0x28] sm:$0xff]  ;;  %p1616_p0 = scmp.ne.s32.totalorder %s1874_s14, 2 }
  0x6c   : > { %v1666_v34 = vld [vmem:[%s2050_s26 + $0x78] sm:$0xff]  ;;  %806 = vmatpush.bf16.msra.mxu0 %v1658_v33  ;;  %1762 = vmatpush.bf16.msra.mxu2 %v1658_v33  ;;  %v1665_v36 = vld [vmem:[%s2050_s26 + $0x70] sm:$0xff]  ;;  %v1664_v38 = vld [vmem:[%s2050_s26 + $0x68] sm:$0xff] }
  0x6d   : > { %895 = vmatpush.bf16.msra.mxu1 %v1666_v34  ;;  %1770 = vmatpush.bf16.msra.mxu3 %v1666_v34  ;;  %v1655_v39 = vld [vmem:[%s2050_s26 + $0x20] sm:$0xff]  ;;  %v1654_v41 = vld [vmem:[%s2050_s26 + $0x18] sm:$0xff]  ;;  %v1653_v43 = vld [vmem:[%s2050_s26 + $0x10] sm:$0xff] }
  0x6e   : > { %v1663_v40 = vld [vmem:[%s2050_s26 + $0x60] sm:$0xff]  ;;  %v1662_v42 = vld [vmem:[%s2050_s26 + $0x58] sm:$0xff]  ;;  %v1661_v44 = vld [vmem:[%s2050_s26 + $0x50] sm:$0xff] }
  0x6f   : > { %v1652_v45 = vld [vmem:[%s2050_s26 + $0x8] sm:$0xff]  ;;  %v1651_v47 = vld [vmem:[%s2050_s26] sm:$0xff]  ;;  %v1434_v61 = vld [vmem:[%s2063_s7 + $0x10] sm:$0xf] }
  0x70   : > { %807 = vmatpush.bf16.msra.mxu0 %v1657_v35  ;;  %1763 = vmatpush.bf16.msra.mxu2 %v1657_v35  ;;  %v1660_v46 = vld [vmem:[%s2050_s26 + $0x48] sm:$0xff]  ;;  %v1659_v48 = vld [vmem:[%s2050_s26 + $0x40] sm:$0xff]  ;;  %v1622_v62 = vld [vmem:[%s2063_s7 + $0x14] sm:$0xf0] }
  0x71   : > { %896 = vmatpush.bf16.msra.mxu1 %v1665_v36  ;;  %1771 = vmatpush.bf16.msra.mxu3 %v1665_v36  ;;  %v1426_v49 = vld [vmem:[%s2063_s7] sm:$0xf]  ;;  %v1620_v50 = vld [vmem:[%s2063_s7 + $0x4] sm:$0xf0]  ;;  %v1619_v53 = vld [vmem:[%s2063_s7 + $0x4] sm:$0xf]  ;;  %v1435_v5 = vor.u32 %v1622_v62, %v1434_v61 }
  0x72   : > { %v1490_v51 = vld [vmem:[%s2063_s7 + $0x80] sm:$0xf]  ;;  %v1636_v52 = vld [vmem:[%s2063_s7 + $0x84] sm:$0xf0]  ;;  %v1428_v54 = vld [vmem:[%s2063_s7 + $0x8] sm:$0xf0]  ;;  %v1427_v57 = vor.u32 %v1620_v50, %v1426_v49 }
  0x73   : > { %v1635_v55 = vld [vmem:[%s2063_s7 + $0x84] sm:$0xf]  ;;  %v1492_v56 = vld [vmem:[%s2063_s7 + $0x88] sm:$0xf0]  ;;  %v1491_v58 = vor.u32 %v1636_v52, %v1490_v51  ;;  %v1431_v59 = vor.u32 %v1619_v53, %v1428_v54  ;;  %v1498_v63 = vld [vmem:[%s2063_s7 + $0x90] sm:$0xf] }
  0x74   : > { %808 = vmatpush.bf16.msra.mxu0 %v1656_v37  ;;  %1764 = vmatpush.bf16.msra.mxu2 %v1656_v37  ;;  %v1495_v60 = vor.u32 %v1635_v55, %v1492_v56  ;;  %v1638_v0 = vld [vmem:[%s2063_s7 + $0x94] sm:$0xf0]  ;;  %v1621_v1 = vld [vmem:[%s2063_s7 + $0x14] sm:$0xf]  ;;  %v1436_v2 = vld [vmem:[%s2063_s7 + $0x18] sm:$0xf0] }
  0x75   : > { %897 = vmatpush.bf16.msra.mxu1 %v1664_v38  ;;  %1772 = vmatpush.bf16.msra.mxu3 %v1664_v38  ;;  %v1637_v3 = vld [vmem:[%s2063_s7 + $0x94] sm:$0xf]  ;;  %v1500_v4 = vld [vmem:[%s2063_s7 + $0x98] sm:$0xf0]  ;;  %v1499_v6 = vor.u32 %v1638_v0, %v1498_v63  ;;  %v1439_v7 = vor.u32 %v1621_v1, %v1436_v2  ;;  %v1442_v9 = vld [vmem:[%s2063_s7 + $0x20] sm:$0xf] }
  0x76   : > { %v1503_v8 = vor.u32 %v1637_v3, %v1500_v4  ;;  %v1624_v10 = vld [vmem:[%s2063_s7 + $0x24] sm:$0xf0]  ;;  %v1506_v11 = vld [vmem:[%s2063_s7 + $0xa0] sm:$0xf]  ;;  %v1623_v13 = vld [vmem:[%s2063_s7 + $0x24] sm:$0xf] }
  0x77   : > { %v1640_v12 = vld [vmem:[%s2063_s7 + $0xa4] sm:$0xf0]  ;;  %v1444_v14 = vld [vmem:[%s2063_s7 + $0x28] sm:$0xf0]  ;;  %v1639_v15 = vld [vmem:[%s2063_s7 + $0xa4] sm:$0xf]  ;;  %v1443_v17 = vor.u32 %v1624_v10, %v1442_v9 }
  0x78   : > { %809 = vmatpush.bf16.msra.mxu0 %v1655_v39  ;;  %1765 = vmatpush.bf16.msra.mxu2 %v1655_v39  ;;  %v1508_v16 = vld [vmem:[%s2063_s7 + $0xa8] sm:$0xf0]  ;;  %v1507_v18 = vor.u32 %v1640_v12, %v1506_v11  ;;  %v1447_v19 = vor.u32 %v1623_v13, %v1444_v14  ;;  %v1450_v21 = vld [vmem:[%s2063_s7 + $0x30] sm:$0xf]  ;;  %v1626_v22 = vld [vmem:[%s2063_s7 + $0x34] sm:$0xf0] }
  0x79   : > { %898 = vmatpush.bf16.msra.mxu1 %v1663_v40  ;;  %1773 = vmatpush.bf16.msra.mxu3 %v1663_v40  ;;  %v1511_v20 = vor.u32 %v1639_v15, %v1508_v16  ;;  %v1514_v23 = vld [vmem:[%s2063_s7 + $0xb0] sm:$0xf]  ;;  %v1642_v24 = vld [vmem:[%s2063_s7 + $0xb4] sm:$0xf0]  ;;  %v1625_v25 = vld [vmem:[%s2063_s7 + $0x34] sm:$0xf]  ;;  %v1451_v29 = vor.u32 %v1626_v22, %v1450_v21 }
  0x7a   : > { %v1452_v26 = vld [vmem:[%s2063_s7 + $0x38] sm:$0xf0]  ;;  %v1641_v27 = vld [vmem:[%s2063_s7 + $0xb4] sm:$0xf]  ;;  %v1515_v30 = vor.u32 %v1642_v24, %v1514_v23  ;;  %v1458_v33 = vld [vmem:[%s2063_s7 + $0x40] sm:$0xf] }
  0x7b   : > { %v1516_v28 = vld [vmem:[%s2063_s7 + $0xb8] sm:$0xf0]  ;;  %v1455_v31 = vor.u32 %v1625_v25, %v1452_v26  ;;  %v1628_v34 = vld [vmem:[%s2063_s7 + $0x44] sm:$0xf0]  ;;  %v1522_v35 = vld [vmem:[%s2063_s7 + $0xc0] sm:$0xf] }
  0x7c   : > { %810 = vmatpush.bf16.msra.mxu0 %v1654_v41  ;;  %1766 = vmatpush.bf16.msra.mxu2 %v1654_v41  ;;  %v1519_v32 = vor.u32 %v1641_v27, %v1516_v28  ;;  %v1644_v36 = vld [vmem:[%s2063_s7 + $0xc4] sm:$0xf0]  ;;  %v1627_v37 = vld [vmem:[%s2063_s7 + $0x44] sm:$0xf]  ;;  %v1460_v38 = vld [vmem:[%s2063_s7 + $0x48] sm:$0xf0]  ;;  %v1459_v41 = vor.u32 %v1628_v34, %v1458_v33 }
  0x7d   : > { %899 = vmatpush.bf16.msra.mxu1 %v1662_v42  ;;  %1774 = vmatpush.bf16.msra.mxu3 %v1662_v42  ;;  %v1643_v39 = vld [vmem:[%s2063_s7 + $0xc4] sm:$0xf]  ;;  %v1524_v40 = vld [vmem:[%s2063_s7 + $0xc8] sm:$0xf0]  ;;  %v1523_v42 = vor.u32 %v1644_v36, %v1522_v35  ;;  %v1629_v49 = vld [vmem:[%s2063_s7 + $0x54] sm:$0xf] }
  0x7e   : > { %v1468_v50 = vld [vmem:[%s2063_s7 + $0x58] sm:$0xf0]  ;;  %v1645_v51 = vld [vmem:[%s2063_s7 + $0xd4] sm:$0xf]  ;;  %v1631_v61 = vld [vmem:[%s2063_s7 + $0x64] sm:$0xf] }
  0x7f   : > { %v1532_v52 = vld [vmem:[%s2063_s7 + $0xd8] sm:$0xf0]  ;;  %v1471_v55 = vor.u32 %v1629_v49, %v1468_v50  ;;  %v1476_v62 = vld [vmem:[%s2063_s7 + $0x68] sm:$0xf0]  ;;  %v1647_v63 = vld [vmem:[%s2063_s7 + $0xe4] sm:$0xf] }
  0x80   : > { %811 = vmatpush.bf16.msra.mxu0 %v1653_v43  ;;  %1767 = vmatpush.bf16.msra.mxu2 %v1653_v43  ;;  %v1463_v43 = vor.u32 %v1627_v37, %v1460_v38  ;;  %v1535_v56 = vor.u32 %v1645_v51, %v1532_v52  ;;  %v1540_v0 = vld [vmem:[%s2063_s7 + $0xe8] sm:$0xf0]  ;;  %v1479_v3 = vor.u32 %v1631_v61, %v1476_v62  ;;  %v1633_v9 = vld [vmem:[%s2063_s7 + $0x74] sm:$0xf]  ;;  %v1484_v10 = vld [vmem:[%s2063_s7 + $0x78] sm:$0xf0] }
  0x81   : > { %900 = vmatpush.bf16.msra.mxu1 %v1661_v44  ;;  %1775 = vmatpush.bf16.msra.mxu3 %v1661_v44  ;;  %v1527_v44 = vor.u32 %v1643_v39, %v1524_v40  ;;  %v1543_v4 = vor.u32 %v1647_v63, %v1540_v0  ;;  %v1649_v11 = vld [vmem:[%s2063_s7 + $0xf4] sm:$0xf]  ;;  %v1548_v12 = vld [vmem:[%s2063_s7 + $0xf8] sm:$0xf0]  ;;  %v1487_v15 = vor.u32 %v1633_v9, %v1484_v10  ;;  %v455_v27 = vld [vmem:[#allocation2] sm:$0xff] }
  0x82   : > { %v1551_v16 = vor.u32 %v1649_v11, %v1548_v12  ;;  %v470_v23 = vld [vmem:[#allocation2 + $0x38] sm:$0xff]  ;;  %v474_v63 = vld [vmem:[#allocation2 + $0xe0] sm:$0xff]  ;;  %v475_v9 = vld [vmem:[#allocation2 + $0x90] sm:$0xff] }
  0x83   : > { %v471_v33 = vld [vmem:[#allocation2 + $0x58] sm:$0xff] }
  0x84   : > { %812 = vmatpush.bf16.msra.mxu0 %v1652_v45  ;;  %1768 = vmatpush.bf16.msra.mxu2 %v1652_v45  ;;  %v1466_v45 = vld [vmem:[%s2063_s7 + $0x50] sm:$0xf]  ;;  %v456_v37 = vld [vmem:[#allocation2 + $0xd8] sm:$0xff] }
  0x85   : > { %901 = vmatpush.bf16.msra.mxu1 %v1660_v46  ;;  %1776 = vmatpush.bf16.msra.mxu3 %v1660_v46  ;;  %v1630_v46 = vld [vmem:[%s2063_s7 + $0x54] sm:$0xf0] }
  0x86   : > { %v1467_v53 = vor.u32 %v1630_v46, %v1466_v45 }
  0x88   : > { %813 = vmatpush.bf16.msra.mxu0 %v1651_v47  ;;  %1769 = vmatpush.bf16.msra.mxu2 %v1651_v47  ;;  %v1530_v47 = vld [vmem:[%s2063_s7 + $0xd0] sm:$0xf] }
  0x89   : > { %902 = vmatpush.bf16.msra.mxu1 %v1659_v48  ;;  %1777 = vmatpush.bf16.msra.mxu3 %v1659_v48  ;;  %v1646_v48 = vld [vmem:[%s2063_s7 + $0xd4] sm:$0xf0] }
  0x8a   : > { %v1531_v54 = vor.u32 %v1646_v48, %v1530_v47  ;;  %v457_v47 = vld [vmem:[#allocation2 + $0x18] sm:$0xff] }
  0x8b   : > { %814 = vmatmul.bf16.vlgmr.msra.gmra.mxu0 %v1427_v57  ;;  %854 = vmatmul.bf16.vlgmr.msra.gmra.mxu2 %v1491_v58  ;;  %v1474_v57 = vld [vmem:[%s2063_s7 + $0x60] sm:$0xf]  ;;  %v1632_v58 = vld [vmem:[%s2063_s7 + $0x64] sm:$0xf0] }
  0x8c   : > { %903 = vmatmul.bf16.vlgmr.msra.gmra.mxu1 %v1431_v59  ;;  %943 = vmatmul.bf16.vlgmr.msra.gmra.mxu3 %v1495_v60  ;;  %v1538_v59 = vld [vmem:[%s2063_s7 + $0xe0] sm:$0xf]  ;;  %v1648_v60 = vld [vmem:[%s2063_s7 + $0xe4] sm:$0xf0]  ;;  %v1475_v1 = vor.u32 %v1632_v58, %v1474_v57  ;;  %v458_v57 = vld [vmem:[#allocation2 + $0x50] sm:$0xff] }
  0x8d   : > { %v1539_v2 = vor.u32 %v1648_v60, %v1538_v59 }
  0x9b   : > { %819 = vmatmul.bf16.gmra.mxu0 %v1435_v5  ;;  %859 = vmatmul.bf16.gmra.mxu2 %v1499_v6  ;;  %v1482_v5 = vld [vmem:[%s2063_s7 + $0x70] sm:$0xf]  ;;  %v1634_v6 = vld [vmem:[%s2063_s7 + $0x74] sm:$0xf0] }
  0x9c   : > { %908 = vmatmul.bf16.gmra.mxu1 %v1439_v7  ;;  %948 = vmatmul.bf16.gmra.mxu3 %v1503_v8  ;;  %v1546_v7 = vld [vmem:[%s2063_s7 + $0xf0] sm:$0xf]  ;;  %v1650_v8 = vld [vmem:[%s2063_s7 + $0xf4] sm:$0xf0]  ;;  %v1483_v13 = vor.u32 %v1634_v6, %v1482_v5 }
  0x9d   : > { %v1547_v14 = vor.u32 %v1650_v8, %v1546_v7 }
  0xab   : > { %824 = vmatmul.bf16.gmra.mxu0 %v1443_v17  ;;  %864 = vmatmul.bf16.gmra.mxu2 %v1507_v18  ;;  %v454_v18 = vld [vmem:[#allocation2 + $0xb0] sm:$0xff] }
  0xac   : > { %913 = vmatmul.bf16.gmra.mxu1 %v1447_v19  ;;  %953 = vmatmul.bf16.gmra.mxu3 %v1511_v20 }
  0xbb   : > { %829 = vmatmul.bf16.gmra.mxu0 %v1451_v29  ;;  %869 = vmatmul.bf16.gmra.mxu2 %v1515_v30 }
  0xbc   : > { %918 = vmatmul.bf16.gmra.mxu1 %v1455_v31  ;;  %958 = vmatmul.bf16.gmra.mxu3 %v1519_v32 }
  0xcb   : > { %834 = vmatmul.bf16.gmra.mxu0 %v1459_v41  ;;  %874 = vmatmul.bf16.gmra.mxu2 %v1523_v42 }
  0xcc   : > { %923 = vmatmul.bf16.gmra.mxu1 %v1463_v43  ;;  %963 = vmatmul.bf16.gmra.mxu3 %v1527_v44  ;;  %v472_v43 = vld [vmem:[#allocation2 + $0x40] sm:$0xff] }
  0xdb   : > { %839 = vmatmul.bf16.gmra.mxu0 %v1467_v53  ;;  %879 = vmatmul.bf16.gmra.mxu2 %v1531_v54  ;;  %v473_v53 = vld [vmem:[#allocation2 + $0xc8] sm:$0xff] }
  0xdc   : > { %928 = vmatmul.bf16.gmra.mxu1 %v1471_v55  ;;  %968 = vmatmul.bf16.gmra.mxu3 %v1535_v56 }
  0xeb   : > { %844 = vmatmul.bf16.gmra.mxu0 %v1475_v1  ;;  %884 = vmatmul.bf16.gmra.mxu2 %v1539_v2 }
  0xec   : > { %933 = vmatmul.bf16.gmra.mxu1 %v1479_v3  ;;  %973 = vmatmul.bf16.gmra.mxu3 %v1543_v4  ;;  %v459_v3 = vld [vmem:[#allocation2 + $0x68] sm:$0xff] }
  0xfb   : > { %849 = vmatmul.bf16.gmra.mxu0 %v1483_v13  ;;  %889 = vmatmul.bf16.gmra.mxu2 %v1547_v14  ;;  %v460_v13 = vld [vmem:[#allocation2 + $0x30] sm:$0xff] }
  0xfc   : > { %938 = vmatmul.bf16.gmra.mxu1 %v1487_v15  ;;  %978 = vmatmul.bf16.gmra.mxu3 %v1551_v16 }
 0x108   : > { %v815_v17 = vpop.f32.mrf.mxu0 }
 0x109   : > { %v904_v19 = vpop.f32.mrf.mxu1 }
 0x10a   : > { %v905_v20 = vadd.f32 %v904_v19, %v815_v17  ;;  %v476_v19 = vld [vmem:[#allocation2 + $0x70] sm:$0xff] }
 0x10c   : > { %v984_v21 = vadd.f32 %v905_v20, %v454_v18 }
 0x10e   : > { %1016 = vst [vmem:[#allocation2 + $0xb0] sm:$0xff] %v984_v21  ;;  %v855_v22 = vpop.f32.mrf.mxu2 }
 0x10f   : > { %v944_v24 = vpop.f32.mrf.mxu3 }
 0x110   : > { %v945_v25 = vadd.f32 %v944_v24, %v855_v22  ;;  %v817_v26 = vpop.f32.mrf.mxu0 }
 0x111   : > { %v906_v28 = vpop.f32.mrf.mxu1 }
 0x112   : > { %v1000_v29 = vadd.f32 %v945_v25, %v470_v23  ;;  %v907_v30 = vadd.f32 %v906_v28, %v817_v26  ;;  %v461_v23 = vld [vmem:[#allocation2 + $0x48] sm:$0xff] }
 0x114   : > { %1032 = vst [vmem:[#allocation2 + $0x38] sm:$0xff] %v1000_v29  ;;  %v985_v31 = vadd.f32 %v907_v30, %v455_v27  ;;  %v477_v29 = vld [vmem:[#allocation2 + $0xc0] sm:$0xff] }
 0x116   : > { %1017 = vst [vmem:[#allocation2] sm:$0xff] %v985_v31  ;;  %v857_v32 = vpop.f32.mrf.mxu2 }
 0x117   : > { %v946_v34 = vpop.f32.mrf.mxu3 }
 0x118   : > { %v947_v35 = vadd.f32 %v946_v34, %v857_v32  ;;  %v820_v36 = vpop.f32.mrf.mxu0 }
 0x119   : > { %v909_v38 = vpop.f32.mrf.mxu1 }
 0x11a   : > { %v1001_v39 = vadd.f32 %v947_v35, %v471_v33  ;;  %v910_v40 = vadd.f32 %v909_v38, %v820_v36  ;;  %v462_v33 = vld [vmem:[#allocation2 + $0x80] sm:$0xff] }
 0x11c   : > { %1033 = vst [vmem:[#allocation2 + $0x58] sm:$0xff] %v1001_v39  ;;  %v986_v41 = vadd.f32 %v910_v40, %v456_v37  ;;  %v478_v39 = vld [vmem:[#allocation2 + $0xa8] sm:$0xff] }
 0x11e   : > { %1018 = vst [vmem:[#allocation2 + $0xd8] sm:$0xff] %v986_v41  ;;  %v860_v42 = vpop.f32.mrf.mxu2 }
 0x11f   : > { %v949_v44 = vpop.f32.mrf.mxu3 }
 0x120   : > { %v950_v45 = vadd.f32 %v949_v44, %v860_v42  ;;  %v822_v46 = vpop.f32.mrf.mxu0 }
 0x121   : > { %v911_v48 = vpop.f32.mrf.mxu1 }
 0x122   : > { %v1002_v49 = vadd.f32 %v950_v45, %v472_v43  ;;  %v912_v50 = vadd.f32 %v911_v48, %v822_v46  ;;  %v463_v43 = vld [vmem:[#allocation2 + $0x88] sm:$0xff] }
 0x124   : > { %1034 = vst [vmem:[#allocation2 + $0x40] sm:$0xff] %v1002_v49  ;;  %v987_v51 = vadd.f32 %v912_v50, %v457_v47  ;;  %v479_v49 = vld [vmem:[#allocation2 + $0xd0] sm:$0xff] }
 0x126   : > { %1019 = vst [vmem:[#allocation2 + $0x18] sm:$0xff] %v987_v51  ;;  %v862_v52 = vpop.f32.mrf.mxu2 }
 0x127   : > { %v951_v54 = vpop.f32.mrf.mxu3 }
 0x128   : > { %v952_v55 = vadd.f32 %v951_v54, %v862_v52  ;;  %v825_v56 = vpop.f32.mrf.mxu0 }
 0x129   : > { %v914_v58 = vpop.f32.mrf.mxu1 }
 0x12a   : > { %v1003_v59 = vadd.f32 %v952_v55, %v473_v53  ;;  %v915_v60 = vadd.f32 %v914_v58, %v825_v56  ;;  %v464_v53 = vld [vmem:[#allocation2 + $0xe8] sm:$0xff] }
 0x12c   : > { %1035 = vst [vmem:[#allocation2 + $0xc8] sm:$0xff] %v1003_v59  ;;  %v988_v61 = vadd.f32 %v915_v60, %v458_v57  ;;  %v480_v59 = vld [vmem:[#allocation2 + $0x10] sm:$0xff] }
 0x12e   : > { %1020 = vst [vmem:[#allocation2 + $0x50] sm:$0xff] %v988_v61  ;;  %v865_v62 = vpop.f32.mrf.mxu2 }
 0x12f   : > { %v954_v0 = vpop.f32.mrf.mxu3 }
 0x130   : > { %v955_v1 = vadd.f32 %v954_v0, %v865_v62  ;;  %v827_v2 = vpop.f32.mrf.mxu0 }
 0x131   : > { %v916_v4 = vpop.f32.mrf.mxu1 }
 0x132   : > { %v1004_v5 = vadd.f32 %v955_v1, %v474_v63  ;;  %v917_v6 = vadd.f32 %v916_v4, %v827_v2  ;;  %v465_v63 = vld [vmem:[#allocation2 + $0xb8] sm:$0xff] }
 0x134   : > { %1036 = vst [vmem:[#allocation2 + $0xe0] sm:$0xff] %v1004_v5  ;;  %v989_v7 = vadd.f32 %v917_v6, %v459_v3  ;;  %v481_v5 = vld [vmem:[#allocation2 + $0x28] sm:$0xff] }
 0x136   : > { %1021 = vst [vmem:[#allocation2 + $0x68] sm:$0xff] %v989_v7  ;;  %v867_v8 = vpop.f32.mrf.mxu2 }
 0x137   : > { %v956_v10 = vpop.f32.mrf.mxu3 }
 0x138   : > { %v957_v11 = vadd.f32 %v956_v10, %v867_v8  ;;  %v830_v12 = vpop.f32.mrf.mxu0 }
 0x139   : > { %v919_v14 = vpop.f32.mrf.mxu1 }
 0x13a   : > { %v1005_v15 = vadd.f32 %v957_v11, %v475_v9  ;;  %v920_v16 = vadd.f32 %v919_v14, %v830_v12  ;;  %v466_v9 = vld [vmem:[#allocation2 + $0x60] sm:$0xff] }
 0x13c   : > { %1037 = vst [vmem:[#allocation2 + $0x90] sm:$0xff] %v1005_v15  ;;  %v990_v17 = vadd.f32 %v920_v16, %v460_v13  ;;  %v482_v15 = vld [vmem:[#allocation2 + $0xa0] sm:$0xff] }
 0x13e   : > { %1022 = vst [vmem:[#allocation2 + $0x30] sm:$0xff] %v990_v17  ;;  %v870_v18 = vpop.f32.mrf.mxu2 }
 0x13f   : > { %v959_v20 = vpop.f32.mrf.mxu3 }
 0x140   : > { %v960_v21 = vadd.f32 %v959_v20, %v870_v18  ;;  %v832_v22 = vpop.f32.mrf.mxu0 }
 0x141   : > { %v921_v24 = vpop.f32.mrf.mxu1 }
 0x142   : > { %v1006_v25 = vadd.f32 %v960_v21, %v476_v19  ;;  %v922_v26 = vadd.f32 %v921_v24, %v832_v22  ;;  %v467_v19 = vld [vmem:[#allocation2 + $0xf0] sm:$0xff] }
 0x144   : > { %1038 = vst [vmem:[#allocation2 + $0x70] sm:$0xff] %v1006_v25  ;;  %v991_v27 = vadd.f32 %v922_v26, %v461_v23  ;;  %v483_v25 = vld [vmem:[#allocation2 + $0xf8] sm:$0xff] }
 0x146   : > { %1023 = vst [vmem:[#allocation2 + $0x48] sm:$0xff] %v991_v27  ;;  %v872_v28 = vpop.f32.mrf.mxu2 }
 0x147   : > { %v961_v30 = vpop.f32.mrf.mxu3 }
 0x148   : > { %v962_v31 = vadd.f32 %v961_v30, %v872_v28  ;;  %v835_v32 = vpop.f32.mrf.mxu0 }
 0x149   : > { %v924_v34 = vpop.f32.mrf.mxu1 }
 0x14a   : > { %v1007_v35 = vadd.f32 %v962_v31, %v477_v29  ;;  %v925_v36 = vadd.f32 %v924_v34, %v835_v32  ;;  %v468_v29 = vld [vmem:[#allocation2 + $0x8] sm:$0xff] }
 0x14c   : > { %1039 = vst [vmem:[#allocation2 + $0xc0] sm:$0xff] %v1007_v35  ;;  %v992_v37 = vadd.f32 %v925_v36, %v462_v33  ;;  %v484_v35 = vld [vmem:[#allocation2 + $0x20] sm:$0xff] }
 0x14e   : > { %1024 = vst [vmem:[#allocation2 + $0x80] sm:$0xff] %v992_v37  ;;  %v875_v38 = vpop.f32.mrf.mxu2 }
 0x14f   : > { %v964_v40 = vpop.f32.mrf.mxu3 }
 0x150   : > { %v965_v41 = vadd.f32 %v964_v40, %v875_v38  ;;  %v837_v42 = vpop.f32.mrf.mxu0 }
 0x151   : > { %v926_v44 = vpop.f32.mrf.mxu1 }
 0x152   : > { %v1008_v45 = vadd.f32 %v965_v41, %v478_v39  ;;  %v927_v46 = vadd.f32 %v926_v44, %v837_v42  ;;  %v469_v39 = vld [vmem:[#allocation2 + $0x78] sm:$0xff] }
 0x154   : > { %1040 = vst [vmem:[#allocation2 + $0xa8] sm:$0xff] %v1008_v45  ;;  %v993_v47 = vadd.f32 %v927_v46, %v463_v43  ;;  %v485_v45 = vld [vmem:[#allocation2 + $0x98] sm:$0xff] }
 0x156   : > { %1025 = vst [vmem:[#allocation2 + $0x88] sm:$0xff] %v993_v47  ;;  %v877_v48 = vpop.f32.mrf.mxu2 }
 0x157   : > { %v966_v50 = vpop.f32.mrf.mxu3 }
 0x158   : > { %v967_v51 = vadd.f32 %v966_v50, %v877_v48  ;;  %v840_v52 = vpop.f32.mrf.mxu0 }
 0x159   : > { %v929_v54 = vpop.f32.mrf.mxu1 }
 0x15a   : > { %v1009_v55 = vadd.f32 %v967_v51, %v479_v49  ;;  %v930_v56 = vadd.f32 %v929_v54, %v840_v52 }
 0x15c   : > { %1041 = vst [vmem:[#allocation2 + $0xd0] sm:$0xff] %v1009_v55  ;;  %v994_v57 = vadd.f32 %v930_v56, %v464_v53 }
 0x15e   : > { %1026 = vst [vmem:[#allocation2 + $0xe8] sm:$0xff] %v994_v57  ;;  %v880_v58 = vpop.f32.mrf.mxu2 }
 0x15f   : > { %v969_v60 = vpop.f32.mrf.mxu3 }
 0x160   : > { %v970_v61 = vadd.f32 %v969_v60, %v880_v58  ;;  %v842_v62 = vpop.f32.mrf.mxu0 }
 0x161   : > { %v931_v0 = vpop.f32.mrf.mxu1 }
 0x162   : > { %v1010_v1 = vadd.f32 %v970_v61, %v480_v59  ;;  %v932_v2 = vadd.f32 %v931_v0, %v842_v62 }
 0x164   : > { %1042 = vst [vmem:[#allocation2 + $0x10] sm:$0xff] %v1010_v1  ;;  %v995_v3 = vadd.f32 %v932_v2, %v465_v63 }
 0x166   : > { %1027 = vst [vmem:[#allocation2 + $0xb8] sm:$0xff] %v995_v3  ;;  %v882_v4 = vpop.f32.mrf.mxu2 }
 0x167   : > { %v971_v6 = vpop.f32.mrf.mxu3 }
 0x168   : > { %v972_v7 = vadd.f32 %v971_v6, %v882_v4  ;;  %v845_v8 = vpop.f32.mrf.mxu0 }
 0x169   : > { %v934_v10 = vpop.f32.mrf.mxu1 }
 0x16a   : > { %v1011_v11 = vadd.f32 %v972_v7, %v481_v5  ;;  %v935_v12 = vadd.f32 %v934_v10, %v845_v8 }
 0x16c   : > { %1043 = vst [vmem:[#allocation2 + $0x28] sm:$0xff] %v1011_v11  ;;  %v996_v13 = vadd.f32 %v935_v12, %v466_v9 }
 0x16e   : > { %1028 = vst [vmem:[#allocation2 + $0x60] sm:$0xff] %v996_v13  ;;  %v885_v14 = vpop.f32.mrf.mxu2 }
 0x16f   : > { %v974_v16 = vpop.f32.mrf.mxu3 }
 0x170   : > { %v975_v17 = vadd.f32 %v974_v16, %v885_v14  ;;  %v847_v18 = vpop.f32.mrf.mxu0 }
 0x171   : > { %v936_v20 = vpop.f32.mrf.mxu1 }
 0x172   : > { %v1012_v21 = vadd.f32 %v975_v17, %v482_v15  ;;  %v937_v22 = vadd.f32 %v936_v20, %v847_v18 }
 0x174   : > { %1044 = vst [vmem:[#allocation2 + $0xa0] sm:$0xff] %v1012_v21  ;;  %v997_v23 = vadd.f32 %v937_v22, %v467_v19 }
 0x176   : > { %1029 = vst [vmem:[#allocation2 + $0xf0] sm:$0xff] %v997_v23  ;;  %v887_v24 = vpop.f32.mrf.mxu2 }
 0x177   : > { %v976_v26 = vpop.f32.mrf.mxu3 }
 0x178   : > { %v977_v27 = vadd.f32 %v976_v26, %v887_v24  ;;  %v850_v28 = vpop.f32.mrf.mxu0 }
 0x179   : > { %v939_v30 = vpop.f32.mrf.mxu1 }
 0x17a   : > { %v1013_v31 = vadd.f32 %v977_v27, %v483_v25  ;;  %v940_v32 = vadd.f32 %v939_v30, %v850_v28 }
 0x17c   : > { %1045 = vst [vmem:[#allocation2 + $0xf8] sm:$0xff] %v1013_v31  ;;  %v998_v33 = vadd.f32 %v940_v32, %v468_v29 }
 0x17e   : > { %1030 = vst [vmem:[#allocation2 + $0x8] sm:$0xff] %v998_v33  ;;  %v890_v34 = vpop.f32.mrf.mxu2 }
 0x17f   : > { %v979_v36 = vpop.f32.mrf.mxu3 }
 0x180   : > { %v980_v37 = vadd.f32 %v979_v36, %v890_v34  ;;  %v852_v38 = vpop.f32.mrf.mxu0 }
 0x181   : > { %v941_v40 = vpop.f32.mrf.mxu1 }
 0x182   : > { %v1014_v41 = vadd.f32 %v980_v37, %v484_v35  ;;  %v942_v42 = vadd.f32 %v941_v40, %v852_v38 }
 0x184   : > { %1046 = vst [vmem:[#allocation2 + $0x20] sm:$0xff] %v1014_v41  ;;  %v999_v43 = vadd.f32 %v942_v42, %v469_v39 }
 0x186   : > { %1031 = vst [vmem:[#allocation2 + $0x78] sm:$0xff] %v999_v43  ;;  %v892_v44 = vpop.f32.mrf.mxu2 }
 0x187   : > { %v981_v46 = vpop.f32.mrf.mxu3 }
 0x188   : > { %v982_v47 = vadd.f32 %v981_v46, %v892_v44  ;;  %1051 = sbr.rel (%p1616_p0) target bundleno = 477 (0x1dd), region = 74 }
 0x18a   : > { %v1015_v48 = vadd.f32 %v982_v47, %v485_v45 }
 0x18c   : > { %1047 = vst [vmem:[#allocation2 + $0x98] sm:$0xff] %v1015_v48 }
 0x18d   : > { %v1052_v49 = vld [vmem:[#allocation2 + $0xb0] sm:$0xff]  ;;  %v1053_v50 = vld [vmem:[#allocation2] sm:$0xff]  ;;  %v1054_v51 = vld [vmem:[#allocation2 + $0xd8] sm:$0xff] }
 0x18e   : > { %v1670_v52 = vpack.c.bf16 %v1053_v50, %v1052_v49  ;;  %v1148_v53 = vadd.f32 %v1053_v50, %v1052_v49  ;;  %v1185_v54 = vmul.f32 %v1052_v49, %v1052_v49  ;;  %v1186_v55 = vmul.f32 %v1053_v50, %v1053_v50  ;;  %v1055_v56 = vld [vmem:[#allocation2 + $0x18] sm:$0xff]  ;;  %v1056_v57 = vld [vmem:[#allocation2 + $0x50] sm:$0xff]  ;;  %v1057_v58 = vld [vmem:[#allocation2 + $0x68] sm:$0xff] }
 0x18f   : > { %v1675_v59 = vpack.c.bf16 %v1055_v56, %v1054_v51  ;;  %v1187_v60 = vmul.f32 %v1054_v51, %v1054_v51  ;;  %v1680_v61 = vpack.c.bf16 %v1057_v58, %v1056_v57  ;;  %v1058_v62 = vld [vmem:[#allocation2 + $0x30] sm:$0xff]  ;;  %v1188_v1 = vmul.f32 %v1055_v56, %v1055_v56  ;;  %v1059_v2 = vld [vmem:[#allocation2 + $0x48] sm:$0xff]  ;;  %v1060_v3 = vld [vmem:[#allocation2 + $0x80] sm:$0xff] }
 0x190   : > { %1671 = vst [vmem:[%s2056_s12] sm:$0xff] %v1670_v52   ;;  %v1217_v63 = vadd.f32 %v1186_v55, %v1185_v54  ;;  %v1149_v0 = vadd.f32 %v1148_v53, %v1054_v51  ;;  %v1061_v4 = vld [vmem:[#allocation2 + $0x88] sm:$0xff]  ;;  %v1685_v5 = vpack.c.bf16 %v1059_v2, %v1058_v62  ;;  %v1189_v10 = vmul.f32 %v1056_v57, %v1056_v57  ;;  %v1063_v11 = vld [vmem:[#allocation2 + $0xb8] sm:$0xff]  ;;  %v1064_v12 = vld [vmem:[#allocation2 + $0x60] sm:$0xff] }
 0x191   : > { %1747 = vst [vmem:[%s2056_s12 + $0x8] sm:$0xff] %v1675_v59   ;;  %v1690_v6 = vpack.c.bf16 %v1061_v4, %v1060_v3  ;;  %v1062_v7 = vld [vmem:[#allocation2 + $0xe8] sm:$0xff]  ;;  %v2150_v13 = vld [vmem:[#allocation2 + $0xf0] sm:$0xff]  ;;  %v1190_v19 = vmul.f32 %v1057_v58, %v1057_v58  ;;  %v2157_v20 = vld [vmem:[#allocation2 + $0x78] sm:$0xff]  ;;  %v1191_v28 = vmul.f32 %v1058_v62, %v1058_v62  ;;  %v1192_v36 = vmul.f32 %v1059_v2, %v1059_v2 }
 0x192   : > { %v1150_v8 = vadd.f32 %v1149_v0, %v1055_v56  ;;  %v1218_v9 = vadd.f32 %v1217_v63, %v1187_v60  ;;  %1748 = vst [vmem:[%s2056_s12 + $0x10] sm:$0xff] %v1680_v61   ;;  %v1695_v14 = vpack.c.bf16 %v1063_v11, %v1062_v7  ;;  %v1700_v15 = vpack.c.bf16 %v2150_v13, %v1064_v12  ;;  %v2154_v16 = vld [vmem:[#allocation2 + $0x8] sm:$0xff]  ;;  %v2159_v21 = vld [vmem:[#allocation2 + $0x38] sm:$0xff]  ;;  %v2168_v25 = vld [vmem:[#allocation2 + $0x40] sm:$0xff] }
 0x193   : > { %1749 = vst [vmem:[%s2056_s12 + $0x18] sm:$0xff] %v1685_v5   ;;  %v2161_v22 = vld [vmem:[#allocation2 + $0x58] sm:$0xff]  ;;  %v1705_v23 = vpack.c.bf16 %v2157_v20, %v2154_v16  ;;  %v2171_v29 = vld [vmem:[#allocation2 + $0xc8] sm:$0xff]  ;;  %v2173_v30 = vld [vmem:[#allocation2 + $0xe0] sm:$0xff]  ;;  %v1193_v42 = vmul.f32 %v1060_v3, %v1060_v3  ;;  %v1194_v45 = vmul.f32 %v1061_v4, %v1061_v4  ;;  %v1195_v51 = vmul.f32 %v1062_v7, %v1062_v7 }
 0x194   : > { %v1219_v17 = vadd.f32 %v1218_v9, %v1188_v1  ;;  %v1151_v18 = vadd.f32 %v1150_v8, %v1056_v57  ;;  %1750 = vst [vmem:[%s2056_s12 + $0x20] sm:$0xff] %v1690_v6   ;;  %v1710_v24 = vpack.c.bf16 %v2161_v22, %v2159_v21  ;;  %v2175_v31 = vld [vmem:[#allocation2 + $0x90] sm:$0xff]  ;;  %v1715_v32 = vpack.c.bf16 %v2171_v29, %v2168_v25  ;;  %v2185_v38 = vld [vmem:[#allocation2 + $0xc0] sm:$0xff]  ;;  %v1076_v46 = vld [vmem:[#allocation2 + $0xa8] sm:$0xff] }
 0x195   : > { %1751 = vst [vmem:[%s2056_s12 + $0x28] sm:$0xff] %v1695_v14   ;;  %v1720_v33 = vpack.c.bf16 %v2175_v31, %v2173_v30  ;;  %v2183_v37 = vld [vmem:[#allocation2 + $0x70] sm:$0xff]  ;;  %v1196_v54 = vmul.f32 %v1063_v11, %v1063_v11  ;;  %v1079_v56 = vld [vmem:[#allocation2 + $0x28] sm:$0xff]  ;;  %v1197_v60 = vmul.f32 %v1064_v12, %v1064_v12  ;;  %v1198_v63 = vmul.f32 %v2150_v13, %v2150_v13  ;;  %v1080_v0 = vld [vmem:[#allocation2 + $0xa0] sm:$0xff] }
 0x196   : > { %v1152_v26 = vadd.f32 %v1151_v18, %v1057_v58  ;;  %v1220_v27 = vadd.f32 %v1219_v17, %v1189_v10  ;;  %1752 = vst [vmem:[%s2056_s12 + $0x30] sm:$0xff] %v1700_v15   ;;  %v1725_v39 = vpack.c.bf16 %v2185_v38, %v2183_v37  ;;  %v2192_v47 = vld [vmem:[#allocation2 + $0xd0] sm:$0xff]  ;;  %v1081_v1 = vld [vmem:[#allocation2 + $0xf8] sm:$0xff]  ;;  %v1199_v5 = vmul.f32 %v2154_v16, %v2154_v16  ;;  %v1082_v9 = vld [vmem:[#allocation2 + $0x20] sm:$0xff] }
 0x197   : > { %1753 = vst [vmem:[%s2056_s12 + $0x38] sm:$0xff] %v1705_v23   ;;  %v1730_v48 = vpack.c.bf16 %v2192_v47, %v1076_v46  ;;  %v1078_v55 = vld [vmem:[#allocation2 + $0x10] sm:$0xff]  ;;  %v1200_v8 = vmul.f32 %v2157_v20, %v2157_v20  ;;  %v1083_v10 = vld [vmem:[#allocation2 + $0x98] sm:$0xff]  ;;  %v1202_v18 = vmul.f32 %v2161_v22, %v2161_v22  ;;  %v1203_v23 = vmul.f32 %v2168_v25, %v2168_v25 }
 0x198   : > { %v1221_v34 = vadd.f32 %v1220_v27, %v1190_v19  ;;  %v1153_v35 = vadd.f32 %v1152_v26, %v1058_v62  ;;  %1754 = vst [vmem:[%s2056_s12 + $0x40] sm:$0xff] %v1710_v24   ;;  %v1735_v57 = vpack.c.bf16 %v1079_v56, %v1078_v55  ;;  %v1204_v26 = vmul.f32 %v2171_v29, %v2171_v29 }
 0x199   : > { %1755 = vst [vmem:[%s2056_s12 + $0x48] sm:$0xff] %v1715_v32  }
 0x19a   : > { %v1154_v40 = vadd.f32 %v1153_v35, %v1059_v2  ;;  %v1222_v41 = vadd.f32 %v1221_v34, %v1191_v28  ;;  %1756 = vst [vmem:[%s2056_s12 + $0x50] sm:$0xff] %v1720_v33   ;;  %v1740_v2 = vpack.c.bf16 %v1081_v1, %v1080_v0 }
 0x19b   : > { %1757 = vst [vmem:[%s2056_s12 + $0x58] sm:$0xff] %v1725_v39  }
 0x19c   : > { %v1223_v43 = vadd.f32 %v1222_v41, %v1192_v36  ;;  %v1155_v44 = vadd.f32 %v1154_v40, %v1060_v3  ;;  %1758 = vst [vmem:[%s2056_s12 + $0x60] sm:$0xff] %v1730_v48   ;;  %v1211_v48 = vmul.f32 %v1078_v55, %v1078_v55 }
 0x19d   : > { %1759 = vst [vmem:[%s2056_s12 + $0x68] sm:$0xff] %v1735_v57  }
 0x19e   : > { %v1156_v49 = vadd.f32 %v1155_v44, %v1061_v4  ;;  %v1224_v50 = vadd.f32 %v1223_v43, %v1193_v42  ;;  %1760 = vst [vmem:[%s2056_s12 + $0x70] sm:$0xff] %v1740_v2   ;;  %v1209_v42 = vmul.f32 %v1076_v46, %v1076_v46  ;;  %v1210_v44 = vmul.f32 %v2192_v47, %v2192_v47 }
 0x1a0   : > { %v1225_v52 = vadd.f32 %v1224_v50, %v1194_v45  ;;  %v1157_v53 = vadd.f32 %v1156_v49, %v1062_v7 }
 0x1a2   : > { %v1158_v58 = vadd.f32 %v1157_v53, %v1063_v11  ;;  %v1226_v59 = vadd.f32 %v1225_v52, %v1195_v51  ;;  %v1745_v11 = vpack.c.bf16 %v1083_v10, %v1082_v9  ;;  %v1212_v51 = vmul.f32 %v1079_v56, %v1079_v56 }
 0x1a3   : > { %v1213_v53 = vmul.f32 %v1080_v0, %v1080_v0 }
 0x1a4   : > { %v1227_v61 = vadd.f32 %v1226_v59, %v1196_v54  ;;  %v1159_v62 = vadd.f32 %v1158_v58, %v1064_v12  ;;  %1761 = vst [vmem:[%s2056_s12 + $0x78] sm:$0xff] %v1745_v11  }
 0x1a6   : > { %v1160_v3 = vadd.f32 %v1159_v62, %v2150_v13  ;;  %v1228_v4 = vadd.f32 %v1227_v61, %v1197_v60  ;;  %v1201_v13 = vmul.f32 %v2159_v21, %v2159_v21  ;;  %v1215_v60 = vmul.f32 %v1082_v9, %v1082_v9 }
 0x1a7   : > { %v1216_v62 = vmul.f32 %v1083_v10, %v1083_v10 }
 0x1a8   : > { %v1229_v6 = vadd.f32 %v1228_v4, %v1198_v63  ;;  %v1161_v7 = vadd.f32 %v1160_v3, %v2154_v16 }
 0x1aa   : > { %v1162_v12 = vadd.f32 %v1161_v7, %v2157_v20  ;;  %v1230_v14 = vadd.f32 %v1229_v6, %v1199_v5 }
 0x1ac   : > { %v1231_v15 = vadd.f32 %v1230_v14, %v1200_v8  ;;  %v1163_v17 = vadd.f32 %v1162_v12, %v2159_v21  ;;  %v1205_v21 = vmul.f32 %v2173_v30, %v2173_v30 }
 0x1ae   : > { %v1164_v16 = vadd.f32 %v1163_v17, %v2161_v22  ;;  %v1232_v19 = vadd.f32 %v1231_v15, %v1201_v13  ;;  %v1206_v22 = vmul.f32 %v2175_v31, %v2175_v31 }
 0x1b0   : > { %v1233_v24 = vadd.f32 %v1232_v19, %v1202_v18  ;;  %v1165_v20 = vadd.f32 %v1164_v16, %v2168_v25  ;;  %v1207_v25 = vmul.f32 %v2183_v37, %v2183_v37 }
 0x1b2   : > { %v1166_v27 = vadd.f32 %v1165_v20, %v2171_v29  ;;  %v1234_v28 = vadd.f32 %v1233_v24, %v1203_v23  ;;  %v1208_v29 = vmul.f32 %v2185_v38, %v2185_v38 }
 0x1b4   : > { %v1235_v32 = vadd.f32 %v1234_v28, %v1204_v26  ;;  %v1167_v33 = vadd.f32 %v1166_v27, %v2173_v30 }
 0x1b6   : > { %v1168_v34 = vadd.f32 %v1167_v33, %v2175_v31  ;;  %v1236_v35 = vadd.f32 %v1235_v32, %v1205_v21 }
 0x1b8   : > { %v1237_v36 = vadd.f32 %v1236_v35, %v1206_v22  ;;  %v1169_v39 = vadd.f32 %v1168_v34, %v2183_v37 }
 0x1ba   : > { %v1170_v40 = vadd.f32 %v1169_v39, %v2185_v38  ;;  %v1238_v41 = vadd.f32 %v1237_v36, %v1207_v25  ;;  %v1214_v38 = vmul.f32 %v1081_v1, %v1081_v1 }
 0x1bc   : > { %v1239_v30 = vadd.f32 %v1238_v41, %v1208_v29  ;;  %v1171_v43 = vadd.f32 %v1170_v40, %v1076_v46 }
 0x1be   : > { %v1172_v31 = vadd.f32 %v1171_v43, %v2192_v47  ;;  %v1240_v45 = vadd.f32 %v1239_v30, %v1209_v42 }
 0x1c0   : > { %v1241_v49 = vadd.f32 %v1240_v45, %v1210_v44  ;;  %v1173_v50 = vadd.f32 %v1172_v31, %v1078_v55  ;;  %v1254_v55 = vlaneseq }
 0x1c2   : > { %v1174_v37 = vadd.f32 %v1173_v50, %v1079_v56  ;;  %v1242_v52 = vadd.f32 %v1241_v49, %v1211_v48 }
 0x1c4   : > { %v1243_v54 = vadd.f32 %v1242_v52, %v1212_v51  ;;  %v1175_v57 = vadd.f32 %v1174_v37, %v1080_v0  ;;  %v1255_v0 = vshrl.u32 %v1254_v55, 7 }
 0x1c6   : > { %v1176_v58 = vadd.f32 %v1175_v57, %v1081_v1  ;;  %v1244_v59 = vadd.f32 %v1243_v54, %v1213_v53  ;;  %vm1257_vm0 = vcmp.eq.s32.totalorder %v1255_v0, 1  ;;  %vm1256_vm1 = vcmp.eq.s32.totalorder %v1255_v0, 0 }
 0x1c8   : > { %v1245_v46 = vadd.f32 %v1244_v59, %v1214_v38  ;;  %v1177_v61 = vadd.f32 %v1176_v58, %v1082_v9 }
 0x1ca   : > { %v1178_v63 = vadd.f32 %v1177_v61, %v1083_v10  ;;  %v1246_v2 = vadd.f32 %v1245_v46, %v1215_v60 }
 0x1cc   : > { %v1179_v47 = vrot.slane %v1178_v63, 4  ;;  %v1247_v3 = vadd.f32 %v1246_v2, %v1216_v62 }
 0x1ce   : > { %v1180_v4 = vadd.f32 %v1179_v47, %v1178_v63  ;;  %v1248_v5 = vrot.slane %v1247_v3, 4 }
 0x1d0   : > { %v1181_v56 = vrot.slane %v1180_v4, 2  ;;  %v1249_v6 = vadd.f32 %v1248_v5, %v1247_v3 }
 0x1d2   : > { %v1182_v7 = vadd.f32 %v1181_v56, %v1180_v4  ;;  %v1250_v8 = vrot.slane %v1249_v6, 2 }
 0x1d4   : > { %v1183_v11 = vrot.slane %v1182_v7, 1  ;;  %v1251_v1 = vadd.f32 %v1250_v8, %v1249_v6 }
 0x1d6   : > { %v1252_v12 = vrot.slane %v1251_v1, 1  ;;  %v1184_v14 = vadd.f32 %v1183_v11, %v1182_v7 }
 0x1d8   : > { %v1253_v9 = vadd.f32 %v1252_v12, %v1251_v1 }
 0x1da   : > { %v1258_v10 = vsel %vm1257_vm0, %v1253_v9, 0.0 }
 0x1db   : > { %v1259_v13 = vsel %vm1256_vm1, %v1184_v14, %v1258_v10 }
 0x1dc   : > { %1260 = vst [vmem:[%s2061_s6] sm:$0xff] %v1259_v13 }
 0x1dd PF: > { %s14_s18 = sadd.s32 1, %s1890_s18   ;;  %s2261_s12 = smov %s1870_s13 }
 0x1de   : > { %p11_p1 = scmp.ge.s32.totalorder %s14_s18, 8   ;;  %s2262_s13 = smov %s1964_s25 }
 0x1df   : > { %s2263_s14 = smov %s1882_s16  ;;  %s2264_s15 = smov %s1886_s17 }
 0x1e0   : > { %s2265_s16 = smov %s2268_s19  ;;  %s2266_s17 = smov %s2272_s20 }
 0x1e1   :  { %13 = sbr.rel (!%p11_p1) target bundleno = 4 (0x4), region = 124 }

// kernel: _lambda_.26
= control target key start
LH: loop header
LB: loop body
LE: loop exit
PB: predicated region body
PF: predicated region fallthrough
CT: control target
= control target key end

     0   :  { %v249_v15 = vmov 0   ;;  %s524_s0 = inlined_call_operand.vmem [shape: bf16[128,256], index: 0, kind: input, shape index: {}]   ;;  %s525_s1 = inlined_call_operand.vmem [shape: f32[1,256], index: 1, kind: input, shape index: {}]   ;;  %s526_s2 = inlined_call_operand.vmem [shape: f32[1,256], index: 2, kind: input, shape index: {}]   ;;  %s527_s3 = inlined_call_operand.vmem [shape: f32[1,256], index: 3, kind: input, shape index: {}]   ;;  %s528_s4 = inlined_call_operand.vmem [shape: bf16[128,256], index: 4, kind: output, shape index: {}]  }
   0x1   :  { %v17_v0 = vld [vmem:[%s524_s0] sm:$0xff]  ;;  %v18_v8 = vld [vmem:[%s524_s0 + $0x8] sm:$0xff]  ;;  %v19_v9 = vld [vmem:[%s524_s0 + $0x10] sm:$0xff] }
   0x2   :  { %v65_v1 = vld [vmem:[%s525_s1] sm:$0x3]  ;;  %v33_v3 = vunpack.c.l.bf16 %v17_v0  ;;  %v34_v4 = vunpack.c.h.bf16 %v17_v0  ;;  %v35_v12 = vunpack.c.l.bf16 %v18_v8  ;;  %v36_v17 = vunpack.c.h.bf16 %v18_v8  ;;  %v20_v26 = vld [vmem:[%s524_s0 + $0x18] sm:$0xff]  ;;  %v22_v48 = vld [vmem:[%s524_s0 + $0x28] sm:$0xff] }
   0x3   :  { %v103_v2 = vld [vmem:[%s526_s2] sm:$0x3]  ;;  %v284_v5 = vperm.slane %v65_v1, 0  ;;  %v286_v6 = vperm.slane %v65_v1, 1  ;;  %v37_v21 = vunpack.c.l.bf16 %v19_v9  ;;  %v38_v25 = vunpack.c.h.bf16 %v19_v9  ;;  %v23_v57 = vld [vmem:[%s524_s0 + $0x30] sm:$0xff] }
   0x4   :  { %v141_v7 = vld [vmem:[%s527_s3] sm:$0x3]  ;;  %v297_v10 = vperm.slane %v103_v2, 0  ;;  %v299_v11 = vperm.slane %v103_v2, 1  ;;  %v39_v37 = vunpack.c.l.bf16 %v20_v26  ;;  %v40_v38 = vunpack.c.h.bf16 %v20_v26 }
   0x5   :  { %vm142_vm0 = vcmp.gt.f32.partialorder %v141_v7, 0.0  ;;  %v71_v13 = vmul.f32 %v284_v5, %v33_v3  ;;  %v72_v14 = vmul.f32 %v286_v6, %v34_v4  ;;  %v73_v20 = vmul.f32 %v284_v5, %v35_v12  ;;  %v21_v39 = vld [vmem:[%s524_s0 + $0x20] sm:$0xff] }
   0x6   :  { %v175_v16 = vsel %vm142_vm0, 1, %v249_v15  ;;  %v74_v24 = vmul.f32 %v286_v6, %v36_v17  ;;  %v75_v30 = vmul.f32 %v284_v5, %v37_v21  ;;  %v76_v34 = vmul.f32 %v286_v6, %v38_v25 }
   0x7   :  { %v176_v18 = vperm.slane %v175_v16, 0  ;;  %v177_v19 = vperm.slane %v175_v16, 1  ;;  %v109_v22 = vadd.f32 %v297_v10, %v71_v13  ;;  %v110_v23 = vadd.f32 %v299_v11, %v72_v14  ;;  %v24_v14 = vld [vmem:[%s524_s0 + $0x38] sm:$0xff] }
   0x8   :  { %v111_v29 = vadd.f32 %v297_v10, %v73_v20  ;;  %v112_v33 = vadd.f32 %v299_v11, %v74_v24  ;;  %v113_v36 = vadd.f32 %v297_v10, %v75_v30  ;;  %v114_v43 = vadd.f32 %v299_v11, %v76_v34 }
   0x9   :  { %vm310_vm1 = vcmp.eq.s32.totalorder %v176_v18, 1  ;;  %vm314_vm2 = vcmp.eq.s32.totalorder %v177_v19, 1  ;;  %v143_v31 = vmax.f32 %v109_v22, 0.0  ;;  %v144_v32 = vmax.f32 %v110_v23, 0.0 }
   0xa   :  { %v145_v35 = vmax.f32 %v111_v29, 0.0  ;;  %v146_v42 = vmax.f32 %v112_v33, 0.0  ;;  %v147_v46 = vmax.f32 %v113_v36, 0.0  ;;  %v77_v47 = vmul.f32 %v284_v5, %v39_v37 }
   0xb   :  { %v180_v40 = vsel %vm310_vm1, %v143_v31, %v109_v22  ;;  %v181_v41 = vsel %vm314_vm2, %v144_v32, %v110_v23  ;;  %v148_v50 = vmax.f32 %v114_v43, 0.0  ;;  %v78_v51 = vmul.f32 %v286_v6, %v40_v38  ;;  %v26_v38 = vld [vmem:[%s524_s0 + $0x48] sm:$0xff] }
   0xc   :  { %v212_v44 = vpack.c.bf16 %v181_v41, %v180_v40  ;;  %v182_v45 = vsel %vm310_vm1, %v145_v35, %v111_v29  ;;  %v183_v49 = vsel %vm314_vm2, %v146_v42, %v112_v33  ;;  %v41_v52 = vunpack.c.l.bf16 %v21_v39  ;;  %v25_v29 = vld [vmem:[%s524_s0 + $0x40] sm:$0xff] }
   0xd   :  { %v213_v53 = vpack.c.bf16 %v183_v49, %v182_v45  ;;  %v184_v54 = vsel %vm310_vm1, %v147_v46, %v113_v36  ;;  %v115_v55 = vadd.f32 %v297_v10, %v77_v47  ;;  %v42_v56 = vunpack.c.h.bf16 %v21_v39  ;;  %v27_v47 = vld [vmem:[%s524_s0 + $0x50] sm:$0xff] }
   0xe   :  { %228 = vst [vmem:[%s528_s4] sm:$0xff] %v212_v44  ;;  %v185_v58 = vsel %vm314_vm2, %v148_v50, %v114_v43  ;;  %v116_v59 = vadd.f32 %v299_v11, %v78_v51  ;;  %v79_v60 = vmul.f32 %v284_v5, %v41_v52  ;;  %v43_v61 = vunpack.c.l.bf16 %v22_v48 }
   0xf   :  { %229 = vst [vmem:[%s528_s4 + $0x8] sm:$0xff] %v213_v53  ;;  %v214_v62 = vpack.c.bf16 %v185_v58, %v184_v54  ;;  %v149_v63 = vmax.f32 %v115_v55, 0.0  ;;  %v80_v0 = vmul.f32 %v286_v6, %v42_v56  ;;  %v44_v1 = vunpack.c.h.bf16 %v22_v48 }
  0x10   :  { %v150_v2 = vmax.f32 %v116_v59, 0.0  ;;  %v117_v3 = vadd.f32 %v297_v10, %v79_v60  ;;  %v81_v4 = vmul.f32 %v284_v5, %v43_v61  ;;  %v45_v7 = vunpack.c.l.bf16 %v23_v57 }
  0x11   :  { %230 = vst [vmem:[%s528_s4 + $0x10] sm:$0xff] %v214_v62  ;;  %v186_v8 = vsel %vm310_vm1, %v149_v63, %v115_v55  ;;  %v118_v9 = vadd.f32 %v299_v11, %v80_v0  ;;  %v82_v12 = vmul.f32 %v286_v6, %v44_v1  ;;  %v46_v13 = vunpack.c.h.bf16 %v23_v57  ;;  %v28_v0 = vld [vmem:[%s524_s0 + $0x58] sm:$0xff] }
  0x12   :  { %v187_v15 = vsel %vm314_vm2, %v150_v2, %v116_v59  ;;  %v151_v16 = vmax.f32 %v117_v3, 0.0  ;;  %v119_v17 = vadd.f32 %v297_v10, %v81_v4  ;;  %v83_v18 = vmul.f32 %v284_v5, %v45_v7 }
  0x13   :  { %v215_v19 = vpack.c.bf16 %v187_v15, %v186_v8  ;;  %v152_v20 = vmax.f32 %v118_v9, 0.0  ;;  %v120_v21 = vadd.f32 %v299_v11, %v82_v12  ;;  %v84_v22 = vmul.f32 %v286_v6, %v46_v13 }
  0x14   :  { %v188_v23 = vsel %vm310_vm1, %v151_v16, %v117_v3  ;;  %v153_v24 = vmax.f32 %v119_v17, 0.0  ;;  %v121_v25 = vadd.f32 %v297_v10, %v83_v18  ;;  %v47_v26 = vunpack.c.l.bf16 %v24_v14 }
  0x15   :  { %231 = vst [vmem:[%s528_s4 + $0x18] sm:$0xff] %v215_v19  ;;  %v189_v30 = vsel %vm314_vm2, %v152_v20, %v118_v9  ;;  %v154_v31 = vmax.f32 %v120_v21, 0.0  ;;  %v122_v32 = vadd.f32 %v299_v11, %v84_v22  ;;  %v48_v33 = vunpack.c.h.bf16 %v24_v14 }
  0x16   :  { %v216_v34 = vpack.c.bf16 %v189_v30, %v188_v23  ;;  %v190_v35 = vsel %vm310_vm1, %v153_v24, %v119_v17  ;;  %v155_v36 = vmax.f32 %v121_v25, 0.0  ;;  %v85_v37 = vmul.f32 %v284_v5, %v47_v26  ;;  %v29_v17 = vld [vmem:[%s524_s0 + $0x60] sm:$0xff]  ;;  %v30_v26 = vld [vmem:[%s524_s0 + $0x68] sm:$0xff] }
  0x17   :  { %v191_v39 = vsel %vm314_vm2, %v154_v31, %v120_v21  ;;  %v156_v40 = vmax.f32 %v122_v32, 0.0  ;;  %v86_v41 = vmul.f32 %v286_v6, %v48_v33  ;;  %v49_v42 = vunpack.c.l.bf16 %v25_v29 }
  0x18   :  { %232 = vst [vmem:[%s528_s4 + $0x20] sm:$0xff] %v216_v34  ;;  %v217_v43 = vpack.c.bf16 %v191_v39, %v190_v35  ;;  %v192_v44 = vsel %vm310_vm1, %v155_v36, %v121_v25  ;;  %v123_v45 = vadd.f32 %v297_v10, %v85_v37  ;;  %v50_v46 = vunpack.c.h.bf16 %v25_v29  ;;  %v31_v37 = vld [vmem:[%s524_s0 + $0x70] sm:$0xff] }
  0x19   :  { %v193_v48 = vsel %vm314_vm2, %v156_v40, %v122_v32  ;;  %v124_v49 = vadd.f32 %v299_v11, %v86_v41  ;;  %v87_v50 = vmul.f32 %v284_v5, %v49_v42  ;;  %v51_v51 = vunpack.c.l.bf16 %v26_v38 }
  0x1a   :  { %233 = vst [vmem:[%s528_s4 + $0x28] sm:$0xff] %v217_v43  ;;  %v218_v52 = vpack.c.bf16 %v193_v48, %v192_v44  ;;  %v157_v53 = vmax.f32 %v123_v45, 0.0  ;;  %v88_v54 = vmul.f32 %v286_v6, %v50_v46  ;;  %v52_v55 = vunpack.c.h.bf16 %v26_v38 }
  0x1b   :  { %v158_v56 = vmax.f32 %v124_v49, 0.0  ;;  %v125_v57 = vadd.f32 %v297_v10, %v87_v50  ;;  %v89_v58 = vmul.f32 %v284_v5, %v51_v51  ;;  %v53_v59 = vunpack.c.l.bf16 %v27_v47 }
  0x1c   :  { %234 = vst [vmem:[%s528_s4 + $0x30] sm:$0xff] %v218_v52  ;;  %v194_v60 = vsel %vm310_vm1, %v157_v53, %v123_v45  ;;  %v126_v61 = vadd.f32 %v299_v11, %v88_v54  ;;  %v90_v62 = vmul.f32 %v286_v6, %v52_v55  ;;  %v54_v63 = vunpack.c.h.bf16 %v27_v47  ;;  %v32_v54 = vld [vmem:[%s524_s0 + $0x78] sm:$0xff] }
  0x1d   :  { %v195_v1 = vsel %vm314_vm2, %v158_v56, %v124_v49  ;;  %v159_v2 = vmax.f32 %v125_v57, 0.0  ;;  %v127_v3 = vadd.f32 %v297_v10, %v89_v58  ;;  %v91_v4 = vmul.f32 %v284_v5, %v53_v59 }
  0x1e   :  { %v219_v7 = vpack.c.bf16 %v195_v1, %v194_v60  ;;  %v160_v8 = vmax.f32 %v126_v61, 0.0  ;;  %v128_v9 = vadd.f32 %v299_v11, %v90_v62  ;;  %v92_v12 = vmul.f32 %v286_v6, %v54_v63 }
  0x1f   :  { %v196_v13 = vsel %vm310_vm1, %v159_v2, %v125_v57  ;;  %v161_v14 = vmax.f32 %v127_v3, 0.0  ;;  %v129_v15 = vadd.f32 %v297_v10, %v91_v4  ;;  %v55_v16 = vunpack.c.l.bf16 %v28_v0 }
  0x20   :  { %235 = vst [vmem:[%s528_s4 + $0x38] sm:$0xff] %v219_v7  ;;  %v197_v18 = vsel %vm314_vm2, %v160_v8, %v126_v61  ;;  %v162_v19 = vmax.f32 %v128_v9, 0.0  ;;  %v130_v20 = vadd.f32 %v299_v11, %v92_v12  ;;  %v56_v21 = vunpack.c.h.bf16 %v28_v0 }
  0x21   :  { %v220_v22 = vpack.c.bf16 %v197_v18, %v196_v13  ;;  %v198_v23 = vsel %vm310_vm1, %v161_v14, %v127_v3  ;;  %v163_v24 = vmax.f32 %v129_v15, 0.0  ;;  %v93_v25 = vmul.f32 %v284_v5, %v55_v16 }
  0x22   :  { %v199_v29 = vsel %vm314_vm2, %v162_v19, %v128_v9  ;;  %v164_v30 = vmax.f32 %v130_v20, 0.0  ;;  %v94_v31 = vmul.f32 %v286_v6, %v56_v21  ;;  %v57_v32 = vunpack.c.l.bf16 %v29_v17 }
  0x23   :  { %236 = vst [vmem:[%s528_s4 + $0x40] sm:$0xff] %v220_v22  ;;  %v221_v33 = vpack.c.bf16 %v199_v29, %v198_v23  ;;  %v200_v34 = vsel %vm310_vm1, %v163_v24, %v129_v15  ;;  %v131_v35 = vadd.f32 %v297_v10, %v93_v25  ;;  %v58_v36 = vunpack.c.h.bf16 %v29_v17 }
  0x24   :  { %v201_v38 = vsel %vm314_vm2, %v164_v30, %v130_v20  ;;  %v132_v39 = vadd.f32 %v299_v11, %v94_v31  ;;  %v95_v40 = vmul.f32 %v284_v5, %v57_v32  ;;  %v59_v41 = vunpack.c.l.bf16 %v30_v26 }
  0x25   :  { %237 = vst [vmem:[%s528_s4 + $0x48] sm:$0xff] %v221_v33  ;;  %v222_v42 = vpack.c.bf16 %v201_v38, %v200_v34  ;;  %v165_v43 = vmax.f32 %v131_v35, 0.0  ;;  %v96_v44 = vmul.f32 %v286_v6, %v58_v36  ;;  %v60_v45 = vunpack.c.h.bf16 %v30_v26 }
  0x26   :  { %v166_v46 = vmax.f32 %v132_v39, 0.0  ;;  %v133_v47 = vadd.f32 %v297_v10, %v95_v40  ;;  %v97_v48 = vmul.f32 %v284_v5, %v59_v41  ;;  %v61_v49 = vunpack.c.l.bf16 %v31_v37 }
  0x27   :  { %238 = vst [vmem:[%s528_s4 + $0x50] sm:$0xff] %v222_v42  ;;  %v202_v50 = vsel %vm310_vm1, %v165_v43, %v131_v35  ;;  %v134_v51 = vadd.f32 %v299_v11, %v96_v44  ;;  %v98_v52 = vmul.f32 %v286_v6, %v60_v45  ;;  %v62_v53 = vunpack.c.h.bf16 %v31_v37 }
  0x28   :  { %v203_v55 = vsel %vm314_vm2, %v166_v46, %v132_v39  ;;  %v167_v56 = vmax.f32 %v133_v47, 0.0  ;;  %v135_v57 = vadd.f32 %v297_v10, %v97_v48  ;;  %v99_v58 = vmul.f32 %v284_v5, %v61_v49 }
  0x29   :  { %v223_v59 = vpack.c.bf16 %v203_v55, %v202_v50  ;;  %v168_v60 = vmax.f32 %v134_v51, 0.0  ;;  %v136_v61 = vadd.f32 %v299_v11, %v98_v52  ;;  %v100_v62 = vmul.f32 %v286_v6, %v62_v53 }
  0x2a   :  { %v204_v63 = vsel %vm310_vm1, %v167_v56, %v133_v47  ;;  %v169_v0 = vmax.f32 %v135_v57, 0.0  ;;  %v137_v1 = vadd.f32 %v297_v10, %v99_v58  ;;  %v63_v2 = vunpack.c.l.bf16 %v32_v54 }
  0x2b   :  { %239 = vst [vmem:[%s528_s4 + $0x58] sm:$0xff] %v223_v59  ;;  %v205_v3 = vsel %vm314_vm2, %v168_v60, %v134_v51  ;;  %v170_v4 = vmax.f32 %v136_v61, 0.0  ;;  %v138_v7 = vadd.f32 %v299_v11, %v100_v62  ;;  %v64_v8 = vunpack.c.h.bf16 %v32_v54 }
  0x2c   :  { %v224_v9 = vpack.c.bf16 %v205_v3, %v204_v63  ;;  %v206_v12 = vsel %vm310_vm1, %v169_v0, %v135_v57  ;;  %v171_v13 = vmax.f32 %v137_v1, 0.0  ;;  %v101_v14 = vmul.f32 %v284_v5, %v63_v2 }
  0x2d   :  { %v207_v15 = vsel %vm314_vm2, %v170_v4, %v136_v61  ;;  %v172_v16 = vmax.f32 %v138_v7, 0.0  ;;  %v102_v17 = vmul.f32 %v286_v6, %v64_v8 }
  0x2e   :  { %240 = vst [vmem:[%s528_s4 + $0x60] sm:$0xff] %v224_v9  ;;  %v225_v18 = vpack.c.bf16 %v207_v15, %v206_v12  ;;  %v208_v19 = vsel %vm310_vm1, %v171_v13, %v137_v1  ;;  %v139_v20 = vadd.f32 %v297_v10, %v101_v14 }
  0x2f   :  { %v209_v21 = vsel %vm314_vm2, %v172_v16, %v138_v7  ;;  %v140_v5 = vadd.f32 %v299_v11, %v102_v17 }
  0x30   :  { %241 = vst [vmem:[%s528_s4 + $0x68] sm:$0xff] %v225_v18  ;;  %v226_v6 = vpack.c.bf16 %v209_v21, %v208_v19  ;;  %v173_v22 = vmax.f32 %v139_v20, 0.0 }
  0x31   :  { %v174_v23 = vmax.f32 %v140_v5, 0.0 }
  0x32   :  { %242 = vst [vmem:[%s528_s4 + $0x70] sm:$0xff] %v226_v6  ;;  %v210_v24 = vsel %vm310_vm1, %v173_v22, %v139_v20 }
  0x33   :  { %v211_v10 = vsel %vm314_vm2, %v174_v23, %v140_v5 }
  0x34   :  { %v227_v25 = vpack.c.bf16 %v211_v10, %v210_v24 }
  0x36   :  { %243 = vst [vmem:[%s528_s4 + $0x78] sm:$0xff] %v227_v25 }

// kernel: _lambda_.25
= control target key start
LH: loop header
LB: loop body
LE: loop exit
PB: predicated region body
PF: predicated region fallthrough
CT: control target
= control target key end

     0   :  { %s1703_s12 = smov 0   ;;  %s1705_s13 = smov 0   ;;  %s1942_s0 = inlined_call_operand.vmem [shape: bf16[128,768], index: 0, kind: input, shape index: {}]   ;;  %s1943_s1 = inlined_call_operand.vmem [shape: bf16[768,256], index: 1, kind: input, shape index: {}]   ;;  %s1944_s2 = inlined_call_operand.vmem [shape: bf16[128,256], index: 2, kind: output, shape index: {0}]   ;;  %s1945_s3 = inlined_call_operand.vmem [shape: f32[8,256], index: 3, kind: output, shape index: {1}]  }
   0x1   :  { %s1707_s14 = smov 0   ;;  %s1709_s15 = smov 0  }
   0x2   :  { %s1711_s16 = smov 0  }
   0x3 LB: > { %s26_s17 = sadd.s32 1, %s1676_s15  ;;  %p49_p1 = scmp.ne.s32.totalorder %s1668_s13, %s1664_s12  ;;  %s1680_s16 = sphi %s1711_s16, %s14_s16   ;;  %s1676_s15 = sphi %s1709_s15, %s1949_s15   ;;  %s1672_s14 = sphi %s1707_s14, %s1948_s14   ;;  %s1668_s13 = sphi %s1705_s13, %s1947_s13   ;;  %s1664_s12 = sphi %s1703_s12, %s1946_s12  }
   0x4   : > { %p27_p0 = scmp.ge.s32.totalorder %s26_s17, 3  ;;  %p50_p2 = scmp.eq.s32.totalorder %s1680_s16, 0 }
   0x5   : > { %s42_s19 = sadd.s32 1, %s1668_s13  ;;  %p1342_p5 = scmp.ge.s32.totalorder %s1680_s16, 3 }
   0x6   : > { %s1951_s17 = smov (%p27_p0, %s26_s17), 0  ;;  %p51_p3 = por %p50_p2, %p49_p1 }
   0x7   : > { %s38_s18 = ssub.s32 %s1676_s15, %s1951_s17  ;;  %159 = sbr.rel (%p1342_p5) target bundleno = 32 (0x20), region = 16 }
   0x8   : > { %p40_p4 = scmp.eq.s32.totalorder %s38_s18, 0 }
   0xa   : > { %s1738_s20 = scalar_select %p40_p4, %s1668_s13, %s42_s19  }
   0xc   : > { %162 = sbr.rel (!%p51_p3) target bundleno = 32 (0x20), region = 20  ;;  %s164_s21 = sand.u32 (%p51_p3), 1, %s1668_s13  }
   0xd   : > { %s1551_s22 = sshll.u32 (%p51_p3), %s1676_s15, 3  ;;  %s1343_s23 = sshll.u32 (%p51_p3), %s164_s21, 7 }
   0xe   : > { %s1746_s26 = scalar_lea.vmem (%p51_p3), %s1942_s0, %s1551_s22  ;;  %s166_s27 = scalar_lea.vmem (%p51_p3), [#allocation3], %s1343_s23 }
   0xf   : > { %v231_v0 = vld [vmem:[%s1746_s26] sm:$0xff] (%p51_p3)  ;;  %v233_v1 = vld [vmem:[%s1746_s26 + $0x18] sm:$0xff] (%p51_p3)  ;;  %v235_v2 = vld [vmem:[%s1746_s26 + $0x30] sm:$0xff] (%p51_p3) }
  0x10   : > { %232 = vst [vmem:[%s166_s27] sm:$0xff] (%p51_p3), %v231_v0  ;;  %v237_v3 = vld [vmem:[%s1746_s26 + $0x48] sm:$0xff] (%p51_p3)  ;;  %v239_v4 = vld [vmem:[%s1746_s26 + $0x60] sm:$0xff] (%p51_p3)  ;;  %v241_v5 = vld [vmem:[%s1746_s26 + $0x78] sm:$0xff] (%p51_p3) }
  0x11   : > { %234 = vst [vmem:[%s166_s27 + $0x8] sm:$0xff] %v233_v1  ;;  %v243_v6 = vld [vmem:[%s1746_s26 + $0x90] sm:$0xff]  ;;  %v245_v7 = vld [vmem:[%s1746_s26 + $0xa8] sm:$0xff]  ;;  %v247_v8 = vld [vmem:[%s1746_s26 + $0xc0] sm:$0xff] }
  0x12   : > { %236 = vst [vmem:[%s166_s27 + $0x10] sm:$0xff] %v235_v2  ;;  %v249_v9 = vld [vmem:[%s1746_s26 + $0xd8] sm:$0xff]  ;;  %v251_v10 = vld [vmem:[%s1746_s26 + $0xf0] sm:$0xff]  ;;  %v253_v11 = vld [vmem:[%s1746_s26 + $0x108] sm:$0xff] }
  0x13   : > { %238 = vst [vmem:[%s166_s27 + $0x18] sm:$0xff] %v237_v3  ;;  %v255_v12 = vld [vmem:[%s1746_s26 + $0x120] sm:$0xff]  ;;  %v257_v13 = vld [vmem:[%s1746_s26 + $0x138] sm:$0xff]  ;;  %v259_v14 = vld [vmem:[%s1746_s26 + $0x150] sm:$0xff] }
  0x14   : > { %240 = vst [vmem:[%s166_s27 + $0x20] sm:$0xff] %v239_v4  ;;  %v261_v15 = vld [vmem:[%s1746_s26 + $0x168] sm:$0xff] }
  0x15   : > { %242 = vst [vmem:[%s166_s27 + $0x28] sm:$0xff] %v241_v5 }
  0x16   : > { %244 = vst [vmem:[%s166_s27 + $0x30] sm:$0xff] %v243_v6 }
  0x17   : > { %246 = vst [vmem:[%s166_s27 + $0x38] sm:$0xff] %v245_v7 }
  0x18   : > { %248 = vst [vmem:[%s166_s27 + $0x40] sm:$0xff] %v247_v8 }
  0x19   : > { %250 = vst [vmem:[%s166_s27 + $0x48] sm:$0xff] %v249_v9 }
  0x1a   : > { %252 = vst [vmem:[%s166_s27 + $0x50] sm:$0xff] %v251_v10 }
  0x1b   : > { %254 = vst [vmem:[%s166_s27 + $0x58] sm:$0xff] %v253_v11 }
  0x1c   : > { %256 = vst [vmem:[%s166_s27 + $0x60] sm:$0xff] %v255_v12 }
  0x1d   : > { %258 = vst [vmem:[%s166_s27 + $0x68] sm:$0xff] %v257_v13 }
  0x1e   : > { %260 = vst [vmem:[%s166_s27 + $0x70] sm:$0xff] %v259_v14 }
  0x1f   : > { %262 = vst [vmem:[%s166_s27 + $0x78] sm:$0xff] %v261_v15 }
  0x20 PF: > { %p1346_p6 = scmp.ge.s32.totalorder %s1680_s16, 1  ;;  %p282_p7 = scmp.lt.s32.totalorder %s1680_s16, 4 }
  0x22   : > { %p283_p8 = pnand %p1346_p6, %p282_p7 }
  0x23   : > { %s289_s28 = sand.u32 (!%p283_p8), 1, %s1664_s12   ;;  %s1348_s29 = sshll.u32 (!%p283_p8), %s1672_s14, 5 }
  0x24   : > { %286 = sbr.rel (%p283_p8) target bundleno = 422 (0x1a6), region = 62  ;;  %s1347_s30 = sshll.u32 (!%p283_p8), %s289_s28, 7 }
  0x25   : > { %p340_p9 = scmp.lt.s32.totalorder (!%p283_p8), %s1348_s29, 95  ;;  %s1773_s8 = scalar_lea.vmem (!%p283_p8), [#allocation3], %s1347_s30 }
  0x26   : > { %p1351_p10 = scmp.ne.s32.totalorder (!%p283_p8), %s1672_s14, 0 }
  0x29   : > { %s1953_s29 = smov (!%p340_p9, %s1348_s29), 95  ;;  %375 = sbr.rel (%p1351_p10) target bundleno = 79 (0x4f), region = 70 }
  0x2a   : > { %s1552_s4 = sshll.u32 %s1953_s29, 3 }
  0x2b   : > { %s1771_s7 = scalar_lea.vmem %s1943_s1, %s1552_s4 }
  0x2e   : > { %v1682_v16 = vmov 0.0  }
  0x2f   : > { %376 = vst [vmem:[#allocation2 + $0xb0] sm:$0xff] %v1682_v16 }
  0x30   : > { %377 = vst [vmem:[#allocation2] sm:$0xff] %v1682_v16 }
  0x31   : > { %378 = vst [vmem:[#allocation2 + $0xd8] sm:$0xff] %v1682_v16 }
  0x32   : > { %379 = vst [vmem:[#allocation2 + $0x18] sm:$0xff] %v1682_v16 }
  0x33   : > { %380 = vst [vmem:[#allocation2 + $0x50] sm:$0xff] %v1682_v16 }
  0x34   : > { %381 = vst [vmem:[#allocation2 + $0x68] sm:$0xff] %v1682_v16 }
  0x35   : > { %382 = vst [vmem:[#allocation2 + $0x30] sm:$0xff] %v1682_v16 }
  0x36   : > { %383 = vst [vmem:[#allocation2 + $0x48] sm:$0xff] %v1682_v16 }
  0x37   : > { %384 = vst [vmem:[#allocation2 + $0x80] sm:$0xff] %v1682_v16 }
  0x38   : > { %385 = vst [vmem:[#allocation2 + $0x88] sm:$0xff] %v1682_v16 }
  0x39   : > { %386 = vst [vmem:[#allocation2 + $0xe8] sm:$0xff] %v1682_v16 }
  0x3a   : > { %387 = vst [vmem:[#allocation2 + $0xb8] sm:$0xff] %v1682_v16 }
  0x3b   : > { %388 = vst [vmem:[#allocation2 + $0x60] sm:$0xff] %v1682_v16 }
  0x3c   : > { %389 = vst [vmem:[#allocation2 + $0xf0] sm:$0xff] %v1682_v16 }
  0x3d   : > { %390 = vst [vmem:[#allocation2 + $0x8] sm:$0xff] %v1682_v16 }
  0x3e   : > { %391 = vst [vmem:[#allocation2 + $0x78] sm:$0xff] %v1682_v16 }
  0x3f   : > { %392 = vst [vmem:[#allocation2 + $0x38] sm:$0xff] %v1682_v16 }
  0x40   : > { %393 = vst [vmem:[#allocation2 + $0x58] sm:$0xff] %v1682_v16 }
  0x41   : > { %394 = vst [vmem:[#allocation2 + $0x40] sm:$0xff] %v1682_v16 }
  0x42   : > { %395 = vst [vmem:[#allocation2 + $0xc8] sm:$0xff] %v1682_v16 }
  0x43   : > { %396 = vst [vmem:[#allocation2 + $0xe0] sm:$0xff] %v1682_v16 }
  0x44   : > { %397 = vst [vmem:[#allocation2 + $0x90] sm:$0xff] %v1682_v16 }
  0x45   : > { %398 = vst [vmem:[#allocation2 + $0x70] sm:$0xff] %v1682_v16 }
  0x46   : > { %399 = vst [vmem:[#allocation2 + $0xc0] sm:$0xff] %v1682_v16 }
  0x47   : > { %400 = vst [vmem:[#allocation2 + $0xa8] sm:$0xff] %v1682_v16 }
  0x48   : > { %401 = vst [vmem:[#allocation2 + $0xd0] sm:$0xff] %v1682_v16 }
  0x49   : > { %402 = vst [vmem:[#allocation2 + $0x10] sm:$0xff] %v1682_v16 }
  0x4a   : > { %403 = vst [vmem:[#allocation2 + $0x28] sm:$0xff] %v1682_v16 }
  0x4b   : > { %404 = vst [vmem:[#allocation2 + $0xa0] sm:$0xff] %v1682_v16 }
  0x4c   : > { %405 = vst [vmem:[#allocation2 + $0xf8] sm:$0xff] %v1682_v16 }
  0x4d   : > { %406 = vst [vmem:[#allocation2 + $0x20] sm:$0xff] %v1682_v16 }
  0x4e   : > { %407 = vst [vmem:[#allocation2 + $0x98] sm:$0xff] %v1682_v16 }
  0x4f PF: > { %v1474_v17 = vld [vmem:[%s1771_s7 + $0x70] sm:$0xf]  ;;  %v1584_v18 = vld [vmem:[%s1771_s7 + $0x74] sm:$0xf0]  ;;  %v1583_v22 = vld [vmem:[%s1771_s7 + $0x74] sm:$0xf] }
  0x50   : > { %v1538_v19 = vld [vmem:[%s1771_s7 + $0xf0] sm:$0xf]  ;;  %v1475_v20 = vor.u32 %v1584_v18, %v1474_v17  ;;  %v1600_v21 = vld [vmem:[%s1771_s7 + $0xf4] sm:$0xf0]  ;;  %v1476_v23 = vld [vmem:[%s1771_s7 + $0x78] sm:$0xf0] }
  0x51   : > { %v1539_v24 = vor.u32 %v1600_v21, %v1538_v19  ;;  %v1479_v25 = vor.u32 %v1583_v22, %v1476_v23  ;;  %v1599_v26 = vld [vmem:[%s1771_s7 + $0xf4] sm:$0xf]  ;;  %v1540_v27 = vld [vmem:[%s1771_s7 + $0xf8] sm:$0xf0]  ;;  %v1466_v28 = vld [vmem:[%s1771_s7 + $0x60] sm:$0xf] }
  0x52   : > { %728 = vmatpush.bf16.msra.mxu0 %v1475_v20  ;;  %v1543_v29 = vor.u32 %v1599_v26, %v1540_v27  ;;  %v1582_v30 = vld [vmem:[%s1771_s7 + $0x64] sm:$0xf0]  ;;  %v1530_v31 = vld [vmem:[%s1771_s7 + $0xe0] sm:$0xf]  ;;  %v1581_v35 = vld [vmem:[%s1771_s7 + $0x64] sm:$0xf] }
  0x53   : > { %v1598_v32 = vld [vmem:[%s1771_s7 + $0xe4] sm:$0xf0]  ;;  %777 = vmatpush.bf16.msra.mxu1 %v1539_v24  ;;  %826 = vmatpush.bf16.msra.mxu2 %v1479_v25  ;;  %v1467_v33 = vor.u32 %v1582_v30, %v1466_v28  ;;  %v1468_v36 = vld [vmem:[%s1771_s7 + $0x68] sm:$0xf0]  ;;  %v1597_v37 = vld [vmem:[%s1771_s7 + $0xe4] sm:$0xf] }
  0x54   : > { %v1531_v34 = vor.u32 %v1598_v32, %v1530_v31  ;;  %875 = vmatpush.bf16.msra.mxu3 %v1543_v29  ;;  %v1471_v38 = vor.u32 %v1581_v35, %v1468_v36  ;;  %v1532_v39 = vld [vmem:[%s1771_s7 + $0xe8] sm:$0xf0]  ;;  %v1458_v40 = vld [vmem:[%s1771_s7 + $0x50] sm:$0xf]  ;;  %v1580_v41 = vld [vmem:[%s1771_s7 + $0x54] sm:$0xf0] }
  0x55   : > { %v1535_v42 = vor.u32 %v1597_v37, %v1532_v39  ;;  %v1522_v43 = vld [vmem:[%s1771_s7 + $0xd0] sm:$0xf]  ;;  %v1596_v44 = vld [vmem:[%s1771_s7 + $0xd4] sm:$0xf0]  ;;  %v1579_v45 = vld [vmem:[%s1771_s7 + $0x54] sm:$0xf]  ;;  %v1459_v46 = vor.u32 %v1580_v41, %v1458_v40 }
  0x56   : > { %729 = vmatpush.bf16.msra.mxu0 %v1467_v33  ;;  %v1460_v47 = vld [vmem:[%s1771_s7 + $0x58] sm:$0xf0]  ;;  %v1595_v48 = vld [vmem:[%s1771_s7 + $0xd4] sm:$0xf]  ;;  %v1523_v50 = vor.u32 %v1596_v44, %v1522_v43  ;;  %v1450_v52 = vld [vmem:[%s1771_s7 + $0x40] sm:$0xf] }
  0x57   : > { %v1524_v49 = vld [vmem:[%s1771_s7 + $0xd8] sm:$0xf0]  ;;  %778 = vmatpush.bf16.msra.mxu1 %v1531_v34  ;;  %827 = vmatpush.bf16.msra.mxu2 %v1471_v38  ;;  %v1463_v51 = vor.u32 %v1579_v45, %v1460_v47  ;;  %v1578_v53 = vld [vmem:[%s1771_s7 + $0x44] sm:$0xf0]  ;;  %v1514_v54 = vld [vmem:[%s1771_s7 + $0xc0] sm:$0xf] }
  0x58   : > { %876 = vmatpush.bf16.msra.mxu3 %v1535_v42  ;;  %v1527_v55 = vor.u32 %v1595_v48, %v1524_v49  ;;  %v1594_v56 = vld [vmem:[%s1771_s7 + $0xc4] sm:$0xf0]  ;;  %v1577_v57 = vld [vmem:[%s1771_s7 + $0x44] sm:$0xf]  ;;  %v1452_v58 = vld [vmem:[%s1771_s7 + $0x48] sm:$0xf0]  ;;  %v1451_v61 = vor.u32 %v1578_v53, %v1450_v52 }
  0x59   : > { %v1593_v59 = vld [vmem:[%s1771_s7 + $0xc4] sm:$0xf]  ;;  %v1516_v60 = vld [vmem:[%s1771_s7 + $0xc8] sm:$0xf0]  ;;  %v1515_v62 = vor.u32 %v1594_v56, %v1514_v54  ;;  %v1455_v63 = vor.u32 %v1577_v57, %v1452_v58  ;;  %v1442_v0 = vld [vmem:[%s1771_s7 + $0x30] sm:$0xf] }
  0x5a   : > { %730 = vmatpush.bf16.msra.mxu0 %v1459_v46  ;;  %v1576_v1 = vld [vmem:[%s1771_s7 + $0x34] sm:$0xf0]  ;;  %v1506_v2 = vld [vmem:[%s1771_s7 + $0xb0] sm:$0xf]  ;;  %v1519_v3 = vor.u32 %v1593_v59, %v1516_v60  ;;  %v1575_v5 = vld [vmem:[%s1771_s7 + $0x34] sm:$0xf] }
  0x5b   : > { %779 = vmatpush.bf16.msra.mxu1 %v1523_v50  ;;  %828 = vmatpush.bf16.msra.mxu2 %v1463_v51  ;;  %v1592_v4 = vld [vmem:[%s1771_s7 + $0xb4] sm:$0xf0]  ;;  %v1444_v6 = vld [vmem:[%s1771_s7 + $0x38] sm:$0xf0]  ;;  %v1591_v7 = vld [vmem:[%s1771_s7 + $0xb4] sm:$0xf]  ;;  %v1443_v9 = vor.u32 %v1576_v1, %v1442_v0 }
  0x5c   : > { %877 = vmatpush.bf16.msra.mxu3 %v1527_v55  ;;  %v1508_v8 = vld [vmem:[%s1771_s7 + $0xb8] sm:$0xf0]  ;;  %v1507_v10 = vor.u32 %v1592_v4, %v1506_v2  ;;  %v1447_v11 = vor.u32 %v1575_v5, %v1444_v6  ;;  %v1434_v12 = vld [vmem:[%s1771_s7 + $0x20] sm:$0xf]  ;;  %v1574_v13 = vld [vmem:[%s1771_s7 + $0x24] sm:$0xf0] }
  0x5d   : > { %v1498_v14 = vld [vmem:[%s1771_s7 + $0xa0] sm:$0xf]  ;;  %v1511_v15 = vor.u32 %v1591_v7, %v1508_v8  ;;  %v1590_v16 = vld [vmem:[%s1771_s7 + $0xa4] sm:$0xf0]  ;;  %v1573_v17 = vld [vmem:[%s1771_s7 + $0x24] sm:$0xf]  ;;  %v1435_v21 = vor.u32 %v1574_v13, %v1434_v12 }
  0x5e   : > { %731 = vmatpush.bf16.msra.mxu0 %v1451_v61  ;;  %v1436_v18 = vld [vmem:[%s1771_s7 + $0x28] sm:$0xf0]  ;;  %v1589_v19 = vld [vmem:[%s1771_s7 + $0xa4] sm:$0xf]  ;;  %v1499_v22 = vor.u32 %v1590_v16, %v1498_v14  ;;  %v1426_v24 = vld [vmem:[%s1771_s7 + $0x10] sm:$0xf] }
  0x5f   : > { %780 = vmatpush.bf16.msra.mxu1 %v1515_v62  ;;  %829 = vmatpush.bf16.msra.mxu2 %v1455_v63  ;;  %v1500_v20 = vld [vmem:[%s1771_s7 + $0xa8] sm:$0xf0]  ;;  %v1439_v23 = vor.u32 %v1573_v17, %v1436_v18  ;;  %v1572_v25 = vld [vmem:[%s1771_s7 + $0x14] sm:$0xf0]  ;;  %v1490_v26 = vld [vmem:[%s1771_s7 + $0x90] sm:$0xf] }
  0x60   : > { %878 = vmatpush.bf16.msra.mxu3 %v1519_v3  ;;  %v1503_v27 = vor.u32 %v1589_v19, %v1500_v20  ;;  %v1588_v28 = vld [vmem:[%s1771_s7 + $0x94] sm:$0xf0]  ;;  %v1571_v29 = vld [vmem:[%s1771_s7 + $0x14] sm:$0xf]  ;;  %v1428_v30 = vld [vmem:[%s1771_s7 + $0x18] sm:$0xf0]  ;;  %v1427_v33 = vor.u32 %v1572_v25, %v1426_v24 }
  0x61   : > { %v1587_v31 = vld [vmem:[%s1771_s7 + $0x94] sm:$0xf]  ;;  %v1492_v32 = vld [vmem:[%s1771_s7 + $0x98] sm:$0xf0]  ;;  %v1491_v34 = vor.u32 %v1588_v28, %v1490_v26  ;;  %v1431_v35 = vor.u32 %v1571_v29, %v1428_v30  ;;  %v1418_v36 = vld [vmem:[%s1771_s7] sm:$0xf] }
  0x62   : > { %732 = vmatpush.bf16.msra.mxu0 %v1443_v9  ;;  %v1570_v37 = vld [vmem:[%s1771_s7 + $0x4] sm:$0xf0]  ;;  %v1482_v38 = vld [vmem:[%s1771_s7 + $0x80] sm:$0xf]  ;;  %v1495_v39 = vor.u32 %v1587_v31, %v1492_v32  ;;  %v1569_v41 = vld [vmem:[%s1771_s7 + $0x4] sm:$0xf] }
  0x63   : > { %781 = vmatpush.bf16.msra.mxu1 %v1507_v10  ;;  %830 = vmatpush.bf16.msra.mxu2 %v1447_v11  ;;  %v1586_v40 = vld [vmem:[%s1771_s7 + $0x84] sm:$0xf0]  ;;  %v1420_v42 = vld [vmem:[%s1771_s7 + $0x8] sm:$0xf0]  ;;  %v1585_v43 = vld [vmem:[%s1771_s7 + $0x84] sm:$0xf]  ;;  %v1419_v45 = vor.u32 %v1570_v37, %v1418_v36 }
  0x64   : > { %879 = vmatpush.bf16.msra.mxu3 %v1511_v15  ;;  %v1484_v44 = vld [vmem:[%s1771_s7 + $0x88] sm:$0xf0]  ;;  %v1354_v46 = vld [vmem:[%s1773_s8] sm:$0xf]  ;;  %v1554_v47 = vld [vmem:[%s1773_s8 + $0x4] sm:$0xf0]  ;;  %v1483_v48 = vor.u32 %v1586_v40, %v1482_v38  ;;  %v1423_v49 = vor.u32 %v1569_v41, %v1420_v42 }
  0x65   : > { %v1553_v50 = vld [vmem:[%s1773_s8 + $0x4] sm:$0xf]  ;;  %v1356_v51 = vld [vmem:[%s1773_s8 + $0x8] sm:$0xf0]  ;;  %v1487_v52 = vor.u32 %v1585_v43, %v1484_v44  ;;  %v1355_v53 = vor.u32 %v1554_v47, %v1354_v46  ;;  %v1362_v55 = vld [vmem:[%s1773_s8 + $0x10] sm:$0xf] }
  0x66   : > { %733 = vmatpush.bf16.msra.mxu0 %v1435_v21  ;;  %v1359_v54 = vor.u32 %v1553_v50, %v1356_v51  ;;  %v1556_v56 = vld [vmem:[%s1773_s8 + $0x14] sm:$0xf0]  ;;  %v1555_v57 = vld [vmem:[%s1773_s8 + $0x14] sm:$0xf]  ;;  %v1364_v58 = vld [vmem:[%s1773_s8 + $0x18] sm:$0xf0] }
  0x67   : > { %782 = vmatpush.bf16.msra.mxu1 %v1499_v22  ;;  %831 = vmatpush.bf16.msra.mxu2 %v1439_v23  ;;  %v1363_v59 = vor.u32 %v1556_v56, %v1362_v55  ;;  %v1367_v60 = vor.u32 %v1555_v57, %v1364_v58  ;;  %v1370_v61 = vld [vmem:[%s1773_s8 + $0x20] sm:$0xf]  ;;  %v1558_v62 = vld [vmem:[%s1773_s8 + $0x24] sm:$0xf0]  ;;  %v1557_v63 = vld [vmem:[%s1773_s8 + $0x24] sm:$0xf] }
  0x68   : > { %880 = vmatpush.bf16.msra.mxu3 %v1503_v27  ;;  %v1372_v0 = vld [vmem:[%s1773_s8 + $0x28] sm:$0xf0]  ;;  %v1371_v1 = vor.u32 %v1558_v62, %v1370_v61  ;;  %v1378_v3 = vld [vmem:[%s1773_s8 + $0x30] sm:$0xf]  ;;  %v1560_v4 = vld [vmem:[%s1773_s8 + $0x34] sm:$0xf0] }
  0x69   : > { %v1375_v2 = vor.u32 %v1557_v63, %v1372_v0  ;;  %v1559_v5 = vld [vmem:[%s1773_s8 + $0x34] sm:$0xf]  ;;  %v1380_v6 = vld [vmem:[%s1773_s8 + $0x38] sm:$0xf0]  ;;  %v1379_v7 = vor.u32 %v1560_v4, %v1378_v3  ;;  %v1386_v9 = vld [vmem:[%s1773_s8 + $0x40] sm:$0xf] }
  0x6a   : > { %734 = vmatpush.bf16.msra.mxu0 %v1427_v33  ;;  %v1383_v8 = vor.u32 %v1559_v5, %v1380_v6  ;;  %v1562_v10 = vld [vmem:[%s1773_s8 + $0x44] sm:$0xf0]  ;;  %v1561_v11 = vld [vmem:[%s1773_s8 + $0x44] sm:$0xf]  ;;  %v1388_v12 = vld [vmem:[%s1773_s8 + $0x48] sm:$0xf0] }
  0x6b   : > { %783 = vmatpush.bf16.msra.mxu1 %v1491_v34  ;;  %832 = vmatpush.bf16.msra.mxu2 %v1431_v35  ;;  %v1387_v13 = vor.u32 %v1562_v10, %v1386_v9  ;;  %v1391_v14 = vor.u32 %v1561_v11, %v1388_v12  ;;  %v1394_v15 = vld [vmem:[%s1773_s8 + $0x50] sm:$0xf]  ;;  %v1564_v16 = vld [vmem:[%s1773_s8 + $0x54] sm:$0xf0]  ;;  %v1563_v17 = vld [vmem:[%s1773_s8 + $0x54] sm:$0xf] }
  0x6c   : > { %881 = vmatpush.bf16.msra.mxu3 %v1495_v39  ;;  %v1396_v18 = vld [vmem:[%s1773_s8 + $0x58] sm:$0xf0]  ;;  %v1395_v19 = vor.u32 %v1564_v16, %v1394_v15  ;;  %v1402_v21 = vld [vmem:[%s1773_s8 + $0x60] sm:$0xf]  ;;  %v1566_v22 = vld [vmem:[%s1773_s8 + $0x64] sm:$0xf0] }
  0x6d   : > { %v1399_v20 = vor.u32 %v1563_v17, %v1396_v18  ;;  %v1565_v23 = vld [vmem:[%s1773_s8 + $0x64] sm:$0xf]  ;;  %v1404_v24 = vld [vmem:[%s1773_s8 + $0x68] sm:$0xf0]  ;;  %v1403_v25 = vor.u32 %v1566_v22, %v1402_v21  ;;  %v1410_v27 = vld [vmem:[%s1773_s8 + $0x70] sm:$0xf] }
  0x6e   : > { %735 = vmatpush.bf16.msra.mxu0 %v1419_v45  ;;  %v1407_v26 = vor.u32 %v1565_v23, %v1404_v24  ;;  %v1568_v28 = vld [vmem:[%s1773_s8 + $0x74] sm:$0xf0]  ;;  %v1567_v29 = vld [vmem:[%s1773_s8 + $0x74] sm:$0xf]  ;;  %v1412_v30 = vld [vmem:[%s1773_s8 + $0x78] sm:$0xf0] }
  0x6f   : > { %784 = vmatpush.bf16.msra.mxu1 %v1483_v48  ;;  %833 = vmatpush.bf16.msra.mxu2 %v1423_v49  ;;  %v1411_v31 = vor.u32 %v1568_v28, %v1410_v27  ;;  %v1415_v32 = vor.u32 %v1567_v29, %v1412_v30  ;;  %v408_v34 = vld [vmem:[#allocation2 + $0xb0] sm:$0xff]  ;;  %v409_v39 = vld [vmem:[#allocation2] sm:$0xff]  ;;  %v410_v43 = vld [vmem:[#allocation2 + $0xd8] sm:$0xff]  ;;  %p1544_p11 = scmp.ne.s32.totalorder %s1672_s14, 2 }
  0x70   : > { %882 = vmatpush.bf16.msra.mxu3 %v1487_v52  ;;  %v411_v49 = vld [vmem:[#allocation2 + $0x18] sm:$0xff]  ;;  %v414_v63 = vld [vmem:[#allocation2 + $0x30] sm:$0xff]  ;;  %v415_v5 = vld [vmem:[#allocation2 + $0x48] sm:$0xff] }
  0x71   : > { %736 = vmatmul.bf16.vlgmr.msra.gmra.mxu0 %v1355_v53  ;;  %v416_v9 = vld [vmem:[#allocation2 + $0x80] sm:$0xff]  ;;  %v417_v15 = vld [vmem:[#allocation2 + $0x88] sm:$0xff] }
  0x72   : > { %785 = vmatmul.bf16.vlgmr.msra.gmra.mxu1 %v1359_v54  ;;  %834 = vmatmul.bf16.vlgmr.msra.gmra.mxu2 %v1355_v53  ;;  %v412_v53 = vld [vmem:[#allocation2 + $0x50] sm:$0xff]  ;;  %v420_v29 = vld [vmem:[#allocation2 + $0x60] sm:$0xff] }
  0x73   : > { %883 = vmatmul.bf16.vlgmr.msra.gmra.mxu3 %v1359_v54 }
  0x81   : > { %741 = vmatmul.bf16.gmra.mxu0 %v1363_v59 }
  0x82   : > { %790 = vmatmul.bf16.gmra.mxu1 %v1367_v60  ;;  %839 = vmatmul.bf16.gmra.mxu2 %v1363_v59  ;;  %v413_v59 = vld [vmem:[#allocation2 + $0x68] sm:$0xff] }
  0x83   : > { %888 = vmatmul.bf16.gmra.mxu3 %v1367_v60 }
  0x91   : > { %746 = vmatmul.bf16.gmra.mxu0 %v1371_v1 }
  0x92   : > { %795 = vmatmul.bf16.gmra.mxu1 %v1375_v2  ;;  %844 = vmatmul.bf16.gmra.mxu2 %v1371_v1 }
  0x93   : > { %893 = vmatmul.bf16.gmra.mxu3 %v1375_v2 }
  0xa1   : > { %751 = vmatmul.bf16.gmra.mxu0 %v1379_v7 }
  0xa2   : > { %800 = vmatmul.bf16.gmra.mxu1 %v1383_v8  ;;  %849 = vmatmul.bf16.gmra.mxu2 %v1379_v7 }
  0xa3   : > { %898 = vmatmul.bf16.gmra.mxu3 %v1383_v8 }
  0xb1   : > { %756 = vmatmul.bf16.gmra.mxu0 %v1387_v13 }
  0xb2   : > { %805 = vmatmul.bf16.gmra.mxu1 %v1391_v14  ;;  %854 = vmatmul.bf16.gmra.mxu2 %v1387_v13 }
  0xb3   : > { %903 = vmatmul.bf16.gmra.mxu3 %v1391_v14 }
  0xc1   : > { %761 = vmatmul.bf16.gmra.mxu0 %v1395_v19 }
  0xc2   : > { %810 = vmatmul.bf16.gmra.mxu1 %v1399_v20  ;;  %859 = vmatmul.bf16.gmra.mxu2 %v1395_v19  ;;  %v418_v19 = vld [vmem:[#allocation2 + $0xe8] sm:$0xff] }
  0xc3   : > { %908 = vmatmul.bf16.gmra.mxu3 %v1399_v20 }
  0xd1   : > { %766 = vmatmul.bf16.gmra.mxu0 %v1403_v25 }
  0xd2   : > { %815 = vmatmul.bf16.gmra.mxu1 %v1407_v26  ;;  %864 = vmatmul.bf16.gmra.mxu2 %v1403_v25  ;;  %v419_v25 = vld [vmem:[#allocation2 + $0xb8] sm:$0xff] }
  0xd3   : > { %913 = vmatmul.bf16.gmra.mxu3 %v1407_v26 }
  0xe1   : > { %771 = vmatmul.bf16.gmra.mxu0 %v1411_v31 }
  0xe2   : > { %820 = vmatmul.bf16.gmra.mxu1 %v1415_v32  ;;  %869 = vmatmul.bf16.gmra.mxu2 %v1411_v31 }
  0xe3   : > { %918 = vmatmul.bf16.gmra.mxu3 %v1415_v32 }
  0xee   : > { %v737_v33 = vpop.f32.mrf.mxu0 }
  0xef   : > { %v786_v35 = vpop.f32.mrf.mxu1 }
  0xf0   : > { %v787_v36 = vadd.f32 %v786_v35, %v737_v33  ;;  %v421_v35 = vld [vmem:[#allocation2 + $0xf0] sm:$0xff] }
  0xf2   : > { %v924_v37 = vadd.f32 %v787_v36, %v408_v34 }
  0xf4   : > { %956 = vst [vmem:[#allocation2 + $0xb0] sm:$0xff] %v924_v37 }
  0xf5   : > { %v835_v38 = vpop.f32.mrf.mxu2 }
  0xf6   : > { %v884_v40 = vpop.f32.mrf.mxu3  ;;  %v739_v41 = vpop.f32.mrf.mxu0 }
  0xf7   : > { %v885_v42 = vadd.f32 %v884_v40, %v835_v38  ;;  %v788_v44 = vpop.f32.mrf.mxu1 }
  0xf8   : > { %v789_v45 = vadd.f32 %v788_v44, %v739_v41 }
  0xf9   : > { %v925_v46 = vadd.f32 %v885_v42, %v409_v39  ;;  %v422_v39 = vld [vmem:[#allocation2 + $0x8] sm:$0xff] }
  0xfa   : > { %v926_v47 = vadd.f32 %v789_v45, %v410_v43  ;;  %v423_v45 = vld [vmem:[#allocation2 + $0x78] sm:$0xff] }
  0xfb   : > { %957 = vst [vmem:[#allocation2] sm:$0xff] %v925_v46 }
  0xfc   : > { %958 = vst [vmem:[#allocation2 + $0xd8] sm:$0xff] %v926_v47 }
  0xfd   : > { %v837_v48 = vpop.f32.mrf.mxu2 }
  0xfe   : > { %v886_v50 = vpop.f32.mrf.mxu3  ;;  %v742_v51 = vpop.f32.mrf.mxu0 }
  0xff   : > { %v887_v52 = vadd.f32 %v886_v50, %v837_v48  ;;  %v791_v54 = vpop.f32.mrf.mxu1 }
 0x100   : > { %v792_v55 = vadd.f32 %v791_v54, %v742_v51 }
 0x101   : > { %v927_v56 = vadd.f32 %v887_v52, %v411_v49  ;;  %v424_v49 = vld [vmem:[#allocation2 + $0x38] sm:$0xff] }
 0x102   : > { %v928_v57 = vadd.f32 %v792_v55, %v412_v53  ;;  %v425_v55 = vld [vmem:[#allocation2 + $0x58] sm:$0xff] }
 0x103   : > { %959 = vst [vmem:[#allocation2 + $0x18] sm:$0xff] %v927_v56 }
 0x104   : > { %960 = vst [vmem:[#allocation2 + $0x50] sm:$0xff] %v928_v57 }
 0x105   : > { %v840_v58 = vpop.f32.mrf.mxu2 }
 0x106   : > { %v889_v60 = vpop.f32.mrf.mxu3  ;;  %v744_v61 = vpop.f32.mrf.mxu0 }
 0x107   : > { %v890_v62 = vadd.f32 %v889_v60, %v840_v58  ;;  %v793_v0 = vpop.f32.mrf.mxu1 }
 0x108   : > { %v794_v1 = vadd.f32 %v793_v0, %v744_v61 }
 0x109   : > { %v929_v2 = vadd.f32 %v890_v62, %v413_v59  ;;  %v426_v59 = vld [vmem:[#allocation2 + $0x40] sm:$0xff] }
 0x10a   : > { %v930_v3 = vadd.f32 %v794_v1, %v414_v63  ;;  %v427_v1 = vld [vmem:[#allocation2 + $0xc8] sm:$0xff] }
 0x10b   : > { %961 = vst [vmem:[#allocation2 + $0x68] sm:$0xff] %v929_v2 }
 0x10c   : > { %962 = vst [vmem:[#allocation2 + $0x30] sm:$0xff] %v930_v3 }
 0x10d   : > { %v842_v4 = vpop.f32.mrf.mxu2 }
 0x10e   : > { %v891_v6 = vpop.f32.mrf.mxu3  ;;  %v747_v7 = vpop.f32.mrf.mxu0 }
 0x10f   : > { %v892_v8 = vadd.f32 %v891_v6, %v842_v4  ;;  %v796_v10 = vpop.f32.mrf.mxu1 }
 0x110   : > { %v797_v11 = vadd.f32 %v796_v10, %v747_v7 }
 0x111   : > { %v931_v12 = vadd.f32 %v892_v8, %v415_v5  ;;  %v428_v5 = vld [vmem:[#allocation2 + $0xe0] sm:$0xff] }
 0x112   : > { %v932_v13 = vadd.f32 %v797_v11, %v416_v9  ;;  %v429_v11 = vld [vmem:[#allocation2 + $0x90] sm:$0xff] }
 0x113   : > { %963 = vst [vmem:[#allocation2 + $0x48] sm:$0xff] %v931_v12 }
 0x114   : > { %964 = vst [vmem:[#allocation2 + $0x80] sm:$0xff] %v932_v13 }
 0x115   : > { %v845_v14 = vpop.f32.mrf.mxu2 }
 0x116   : > { %v894_v16 = vpop.f32.mrf.mxu3  ;;  %v749_v17 = vpop.f32.mrf.mxu0 }
 0x117   : > { %v895_v18 = vadd.f32 %v894_v16, %v845_v14  ;;  %v798_v20 = vpop.f32.mrf.mxu1 }
 0x118   : > { %v799_v21 = vadd.f32 %v798_v20, %v749_v17 }
 0x119   : > { %v933_v22 = vadd.f32 %v895_v18, %v417_v15  ;;  %v430_v15 = vld [vmem:[#allocation2 + $0x70] sm:$0xff] }
 0x11a   : > { %v934_v23 = vadd.f32 %v799_v21, %v418_v19  ;;  %v431_v21 = vld [vmem:[#allocation2 + $0xc0] sm:$0xff] }
 0x11b   : > { %965 = vst [vmem:[#allocation2 + $0x88] sm:$0xff] %v933_v22 }
 0x11c   : > { %966 = vst [vmem:[#allocation2 + $0xe8] sm:$0xff] %v934_v23 }
 0x11d   : > { %v847_v24 = vpop.f32.mrf.mxu2 }
 0x11e   : > { %v896_v26 = vpop.f32.mrf.mxu3  ;;  %v752_v27 = vpop.f32.mrf.mxu0 }
 0x11f   : > { %v897_v28 = vadd.f32 %v896_v26, %v847_v24  ;;  %v801_v30 = vpop.f32.mrf.mxu1 }
 0x120   : > { %v802_v31 = vadd.f32 %v801_v30, %v752_v27 }
 0x121   : > { %v935_v32 = vadd.f32 %v897_v28, %v419_v25  ;;  %v432_v25 = vld [vmem:[#allocation2 + $0xa8] sm:$0xff] }
 0x122   : > { %v936_v33 = vadd.f32 %v802_v31, %v420_v29  ;;  %v433_v31 = vld [vmem:[#allocation2 + $0xd0] sm:$0xff] }
 0x123   : > { %967 = vst [vmem:[#allocation2 + $0xb8] sm:$0xff] %v935_v32 }
 0x124   : > { %968 = vst [vmem:[#allocation2 + $0x60] sm:$0xff] %v936_v33 }
 0x125   : > { %v850_v34 = vpop.f32.mrf.mxu2 }
 0x126   : > { %v899_v36 = vpop.f32.mrf.mxu3  ;;  %v754_v37 = vpop.f32.mrf.mxu0 }
 0x127   : > { %v900_v38 = vadd.f32 %v899_v36, %v850_v34  ;;  %v803_v40 = vpop.f32.mrf.mxu1 }
 0x128   : > { %v804_v41 = vadd.f32 %v803_v40, %v754_v37 }
 0x129   : > { %v937_v42 = vadd.f32 %v900_v38, %v421_v35  ;;  %v434_v35 = vld [vmem:[#allocation2 + $0x10] sm:$0xff] }
 0x12a   : > { %v938_v43 = vadd.f32 %v804_v41, %v422_v39  ;;  %v435_v41 = vld [vmem:[#allocation2 + $0x28] sm:$0xff] }
 0x12b   : > { %969 = vst [vmem:[#allocation2 + $0xf0] sm:$0xff] %v937_v42 }
 0x12c   : > { %970 = vst [vmem:[#allocation2 + $0x8] sm:$0xff] %v938_v43 }
 0x12d   : > { %v852_v44 = vpop.f32.mrf.mxu2 }
 0x12e   : > { %v901_v46 = vpop.f32.mrf.mxu3  ;;  %v757_v47 = vpop.f32.mrf.mxu0 }
 0x12f   : > { %v902_v48 = vadd.f32 %v901_v46, %v852_v44  ;;  %v806_v50 = vpop.f32.mrf.mxu1 }
 0x130   : > { %v807_v51 = vadd.f32 %v806_v50, %v757_v47 }
 0x131   : > { %v939_v52 = vadd.f32 %v902_v48, %v423_v45  ;;  %v436_v45 = vld [vmem:[#allocation2 + $0xa0] sm:$0xff] }
 0x132   : > { %v940_v53 = vadd.f32 %v807_v51, %v424_v49  ;;  %v437_v51 = vld [vmem:[#allocation2 + $0xf8] sm:$0xff] }
 0x133   : > { %971 = vst [vmem:[#allocation2 + $0x78] sm:$0xff] %v939_v52 }
 0x134   : > { %972 = vst [vmem:[#allocation2 + $0x38] sm:$0xff] %v940_v53 }
 0x135   : > { %v855_v54 = vpop.f32.mrf.mxu2 }
 0x136   : > { %v904_v56 = vpop.f32.mrf.mxu3  ;;  %v759_v57 = vpop.f32.mrf.mxu0 }
 0x137   : > { %v905_v58 = vadd.f32 %v904_v56, %v855_v54  ;;  %v808_v60 = vpop.f32.mrf.mxu1 }
 0x138   : > { %v809_v61 = vadd.f32 %v808_v60, %v759_v57 }
 0x139   : > { %v941_v62 = vadd.f32 %v905_v58, %v425_v55  ;;  %v438_v55 = vld [vmem:[#allocation2 + $0x20] sm:$0xff] }
 0x13a   : > { %v942_v63 = vadd.f32 %v809_v61, %v426_v59  ;;  %v439_v61 = vld [vmem:[#allocation2 + $0x98] sm:$0xff] }
 0x13b   : > { %973 = vst [vmem:[#allocation2 + $0x58] sm:$0xff] %v941_v62 }
 0x13c   : > { %974 = vst [vmem:[#allocation2 + $0x40] sm:$0xff] %v942_v63 }
 0x13d   : > { %v857_v0 = vpop.f32.mrf.mxu2 }
 0x13e   : > { %v906_v2 = vpop.f32.mrf.mxu3  ;;  %v762_v3 = vpop.f32.mrf.mxu0 }
 0x13f   : > { %v907_v4 = vadd.f32 %v906_v2, %v857_v0  ;;  %v811_v6 = vpop.f32.mrf.mxu1 }
 0x140   : > { %v812_v7 = vadd.f32 %v811_v6, %v762_v3 }
 0x141   : > { %v943_v8 = vadd.f32 %v907_v4, %v427_v1 }
 0x142   : > { %v944_v9 = vadd.f32 %v812_v7, %v428_v5 }
 0x143   : > { %975 = vst [vmem:[#allocation2 + $0xc8] sm:$0xff] %v943_v8 }
 0x144   : > { %976 = vst [vmem:[#allocation2 + $0xe0] sm:$0xff] %v944_v9 }
 0x145   : > { %v860_v10 = vpop.f32.mrf.mxu2 }
 0x146   : > { %v909_v12 = vpop.f32.mrf.mxu3  ;;  %v764_v13 = vpop.f32.mrf.mxu0 }
 0x147   : > { %v910_v14 = vadd.f32 %v909_v12, %v860_v10  ;;  %v813_v16 = vpop.f32.mrf.mxu1 }
 0x148   : > { %v814_v17 = vadd.f32 %v813_v16, %v764_v13 }
 0x149   : > { %v945_v18 = vadd.f32 %v910_v14, %v429_v11 }
 0x14a   : > { %v946_v19 = vadd.f32 %v814_v17, %v430_v15 }
 0x14b   : > { %977 = vst [vmem:[#allocation2 + $0x90] sm:$0xff] %v945_v18 }
 0x14c   : > { %978 = vst [vmem:[#allocation2 + $0x70] sm:$0xff] %v946_v19 }
 0x14d   : > { %v862_v20 = vpop.f32.mrf.mxu2 }
 0x14e   : > { %v911_v22 = vpop.f32.mrf.mxu3  ;;  %v767_v23 = vpop.f32.mrf.mxu0 }
 0x14f   : > { %v912_v24 = vadd.f32 %v911_v22, %v862_v20  ;;  %v816_v26 = vpop.f32.mrf.mxu1 }
 0x150   : > { %v817_v27 = vadd.f32 %v816_v26, %v767_v23 }
 0x151   : > { %v947_v28 = vadd.f32 %v912_v24, %v431_v21 }
 0x152   : > { %v948_v29 = vadd.f32 %v817_v27, %v432_v25 }
 0x153   : > { %979 = vst [vmem:[#allocation2 + $0xc0] sm:$0xff] %v947_v28 }
 0x154   : > { %980 = vst [vmem:[#allocation2 + $0xa8] sm:$0xff] %v948_v29 }
 0x155   : > { %v865_v30 = vpop.f32.mrf.mxu2 }
 0x156   : > { %v914_v32 = vpop.f32.mrf.mxu3  ;;  %v769_v33 = vpop.f32.mrf.mxu0 }
 0x157   : > { %v915_v34 = vadd.f32 %v914_v32, %v865_v30  ;;  %v818_v36 = vpop.f32.mrf.mxu1 }
 0x158   : > { %v819_v37 = vadd.f32 %v818_v36, %v769_v33 }
 0x159   : > { %v949_v38 = vadd.f32 %v915_v34, %v433_v31 }
 0x15a   : > { %v950_v39 = vadd.f32 %v819_v37, %v434_v35 }
 0x15b   : > { %981 = vst [vmem:[#allocation2 + $0xd0] sm:$0xff] %v949_v38 }
 0x15c   : > { %982 = vst [vmem:[#allocation2 + $0x10] sm:$0xff] %v950_v39 }
 0x15d   : > { %v867_v40 = vpop.f32.mrf.mxu2 }
 0x15e   : > { %v916_v42 = vpop.f32.mrf.mxu3  ;;  %v772_v43 = vpop.f32.mrf.mxu0 }
 0x15f   : > { %v917_v44 = vadd.f32 %v916_v42, %v867_v40  ;;  %v821_v46 = vpop.f32.mrf.mxu1 }
 0x160   : > { %v822_v47 = vadd.f32 %v821_v46, %v772_v43 }
 0x161   : > { %v951_v48 = vadd.f32 %v917_v44, %v435_v41 }
 0x162   : > { %v952_v49 = vadd.f32 %v822_v47, %v436_v45 }
 0x163   : > { %983 = vst [vmem:[#allocation2 + $0x28] sm:$0xff] %v951_v48 }
 0x164   : > { %984 = vst [vmem:[#allocation2 + $0xa0] sm:$0xff] %v952_v49 }
 0x165   : > { %v870_v50 = vpop.f32.mrf.mxu2 }
 0x166   : > { %v919_v52 = vpop.f32.mrf.mxu3  ;;  %v774_v53 = vpop.f32.mrf.mxu0 }
 0x167   : > { %v920_v54 = vadd.f32 %v919_v52, %v870_v50  ;;  %v823_v56 = vpop.f32.mrf.mxu1 }
 0x168   : > { %v824_v57 = vadd.f32 %v823_v56, %v774_v53 }
 0x169   : > { %v953_v58 = vadd.f32 %v920_v54, %v437_v51 }
 0x16a   : > { %v954_v59 = vadd.f32 %v824_v57, %v438_v55 }
 0x16b   : > { %985 = vst [vmem:[#allocation2 + $0xf8] sm:$0xff] %v953_v58 }
 0x16c   : > { %986 = vst [vmem:[#allocation2 + $0x20] sm:$0xff] %v954_v59 }
 0x16d   : > { %v872_v60 = vpop.f32.mrf.mxu2 }
 0x16e   : > { %v921_v62 = vpop.f32.mrf.mxu3 }
 0x16f   : > { %v922_v63 = vadd.f32 %v921_v62, %v872_v60  ;;  %991 = sbr.rel (%p1544_p11) target bundleno = 422 (0x1a6), region = 74 }
 0x171   : > { %v955_v0 = vadd.f32 %v922_v63, %v439_v61 }
 0x173   : > { %987 = vst [vmem:[#allocation2 + $0x98] sm:$0xff] %v955_v0 }
 0x174   : > { %v992_v1 = vld [vmem:[#allocation2 + $0xb0] sm:$0xff]  ;;  %v993_v2 = vld [vmem:[#allocation2] sm:$0xff]  ;;  %v994_v3 = vld [vmem:[#allocation2 + $0xd8] sm:$0xff] }
 0x175   : > { %v1024_v4 = vpack.c.bf16 %v993_v2, %v992_v1  ;;  %v1098_v5 = vmul.f32 %v992_v1, %v992_v1  ;;  %v1099_v6 = vmul.f32 %v993_v2, %v993_v2  ;;  %v995_v7 = vld [vmem:[#allocation2 + $0x18] sm:$0xff]  ;;  %v1056_v8 = vadd.f32 %v994_v3, %v992_v1  ;;  %v996_v9 = vld [vmem:[#allocation2 + $0x50] sm:$0xff]  ;;  %v997_v10 = vld [vmem:[#allocation2 + $0x68] sm:$0xff] }
 0x176   : > { %v1025_v11 = vpack.c.bf16 %v995_v7, %v994_v3  ;;  %v1077_v12 = vadd.f32 %v995_v7, %v993_v2  ;;  %v1100_v13 = vmul.f32 %v994_v3, %v994_v3  ;;  %v1101_v14 = vmul.f32 %v995_v7, %v995_v7  ;;  %v998_v15 = vld [vmem:[#allocation2 + $0x30] sm:$0xff]  ;;  %v999_v16 = vld [vmem:[#allocation2 + $0x48] sm:$0xff]  ;;  %v1000_v21 = vld [vmem:[#allocation2 + $0x80] sm:$0xff] }
 0x177   : > { %1040 = vst [vmem:[%s1944_s2] sm:$0xff] %v1024_v4  ;;  %v1026_v17 = vpack.c.bf16 %v997_v10, %v996_v9  ;;  %v1057_v18 = vadd.f32 %v1056_v8, %v996_v9  ;;  %v1102_v19 = vmul.f32 %v996_v9, %v996_v9  ;;  %v1103_v20 = vmul.f32 %v997_v10, %v997_v10  ;;  %v1001_v26 = vld [vmem:[#allocation2 + $0x88] sm:$0xff]  ;;  %v1003_v32 = vld [vmem:[#allocation2 + $0xb8] sm:$0xff]  ;;  %v1004_v37 = vld [vmem:[#allocation2 + $0x60] sm:$0xff] }
 0x178   : > { %1041 = vst [vmem:[%s1944_s2 + $0x8] sm:$0xff] %v1025_v11  ;;  %v1130_v22 = vadd.f32 %v1100_v13, %v1098_v5  ;;  %v1151_v23 = vadd.f32 %v1101_v14, %v1099_v6  ;;  %v1078_v24 = vadd.f32 %v1077_v12, %v997_v10  ;;  %v1027_v25 = vpack.c.bf16 %v999_v16, %v998_v15  ;;  %v1002_v27 = vld [vmem:[#allocation2 + $0xe8] sm:$0xff]  ;;  %v1005_v38 = vld [vmem:[#allocation2 + $0xf0] sm:$0xff]  ;;  %v1007_v52 = vld [vmem:[#allocation2 + $0x78] sm:$0xff] }
 0x179   : > { %1042 = vst [vmem:[%s1944_s2 + $0x10] sm:$0xff] %v1026_v17  ;;  %v1058_v28 = vadd.f32 %v1057_v18, %v998_v15  ;;  %v1104_v29 = vmul.f32 %v998_v15, %v998_v15  ;;  %v1105_v30 = vmul.f32 %v999_v16, %v999_v16  ;;  %v1028_v31 = vpack.c.bf16 %v1001_v26, %v1000_v21  ;;  %v1006_v47 = vld [vmem:[#allocation2 + $0x8] sm:$0xff]  ;;  %v1008_v57 = vld [vmem:[#allocation2 + $0x38] sm:$0xff]  ;;  %v1010_v2 = vld [vmem:[#allocation2 + $0x40] sm:$0xff] }
 0x17a   : > { %v1131_v33 = vadd.f32 %v1130_v22, %v1102_v19  ;;  %v1152_v34 = vadd.f32 %v1151_v23, %v1103_v20  ;;  %1043 = vst [vmem:[%s1944_s2 + $0x18] sm:$0xff] %v1027_v25  ;;  %v1079_v35 = vadd.f32 %v1078_v24, %v999_v16  ;;  %v1106_v36 = vmul.f32 %v1000_v21, %v1000_v21  ;;  %v1009_v58 = vld [vmem:[#allocation2 + $0x58] sm:$0xff]  ;;  %v1011_v3 = vld [vmem:[#allocation2 + $0xc8] sm:$0xff]  ;;  %v1012_v11 = vld [vmem:[#allocation2 + $0xe0] sm:$0xff] }
 0x17b   : > { %1044 = vst [vmem:[%s1944_s2 + $0x20] sm:$0xff] %v1028_v31  ;;  %v1059_v39 = vadd.f32 %v1058_v28, %v1000_v21  ;;  %v1107_v40 = vmul.f32 %v1001_v26, %v1001_v26  ;;  %v1029_v41 = vpack.c.bf16 %v1003_v32, %v1002_v27  ;;  %v1108_v42 = vmul.f32 %v1002_v27, %v1002_v27  ;;  %v1013_v12 = vld [vmem:[#allocation2 + $0x90] sm:$0xff]  ;;  %v1015_v18 = vld [vmem:[#allocation2 + $0xc0] sm:$0xff]  ;;  %v1016_v23 = vld [vmem:[#allocation2 + $0xa8] sm:$0xff] }
 0x17c   : > { %v1132_v43 = vadd.f32 %v1131_v33, %v1104_v29  ;;  %v1153_v44 = vadd.f32 %v1152_v34, %v1105_v30  ;;  %v1080_v45 = vadd.f32 %v1079_v35, %v1001_v26  ;;  %v1109_v46 = vmul.f32 %v1003_v32, %v1003_v32  ;;  %v1014_v17 = vld [vmem:[#allocation2 + $0x70] sm:$0xff]  ;;  %v1019_v33 = vld [vmem:[#allocation2 + $0x28] sm:$0xff] }
 0x17d   : > { %1045 = vst [vmem:[%s1944_s2 + $0x28] sm:$0xff] %v1029_v41  ;;  %v1060_v48 = vadd.f32 %v1059_v39, %v1002_v27  ;;  %v1030_v49 = vpack.c.bf16 %v1005_v38, %v1004_v37  ;;  %v1110_v50 = vmul.f32 %v1004_v37, %v1004_v37  ;;  %v1111_v51 = vmul.f32 %v1005_v38, %v1005_v38  ;;  %v1017_v24 = vld [vmem:[#allocation2 + $0xd0] sm:$0xff]  ;;  %v1020_v41 = vld [vmem:[#allocation2 + $0xa0] sm:$0xff] }
 0x17e   : > { %v1133_v53 = vadd.f32 %v1132_v43, %v1106_v36  ;;  %v1154_v54 = vadd.f32 %v1153_v44, %v1107_v40  ;;  %v1081_v55 = vadd.f32 %v1080_v45, %v1003_v32  ;;  %v1031_v56 = vpack.c.bf16 %v1007_v52, %v1006_v47  ;;  %v1018_v32 = vld [vmem:[#allocation2 + $0x10] sm:$0xff] }
 0x17f   : > { %1046 = vst [vmem:[%s1944_s2 + $0x30] sm:$0xff] %v1030_v49  ;;  %v1061_v59 = vadd.f32 %v1060_v48, %v1004_v37  ;;  %v1112_v60 = vmul.f32 %v1006_v47, %v1006_v47  ;;  %v1032_v61 = vpack.c.bf16 %v1009_v58, %v1008_v57  ;;  %v1113_v1 = vmul.f32 %v1007_v52, %v1007_v52  ;;  %v1023_v48 = vld [vmem:[#allocation2 + $0x98] sm:$0xff] }
 0x180   : > { %v1134_v62 = vadd.f32 %v1133_v53, %v1108_v42  ;;  %v1155_v63 = vadd.f32 %v1154_v54, %v1109_v46  ;;  %v1082_v0 = vadd.f32 %v1081_v55, %v1005_v38  ;;  %1047 = vst [vmem:[%s1944_s2 + $0x38] sm:$0xff] %v1031_v56  ;;  %v1114_v5 = vmul.f32 %v1008_v57, %v1008_v57  ;;  %v1021_v42 = vld [vmem:[#allocation2 + $0xf8] sm:$0xff] }
 0x181   : > { %v1062_v4 = vadd.f32 %v1061_v59, %v1006_v47  ;;  %1048 = vst [vmem:[%s1944_s2 + $0x40] sm:$0xff] %v1032_v61  ;;  %v1033_v6 = vpack.c.bf16 %v1011_v3, %v1010_v2  ;;  %v1115_v10 = vmul.f32 %v1009_v58, %v1009_v58  ;;  %v1116_v14 = vmul.f32 %v1010_v2, %v1010_v2  ;;  %v1022_v47 = vld [vmem:[#allocation2 + $0x20] sm:$0xff] }
 0x182   : > { %v1135_v7 = vadd.f32 %v1134_v62, %v1110_v50  ;;  %v1156_v8 = vadd.f32 %v1155_v63, %v1111_v51  ;;  %v1083_v9 = vadd.f32 %v1082_v0, %v1007_v52  ;;  %v1117_v15 = vmul.f32 %v1011_v3, %v1011_v3 }
 0x183   : > { %v1063_v13 = vadd.f32 %v1062_v4, %v1008_v57  ;;  %1049 = vst [vmem:[%s1944_s2 + $0x48] sm:$0xff] %v1033_v6  ;;  %v1034_v16 = vpack.c.bf16 %v1013_v12, %v1012_v11  ;;  %v1035_v22 = vpack.c.bf16 %v1015_v18, %v1014_v17  ;;  %v1118_v26 = vmul.f32 %v1012_v11, %v1012_v11 }
 0x184   : > { %v1136_v19 = vadd.f32 %v1135_v7, %v1112_v60  ;;  %v1157_v20 = vadd.f32 %v1156_v8, %v1113_v1  ;;  %v1084_v21 = vadd.f32 %v1083_v9, %v1009_v58  ;;  %v1036_v27 = vpack.c.bf16 %v1017_v24, %v1016_v23 }
 0x185   : > { %v1064_v25 = vadd.f32 %v1063_v13, %v1010_v2  ;;  %1050 = vst [vmem:[%s1944_s2 + $0x50] sm:$0xff] %v1034_v16  ;;  %v1119_v31 = vmul.f32 %v1013_v12, %v1013_v12  ;;  %v1120_v35 = vmul.f32 %v1014_v17, %v1014_v17  ;;  %v1037_v36 = vpack.c.bf16 %v1019_v33, %v1018_v32 }
 0x186   : > { %v1137_v28 = vadd.f32 %v1136_v19, %v1114_v5  ;;  %v1158_v29 = vadd.f32 %v1157_v20, %v1115_v10  ;;  %v1085_v30 = vadd.f32 %v1084_v21, %v1011_v3  ;;  %1051 = vst [vmem:[%s1944_s2 + $0x58] sm:$0xff] %v1035_v22  ;;  %v1121_v40 = vmul.f32 %v1015_v18, %v1015_v18 }
 0x187   : > { %v1065_v34 = vadd.f32 %v1064_v25, %v1012_v11  ;;  %1052 = vst [vmem:[%s1944_s2 + $0x60] sm:$0xff] %v1036_v27  ;;  %v1122_v44 = vmul.f32 %v1016_v23, %v1016_v23  ;;  %v1123_v45 = vmul.f32 %v1017_v24, %v1017_v24  ;;  %v1038_v46 = vpack.c.bf16 %v1021_v42, %v1020_v41 }
 0x188   : > { %v1138_v37 = vadd.f32 %v1137_v28, %v1116_v14  ;;  %v1159_v38 = vadd.f32 %v1158_v29, %v1117_v15  ;;  %v1086_v39 = vadd.f32 %v1085_v30, %v1013_v12  ;;  %1053 = vst [vmem:[%s1944_s2 + $0x68] sm:$0xff] %v1037_v36  ;;  %v1039_v52 = vpack.c.bf16 %v1023_v48, %v1022_v47 }
 0x189   : > { %v1066_v43 = vadd.f32 %v1065_v34, %v1014_v17  ;;  %v1124_v54 = vmul.f32 %v1018_v32, %v1018_v32  ;;  %1054 = vst [vmem:[%s1944_s2 + $0x70] sm:$0xff] %v1038_v46  ;;  %v1125_v58 = vmul.f32 %v1019_v33, %v1019_v33  ;;  %v1126_v60 = vmul.f32 %v1020_v41, %v1020_v41 }
 0x18a   : > { %v1139_v49 = vadd.f32 %v1138_v37, %v1118_v26  ;;  %v1160_v50 = vadd.f32 %v1159_v38, %v1119_v31  ;;  %v1087_v51 = vadd.f32 %v1086_v39, %v1015_v18  ;;  %1055 = vst [vmem:[%s1944_s2 + $0x78] sm:$0xff] %v1039_v52  ;;  %v1127_v0 = vmul.f32 %v1021_v42, %v1021_v42 }
 0x18b   : > { %v1067_v53 = vadd.f32 %v1066_v43, %v1016_v23  ;;  %v1128_v2 = vmul.f32 %v1022_v47, %v1022_v47  ;;  %v1129_v6 = vmul.f32 %v1023_v48, %v1023_v48  ;;  %v1172_v20 = vlaneseq }
 0x18c   : > { %v1140_v55 = vadd.f32 %v1139_v49, %v1120_v35  ;;  %v1161_v56 = vadd.f32 %v1160_v50, %v1121_v40  ;;  %v1088_v57 = vadd.f32 %v1087_v51, %v1017_v24 }
 0x18d   : > { %v1068_v59 = vadd.f32 %v1067_v53, %v1018_v32  ;;  %v1173_v29 = vshrl.u32 %v1172_v20, 7 }
 0x18e   : > { %v1141_v61 = vadd.f32 %v1140_v55, %v1122_v44  ;;  %v1162_v62 = vadd.f32 %v1161_v56, %v1123_v45  ;;  %v1089_v63 = vadd.f32 %v1088_v57, %v1019_v33 }
 0x18f   : > { %v1069_v1 = vadd.f32 %v1068_v59, %v1020_v41  ;;  %vm1175_vm0 = vcmp.eq.s32.totalorder %v1173_v29, 1  ;;  %vm1174_vm1 = vcmp.eq.s32.totalorder %v1173_v29, 0 }
 0x190   : > { %v1142_v3 = vadd.f32 %v1141_v61, %v1124_v54  ;;  %v1163_v4 = vadd.f32 %v1162_v62, %v1125_v58  ;;  %v1090_v5 = vadd.f32 %v1089_v63, %v1021_v42 }
 0x191   : > { %v1070_v7 = vadd.f32 %v1069_v1, %v1022_v47 }
 0x192   : > { %v1143_v8 = vadd.f32 %v1142_v3, %v1126_v60  ;;  %v1164_v9 = vadd.f32 %v1163_v4, %v1127_v0  ;;  %v1091_v10 = vadd.f32 %v1090_v5, %v1023_v48 }
 0x193   : > { %v1071_v11 = vrot.slane %v1070_v7, 4 }
 0x194   : > { %v1092_v12 = vrot.slane %v1091_v10, 4  ;;  %v1144_v13 = vadd.f32 %v1143_v8, %v1128_v2  ;;  %v1165_v14 = vadd.f32 %v1164_v9, %v1129_v6 }
 0x195   : > { %v1072_v15 = vadd.f32 %v1071_v11, %v1070_v7 }
 0x196   : > { %v1093_v16 = vadd.f32 %v1092_v12, %v1091_v10  ;;  %v1145_v17 = vrot.slane %v1144_v13, 4  ;;  %v1166_v18 = vrot.slane %v1165_v14, 4 }
 0x197   : > { %v1073_v19 = vrot.slane %v1072_v15, 2 }
 0x198   : > { %v1146_v21 = vadd.f32 %v1145_v17, %v1144_v13  ;;  %v1094_v22 = vrot.slane %v1093_v16, 2  ;;  %v1167_v23 = vadd.f32 %v1166_v18, %v1165_v14 }
 0x199   : > { %v1074_v24 = vadd.f32 %v1073_v19, %v1072_v15 }
 0x19a   : > { %v1147_v25 = vrot.slane %v1146_v21, 2  ;;  %v1095_v26 = vadd.f32 %v1094_v22, %v1093_v16  ;;  %v1168_v27 = vrot.slane %v1167_v23, 2 }
 0x19b   : > { %v1075_v28 = vrot.slane %v1074_v24, 1 }
 0x19c   : > { %v1148_v30 = vadd.f32 %v1147_v25, %v1146_v21  ;;  %v1096_v31 = vrot.slane %v1095_v26, 1  ;;  %v1169_v32 = vadd.f32 %v1168_v27, %v1167_v23 }
 0x19d   : > { %v1076_v35 = vadd.f32 %v1075_v28, %v1074_v24 }
 0x19e   : > { %v1149_v33 = vrot.slane %v1148_v30, 1  ;;  %v1170_v34 = vrot.slane %v1169_v32, 1  ;;  %v1097_v36 = vadd.f32 %v1096_v31, %v1095_v26 }
 0x1a0   : > { %v1150_v37 = vadd.f32 %v1149_v33, %v1148_v30  ;;  %v1171_v38 = vadd.f32 %v1170_v34, %v1169_v32 }
 0x1a2   : > { %v1176_v39 = vsel %vm1175_vm0, %v1150_v37, 0.0  ;;  %v1177_v40 = vsel %vm1175_vm0, %v1171_v38, 0.0 }
 0x1a3   : > { %v1178_v41 = vsel %vm1174_vm1, %v1076_v35, %v1176_v39  ;;  %v1179_v42 = vsel %vm1174_vm1, %v1097_v36, %v1177_v40 }
 0x1a4   : > { %1180 = vst [vmem:[%s1945_s3] sm:$0xff] %v1178_v41 }
 0x1a5   : > { %1181 = vst [vmem:[%s1945_s3 + $0x8] sm:$0xff] %v1179_v42 }
 0x1a6 PF: > { %s14_s16 = sadd.s32 1, %s1680_s16   ;;  %s1946_s12 = smov %s1668_s13 }
 0x1a7   : > { %p11_p12 = scmp.ge.s32.totalorder %s14_s16, 5   ;;  %s1947_s13 = smov %s1738_s20 }
 0x1a8   : > { %s1948_s14 = smov %s1676_s15  ;;  %s1949_s15 = smov %s1951_s17 }
 0x1a9   :  { %13 = sbr.rel (!%p11_p12) target bundleno = 3 (0x3), region = 124 }

// kernel: _lambda_.27
= control target key start
LH: loop header
LB: loop body
LE: loop exit
PB: predicated region body
PF: predicated region fallthrough
CT: control target
= control target key end

     0   :  { %s1341_s12 = smov 0   ;;  %s1343_s13 = smov 0   ;;  %s1505_s0 = inlined_call_operand.vmem [shape: bf16[128,1280], index: 0, kind: input, shape index: {}]   ;;  %s1506_s1 = inlined_call_operand.vmem [shape: bf16[1280,128], index: 1, kind: input, shape index: {}]   ;;  %s1507_s2 = inlined_call_operand.vmem [shape: bf16[128,128], index: 2, kind: output, shape index: {0}]   ;;  %s1508_s3 = inlined_call_operand.vmem [shape: f32[8,128], index: 3, kind: output, shape index: {1}]  }
   0x1   :  { %s1345_s14 = smov 0   ;;  %s1347_s15 = smov 0  }
   0x2   :  { %s1349_s16 = smov 0  }
   0x3 LB: > { %s26_s17 = sadd.s32 1, %s1314_s15  ;;  %p49_p1 = scmp.ne.s32.totalorder %s1306_s13, %s1302_s12  ;;  %s1318_s16 = sphi %s1349_s16, %s14_s16   ;;  %s1314_s15 = sphi %s1347_s15, %s1512_s15   ;;  %s1310_s14 = sphi %s1345_s14, %s1511_s14   ;;  %s1306_s13 = sphi %s1343_s13, %s1510_s13   ;;  %s1302_s12 = sphi %s1341_s12, %s1509_s12  }
   0x4   : > { %p27_p0 = scmp.ge.s32.totalorder %s26_s17, 5  ;;  %p50_p2 = scmp.eq.s32.totalorder %s1318_s16, 0 }
   0x5   : > { %s42_s19 = sadd.s32 1, %s1306_s13  ;;  %p1000_p5 = scmp.ge.s32.totalorder %s1318_s16, 5 }
   0x6   : > { %s1514_s17 = smov (%p27_p0, %s26_s17), 0  ;;  %p51_p3 = por %p50_p2, %p49_p1 }
   0x7   : > { %s38_s18 = ssub.s32 %s1314_s15, %s1514_s17  ;;  %159 = sbr.rel (%p1000_p5) target bundleno = 32 (0x20), region = 16 }
   0x8   : > { %p40_p4 = scmp.eq.s32.totalorder %s38_s18, 0 }
   0xa   : > { %s1376_s20 = scalar_select %p40_p4, %s1306_s13, %s42_s19  }
   0xc   : > { %162 = sbr.rel (!%p51_p3) target bundleno = 32 (0x20), region = 20  ;;  %s164_s21 = sand.u32 (%p51_p3), 1, %s1306_s13  }
   0xd   : > { %s1143_s22 = sshll.u32 (%p51_p3), %s1314_s15, 3  ;;  %s1001_s23 = sshll.u32 (%p51_p3), %s164_s21, 7 }
   0xe   : > { %s1384_s26 = scalar_lea.vmem (%p51_p3), %s1505_s0, %s1143_s22  ;;  %s166_s27 = scalar_lea.vmem (%p51_p3), [#allocation3], %s1001_s23 }
   0xf   : > { %v231_v0 = vld [vmem:[%s1384_s26] sm:$0xff] (%p51_p3)  ;;  %v233_v1 = vld [vmem:[%s1384_s26 + $0x28] sm:$0xff] (%p51_p3)  ;;  %v235_v2 = vld [vmem:[%s1384_s26 + $0x50] sm:$0xff] (%p51_p3) }
  0x10   : > { %232 = vst [vmem:[%s166_s27] sm:$0xff] (%p51_p3), %v231_v0  ;;  %v237_v3 = vld [vmem:[%s1384_s26 + $0x78] sm:$0xff] (%p51_p3)  ;;  %v239_v4 = vld [vmem:[%s1384_s26 + $0xa0] sm:$0xff] (%p51_p3)  ;;  %v241_v5 = vld [vmem:[%s1384_s26 + $0xc8] sm:$0xff] (%p51_p3) }
  0x11   : > { %234 = vst [vmem:[%s166_s27 + $0x8] sm:$0xff] %v233_v1  ;;  %v243_v6 = vld [vmem:[%s1384_s26 + $0xf0] sm:$0xff]  ;;  %v245_v7 = vld [vmem:[%s1384_s26 + $0x118] sm:$0xff]  ;;  %v247_v8 = vld [vmem:[%s1384_s26 + $0x140] sm:$0xff] }
  0x12   : > { %236 = vst [vmem:[%s166_s27 + $0x10] sm:$0xff] %v235_v2  ;;  %v249_v9 = vld [vmem:[%s1384_s26 + $0x168] sm:$0xff]  ;;  %v251_v10 = vld [vmem:[%s1384_s26 + $0x190] sm:$0xff]  ;;  %v253_v11 = vld [vmem:[%s1384_s26 + $0x1b8] sm:$0xff] }
  0x13   : > { %238 = vst [vmem:[%s166_s27 + $0x18] sm:$0xff] %v237_v3  ;;  %v255_v12 = vld [vmem:[%s1384_s26 + $0x1e0] sm:$0xff]  ;;  %v257_v13 = vld [vmem:[%s1384_s26 + $0x208] sm:$0xff]  ;;  %v259_v14 = vld [vmem:[%s1384_s26 + $0x230] sm:$0xff] }
  0x14   : > { %240 = vst [vmem:[%s166_s27 + $0x20] sm:$0xff] %v239_v4  ;;  %v261_v15 = vld [vmem:[%s1384_s26 + $0x258] sm:$0xff] }
  0x15   : > { %242 = vst [vmem:[%s166_s27 + $0x28] sm:$0xff] %v241_v5 }
  0x16   : > { %244 = vst [vmem:[%s166_s27 + $0x30] sm:$0xff] %v243_v6 }
  0x17   : > { %246 = vst [vmem:[%s166_s27 + $0x38] sm:$0xff] %v245_v7 }
  0x18   : > { %248 = vst [vmem:[%s166_s27 + $0x40] sm:$0xff] %v247_v8 }
  0x19   : > { %250 = vst [vmem:[%s166_s27 + $0x48] sm:$0xff] %v249_v9 }
  0x1a   : > { %252 = vst [vmem:[%s166_s27 + $0x50] sm:$0xff] %v251_v10 }
  0x1b   : > { %254 = vst [vmem:[%s166_s27 + $0x58] sm:$0xff] %v253_v11 }
  0x1c   : > { %256 = vst [vmem:[%s166_s27 + $0x60] sm:$0xff] %v255_v12 }
  0x1d   : > { %258 = vst [vmem:[%s166_s27 + $0x68] sm:$0xff] %v257_v13 }
  0x1e   : > { %260 = vst [vmem:[%s166_s27 + $0x70] sm:$0xff] %v259_v14 }
  0x1f   : > { %262 = vst [vmem:[%s166_s27 + $0x78] sm:$0xff] %v261_v15 }
  0x20 PF: > { %p1004_p6 = scmp.ge.s32.totalorder %s1318_s16, 1  ;;  %p279_p7 = scmp.lt.s32.totalorder %s1318_s16, 6 }
  0x22   : > { %p280_p8 = pnand %p1004_p6, %p279_p7 }
  0x23   : > { %s286_s28 = sand.u32 (!%p280_p8), 1, %s1302_s12   ;;  %s1006_s29 = sshll.u32 (!%p280_p8), %s1310_s14, 5 }
  0x24   : > { %283 = sbr.rel (%p280_p8) target bundleno = 337 (0x151), region = 62  ;;  %s1005_s30 = sshll.u32 (!%p280_p8), %s286_s28, 7 }
  0x25   : > { %p330_p9 = scmp.lt.s32.totalorder (!%p280_p8), %s1006_s29, 159  ;;  %s1411_s8 = scalar_lea.vmem (!%p280_p8), [#allocation3], %s1005_s30 }
  0x26   : > { %p1008_p10 = scmp.ne.s32.totalorder (!%p280_p8), %s1310_s14, 0 }
  0x29   : > { %s1516_s29 = smov (!%p330_p9, %s1006_s29), 159  ;;  %357 = sbr.rel (%p1008_p10) target bundleno = 63 (0x3f), region = 70 }
  0x2a   : > { %s1007_s4 = sshll.u32 %s1516_s29, 2 }
  0x2b   : > { %s1409_s7 = scalar_lea.vmem %s1506_s1, %s1007_s4 }
  0x2e   : > { %v1320_v16 = vmov 0.0  }
  0x2f   : > { %358 = vst [vmem:[#allocation2 + $0x30] sm:$0xff] %v1320_v16 }
  0x30   : > { %359 = vst [vmem:[#allocation2] sm:$0xff] %v1320_v16 }
  0x31   : > { %360 = vst [vmem:[#allocation2 + $0x58] sm:$0xff] %v1320_v16 }
  0x32   : > { %361 = vst [vmem:[#allocation2 + $0x18] sm:$0xff] %v1320_v16 }
  0x33   : > { %362 = vst [vmem:[#allocation2 + $0x50] sm:$0xff] %v1320_v16 }
  0x34   : > { %363 = vst [vmem:[#allocation2 + $0x68] sm:$0xff] %v1320_v16 }
  0x35   : > { %364 = vst [vmem:[#allocation2 + $0x8] sm:$0xff] %v1320_v16 }
  0x36   : > { %365 = vst [vmem:[#allocation2 + $0x48] sm:$0xff] %v1320_v16 }
  0x37   : > { %366 = vst [vmem:[#allocation2 + $0x40] sm:$0xff] %v1320_v16 }
  0x38   : > { %367 = vst [vmem:[#allocation2 + $0x20] sm:$0xff] %v1320_v16 }
  0x39   : > { %368 = vst [vmem:[#allocation2 + $0x10] sm:$0xff] %v1320_v16 }
  0x3a   : > { %369 = vst [vmem:[#allocation2 + $0x38] sm:$0xff] %v1320_v16 }
  0x3b   : > { %370 = vst [vmem:[#allocation2 + $0x60] sm:$0xff] %v1320_v16 }
  0x3c   : > { %371 = vst [vmem:[#allocation2 + $0x70] sm:$0xff] %v1320_v16 }
  0x3d   : > { %372 = vst [vmem:[#allocation2 + $0x78] sm:$0xff] %v1320_v16 }
  0x3e   : > { %373 = vst [vmem:[#allocation2 + $0x28] sm:$0xff] %v1320_v16 }
  0x3f PF: > { %v1167_v17 = vld [vmem:[%s1409_s7 + $0x38] sm:$0xff]  ;;  %v1166_v19 = vld [vmem:[%s1409_s7 + $0x30] sm:$0xff]  ;;  %v1165_v21 = vld [vmem:[%s1409_s7 + $0x28] sm:$0xff]  ;;  %p1137_p11 = scmp.ne.s32.totalorder %s1310_s14, 4 }
  0x40   : > { %v1175_v18 = vld [vmem:[%s1409_s7 + $0x78] sm:$0xff]  ;;  %614 = vmatpush.bf16.msra.mxu0 %v1167_v17  ;;  %1223 = vmatpush.bf16.msra.mxu2 %v1167_v17  ;;  %v1174_v20 = vld [vmem:[%s1409_s7 + $0x70] sm:$0xff]  ;;  %v1173_v22 = vld [vmem:[%s1409_s7 + $0x68] sm:$0xff] }
  0x41   : > { %663 = vmatpush.bf16.msra.mxu1 %v1175_v18  ;;  %1231 = vmatpush.bf16.msra.mxu3 %v1175_v18  ;;  %v1164_v23 = vld [vmem:[%s1409_s7 + $0x20] sm:$0xff]  ;;  %v1163_v25 = vld [vmem:[%s1409_s7 + $0x18] sm:$0xff]  ;;  %v1162_v27 = vld [vmem:[%s1409_s7 + $0x10] sm:$0xff] }
  0x42   : > { %v1172_v24 = vld [vmem:[%s1409_s7 + $0x60] sm:$0xff]  ;;  %v1171_v26 = vld [vmem:[%s1409_s7 + $0x58] sm:$0xff]  ;;  %v1170_v28 = vld [vmem:[%s1409_s7 + $0x50] sm:$0xff] }
  0x43   : > { %v1161_v29 = vld [vmem:[%s1409_s7 + $0x8] sm:$0xff]  ;;  %v1160_v31 = vld [vmem:[%s1409_s7] sm:$0xff]  ;;  %v1019_v45 = vld [vmem:[%s1411_s8 + $0x10] sm:$0xf] }
  0x44   : > { %615 = vmatpush.bf16.msra.mxu0 %v1166_v19  ;;  %1224 = vmatpush.bf16.msra.mxu2 %v1166_v19  ;;  %v1169_v30 = vld [vmem:[%s1409_s7 + $0x48] sm:$0xff]  ;;  %v1168_v32 = vld [vmem:[%s1409_s7 + $0x40] sm:$0xff]  ;;  %v1147_v46 = vld [vmem:[%s1411_s8 + $0x14] sm:$0xf0] }
  0x45   : > { %664 = vmatpush.bf16.msra.mxu1 %v1174_v20  ;;  %1232 = vmatpush.bf16.msra.mxu3 %v1174_v20  ;;  %v1011_v33 = vld [vmem:[%s1411_s8] sm:$0xf]  ;;  %v1145_v34 = vld [vmem:[%s1411_s8 + $0x4] sm:$0xf0]  ;;  %v1144_v37 = vld [vmem:[%s1411_s8 + $0x4] sm:$0xf]  ;;  %v1020_v53 = vor.u32 %v1147_v46, %v1019_v45 }
  0x46   : > { %v1043_v35 = vld [vmem:[%s1411_s8 + $0x40] sm:$0xf]  ;;  %v1153_v36 = vld [vmem:[%s1411_s8 + $0x44] sm:$0xf0]  ;;  %v1013_v38 = vld [vmem:[%s1411_s8 + $0x8] sm:$0xf0]  ;;  %v1012_v41 = vor.u32 %v1145_v34, %v1011_v33 }
  0x47   : > { %v1152_v39 = vld [vmem:[%s1411_s8 + $0x44] sm:$0xf]  ;;  %v1045_v40 = vld [vmem:[%s1411_s8 + $0x48] sm:$0xf0]  ;;  %v1044_v42 = vor.u32 %v1153_v36, %v1043_v35  ;;  %v1016_v43 = vor.u32 %v1144_v37, %v1013_v38  ;;  %v1051_v47 = vld [vmem:[%s1411_s8 + $0x50] sm:$0xf] }
  0x48   : > { %616 = vmatpush.bf16.msra.mxu0 %v1165_v21  ;;  %1225 = vmatpush.bf16.msra.mxu2 %v1165_v21  ;;  %v1048_v44 = vor.u32 %v1152_v39, %v1045_v40  ;;  %v1155_v48 = vld [vmem:[%s1411_s8 + $0x54] sm:$0xf0]  ;;  %v1146_v49 = vld [vmem:[%s1411_s8 + $0x14] sm:$0xf]  ;;  %v1021_v50 = vld [vmem:[%s1411_s8 + $0x18] sm:$0xf0] }
  0x49   : > { %665 = vmatpush.bf16.msra.mxu1 %v1173_v22  ;;  %1233 = vmatpush.bf16.msra.mxu3 %v1173_v22  ;;  %v1154_v51 = vld [vmem:[%s1411_s8 + $0x54] sm:$0xf]  ;;  %v1053_v52 = vld [vmem:[%s1411_s8 + $0x58] sm:$0xf0]  ;;  %v1052_v54 = vor.u32 %v1155_v48, %v1051_v47  ;;  %v1024_v55 = vor.u32 %v1146_v49, %v1021_v50  ;;  %v1027_v57 = vld [vmem:[%s1411_s8 + $0x20] sm:$0xf] }
  0x4a   : > { %v1056_v56 = vor.u32 %v1154_v51, %v1053_v52  ;;  %v1149_v58 = vld [vmem:[%s1411_s8 + $0x24] sm:$0xf0]  ;;  %v1059_v59 = vld [vmem:[%s1411_s8 + $0x60] sm:$0xf]  ;;  %v1148_v61 = vld [vmem:[%s1411_s8 + $0x24] sm:$0xf] }
  0x4b   : > { %v1157_v60 = vld [vmem:[%s1411_s8 + $0x64] sm:$0xf0]  ;;  %v1029_v62 = vld [vmem:[%s1411_s8 + $0x28] sm:$0xf0]  ;;  %v1156_v63 = vld [vmem:[%s1411_s8 + $0x64] sm:$0xf]  ;;  %v1028_v1 = vor.u32 %v1149_v58, %v1027_v57 }
  0x4c   : > { %617 = vmatpush.bf16.msra.mxu0 %v1164_v23  ;;  %1226 = vmatpush.bf16.msra.mxu2 %v1164_v23  ;;  %v1061_v0 = vld [vmem:[%s1411_s8 + $0x68] sm:$0xf0]  ;;  %v1060_v2 = vor.u32 %v1157_v60, %v1059_v59  ;;  %v1032_v3 = vor.u32 %v1148_v61, %v1029_v62  ;;  %v1035_v5 = vld [vmem:[%s1411_s8 + $0x30] sm:$0xf]  ;;  %v1151_v6 = vld [vmem:[%s1411_s8 + $0x34] sm:$0xf0] }
  0x4d   : > { %666 = vmatpush.bf16.msra.mxu1 %v1172_v24  ;;  %1234 = vmatpush.bf16.msra.mxu3 %v1172_v24  ;;  %v1064_v4 = vor.u32 %v1156_v63, %v1061_v0  ;;  %v1067_v7 = vld [vmem:[%s1411_s8 + $0x70] sm:$0xf]  ;;  %v1159_v8 = vld [vmem:[%s1411_s8 + $0x74] sm:$0xf0]  ;;  %v1150_v9 = vld [vmem:[%s1411_s8 + $0x34] sm:$0xf]  ;;  %v1036_v13 = vor.u32 %v1151_v6, %v1035_v5 }
  0x4e   : > { %v1037_v10 = vld [vmem:[%s1411_s8 + $0x38] sm:$0xf0]  ;;  %v1158_v11 = vld [vmem:[%s1411_s8 + $0x74] sm:$0xf]  ;;  %v1068_v14 = vor.u32 %v1159_v8, %v1067_v7  ;;  %v382_v23 = vld [vmem:[#allocation2 + $0x40] sm:$0xff] }
  0x4f   : > { %v1069_v12 = vld [vmem:[%s1411_s8 + $0x78] sm:$0xf0]  ;;  %v1040_v15 = vor.u32 %v1150_v9, %v1037_v10  ;;  %v374_v18 = vld [vmem:[#allocation2 + $0x30] sm:$0xff]  ;;  %v383_v33 = vld [vmem:[#allocation2 + $0x20] sm:$0xff] }
  0x50   : > { %618 = vmatpush.bf16.msra.mxu0 %v1163_v25  ;;  %1227 = vmatpush.bf16.msra.mxu2 %v1163_v25  ;;  %v1072_v16 = vor.u32 %v1158_v11, %v1069_v12  ;;  %v376_v37 = vld [vmem:[#allocation2 + $0x58] sm:$0xff]  ;;  %v378_v57 = vld [vmem:[#allocation2 + $0x50] sm:$0xff]  ;;  %v386_v63 = vld [vmem:[#allocation2 + $0x60] sm:$0xff] }
  0x51   : > { %667 = vmatpush.bf16.msra.mxu1 %v1171_v26  ;;  %1235 = vmatpush.bf16.msra.mxu3 %v1171_v26  ;;  %v377_v47 = vld [vmem:[#allocation2 + $0x18] sm:$0xff]  ;;  %v387_v9 = vld [vmem:[#allocation2 + $0x70] sm:$0xff] }
  0x54   : > { %619 = vmatpush.bf16.msra.mxu0 %v1162_v27  ;;  %1228 = vmatpush.bf16.msra.mxu2 %v1162_v27  ;;  %v375_v27 = vld [vmem:[#allocation2] sm:$0xff] }
  0x55   : > { %668 = vmatpush.bf16.msra.mxu1 %v1170_v28  ;;  %1236 = vmatpush.bf16.msra.mxu3 %v1170_v28 }
  0x58   : > { %620 = vmatpush.bf16.msra.mxu0 %v1161_v29  ;;  %1229 = vmatpush.bf16.msra.mxu2 %v1161_v29 }
  0x59   : > { %669 = vmatpush.bf16.msra.mxu1 %v1169_v30  ;;  %1237 = vmatpush.bf16.msra.mxu3 %v1169_v30 }
  0x5c   : > { %621 = vmatpush.bf16.msra.mxu0 %v1160_v31  ;;  %1230 = vmatpush.bf16.msra.mxu2 %v1160_v31 }
  0x5d   : > { %670 = vmatpush.bf16.msra.mxu1 %v1168_v32  ;;  %1238 = vmatpush.bf16.msra.mxu3 %v1168_v32 }
  0x5f   : > { %622 = vmatmul.bf16.vlgmr.msra.gmra.mxu0 %v1012_v41  ;;  %642 = vmatmul.bf16.vlgmr.msra.gmra.mxu2 %v1044_v42 }
  0x60   : > { %671 = vmatmul.bf16.vlgmr.msra.gmra.mxu1 %v1016_v43  ;;  %691 = vmatmul.bf16.vlgmr.msra.gmra.mxu3 %v1048_v44  ;;  %v384_v43 = vld [vmem:[#allocation2 + $0x10] sm:$0xff] }
  0x6f   : > { %627 = vmatmul.bf16.gmra.mxu0 %v1020_v53  ;;  %647 = vmatmul.bf16.gmra.mxu2 %v1052_v54  ;;  %v385_v53 = vld [vmem:[#allocation2 + $0x38] sm:$0xff] }
  0x70   : > { %676 = vmatmul.bf16.gmra.mxu1 %v1024_v55  ;;  %696 = vmatmul.bf16.gmra.mxu3 %v1056_v56 }
  0x7f   : > { %632 = vmatmul.bf16.gmra.mxu0 %v1028_v1  ;;  %652 = vmatmul.bf16.gmra.mxu2 %v1060_v2 }
  0x80   : > { %681 = vmatmul.bf16.gmra.mxu1 %v1032_v3  ;;  %701 = vmatmul.bf16.gmra.mxu3 %v1064_v4  ;;  %v379_v3 = vld [vmem:[#allocation2 + $0x68] sm:$0xff] }
  0x8f   : > { %637 = vmatmul.bf16.gmra.mxu0 %v1036_v13  ;;  %657 = vmatmul.bf16.gmra.mxu2 %v1068_v14  ;;  %v380_v13 = vld [vmem:[#allocation2 + $0x8] sm:$0xff] }
  0x90   : > { %686 = vmatmul.bf16.gmra.mxu1 %v1040_v15  ;;  %706 = vmatmul.bf16.gmra.mxu3 %v1072_v16 }
  0xdc   : > { %v623_v17 = vpop.f32.mrf.mxu0 }
  0xdd   : > { %v672_v19 = vpop.f32.mrf.mxu1 }
  0xde   : > { %v673_v20 = vadd.f32 %v672_v19, %v623_v17  ;;  %v388_v19 = vld [vmem:[#allocation2 + $0x78] sm:$0xff] }
  0xe0   : > { %v712_v21 = vadd.f32 %v673_v20, %v374_v18 }
  0xe2   : > { %728 = vst [vmem:[#allocation2 + $0x30] sm:$0xff] %v712_v21  ;;  %v643_v22 = vpop.f32.mrf.mxu2 }
  0xe3   : > { %v692_v24 = vpop.f32.mrf.mxu3 }
  0xe4   : > { %v693_v25 = vadd.f32 %v692_v24, %v643_v22  ;;  %v625_v26 = vpop.f32.mrf.mxu0 }
  0xe5   : > { %v674_v28 = vpop.f32.mrf.mxu1 }
  0xe6   : > { %v720_v29 = vadd.f32 %v693_v25, %v382_v23  ;;  %v675_v30 = vadd.f32 %v674_v28, %v625_v26  ;;  %v381_v23 = vld [vmem:[#allocation2 + $0x48] sm:$0xff] }
  0xe8   : > { %736 = vst [vmem:[#allocation2 + $0x40] sm:$0xff] %v720_v29  ;;  %v713_v31 = vadd.f32 %v675_v30, %v375_v27  ;;  %v389_v29 = vld [vmem:[#allocation2 + $0x28] sm:$0xff] }
  0xea   : > { %729 = vst [vmem:[#allocation2] sm:$0xff] %v713_v31  ;;  %v645_v32 = vpop.f32.mrf.mxu2 }
  0xeb   : > { %v694_v34 = vpop.f32.mrf.mxu3 }
  0xec   : > { %v695_v35 = vadd.f32 %v694_v34, %v645_v32  ;;  %v628_v36 = vpop.f32.mrf.mxu0 }
  0xed   : > { %v677_v38 = vpop.f32.mrf.mxu1 }
  0xee   : > { %v721_v39 = vadd.f32 %v695_v35, %v383_v33  ;;  %v678_v40 = vadd.f32 %v677_v38, %v628_v36 }
  0xf0   : > { %737 = vst [vmem:[#allocation2 + $0x20] sm:$0xff] %v721_v39  ;;  %v714_v41 = vadd.f32 %v678_v40, %v376_v37 }
  0xf2   : > { %730 = vst [vmem:[#allocation2 + $0x58] sm:$0xff] %v714_v41  ;;  %v648_v42 = vpop.f32.mrf.mxu2 }
  0xf3   : > { %v697_v44 = vpop.f32.mrf.mxu3 }
  0xf4   : > { %v698_v45 = vadd.f32 %v697_v44, %v648_v42  ;;  %v630_v46 = vpop.f32.mrf.mxu0 }
  0xf5   : > { %v679_v48 = vpop.f32.mrf.mxu1 }
  0xf6   : > { %v722_v49 = vadd.f32 %v698_v45, %v384_v43  ;;  %v680_v50 = vadd.f32 %v679_v48, %v630_v46 }
  0xf8   : > { %738 = vst [vmem:[#allocation2 + $0x10] sm:$0xff] %v722_v49  ;;  %v715_v51 = vadd.f32 %v680_v50, %v377_v47 }
  0xfa   : > { %731 = vst [vmem:[#allocation2 + $0x18] sm:$0xff] %v715_v51  ;;  %v650_v52 = vpop.f32.mrf.mxu2 }
  0xfb   : > { %v699_v54 = vpop.f32.mrf.mxu3 }
  0xfc   : > { %v700_v55 = vadd.f32 %v699_v54, %v650_v52  ;;  %v633_v56 = vpop.f32.mrf.mxu0 }
  0xfd   : > { %v682_v58 = vpop.f32.mrf.mxu1 }
  0xfe   : > { %v723_v59 = vadd.f32 %v700_v55, %v385_v53  ;;  %v683_v60 = vadd.f32 %v682_v58, %v633_v56 }
 0x100   : > { %739 = vst [vmem:[#allocation2 + $0x38] sm:$0xff] %v723_v59  ;;  %v716_v61 = vadd.f32 %v683_v60, %v378_v57 }
 0x102   : > { %732 = vst [vmem:[#allocation2 + $0x50] sm:$0xff] %v716_v61  ;;  %v653_v62 = vpop.f32.mrf.mxu2 }
 0x103   : > { %v702_v0 = vpop.f32.mrf.mxu3 }
 0x104   : > { %v703_v1 = vadd.f32 %v702_v0, %v653_v62  ;;  %v635_v2 = vpop.f32.mrf.mxu0 }
 0x105   : > { %v684_v4 = vpop.f32.mrf.mxu1 }
 0x106   : > { %v724_v5 = vadd.f32 %v703_v1, %v386_v63  ;;  %v685_v6 = vadd.f32 %v684_v4, %v635_v2 }
 0x108   : > { %740 = vst [vmem:[#allocation2 + $0x60] sm:$0xff] %v724_v5  ;;  %v717_v7 = vadd.f32 %v685_v6, %v379_v3 }
 0x10a   : > { %733 = vst [vmem:[#allocation2 + $0x68] sm:$0xff] %v717_v7  ;;  %v655_v8 = vpop.f32.mrf.mxu2 }
 0x10b   : > { %v704_v10 = vpop.f32.mrf.mxu3 }
 0x10c   : > { %v705_v11 = vadd.f32 %v704_v10, %v655_v8  ;;  %v638_v12 = vpop.f32.mrf.mxu0 }
 0x10d   : > { %v687_v14 = vpop.f32.mrf.mxu1 }
 0x10e   : > { %v725_v15 = vadd.f32 %v705_v11, %v387_v9  ;;  %v688_v16 = vadd.f32 %v687_v14, %v638_v12 }
 0x110   : > { %741 = vst [vmem:[#allocation2 + $0x70] sm:$0xff] %v725_v15  ;;  %v718_v17 = vadd.f32 %v688_v16, %v380_v13 }
 0x112   : > { %734 = vst [vmem:[#allocation2 + $0x8] sm:$0xff] %v718_v17  ;;  %v658_v18 = vpop.f32.mrf.mxu2 }
 0x113   : > { %v707_v20 = vpop.f32.mrf.mxu3 }
 0x114   : > { %v708_v21 = vadd.f32 %v707_v20, %v658_v18  ;;  %v640_v22 = vpop.f32.mrf.mxu0 }
 0x115   : > { %v689_v24 = vpop.f32.mrf.mxu1 }
 0x116   : > { %v726_v25 = vadd.f32 %v708_v21, %v388_v19  ;;  %v690_v26 = vadd.f32 %v689_v24, %v640_v22 }
 0x118   : > { %742 = vst [vmem:[#allocation2 + $0x78] sm:$0xff] %v726_v25  ;;  %v719_v27 = vadd.f32 %v690_v26, %v381_v23 }
 0x11a   : > { %735 = vst [vmem:[#allocation2 + $0x48] sm:$0xff] %v719_v27  ;;  %v660_v28 = vpop.f32.mrf.mxu2 }
 0x11b   : > { %v709_v30 = vpop.f32.mrf.mxu3 }
 0x11c   : > { %v710_v31 = vadd.f32 %v709_v30, %v660_v28  ;;  %747 = sbr.rel (%p1137_p11) target bundleno = 337 (0x151), region = 74 }
 0x11e   : > { %v727_v32 = vadd.f32 %v710_v31, %v389_v29 }
 0x120   : > { %743 = vst [vmem:[#allocation2 + $0x28] sm:$0xff] %v727_v32 }
 0x121   : > { %v748_v33 = vld [vmem:[#allocation2 + $0x30] sm:$0xff]  ;;  %v749_v34 = vld [vmem:[#allocation2] sm:$0xff]  ;;  %v750_v35 = vld [vmem:[#allocation2 + $0x58] sm:$0xff] }
 0x122   : > { %v1179_v36 = vpack.c.bf16 %v749_v34, %v748_v33  ;;  %v796_v37 = vadd.f32 %v749_v34, %v748_v33  ;;  %v817_v38 = vmul.f32 %v748_v33, %v748_v33  ;;  %v818_v39 = vmul.f32 %v749_v34, %v749_v34  ;;  %v751_v40 = vld [vmem:[#allocation2 + $0x18] sm:$0xff]  ;;  %v752_v41 = vld [vmem:[#allocation2 + $0x50] sm:$0xff]  ;;  %v753_v42 = vld [vmem:[#allocation2 + $0x68] sm:$0xff] }
 0x123   : > { %v1184_v43 = vpack.c.bf16 %v751_v40, %v750_v35  ;;  %v819_v44 = vmul.f32 %v750_v35, %v750_v35  ;;  %v1189_v45 = vpack.c.bf16 %v753_v42, %v752_v41  ;;  %v754_v46 = vld [vmem:[#allocation2 + $0x8] sm:$0xff]  ;;  %v820_v49 = vmul.f32 %v751_v40, %v751_v40  ;;  %v756_v51 = vld [vmem:[#allocation2 + $0x40] sm:$0xff]  ;;  %v758_v55 = vld [vmem:[#allocation2 + $0x10] sm:$0xff] }
 0x124   : > { %1180 = vst [vmem:[%s1507_s2] sm:$0xff] %v1179_v36   ;;  %v833_v47 = vadd.f32 %v818_v39, %v817_v38  ;;  %v797_v48 = vadd.f32 %v796_v37, %v750_v35  ;;  %v755_v50 = vld [vmem:[#allocation2 + $0x48] sm:$0xff]  ;;  %v757_v52 = vld [vmem:[#allocation2 + $0x20] sm:$0xff]  ;;  %v821_v58 = vmul.f32 %v752_v41, %v752_v41  ;;  %v759_v59 = vld [vmem:[#allocation2 + $0x38] sm:$0xff]  ;;  %v822_v2 = vmul.f32 %v753_v42, %v753_v42 }
 0x125   : > { %1216 = vst [vmem:[%s1507_s2 + $0x8] sm:$0xff] %v1184_v43   ;;  %v1194_v53 = vpack.c.bf16 %v755_v50, %v754_v46  ;;  %v1199_v54 = vpack.c.bf16 %v757_v52, %v756_v51  ;;  %v760_v60 = vld [vmem:[#allocation2 + $0x60] sm:$0xff]  ;;  %v761_v61 = vld [vmem:[#allocation2 + $0x70] sm:$0xff]  ;;  %v1204_v62 = vpack.c.bf16 %v759_v59, %v758_v55  ;;  %v762_v3 = vld [vmem:[#allocation2 + $0x78] sm:$0xff]  ;;  %v823_v8 = vmul.f32 %v754_v46, %v754_v46 }
 0x126   : > { %v798_v56 = vadd.f32 %v797_v48, %v751_v40  ;;  %v834_v57 = vadd.f32 %v833_v47, %v819_v44  ;;  %1217 = vst [vmem:[%s1507_s2 + $0x10] sm:$0xff] %v1189_v45   ;;  %v1209_v63 = vpack.c.bf16 %v761_v61, %v760_v60  ;;  %v824_v11 = vmul.f32 %v755_v50, %v755_v50 }
 0x127   : > { %1218 = vst [vmem:[%s1507_s2 + $0x18] sm:$0xff] %v1194_v53   ;;  %v763_v4 = vld [vmem:[#allocation2 + $0x28] sm:$0xff]  ;;  %v825_v14 = vmul.f32 %v756_v51, %v756_v51  ;;  %v826_v17 = vmul.f32 %v757_v52, %v757_v52  ;;  %v827_v20 = vmul.f32 %v758_v55, %v758_v55  ;;  %v828_v23 = vmul.f32 %v759_v59, %v759_v59 }
 0x128   : > { %v835_v0 = vadd.f32 %v834_v57, %v820_v49  ;;  %v799_v1 = vadd.f32 %v798_v56, %v752_v41  ;;  %1219 = vst [vmem:[%s1507_s2 + $0x20] sm:$0xff] %v1199_v54   ;;  %v1214_v5 = vpack.c.bf16 %v763_v4, %v762_v3  ;;  %v829_v26 = vmul.f32 %v760_v60, %v760_v60 }
 0x129   : > { %1220 = vst [vmem:[%s1507_s2 + $0x28] sm:$0xff] %v1204_v62   ;;  %v830_v29 = vmul.f32 %v761_v61, %v761_v61  ;;  %v831_v32 = vmul.f32 %v762_v3, %v762_v3  ;;  %v832_v35 = vmul.f32 %v763_v4, %v763_v4 }
 0x12a   : > { %v800_v6 = vadd.f32 %v799_v1, %v753_v42  ;;  %v836_v7 = vadd.f32 %v835_v0, %v821_v58  ;;  %1221 = vst [vmem:[%s1507_s2 + $0x30] sm:$0xff] %v1209_v63   ;;  %v854_v42 = vlaneseq }
 0x12b   : > { %1222 = vst [vmem:[%s1507_s2 + $0x38] sm:$0xff] %v1214_v5  }
 0x12c   : > { %v837_v9 = vadd.f32 %v836_v7, %v822_v2  ;;  %v801_v10 = vadd.f32 %v800_v6, %v754_v46  ;;  %v855_v47 = vshrl.u32 %v854_v42, 7 }
 0x12e   : > { %v802_v12 = vadd.f32 %v801_v10, %v755_v50  ;;  %v838_v13 = vadd.f32 %v837_v9, %v823_v8  ;;  %vm857_vm0 = vcmp.eq.s32.totalorder %v855_v47, 1  ;;  %vm856_vm1 = vcmp.eq.s32.totalorder %v855_v47, 0 }
 0x130   : > { %v839_v15 = vadd.f32 %v838_v13, %v824_v11  ;;  %v803_v16 = vadd.f32 %v802_v12, %v756_v51 }
 0x132   : > { %v804_v18 = vadd.f32 %v803_v16, %v757_v52  ;;  %v840_v19 = vadd.f32 %v839_v15, %v825_v14 }
 0x134   : > { %v841_v21 = vadd.f32 %v840_v19, %v826_v17  ;;  %v805_v22 = vadd.f32 %v804_v18, %v758_v55 }
 0x136   : > { %v806_v24 = vadd.f32 %v805_v22, %v759_v59  ;;  %v842_v25 = vadd.f32 %v841_v21, %v827_v20 }
 0x138   : > { %v843_v27 = vadd.f32 %v842_v25, %v828_v23  ;;  %v807_v28 = vadd.f32 %v806_v24, %v760_v60 }
 0x13a   : > { %v808_v30 = vadd.f32 %v807_v28, %v761_v61  ;;  %v844_v31 = vadd.f32 %v843_v27, %v829_v26 }
 0x13c   : > { %v845_v33 = vadd.f32 %v844_v31, %v830_v29  ;;  %v809_v34 = vadd.f32 %v808_v30, %v762_v3 }
 0x13e   : > { %v810_v36 = vadd.f32 %v809_v34, %v763_v4  ;;  %v846_v37 = vadd.f32 %v845_v33, %v831_v32 }
 0x140   : > { %v811_v38 = vrot.slane %v810_v36, 4  ;;  %v847_v39 = vadd.f32 %v846_v37, %v832_v35 }
 0x142   : > { %v812_v40 = vadd.f32 %v811_v38, %v810_v36  ;;  %v848_v41 = vrot.slane %v847_v39, 4 }
 0x144   : > { %v813_v43 = vrot.slane %v812_v40, 2  ;;  %v849_v44 = vadd.f32 %v848_v41, %v847_v39 }
 0x146   : > { %v814_v45 = vadd.f32 %v813_v43, %v812_v40  ;;  %v850_v46 = vrot.slane %v849_v44, 2 }
 0x148   : > { %v815_v48 = vrot.slane %v814_v45, 1  ;;  %v851_v49 = vadd.f32 %v850_v46, %v849_v44 }
 0x14a   : > { %v852_v50 = vrot.slane %v851_v49, 1  ;;  %v816_v51 = vadd.f32 %v815_v48, %v814_v45 }
 0x14c   : > { %v853_v52 = vadd.f32 %v852_v50, %v851_v49 }
 0x14e   : > { %v858_v53 = vsel %vm857_vm0, %v853_v52, 0.0 }
 0x14f   : > { %v859_v54 = vsel %vm856_vm1, %v816_v51, %v858_v53 }
 0x150   : > { %860 = vst [vmem:[%s1508_s3] sm:$0xff] %v859_v54 }
 0x151 PF: > { %s14_s16 = sadd.s32 1, %s1318_s16   ;;  %s1509_s12 = smov %s1306_s13 }
 0x152   : > { %p11_p12 = scmp.ge.s32.totalorder %s14_s16, 7   ;;  %s1510_s13 = smov %s1376_s20 }
 0x153   : > { %s1511_s14 = smov %s1314_s15  ;;  %s1512_s15 = smov %s1514_s17 }
 0x154   :  { %13 = sbr.rel (!%p11_p12) target bundleno = 3 (0x3), region = 124 }

// kernel: _lambda_.28
= control target key start
LH: loop header
LB: loop body
LE: loop exit
PB: predicated region body
PF: predicated region fallthrough
CT: control target
= control target key end

     0   :  { %s455_s0 = inlined_call_operand.vmem [shape: bf16[128,128], index: 0, kind: input, shape index: {}]   ;;  %s456_s1 = inlined_call_operand.vmem [shape: f32[1,128], index: 1, kind: input, shape index: {}]   ;;  %s457_s2 = inlined_call_operand.vmem [shape: f32[1,128], index: 2, kind: input, shape index: {}]   ;;  %s458_s3 = inlined_call_operand.vmem [shape: bf16[128,128], index: 3, kind: input, shape index: {}]   ;;  %s459_s4 = inlined_call_operand.vmem [shape: bf16[128,128], index: 4, kind: output, shape index: {}]  }
   0x1   :  { %v190_v0 = vld [vmem:[%s455_s0] sm:$0xff]   ;;  %v293_v8 = vld [vmem:[%s455_s0 + $0x8] sm:$0xff]   ;;  %v294_v10 = vld [vmem:[%s455_s0 + $0x10] sm:$0xff]  }
   0x2   :  { %v347_v1 = vld [vmem:[%s456_s1] ss:$0 sm:$0xff]  ;;  %v191_v2 = vunpack.c.l.bf16 %v190_v0  ;;  %v192_v3 = vunpack.c.h.bf16 %v190_v0  ;;  %v300_v9 = vld [vmem:[%s458_s3 + $0x8] sm:$0xff]   ;;  %v195_v13 = vunpack.c.l.bf16 %v293_v8  ;;  %v196_v14 = vunpack.c.h.bf16 %v293_v8  ;;  %v301_v15 = vld [vmem:[%s458_s3 + $0x10] sm:$0xff]  }
   0x3   :  { %v352_v4 = vld [vmem:[%s457_s2] ss:$0 sm:$0xff]  ;;  %v227_v16 = vunpack.c.l.bf16 %v300_v9  ;;  %v228_v17 = vunpack.c.h.bf16 %v300_v9  ;;  %v199_v18 = vunpack.c.l.bf16 %v294_v10  ;;  %v200_v19 = vunpack.c.h.bf16 %v294_v10  ;;  %v295_v24 = vld [vmem:[%s455_s0 + $0x18] sm:$0xff]   ;;  %v297_v56 = vld [vmem:[%s455_s0 + $0x28] sm:$0xff]  }
   0x4   :  { %v222_v5 = vld [vmem:[%s458_s3] sm:$0xff]   ;;  %v53_v11 = vmul.f32 %v347_v1, %v191_v2  ;;  %v54_v12 = vmul.f32 %v347_v1, %v192_v3  ;;  %v55_v22 = vmul.f32 %v347_v1, %v195_v13  ;;  %v56_v23 = vmul.f32 %v347_v1, %v196_v14  ;;  %v302_v37 = vld [vmem:[%s458_s3 + $0x18] sm:$0xff]   ;;  %v304_v61 = vld [vmem:[%s458_s3 + $0x28] sm:$0xff]  }
   0x5   :  { %v223_v6 = vunpack.c.l.bf16 %v222_v5  ;;  %v224_v7 = vunpack.c.h.bf16 %v222_v5  ;;  %v57_v25 = vmul.f32 %v347_v1, %v199_v18  ;;  %v58_v26 = vmul.f32 %v347_v1, %v200_v19  ;;  %v296_v46 = vld [vmem:[%s455_s0 + $0x20] sm:$0xff]   ;;  %v298_v8 = vld [vmem:[%s455_s0 + $0x30] sm:$0xff]  }
   0x6   :  { %v73_v20 = vadd.f32 %v352_v4, %v53_v11  ;;  %v74_v21 = vadd.f32 %v352_v4, %v54_v12  ;;  %v231_v27 = vunpack.c.l.bf16 %v301_v15  ;;  %v232_v28 = vunpack.c.h.bf16 %v301_v15  ;;  %v303_v51 = vld [vmem:[%s458_s3 + $0x20] sm:$0xff]   ;;  %v305_v9 = vld [vmem:[%s458_s3 + $0x30] sm:$0xff]  }
   0x7   :  { %v75_v31 = vadd.f32 %v352_v4, %v55_v22  ;;  %v76_v32 = vadd.f32 %v352_v4, %v56_v23  ;;  %v77_v33 = vadd.f32 %v352_v4, %v57_v25  ;;  %v78_v34 = vadd.f32 %v352_v4, %v58_v26  ;;  %v299_v22 = vld [vmem:[%s455_s0 + $0x38] sm:$0xff]  }
   0x8   :  { %v121_v29 = vadd.f32 %v223_v6, %v73_v20  ;;  %v122_v30 = vadd.f32 %v224_v7, %v74_v21  ;;  %v203_v35 = vunpack.c.l.bf16 %v295_v24  ;;  %v204_v36 = vunpack.c.h.bf16 %v295_v24 }
   0x9   :  { %v123_v40 = vadd.f32 %v227_v16, %v75_v31  ;;  %v124_v41 = vadd.f32 %v228_v17, %v76_v32  ;;  %v125_v42 = vadd.f32 %v231_v27, %v77_v33  ;;  %v126_v43 = vadd.f32 %v232_v28, %v78_v34  ;;  %v306_v31 = vld [vmem:[%s458_s3 + $0x38] sm:$0xff]  }
   0xa   :  { %v137_v38 = vmax.f32 %v121_v29, 0.0  ;;  %v138_v39 = vmax.f32 %v122_v30, 0.0  ;;  %v59_v44 = vmul.f32 %v347_v1, %v203_v35  ;;  %v60_v45 = vmul.f32 %v347_v1, %v204_v36 }
   0xb   :  { %v139_v48 = vmax.f32 %v123_v40, 0.0  ;;  %v140_v49 = vmax.f32 %v124_v41, 0.0  ;;  %v235_v50 = vunpack.c.l.bf16 %v302_v37  ;;  %v141_v52 = vmax.f32 %v125_v42, 0.0 }
   0xc   :  { %v256_v47 = vpack.c.bf16 %v138_v39, %v137_v38  ;;  %v142_v53 = vmax.f32 %v126_v43, 0.0  ;;  %v79_v54 = vadd.f32 %v352_v4, %v59_v44  ;;  %v80_v55 = vadd.f32 %v352_v4, %v60_v45 }
   0xd   :  { %v261_v57 = vpack.c.bf16 %v140_v49, %v139_v48  ;;  %v236_v58 = vunpack.c.h.bf16 %v302_v37  ;;  %v207_v59 = vunpack.c.l.bf16 %v296_v46  ;;  %v208_v60 = vunpack.c.h.bf16 %v296_v46 }
   0xe   :  { %257 = vst [vmem:[%s459_s4] sm:$0xff] %v256_v47   ;;  %v266_v62 = vpack.c.bf16 %v142_v53, %v141_v52  ;;  %v127_v63 = vadd.f32 %v235_v50, %v79_v54  ;;  %v239_v0 = vunpack.c.l.bf16 %v303_v51  ;;  %v240_v2 = vunpack.c.h.bf16 %v303_v51 }
   0xf   :  { %307 = vst [vmem:[%s459_s4 + $0x8] sm:$0xff] %v261_v57   ;;  %v128_v3 = vadd.f32 %v236_v58, %v80_v55  ;;  %v61_v5 = vmul.f32 %v347_v1, %v207_v59  ;;  %v62_v6 = vmul.f32 %v347_v1, %v208_v60  ;;  %v211_v7 = vunpack.c.l.bf16 %v297_v56 }
  0x10   :  { %308 = vst [vmem:[%s459_s4 + $0x10] sm:$0xff] %v266_v62   ;;  %v143_v10 = vmax.f32 %v127_v63, 0.0  ;;  %v212_v11 = vunpack.c.h.bf16 %v297_v56  ;;  %v243_v12 = vunpack.c.l.bf16 %v304_v61  ;;  %v244_v13 = vunpack.c.h.bf16 %v304_v61 }
  0x11   :  { %v144_v14 = vmax.f32 %v128_v3, 0.0  ;;  %v81_v15 = vadd.f32 %v352_v4, %v61_v5  ;;  %v82_v16 = vadd.f32 %v352_v4, %v62_v6  ;;  %v63_v17 = vmul.f32 %v347_v1, %v211_v7 }
  0x12   :  { %v64_v18 = vmul.f32 %v347_v1, %v212_v11  ;;  %v215_v19 = vunpack.c.l.bf16 %v298_v8  ;;  %v216_v20 = vunpack.c.h.bf16 %v298_v8  ;;  %v247_v21 = vunpack.c.l.bf16 %v305_v9 }
  0x13   :  { %v271_v23 = vpack.c.bf16 %v144_v14, %v143_v10  ;;  %v129_v24 = vadd.f32 %v239_v0, %v81_v15  ;;  %v130_v25 = vadd.f32 %v240_v2, %v82_v16  ;;  %v83_v26 = vadd.f32 %v352_v4, %v63_v17 }
  0x14   :  { %v84_v27 = vadd.f32 %v352_v4, %v64_v18  ;;  %v65_v28 = vmul.f32 %v347_v1, %v215_v19  ;;  %v66_v29 = vmul.f32 %v347_v1, %v216_v20  ;;  %v248_v30 = vunpack.c.h.bf16 %v305_v9 }
  0x15   :  { %309 = vst [vmem:[%s459_s4 + $0x18] sm:$0xff] %v271_v23   ;;  %v145_v32 = vmax.f32 %v129_v24, 0.0  ;;  %v146_v33 = vmax.f32 %v130_v25, 0.0  ;;  %v131_v34 = vadd.f32 %v243_v12, %v83_v26  ;;  %v219_v35 = vunpack.c.l.bf16 %v299_v22 }
  0x16   :  { %v132_v36 = vadd.f32 %v244_v13, %v84_v27  ;;  %v85_v37 = vadd.f32 %v352_v4, %v65_v28  ;;  %v86_v38 = vadd.f32 %v352_v4, %v66_v29  ;;  %v220_v39 = vunpack.c.h.bf16 %v299_v22 }
  0x17   :  { %v276_v40 = vpack.c.bf16 %v146_v33, %v145_v32  ;;  %v147_v41 = vmax.f32 %v131_v34, 0.0  ;;  %v67_v42 = vmul.f32 %v347_v1, %v219_v35  ;;  %v251_v43 = vunpack.c.l.bf16 %v306_v31 }
  0x18   :  { %v148_v44 = vmax.f32 %v132_v36, 0.0  ;;  %v133_v45 = vadd.f32 %v247_v21, %v85_v37  ;;  %v134_v46 = vadd.f32 %v248_v30, %v86_v38  ;;  %v68_v47 = vmul.f32 %v347_v1, %v220_v39 }
  0x19   :  { %310 = vst [vmem:[%s459_s4 + $0x20] sm:$0xff] %v276_v40   ;;  %v87_v48 = vadd.f32 %v352_v4, %v67_v42  ;;  %v252_v49 = vunpack.c.h.bf16 %v306_v31 }
  0x1a   :  { %v281_v50 = vpack.c.bf16 %v148_v44, %v147_v41  ;;  %v149_v51 = vmax.f32 %v133_v45, 0.0  ;;  %v150_v52 = vmax.f32 %v134_v46, 0.0  ;;  %v88_v53 = vadd.f32 %v352_v4, %v68_v47 }
  0x1b   :  { %v135_v54 = vadd.f32 %v251_v43, %v87_v48 }
  0x1c   :  { %311 = vst [vmem:[%s459_s4 + $0x28] sm:$0xff] %v281_v50   ;;  %v286_v55 = vpack.c.bf16 %v150_v52, %v149_v51  ;;  %v136_v56 = vadd.f32 %v252_v49, %v88_v53 }
  0x1d   :  { %v151_v1 = vmax.f32 %v135_v54, 0.0 }
  0x1e   :  { %312 = vst [vmem:[%s459_s4 + $0x30] sm:$0xff] %v286_v55   ;;  %v152_v57 = vmax.f32 %v136_v56, 0.0 }
  0x20   :  { %v291_v58 = vpack.c.bf16 %v152_v57, %v151_v1 }
  0x22   :  { %313 = vst [vmem:[%s459_s4 + $0x38] sm:$0xff] %v291_v58  }

// kernel: _lambda_.30
= control target key start
LH: loop header
LB: loop body
LE: loop exit
PB: predicated region body
PF: predicated region fallthrough
CT: control target
= control target key end

     0   :  { %v157_v14 = vmov 0   ;;  %s336_s0 = inlined_call_operand.vmem [shape: bf16[32,512], index: 0, kind: input, shape index: {}]   ;;  %s337_s1 = inlined_call_operand.vmem [shape: f32[1,512], index: 1, kind: input, shape index: {}]   ;;  %s338_s2 = inlined_call_operand.vmem [shape: f32[1,512], index: 2, kind: input, shape index: {}]   ;;  %s339_s3 = inlined_call_operand.vmem [shape: f32[1,512], index: 3, kind: input, shape index: {}]   ;;  %s340_s4 = inlined_call_operand.vmem [shape: bf16[32,512], index: 4, kind: output, shape index: {}]  }
   0x1   :  { %v17_v0 = vld [vmem:[%s336_s0] sm:$0xff]  ;;  %v18_v8 = vld [vmem:[%s336_s0 + $0x8] sm:$0xff]  ;;  %v19_v25 = vld [vmem:[%s336_s0 + $0x10] sm:$0xff] }
   0x2   :  { %v41_v1 = vld [vmem:[%s337_s1] sm:$0xf]  ;;  %v25_v3 = vunpack.c.l.bf16 %v17_v0  ;;  %v26_v4 = vunpack.c.h.bf16 %v17_v0  ;;  %v27_v11 = vunpack.c.l.bf16 %v18_v8  ;;  %v28_v16 = vunpack.c.h.bf16 %v18_v8  ;;  %v20_v38 = vld [vmem:[%s336_s0 + $0x18] sm:$0xff]  ;;  %v22_v52 = vld [vmem:[%s336_s0 + $0x28] sm:$0xff] }
   0x3   :  { %v67_v2 = vld [vmem:[%s338_s2] sm:$0xf]  ;;  %v192_v5 = vperm.slane %v41_v1, 0  ;;  %v194_v6 = vperm.slane %v41_v1, 1  ;;  %v208_v19 = vperm.slane %v41_v1, 2  ;;  %v210_v20 = vperm.slane %v41_v1, 3 }
   0x4   :  { %v93_v7 = vld [vmem:[%s339_s3] sm:$0xf]  ;;  %v202_v9 = vperm.slane %v67_v2, 0  ;;  %v204_v10 = vperm.slane %v67_v2, 1  ;;  %v214_v23 = vperm.slane %v67_v2, 2  ;;  %v216_v24 = vperm.slane %v67_v2, 3 }
   0x5   :  { %vm94_vm0 = vcmp.gt.f32.partialorder %v93_v7, 0.0  ;;  %v51_v12 = vmul.f32 %v192_v5, %v25_v3  ;;  %v52_v13 = vmul.f32 %v194_v6, %v26_v4  ;;  %v53_v28 = vmul.f32 %v208_v19, %v27_v11  ;;  %v21_v39 = vld [vmem:[%s336_s0 + $0x20] sm:$0xff] }
   0x6   :  { %v111_v15 = vsel %vm94_vm0, 1, %v157_v14  ;;  %v54_v29 = vmul.f32 %v210_v20, %v28_v16  ;;  %v29_v36 = vunpack.c.l.bf16 %v19_v25  ;;  %v30_v37 = vunpack.c.h.bf16 %v19_v25 }
   0x7   :  { %v112_v17 = vperm.slane %v111_v15, 0  ;;  %v113_v18 = vperm.slane %v111_v15, 1  ;;  %v77_v21 = vadd.f32 %v202_v9, %v51_v12  ;;  %v78_v22 = vadd.f32 %v204_v10, %v52_v13  ;;  %v23_v13 = vld [vmem:[%s336_s0 + $0x30] sm:$0xff] }
   0x8   :  { %v114_v32 = vperm.slane %v111_v15, 2  ;;  %v115_v33 = vperm.slane %v111_v15, 3  ;;  %v79_v34 = vadd.f32 %v214_v23, %v53_v28  ;;  %v80_v35 = vadd.f32 %v216_v24, %v54_v29 }
   0x9   :  { %vm221_vm1 = vcmp.eq.s32.totalorder %v112_v17, 1  ;;  %vm225_vm2 = vcmp.eq.s32.totalorder %v113_v18, 1  ;;  %v95_v30 = vmax.f32 %v77_v21, 0.0  ;;  %v96_v31 = vmax.f32 %v78_v22, 0.0 }
   0xa   :  { %vm243_vm3 = vcmp.eq.s32.totalorder %v114_v32, 1  ;;  %vm247_vm4 = vcmp.eq.s32.totalorder %v115_v33, 1  ;;  %v97_v45 = vmax.f32 %v79_v34, 0.0  ;;  %v98_v46 = vmax.f32 %v80_v35, 0.0  ;;  %v24_v32 = vld [vmem:[%s336_s0 + $0x38] sm:$0xff] }
   0xb   :  { %v120_v40 = vsel %vm221_vm1, %v95_v30, %v77_v21  ;;  %v121_v41 = vsel %vm225_vm2, %v96_v31, %v78_v22  ;;  %v55_v47 = vmul.f32 %v192_v5, %v29_v36  ;;  %v56_v48 = vmul.f32 %v194_v6, %v30_v37 }
   0xc   :  { %v136_v44 = vpack.c.bf16 %v121_v41, %v120_v40  ;;  %v31_v49 = vunpack.c.l.bf16 %v20_v38  ;;  %v32_v50 = vunpack.c.h.bf16 %v20_v38  ;;  %v33_v51 = vunpack.c.l.bf16 %v21_v39 }
   0xd   :  { %v122_v53 = vsel %vm243_vm3, %v97_v45, %v79_v34  ;;  %v123_v54 = vsel %vm247_vm4, %v98_v46, %v80_v35  ;;  %v81_v55 = vadd.f32 %v202_v9, %v55_v47  ;;  %v34_v56 = vunpack.c.h.bf16 %v21_v39 }
   0xe   :  { %144 = vst [vmem:[%s340_s4] sm:$0xff] %v136_v44  ;;  %v137_v57 = vpack.c.bf16 %v123_v54, %v122_v53  ;;  %v82_v58 = vadd.f32 %v204_v10, %v56_v48  ;;  %v57_v59 = vmul.f32 %v208_v19, %v31_v49  ;;  %v58_v60 = vmul.f32 %v210_v20, %v32_v50 }
   0xf   :  { %v99_v61 = vmax.f32 %v81_v55, 0.0  ;;  %v59_v62 = vmul.f32 %v192_v5, %v33_v51  ;;  %v60_v63 = vmul.f32 %v194_v6, %v34_v56  ;;  %v35_v0 = vunpack.c.l.bf16 %v22_v52 }
  0x10   :  { %145 = vst [vmem:[%s340_s4 + $0x8] sm:$0xff] %v137_v57  ;;  %v100_v1 = vmax.f32 %v82_v58, 0.0  ;;  %v83_v2 = vadd.f32 %v214_v23, %v57_v59  ;;  %v84_v3 = vadd.f32 %v216_v24, %v58_v60  ;;  %v36_v4 = vunpack.c.h.bf16 %v22_v52 }
  0x11   :  { %v124_v7 = vsel %vm221_vm1, %v99_v61, %v81_v55  ;;  %v85_v8 = vadd.f32 %v202_v9, %v59_v62  ;;  %v86_v11 = vadd.f32 %v204_v10, %v60_v63  ;;  %v61_v12 = vmul.f32 %v208_v19, %v35_v0 }
  0x12   :  { %v125_v14 = vsel %vm225_vm2, %v100_v1, %v82_v58  ;;  %v101_v15 = vmax.f32 %v83_v2, 0.0  ;;  %v102_v16 = vmax.f32 %v84_v3, 0.0  ;;  %v62_v17 = vmul.f32 %v210_v20, %v36_v4 }
  0x13   :  { %v138_v18 = vpack.c.bf16 %v125_v14, %v124_v7  ;;  %v103_v21 = vmax.f32 %v85_v8, 0.0  ;;  %v104_v22 = vmax.f32 %v86_v11, 0.0  ;;  %v87_v25 = vadd.f32 %v214_v23, %v61_v12 }
  0x14   :  { %v126_v28 = vsel %vm243_vm3, %v101_v15, %v83_v2  ;;  %v127_v29 = vsel %vm247_vm4, %v102_v16, %v84_v3  ;;  %v88_v30 = vadd.f32 %v216_v24, %v62_v17  ;;  %v37_v31 = vunpack.c.l.bf16 %v23_v13 }
  0x15   :  { %146 = vst [vmem:[%s340_s4 + $0x10] sm:$0xff] %v138_v18  ;;  %v139_v33 = vpack.c.bf16 %v127_v29, %v126_v28  ;;  %v128_v34 = vsel %vm221_vm1, %v103_v21, %v85_v8  ;;  %v129_v35 = vsel %vm225_vm2, %v104_v22, %v86_v11  ;;  %v105_v36 = vmax.f32 %v87_v25, 0.0 }
  0x16   :  { %v140_v37 = vpack.c.bf16 %v129_v35, %v128_v34  ;;  %v106_v38 = vmax.f32 %v88_v30, 0.0  ;;  %v38_v39 = vunpack.c.h.bf16 %v23_v13  ;;  %v63_v40 = vmul.f32 %v192_v5, %v37_v31 }
  0x17   :  { %147 = vst [vmem:[%s340_s4 + $0x18] sm:$0xff] %v139_v33  ;;  %v130_v41 = vsel %vm243_vm3, %v105_v36, %v87_v25  ;;  %v39_v44 = vunpack.c.l.bf16 %v24_v32  ;;  %v40_v45 = vunpack.c.h.bf16 %v24_v32 }
  0x18   :  { %148 = vst [vmem:[%s340_s4 + $0x20] sm:$0xff] %v140_v37  ;;  %v131_v46 = vsel %vm247_vm4, %v106_v38, %v88_v30  ;;  %v64_v47 = vmul.f32 %v194_v6, %v38_v39  ;;  %v89_v5 = vadd.f32 %v202_v9, %v63_v40 }
  0x19   :  { %v141_v48 = vpack.c.bf16 %v131_v46, %v130_v41  ;;  %v65_v49 = vmul.f32 %v208_v19, %v39_v44  ;;  %v66_v50 = vmul.f32 %v210_v20, %v40_v45 }
  0x1a   :  { %v90_v51 = vadd.f32 %v204_v10, %v64_v47  ;;  %v107_v52 = vmax.f32 %v89_v5, 0.0 }
  0x1b   :  { %149 = vst [vmem:[%s340_s4 + $0x28] sm:$0xff] %v141_v48  ;;  %v91_v53 = vadd.f32 %v214_v23, %v65_v49  ;;  %v92_v54 = vadd.f32 %v216_v24, %v66_v50 }
  0x1c   :  { %v108_v55 = vmax.f32 %v90_v51, 0.0  ;;  %v132_v6 = vsel %vm221_vm1, %v107_v52, %v89_v5 }
  0x1d   :  { %v109_v9 = vmax.f32 %v91_v53, 0.0  ;;  %v110_v56 = vmax.f32 %v92_v54, 0.0 }
  0x1e   :  { %v133_v19 = vsel %vm225_vm2, %v108_v55, %v90_v51 }
  0x1f   :  { %v142_v20 = vpack.c.bf16 %v133_v19, %v132_v6  ;;  %v134_v10 = vsel %vm243_vm3, %v109_v9, %v91_v53  ;;  %v135_v57 = vsel %vm247_vm4, %v110_v56, %v92_v54 }
  0x20   :  { %v143_v58 = vpack.c.bf16 %v135_v57, %v134_v10 }
  0x21   :  { %150 = vst [vmem:[%s340_s4 + $0x30] sm:$0xff] %v142_v20 }
  0x22   :  { %151 = vst [vmem:[%s340_s4 + $0x38] sm:$0xff] %v143_v58 }

// kernel: _lambda_.29
= control target key start
LH: loop header
LB: loop body
LE: loop exit
PB: predicated region body
PF: predicated region fallthrough
CT: control target
= control target key end

     0   :  { %s1790_s0 = inlined_call_operand.vmem [shape: bf16[32,1280], index: 0, kind: input, shape index: {}]   ;;  %s1791_s1 = inlined_call_operand.vmem [shape: bf16[1280,512], index: 1, kind: input, shape index: {}]   ;;  %s1792_s2 = inlined_call_operand.vmem [shape: bf16[32,512], index: 2, kind: output, shape index: {0}]   ;;  %s1793_s3 = inlined_call_operand.vmem [shape: f32[8,512], index: 3, kind: output, shape index: {1}]  }
   0x1   :  { %1796 = sst [smem:[#allocation8_spill]] %s1790_s0 }
   0x2   :  { %1797 = sst [smem:[#allocation9_spill]] %s1791_s1 }
   0x3   :  { %s1468_s12 = smov 0   ;;  %s1470_s13 = smov 0  }
   0x4   :  { %s1472_s14 = smov 0   ;;  %s1474_s15 = smov 0  }
   0x5   :  { %s1476_s16 = smov 0   ;;  %s1478_s17 = smov 0  }
   0x6   :  { %s1480_s18 = smov 0   ;;  %s1482_s19 = smov 0  }
   0x7   :  { %s1484_s20 = smov 0   ;;  %s1486_s21 = smov 0  }
   0x8   :  { %s1488_s22 = smov 0  }
   0x9 LB: > { %s1062_s23 = sadd.s32 4294967295, %s1445_s22   ;;  %s26_s24 = sadd.s32 1, %s1437_s20  ;;  %s1445_s22 = sphi %s1488_s22, %s14_s22   ;;  %s1441_s21 = sphi %s1486_s21, %s1816_s21   ;;  %s1437_s20 = sphi %s1484_s20, %s1815_s20   ;;  %s1433_s19 = sphi %s1482_s19, %s1814_s19   ;;  %s1429_s18 = sphi %s1480_s18, %s1813_s18   ;;  %s1425_s17 = sphi %s1478_s17, %s1812_s17   ;;  %s1421_s16 = sphi %s1476_s16, %s1811_s16   ;;  %s1417_s15 = sphi %s1474_s15, %s1810_s15   ;;  %s1413_s14 = sphi %s1472_s14, %s1809_s14   ;;  %s1409_s13 = sphi %s1470_s13, %s1808_s13   ;;  %s1405_s12 = sphi %s1468_s12, %s1807_s12  }
   0xa   : > { %p27_p0 = scmp.ge.s32.totalorder %s26_s24, 5  ;;  %s29_s25 = sadd.s32 1, %s1441_s21 }
   0xb   : > { %s42_s26 = sadd.s32 1, %s1425_s17  ;;  %p49_p1 = scmp.ne.s32.totalorder %s1425_s17, %s1421_s16 }
   0xc   : > { %s1818_s24 = smov (%p27_p0, %s26_s24), 0  ;;  %s1820_s25 = smov (!%p27_p0, %s29_s25), %s1441_s21 }
   0xd   : > { %1798 = sst [smem:[#allocation6_spill]] %s1818_s24  ;;  %s38_s27 = ssub.s32 %s1437_s20, %s1818_s24 }
   0xe   : > { %p50_p2 = scmp.eq.s32.totalorder %s1445_s22, 0  ;;  %p31_p3 = scmp.ge.s32.totalorder %s1820_s25, 2 }
   0xf   : > { %p40_p4 = scmp.eq.s32.totalorder %s38_s27, 0  ;;  %s70_s29 = sadd.s32 1, %s1417_s15 }
  0x10   : > { %p1535_p5 = por %p50_p2, %p49_p1  ;;  %s1822_s25 = smov (%p31_p3, %s1820_s25), 0 }
  0x11   : > { %1800 = sst [smem:[#allocation7_spill]] %s1822_s25  ;;  %s66_s4 = ssub.s32 %s1441_s21, %s1822_s25 }
  0x12   : > { %s1543_s30 = scalar_select %p40_p4, %s1425_s17, %s42_s26  }
  0x13   : > { %p77_p6 = scmp.ne.s32.totalorder %s1417_s15, %s1413_s14  ;;  %s67_s5 = sor.u32 %s66_s4, %s38_s27 }
  0x14   : > { %p96_p7 = scmp.eq.s32.totalorder %s66_s4, 0  ;;  %p68_p8 = scmp.eq.s32.totalorder %s67_s5, 0 }
  0x15   : > { %p1549_p9 = por %p77_p6, %p50_p2  ;;  %s98_s7 = sadd.s32 1, %s1409_s13 }
  0x16   : > { %p108_p10 = scmp.ne.s32.totalorder %s1409_s13, %s1405_s12  ;;  %p109_p11 = scmp.eq.s32.totalorder %s1062_s23, 9 }
  0x17   : > { %s1557_s8 = scalar_select %p68_p8, %s1417_s15, %s70_s29  }
  0x18   : > { %s1560_s9 = scalar_select %p96_p7, %s1409_s13, %s98_s7  }
  0x19   : > { %p1562_p12 = por %p109_p11, %p108_p10  ;;  %p1065_p13 = scmp.ge.s32.totalorder %s1445_s22, 10 }
  0x1b   : > { %159 = sbr.rel (%p1065_p13) target bundleno = 88 (0x58), region = 16 }
  0x20   : > { %162 = sbr.rel (!%p1535_p5) target bundleno = 46 (0x2e), region = 20  ;;  %s164_s11 = sand.u32 (%p1535_p5), 1, %s1425_s17  }
  0x21   : > { %s1231_s26 = sshll.u32 (%p1535_p5), %s1437_s20, 3  ;;  %s1066_s27 = sshll.u32 (%p1535_p5), %s164_s11, 5 }
  0x22   : > { %s1803_s0 = sld [smem:[#allocation8_spill]] (%p1535_p5)  ;;  %s166_s23 = scalar_lea.vmem (%p1535_p5), [#allocation3], %s1066_s27 }
  0x28   : > { %s172_s5 = scalar_lea.vmem %s1803_s0, %s1231_s26 }
  0x29   : > { %v207_v0 = vld [vmem:[%s172_s5] sm:$0xff]  ;;  %v209_v1 = vld [vmem:[%s172_s5 + $0x28] sm:$0xff]  ;;  %v211_v2 = vld [vmem:[%s172_s5 + $0x50] sm:$0xff] }
  0x2a   : > { %208 = vst [vmem:[%s166_s23] sm:$0xff] %v207_v0  ;;  %v213_v3 = vld [vmem:[%s172_s5 + $0x78] sm:$0xff] }
  0x2b   : > { %210 = vst [vmem:[%s166_s23 + $0x8] sm:$0xff] %v209_v1 }
  0x2c   : > { %212 = vst [vmem:[%s166_s23 + $0x10] sm:$0xff] %v211_v2 }
  0x2d   : > { %214 = vst [vmem:[%s166_s23 + $0x18] sm:$0xff] %v213_v3 }
  0x2e PF: > { %220 = sbr.rel (!%p1549_p9) target bundleno = 88 (0x58), region = 58  ;;  %s222_s28 = sand.u32 (%p1549_p9), 1, %s1417_s15  }
  0x2f   : > { %s1071_s7 = sshll.u32 (%p1549_p9), %s1441_s21, 1  ;;  %s1069_s11 = sshll.u32 (%p1549_p9), %s222_s28, 8 }
  0x30   : > { %s1232_s26 = sshll.u32 (%p1549_p9), %s1437_s20, 7  ;;  %s1804_s1 = sld [smem:[#allocation9_spill]] (%p1549_p9) }
  0x31   : > { %s228_s29 = sadd.s32 (%p1549_p9), %s1232_s26, %s1071_s7  ;;  %s1587_s6 = scalar_lea.vmem (%p1549_p9), [#allocation4], %s1069_s11 }
  0x32   : > { %s1073_s4 = sshll.u32 (%p1549_p9), %s228_s29, 2 }
  0x36   : > { %s1582_s5 = scalar_lea.vmem %s1804_s1, %s1073_s4 }
  0x37   : > { %v321_v4 = vld [vmem:[%s1582_s5] sm:$0xff]  ;;  %v323_v5 = vld [vmem:[%s1582_s5 + $0x10] sm:$0xff] }
  0x38   : > { %v325_v6 = vld [vmem:[%s1582_s5 + $0x20] sm:$0xff]  ;;  %322 = vst [vmem:[%s1587_s6] sm:$0xff] %v321_v4  ;;  %v327_v7 = vld [vmem:[%s1582_s5 + $0x30] sm:$0xff] }
  0x39   : > { %324 = vst [vmem:[%s1587_s6 + $0x8] sm:$0xff] %v323_v5  ;;  %v329_v8 = vld [vmem:[%s1582_s5 + $0x40] sm:$0xff]  ;;  %v331_v9 = vld [vmem:[%s1582_s5 + $0x50] sm:$0xff] }
  0x3a   : > { %326 = vst [vmem:[%s1587_s6 + $0x10] sm:$0xff] %v325_v6  ;;  %v333_v10 = vld [vmem:[%s1582_s5 + $0x60] sm:$0xff]  ;;  %v335_v11 = vld [vmem:[%s1582_s5 + $0x70] sm:$0xff] }
  0x3b   : > { %328 = vst [vmem:[%s1587_s6 + $0x18] sm:$0xff] %v327_v7  ;;  %v337_v12 = vld [vmem:[%s1582_s5 + $0x80] sm:$0xff]  ;;  %v339_v13 = vld [vmem:[%s1582_s5 + $0x90] sm:$0xff] }
  0x3c   : > { %330 = vst [vmem:[%s1587_s6 + $0x20] sm:$0xff] %v329_v8  ;;  %v341_v14 = vld [vmem:[%s1582_s5 + $0xa0] sm:$0xff]  ;;  %v343_v15 = vld [vmem:[%s1582_s5 + $0xb0] sm:$0xff] }
  0x3d   : > { %332 = vst [vmem:[%s1587_s6 + $0x28] sm:$0xff] %v331_v9  ;;  %v345_v16 = vld [vmem:[%s1582_s5 + $0xc0] sm:$0xff]  ;;  %v347_v17 = vld [vmem:[%s1582_s5 + $0xd0] sm:$0xff] }
  0x3e   : > { %334 = vst [vmem:[%s1587_s6 + $0x30] sm:$0xff] %v333_v10  ;;  %v349_v18 = vld [vmem:[%s1582_s5 + $0xe0] sm:$0xff]  ;;  %v351_v19 = vld [vmem:[%s1582_s5 + $0xf0] sm:$0xff] }
  0x3f   : > { %336 = vst [vmem:[%s1587_s6 + $0x38] sm:$0xff] %v335_v11  ;;  %v353_v20 = vld [vmem:[%s1582_s5 + $0x100] sm:$0xff]  ;;  %v355_v21 = vld [vmem:[%s1582_s5 + $0x110] sm:$0xff] }
  0x40   : > { %338 = vst [vmem:[%s1587_s6 + $0x40] sm:$0xff] %v337_v12  ;;  %v357_v22 = vld [vmem:[%s1582_s5 + $0x120] sm:$0xff]  ;;  %v359_v23 = vld [vmem:[%s1582_s5 + $0x130] sm:$0xff] }
  0x41   : > { %340 = vst [vmem:[%s1587_s6 + $0x48] sm:$0xff] %v339_v13  ;;  %v361_v24 = vld [vmem:[%s1582_s5 + $0x140] sm:$0xff]  ;;  %v363_v25 = vld [vmem:[%s1582_s5 + $0x150] sm:$0xff] }
  0x42   : > { %342 = vst [vmem:[%s1587_s6 + $0x50] sm:$0xff] %v341_v14  ;;  %v365_v26 = vld [vmem:[%s1582_s5 + $0x160] sm:$0xff]  ;;  %v367_v27 = vld [vmem:[%s1582_s5 + $0x170] sm:$0xff] }
  0x43   : > { %344 = vst [vmem:[%s1587_s6 + $0x58] sm:$0xff] %v343_v15  ;;  %v369_v28 = vld [vmem:[%s1582_s5 + $0x180] sm:$0xff]  ;;  %v371_v29 = vld [vmem:[%s1582_s5 + $0x190] sm:$0xff] }
  0x44   : > { %346 = vst [vmem:[%s1587_s6 + $0x60] sm:$0xff] %v345_v16  ;;  %v373_v30 = vld [vmem:[%s1582_s5 + $0x1a0] sm:$0xff]  ;;  %v375_v31 = vld [vmem:[%s1582_s5 + $0x1b0] sm:$0xff] }
  0x45   : > { %348 = vst [vmem:[%s1587_s6 + $0x68] sm:$0xff] %v347_v17  ;;  %v377_v32 = vld [vmem:[%s1582_s5 + $0x1c0] sm:$0xff]  ;;  %v379_v33 = vld [vmem:[%s1582_s5 + $0x1d0] sm:$0xff] }
  0x46   : > { %350 = vst [vmem:[%s1587_s6 + $0x70] sm:$0xff] %v349_v18  ;;  %v381_v34 = vld [vmem:[%s1582_s5 + $0x1e0] sm:$0xff]  ;;  %v383_v35 = vld [vmem:[%s1582_s5 + $0x1f0] sm:$0xff] }
  0x47   : > { %352 = vst [vmem:[%s1587_s6 + $0x78] sm:$0xff] %v351_v19 }
  0x48   : > { %354 = vst [vmem:[%s1587_s6 + $0x80] sm:$0xff] %v353_v20 }
  0x49   : > { %356 = vst [vmem:[%s1587_s6 + $0x88] sm:$0xff] %v355_v21 }
  0x4a   : > { %358 = vst [vmem:[%s1587_s6 + $0x90] sm:$0xff] %v357_v22 }
  0x4b   : > { %360 = vst [vmem:[%s1587_s6 + $0x98] sm:$0xff] %v359_v23 }
  0x4c   : > { %362 = vst [vmem:[%s1587_s6 + $0xa0] sm:$0xff] %v361_v24 }
  0x4d   : > { %364 = vst [vmem:[%s1587_s6 + $0xa8] sm:$0xff] %v363_v25 }
  0x4e   : > { %366 = vst [vmem:[%s1587_s6 + $0xb0] sm:$0xff] %v365_v26 }
  0x4f   : > { %368 = vst [vmem:[%s1587_s6 + $0xb8] sm:$0xff] %v367_v27 }
  0x50   : > { %370 = vst [vmem:[%s1587_s6 + $0xc0] sm:$0xff] %v369_v28 }
  0x51   : > { %372 = vst [vmem:[%s1587_s6 + $0xc8] sm:$0xff] %v371_v29 }
  0x52   : > { %374 = vst [vmem:[%s1587_s6 + $0xd0] sm:$0xff] %v373_v30 }
  0x53   : > { %376 = vst [vmem:[%s1587_s6 + $0xd8] sm:$0xff] %v375_v31 }
  0x54   : > { %378 = vst [vmem:[%s1587_s6 + $0xe0] sm:$0xff] %v377_v32 }
  0x55   : > { %380 = vst [vmem:[%s1587_s6 + $0xe8] sm:$0xff] %v379_v33 }
  0x56   : > { %382 = vst [vmem:[%s1587_s6 + $0xf0] sm:$0xff] %v381_v34 }
  0x57   : > { %384 = vst [vmem:[%s1587_s6 + $0xf8] sm:$0xff] %v383_v35 }
  0x58 PF: > { %p1074_p0 = scmp.ge.s32.totalorder %s1445_s22, 1  ;;  %p389_p1 = scmp.lt.s32.totalorder %s1445_s22, 11 }
  0x5a   : > { %p390_p2 = pnand %p1074_p0, %p389_p1 }
  0x5b   : > { %s396_s0 = sand.u32 (!%p390_p2), 1, %s1421_s16   ;;  %s403_s23 = sand.u32 (!%p390_p2), 1, %s1413_s14  }
  0x5c   : > { %393 = sbr.rel (%p390_p2) target bundleno = 343 (0x157), region = 96  ;;  %s1075_s28 = sshll.u32 (!%p390_p2), %s396_s0, 5 }
  0x5d   : > { %s1076_s7 = sshll.u32 (!%p390_p2), %s403_s23, 8  ;;  %s424_s11 = sand.u32 (!%p390_p2), 1, %s1405_s12  }
  0x5e   : > { %s1078_s26 = sshll.u32 (!%p390_p2), %s1433_s19, 1  ;;  %s1077_s29 = sshll.u32 (!%p390_p2), %s424_s11, 5 }
  0x5f   : > { %p447_p3 = scmp.lt.s32.totalorder (!%p390_p2), %s1078_s26, 3  ;;  %s1661_s1 = scalar_lea.vmem (!%p390_p2), [#allocation3], %s1075_s28 }
  0x60   : > { %s1663_s25 = scalar_lea.vmem (!%p390_p2), [#allocation4], %s1076_s7  ;;  %s1665_s24 = scalar_lea.vmem (!%p390_p2), [#allocation5], %s1077_s29 }
  0x61   : > { %s1824_s26 = smov (!%p447_p3, %s1078_s26), 3  ;;  %p1080_p4 = scmp.ne.s32.totalorder %s1429_s18, 0 }
  0x62   : > { %s1079_s4 = sshll.u32 %s1824_s26, 3 }
  0x63   : > { %s1659_s6 = scalar_lea.vmem %s1793_s3, %s1079_s4  ;;  %457 = sbr.rel (%p1080_p4) target bundleno = 113 (0x71), region = 108 }
  0x68   : > { %v1447_v36 = vmov 0.0  }
  0x69   : > { %458 = vst [vmem:[#allocation2 + $0x30] sm:$0xff] %v1447_v36 }
  0x6a   : > { %459 = vst [vmem:[#allocation2] sm:$0xff] %v1447_v36 }
  0x6b   : > { %460 = vst [vmem:[#allocation2 + $0x18] sm:$0xff] %v1447_v36 }
  0x6c   : > { %461 = vst [vmem:[#allocation2 + $0x10] sm:$0xff] %v1447_v36 }
  0x6d   : > { %462 = vst [vmem:[#allocation2 + $0x8] sm:$0xff] %v1447_v36 }
  0x6e   : > { %463 = vst [vmem:[#allocation2 + $0x20] sm:$0xff] %v1447_v36 }
  0x6f   : > { %464 = vst [vmem:[#allocation2 + $0x28] sm:$0xff] %v1447_v36 }
  0x70   : > { %465 = vst [vmem:[#allocation2 + $0x38] sm:$0xff] %v1447_v36 }
  0x71 PF: > { %v1155_v37 = vld [vmem:[%s1663_s25 + $0x70] sm:$0xf]  ;;  %v1252_v38 = vld [vmem:[%s1663_s25 + $0x74] sm:$0xf0]  ;;  %v1251_v42 = vld [vmem:[%s1663_s25 + $0x74] sm:$0xf] }
  0x72   : > { %v1219_v39 = vld [vmem:[%s1663_s25 + $0xf0] sm:$0xf]  ;;  %v1156_v40 = vor.u32 %v1252_v38, %v1155_v37  ;;  %v1268_v41 = vld [vmem:[%s1663_s25 + $0xf4] sm:$0xf0]  ;;  %v1157_v43 = vld [vmem:[%s1663_s25 + $0x78] sm:$0xf0] }
  0x73   : > { %v1220_v44 = vor.u32 %v1268_v41, %v1219_v39  ;;  %v1160_v45 = vor.u32 %v1251_v42, %v1157_v43  ;;  %v1267_v46 = vld [vmem:[%s1663_s25 + $0xf4] sm:$0xf]  ;;  %v1221_v47 = vld [vmem:[%s1663_s25 + $0xf8] sm:$0xf0]  ;;  %v1147_v48 = vld [vmem:[%s1663_s25 + $0x60] sm:$0xf] }
  0x74   : > { %690 = vmatpush.bf16.msra.mxu0 %v1156_v40  ;;  %v1224_v49 = vor.u32 %v1267_v46, %v1221_v47  ;;  %v1250_v50 = vld [vmem:[%s1663_s25 + $0x64] sm:$0xf0]  ;;  %v1211_v51 = vld [vmem:[%s1663_s25 + $0xe0] sm:$0xf]  ;;  %v1249_v55 = vld [vmem:[%s1663_s25 + $0x64] sm:$0xf] }
  0x75   : > { %v1266_v52 = vld [vmem:[%s1663_s25 + $0xe4] sm:$0xf0]  ;;  %709 = vmatpush.bf16.msra.mxu1 %v1220_v44  ;;  %728 = vmatpush.bf16.msra.mxu2 %v1160_v45  ;;  %v1148_v53 = vor.u32 %v1250_v50, %v1147_v48  ;;  %v1149_v56 = vld [vmem:[%s1663_s25 + $0x68] sm:$0xf0]  ;;  %v1265_v57 = vld [vmem:[%s1663_s25 + $0xe4] sm:$0xf] }
  0x76   : > { %v1212_v54 = vor.u32 %v1266_v52, %v1211_v51  ;;  %747 = vmatpush.bf16.msra.mxu3 %v1224_v49  ;;  %v1152_v58 = vor.u32 %v1249_v55, %v1149_v56  ;;  %v1213_v59 = vld [vmem:[%s1663_s25 + $0xe8] sm:$0xf0]  ;;  %v1139_v60 = vld [vmem:[%s1663_s25 + $0x50] sm:$0xf]  ;;  %v1248_v61 = vld [vmem:[%s1663_s25 + $0x54] sm:$0xf0] }
  0x77   : > { %v1216_v62 = vor.u32 %v1265_v57, %v1213_v59  ;;  %v1203_v63 = vld [vmem:[%s1663_s25 + $0xd0] sm:$0xf]  ;;  %v1264_v0 = vld [vmem:[%s1663_s25 + $0xd4] sm:$0xf0]  ;;  %v1247_v1 = vld [vmem:[%s1663_s25 + $0x54] sm:$0xf]  ;;  %v1140_v2 = vor.u32 %v1248_v61, %v1139_v60 }
  0x78   : > { %691 = vmatpush.bf16.msra.mxu0 %v1148_v53  ;;  %v1141_v3 = vld [vmem:[%s1663_s25 + $0x58] sm:$0xf0]  ;;  %v1263_v4 = vld [vmem:[%s1663_s25 + $0xd4] sm:$0xf]  ;;  %v1204_v6 = vor.u32 %v1264_v0, %v1203_v63  ;;  %v1131_v8 = vld [vmem:[%s1663_s25 + $0x40] sm:$0xf] }
  0x79   : > { %v1205_v5 = vld [vmem:[%s1663_s25 + $0xd8] sm:$0xf0]  ;;  %710 = vmatpush.bf16.msra.mxu1 %v1212_v54  ;;  %729 = vmatpush.bf16.msra.mxu2 %v1152_v58  ;;  %v1144_v7 = vor.u32 %v1247_v1, %v1141_v3  ;;  %v1246_v9 = vld [vmem:[%s1663_s25 + $0x44] sm:$0xf0]  ;;  %v1195_v10 = vld [vmem:[%s1663_s25 + $0xc0] sm:$0xf] }
  0x7a   : > { %748 = vmatpush.bf16.msra.mxu3 %v1216_v62  ;;  %v1208_v11 = vor.u32 %v1263_v4, %v1205_v5  ;;  %v1262_v12 = vld [vmem:[%s1663_s25 + $0xc4] sm:$0xf0]  ;;  %v1245_v13 = vld [vmem:[%s1663_s25 + $0x44] sm:$0xf]  ;;  %v1133_v14 = vld [vmem:[%s1663_s25 + $0x48] sm:$0xf0]  ;;  %v1132_v17 = vor.u32 %v1246_v9, %v1131_v8 }
  0x7b   : > { %v1261_v15 = vld [vmem:[%s1663_s25 + $0xc4] sm:$0xf]  ;;  %v1197_v16 = vld [vmem:[%s1663_s25 + $0xc8] sm:$0xf0]  ;;  %v1196_v18 = vor.u32 %v1262_v12, %v1195_v10  ;;  %v1136_v19 = vor.u32 %v1245_v13, %v1133_v14  ;;  %v1123_v20 = vld [vmem:[%s1663_s25 + $0x30] sm:$0xf] }
  0x7c   : > { %692 = vmatpush.bf16.msra.mxu0 %v1140_v2  ;;  %v1244_v21 = vld [vmem:[%s1663_s25 + $0x34] sm:$0xf0]  ;;  %v1187_v22 = vld [vmem:[%s1663_s25 + $0xb0] sm:$0xf]  ;;  %v1200_v23 = vor.u32 %v1261_v15, %v1197_v16  ;;  %v1243_v25 = vld [vmem:[%s1663_s25 + $0x34] sm:$0xf] }
  0x7d   : > { %711 = vmatpush.bf16.msra.mxu1 %v1204_v6  ;;  %730 = vmatpush.bf16.msra.mxu2 %v1144_v7  ;;  %v1260_v24 = vld [vmem:[%s1663_s25 + $0xb4] sm:$0xf0]  ;;  %v1125_v26 = vld [vmem:[%s1663_s25 + $0x38] sm:$0xf0]  ;;  %v1259_v27 = vld [vmem:[%s1663_s25 + $0xb4] sm:$0xf]  ;;  %v1124_v29 = vor.u32 %v1244_v21, %v1123_v20 }
  0x7e   : > { %749 = vmatpush.bf16.msra.mxu3 %v1208_v11  ;;  %v1189_v28 = vld [vmem:[%s1663_s25 + $0xb8] sm:$0xf0]  ;;  %v1188_v30 = vor.u32 %v1260_v24, %v1187_v22  ;;  %v1128_v31 = vor.u32 %v1243_v25, %v1125_v26  ;;  %v1115_v32 = vld [vmem:[%s1663_s25 + $0x20] sm:$0xf]  ;;  %v1242_v33 = vld [vmem:[%s1663_s25 + $0x24] sm:$0xf0] }
  0x7f   : > { %v1179_v34 = vld [vmem:[%s1663_s25 + $0xa0] sm:$0xf]  ;;  %v1192_v35 = vor.u32 %v1259_v27, %v1189_v28  ;;  %v1258_v36 = vld [vmem:[%s1663_s25 + $0xa4] sm:$0xf0]  ;;  %v1241_v37 = vld [vmem:[%s1663_s25 + $0x24] sm:$0xf]  ;;  %v1116_v41 = vor.u32 %v1242_v33, %v1115_v32 }
  0x80   : > { %693 = vmatpush.bf16.msra.mxu0 %v1132_v17  ;;  %v1117_v38 = vld [vmem:[%s1663_s25 + $0x28] sm:$0xf0]  ;;  %v1257_v39 = vld [vmem:[%s1663_s25 + $0xa4] sm:$0xf]  ;;  %v1180_v42 = vor.u32 %v1258_v36, %v1179_v34  ;;  %v1107_v44 = vld [vmem:[%s1663_s25 + $0x10] sm:$0xf] }
  0x81   : > { %712 = vmatpush.bf16.msra.mxu1 %v1196_v18  ;;  %731 = vmatpush.bf16.msra.mxu2 %v1136_v19  ;;  %v1181_v40 = vld [vmem:[%s1663_s25 + $0xa8] sm:$0xf0]  ;;  %v1120_v43 = vor.u32 %v1241_v37, %v1117_v38  ;;  %v1240_v45 = vld [vmem:[%s1663_s25 + $0x14] sm:$0xf0]  ;;  %v1171_v46 = vld [vmem:[%s1663_s25 + $0x90] sm:$0xf] }
  0x82   : > { %750 = vmatpush.bf16.msra.mxu3 %v1200_v23  ;;  %v1184_v47 = vor.u32 %v1257_v39, %v1181_v40  ;;  %v1256_v48 = vld [vmem:[%s1663_s25 + $0x94] sm:$0xf0]  ;;  %v1239_v49 = vld [vmem:[%s1663_s25 + $0x14] sm:$0xf]  ;;  %v1109_v50 = vld [vmem:[%s1663_s25 + $0x18] sm:$0xf0]  ;;  %v1108_v53 = vor.u32 %v1240_v45, %v1107_v44 }
  0x83   : > { %v1255_v51 = vld [vmem:[%s1663_s25 + $0x94] sm:$0xf]  ;;  %v1173_v52 = vld [vmem:[%s1663_s25 + $0x98] sm:$0xf0]  ;;  %v1172_v54 = vor.u32 %v1256_v48, %v1171_v46  ;;  %v1112_v55 = vor.u32 %v1239_v49, %v1109_v50  ;;  %v1099_v56 = vld [vmem:[%s1663_s25] sm:$0xf] }
  0x84   : > { %694 = vmatpush.bf16.msra.mxu0 %v1124_v29  ;;  %v1238_v57 = vld [vmem:[%s1663_s25 + $0x4] sm:$0xf0]  ;;  %v1163_v58 = vld [vmem:[%s1663_s25 + $0x80] sm:$0xf]  ;;  %v1176_v59 = vor.u32 %v1255_v51, %v1173_v52  ;;  %v1237_v61 = vld [vmem:[%s1663_s25 + $0x4] sm:$0xf] }
  0x85   : > { %713 = vmatpush.bf16.msra.mxu1 %v1188_v30  ;;  %732 = vmatpush.bf16.msra.mxu2 %v1128_v31  ;;  %v1254_v60 = vld [vmem:[%s1663_s25 + $0x84] sm:$0xf0]  ;;  %v1101_v62 = vld [vmem:[%s1663_s25 + $0x8] sm:$0xf0]  ;;  %v1253_v63 = vld [vmem:[%s1663_s25 + $0x84] sm:$0xf]  ;;  %v1100_v1 = vor.u32 %v1238_v57, %v1099_v56 }
  0x86   : > { %751 = vmatpush.bf16.msra.mxu3 %v1192_v35  ;;  %v1165_v0 = vld [vmem:[%s1663_s25 + $0x88] sm:$0xf0]  ;;  %v1083_v2 = vld [vmem:[%s1661_s1] sm:$0xf]  ;;  %v1234_v3 = vld [vmem:[%s1661_s1 + $0x4] sm:$0xf0]  ;;  %v1164_v4 = vor.u32 %v1254_v60, %v1163_v58  ;;  %v1104_v5 = vor.u32 %v1237_v61, %v1101_v62 }
  0x87   : > { %v1233_v6 = vld [vmem:[%s1661_s1 + $0x4] sm:$0xf]  ;;  %v1085_v7 = vld [vmem:[%s1661_s1 + $0x8] sm:$0xf0]  ;;  %v1168_v8 = vor.u32 %v1253_v63, %v1165_v0  ;;  %v1084_v9 = vor.u32 %v1234_v3, %v1083_v2  ;;  %v1091_v11 = vld [vmem:[%s1661_s1 + $0x10] sm:$0xf] }
  0x88   : > { %695 = vmatpush.bf16.msra.mxu0 %v1116_v41  ;;  %v1088_v10 = vor.u32 %v1233_v6, %v1085_v7  ;;  %v1236_v12 = vld [vmem:[%s1661_s1 + $0x14] sm:$0xf0]  ;;  %v1235_v13 = vld [vmem:[%s1661_s1 + $0x14] sm:$0xf]  ;;  %v1093_v14 = vld [vmem:[%s1661_s1 + $0x18] sm:$0xf0] }
  0x89   : > { %714 = vmatpush.bf16.msra.mxu1 %v1180_v42  ;;  %733 = vmatpush.bf16.msra.mxu2 %v1120_v43  ;;  %v1092_v15 = vor.u32 %v1236_v12, %v1091_v11  ;;  %v1096_v16 = vor.u32 %v1235_v13, %v1093_v14  ;;  %v466_v18 = vld [vmem:[#allocation2 + $0x30] sm:$0xff]  ;;  %v467_v23 = vld [vmem:[#allocation2] sm:$0xff]  ;;  %v468_v27 = vld [vmem:[#allocation2 + $0x18] sm:$0xff]  ;;  %p1225_p5 = scmp.ne.s32.totalorder %s1429_s18, 4 }
  0x8a   : > { %752 = vmatpush.bf16.msra.mxu3 %v1184_v47  ;;  %v469_v33 = vld [vmem:[#allocation2 + $0x10] sm:$0xff]  ;;  %v470_v37 = vld [vmem:[#allocation2 + $0x8] sm:$0xff]  ;;  %v471_v43 = vld [vmem:[#allocation2 + $0x20] sm:$0xff] }
  0x8b   : > { %v472_v47 = vld [vmem:[#allocation2 + $0x28] sm:$0xff] }
  0x8c   : > { %696 = vmatpush.bf16.msra.mxu0 %v1108_v53  ;;  %v473_v53 = vld [vmem:[#allocation2 + $0x38] sm:$0xff] }
  0x8d   : > { %715 = vmatpush.bf16.msra.mxu1 %v1172_v54  ;;  %734 = vmatpush.bf16.msra.mxu2 %v1112_v55 }
  0x8e   : > { %753 = vmatpush.bf16.msra.mxu3 %v1176_v59 }
  0x90   : > { %697 = vmatpush.bf16.msra.mxu0 %v1100_v1 }
  0x91   : > { %716 = vmatpush.bf16.msra.mxu1 %v1164_v4  ;;  %735 = vmatpush.bf16.msra.mxu2 %v1104_v5 }
  0x92   : > { %754 = vmatpush.bf16.msra.mxu3 %v1168_v8 }
  0x93   : > { %698 = vmatmul.bf16.vlgmr.msra.gmra.mxu0 %v1084_v9 }
  0x94   : > { %717 = vmatmul.bf16.vlgmr.msra.gmra.mxu1 %v1088_v10  ;;  %736 = vmatmul.bf16.vlgmr.msra.gmra.mxu2 %v1084_v9 }
  0x95   : > { %755 = vmatmul.bf16.vlgmr.msra.gmra.mxu3 %v1088_v10 }
  0xa3   : > { %703 = vmatmul.bf16.gmra.mxu0 %v1092_v15 }
  0xa4   : > { %722 = vmatmul.bf16.gmra.mxu1 %v1096_v16  ;;  %741 = vmatmul.bf16.gmra.mxu2 %v1092_v15 }
  0xa5   : > { %760 = vmatmul.bf16.gmra.mxu3 %v1096_v16 }
 0x110   : > { %v699_v17 = vpop.f32.mrf.mxu0 }
 0x111   : > { %v718_v19 = vpop.f32.mrf.mxu1 }
 0x112   : > { %v719_v20 = vadd.f32 %v718_v19, %v699_v17 }
 0x114   : > { %v766_v21 = vadd.f32 %v719_v20, %v466_v18 }
 0x116   : > { %774 = vst [vmem:[#allocation2 + $0x30] sm:$0xff] %v766_v21 }
 0x117   : > { %v737_v22 = vpop.f32.mrf.mxu2 }
 0x118   : > { %v756_v24 = vpop.f32.mrf.mxu3  ;;  %v701_v25 = vpop.f32.mrf.mxu0 }
 0x119   : > { %v757_v26 = vadd.f32 %v756_v24, %v737_v22  ;;  %v720_v28 = vpop.f32.mrf.mxu1 }
 0x11a   : > { %v721_v29 = vadd.f32 %v720_v28, %v701_v25 }
 0x11b   : > { %v767_v30 = vadd.f32 %v757_v26, %v467_v23 }
 0x11c   : > { %v768_v31 = vadd.f32 %v721_v29, %v468_v27 }
 0x11d   : > { %775 = vst [vmem:[#allocation2] sm:$0xff] %v767_v30 }
 0x11e   : > { %776 = vst [vmem:[#allocation2 + $0x18] sm:$0xff] %v768_v31 }
 0x11f   : > { %v739_v32 = vpop.f32.mrf.mxu2 }
 0x120   : > { %v758_v34 = vpop.f32.mrf.mxu3  ;;  %v704_v35 = vpop.f32.mrf.mxu0 }
 0x121   : > { %v759_v36 = vadd.f32 %v758_v34, %v739_v32  ;;  %v723_v38 = vpop.f32.mrf.mxu1 }
 0x122   : > { %v724_v39 = vadd.f32 %v723_v38, %v704_v35 }
 0x123   : > { %v769_v40 = vadd.f32 %v759_v36, %v469_v33 }
 0x124   : > { %v770_v41 = vadd.f32 %v724_v39, %v470_v37 }
 0x125   : > { %777 = vst [vmem:[#allocation2 + $0x10] sm:$0xff] %v769_v40 }
 0x126   : > { %778 = vst [vmem:[#allocation2 + $0x8] sm:$0xff] %v770_v41 }
 0x127   : > { %v742_v42 = vpop.f32.mrf.mxu2 }
 0x128   : > { %v761_v44 = vpop.f32.mrf.mxu3  ;;  %v706_v45 = vpop.f32.mrf.mxu0 }
 0x129   : > { %v762_v46 = vadd.f32 %v761_v44, %v742_v42  ;;  %v725_v48 = vpop.f32.mrf.mxu1 }
 0x12a   : > { %v726_v49 = vadd.f32 %v725_v48, %v706_v45 }
 0x12b   : > { %v771_v50 = vadd.f32 %v762_v46, %v471_v43 }
 0x12c   : > { %v772_v51 = vadd.f32 %v726_v49, %v472_v47 }
 0x12d   : > { %779 = vst [vmem:[#allocation2 + $0x20] sm:$0xff] %v771_v50 }
 0x12e   : > { %780 = vst [vmem:[#allocation2 + $0x28] sm:$0xff] %v772_v51 }
 0x12f   : > { %v744_v52 = vpop.f32.mrf.mxu2 }
 0x130   : > { %v763_v54 = vpop.f32.mrf.mxu3 }
 0x131   : > { %v764_v55 = vadd.f32 %v763_v54, %v744_v52  ;;  %785 = sbr.rel (%p1225_p5) target bundleno = 337 (0x151), region = 112 }
 0x133   : > { %v773_v56 = vadd.f32 %v764_v55, %v473_v53 }
 0x135   : > { %781 = vst [vmem:[#allocation2 + $0x38] sm:$0xff] %v773_v56 }
 0x136   : > { %v786_v57 = vld [vmem:[#allocation2 + $0x30] sm:$0xff]  ;;  %v788_v58 = vld [vmem:[#allocation2 + $0x18] sm:$0xff]  ;;  %v790_v59 = vld [vmem:[#allocation2 + $0x8] sm:$0xff]  ;;  %v846_v28 = vlaneseq }
 0x137   : > { %v792_v60 = vld [vmem:[#allocation2 + $0x28] sm:$0xff]  ;;  %v802_v61 = vadd.f32 %v788_v58, %v786_v57  ;;  %v820_v62 = vmul.f32 %v786_v57, %v786_v57  ;;  %v822_v63 = vmul.f32 %v788_v58, %v788_v58  ;;  %v824_v0 = vmul.f32 %v790_v59, %v790_v59  ;;  %v787_v1 = vld [vmem:[#allocation2] sm:$0xff]  ;;  %v789_v2 = vld [vmem:[#allocation2 + $0x10] sm:$0xff] }
 0x138   : > { %v826_v3 = vmul.f32 %v792_v60, %v792_v60  ;;  %v794_v4 = vpack.c.bf16 %v787_v1, %v786_v57  ;;  %v821_v5 = vmul.f32 %v787_v1, %v787_v1  ;;  %v791_v6 = vld [vmem:[#allocation2 + $0x20] sm:$0xff]  ;;  %v795_v9 = vpack.c.bf16 %v789_v2, %v788_v58 }
 0x139   : > { %v803_v7 = vadd.f32 %v802_v61, %v790_v59  ;;  %v828_v8 = vadd.f32 %v822_v63, %v820_v62  ;;  %v811_v10 = vadd.f32 %v789_v2, %v787_v1  ;;  %v823_v12 = vmul.f32 %v789_v2, %v789_v2 }
 0x13a   : > { %798 = vst [vmem:[%s1665_s24] sm:$0xff] %v794_v4  ;;  %v796_v13 = vpack.c.bf16 %v791_v6, %v790_v59  ;;  %v825_v17 = vmul.f32 %v791_v6, %v791_v6  ;;  %v847_v37 = vshrl.u32 %v846_v28, 7 }
 0x13b   : > { %v804_v14 = vadd.f32 %v803_v7, %v792_v60  ;;  %v829_v15 = vadd.f32 %v828_v8, %v824_v0  ;;  %799 = vst [vmem:[%s1665_s24 + $0x8] sm:$0xff] %v795_v9  ;;  %v812_v16 = vadd.f32 %v811_v10, %v791_v6  ;;  %v837_v18 = vadd.f32 %v823_v12, %v821_v5 }
 0x13c   : > { %v793_v11 = vld [vmem:[#allocation2 + $0x38] sm:$0xff]  ;;  %800 = vst [vmem:[%s1665_s24 + $0x10] sm:$0xff] %v796_v13  ;;  %vm849_vm0 = vcmp.eq.s32.totalorder %v847_v37, 1  ;;  %vm848_vm1 = vcmp.eq.s32.totalorder %v847_v37, 0 }
 0x13d   : > { %v797_v19 = vpack.c.bf16 %v793_v11, %v792_v60  ;;  %v827_v20 = vmul.f32 %v793_v11, %v793_v11  ;;  %v805_v21 = vrot.slane %v804_v14, 4  ;;  %v830_v22 = vadd.f32 %v829_v15, %v826_v3 }
 0x13e   : > { %v813_v23 = vadd.f32 %v812_v16, %v793_v11  ;;  %v838_v24 = vadd.f32 %v837_v18, %v825_v17 }
 0x13f   : > { %801 = vst [vmem:[%s1665_s24 + $0x18] sm:$0xff] %v797_v19  ;;  %v806_v25 = vadd.f32 %v805_v21, %v804_v14  ;;  %v831_v26 = vrot.slane %v830_v22, 4 }
 0x140   : > { %v814_v27 = vrot.slane %v813_v23, 4  ;;  %v839_v29 = vadd.f32 %v838_v24, %v827_v20 }
 0x141   : > { %v807_v30 = vrot.slane %v806_v25, 2  ;;  %v832_v31 = vadd.f32 %v831_v26, %v830_v22 }
 0x142   : > { %v815_v32 = vadd.f32 %v814_v27, %v813_v23  ;;  %v840_v33 = vrot.slane %v839_v29, 4 }
 0x143   : > { %v808_v34 = vadd.f32 %v807_v30, %v806_v25  ;;  %v833_v35 = vrot.slane %v832_v31, 2 }
 0x144   : > { %v816_v36 = vrot.slane %v815_v32, 2  ;;  %v841_v38 = vadd.f32 %v840_v33, %v839_v29 }
 0x145   : > { %v809_v39 = vrot.slane %v808_v34, 1  ;;  %v834_v40 = vadd.f32 %v833_v35, %v832_v31 }
 0x146   : > { %v817_v41 = vadd.f32 %v816_v36, %v815_v32  ;;  %v842_v42 = vrot.slane %v841_v38, 2 }
 0x147   : > { %v835_v43 = vrot.slane %v834_v40, 1  ;;  %v810_v45 = vadd.f32 %v809_v39, %v808_v34 }
 0x148   : > { %v818_v44 = vrot.slane %v817_v41, 1  ;;  %v843_v46 = vadd.f32 %v842_v42, %v841_v38 }
 0x149   : > { %v836_v47 = vadd.f32 %v835_v43, %v834_v40 }
 0x14a   : > { %v844_v48 = vrot.slane %v843_v46, 1  ;;  %v819_v50 = vadd.f32 %v818_v44, %v817_v41 }
 0x14b   : > { %v850_v49 = vsel %vm849_vm0, %v836_v47, 0.0 }
 0x14c   : > { %v852_v51 = vsel %vm848_vm1, %v810_v45, %v850_v49  ;;  %v845_v52 = vadd.f32 %v844_v48, %v843_v46 }
 0x14d   : > { %854 = vst [vmem:[%s1659_s6] sm:$0xff] %v852_v51 }
 0x14e   : > { %v851_v53 = vsel %vm849_vm0, %v845_v52, 0.0 }
 0x14f   : > { %v853_v54 = vsel %vm848_vm1, %v819_v50, %v851_v53 }
 0x150   : > { %855 = vst [vmem:[%s1659_s6 + $0x8] sm:$0xff] %v853_v54 }
 0x151 PF: > { %871 = sbr.rel (!%p1562_p12) target bundleno = 343 (0x157), region = 116  ;;  %s1269_s1 = sshll.u32 (%p1562_p12), %s1433_s19, 3  ;;  %v912_v55 = vld [vmem:[%s1665_s24] sm:$0xff] (%p1562_p12)  ;;  %v914_v56 = vld [vmem:[%s1665_s24 + $0x8] sm:$0xff] (%p1562_p12)  ;;  %v916_v57 = vld [vmem:[%s1665_s24 + $0x10] sm:$0xff] (%p1562_p12) }
 0x152   : > { %s877_s16 = scalar_lea.vmem (%p1562_p12), %s1792_s2, %s1269_s1  ;;  %v918_v58 = vld [vmem:[%s1665_s24 + $0x18] sm:$0xff] (%p1562_p12) }
 0x153   : > { %913 = vst [vmem:[%s877_s16] sm:$0xff] (%p1562_p12), %v912_v55 }
 0x154   : > { %915 = vst [vmem:[%s877_s16 + $0x10] sm:$0xff] (%p1562_p12), %v914_v56 }
 0x155   : > { %917 = vst [vmem:[%s877_s16 + $0x20] sm:$0xff] (%p1562_p12), %v916_v57 }
 0x156   : > { %919 = vst [vmem:[%s877_s16 + $0x30] sm:$0xff] %v918_v58 }
 0x157 PF: > { %s14_s22 = sadd.s32 1, %s1445_s22   ;;  %s1805_s25 = sld [smem:[#allocation6_spill]] }
 0x158   : > { %p11_p6 = scmp.ge.s32.totalorder %s14_s22, 12   ;;  %s1806_s10 = sld [smem:[#allocation7_spill]] }
 0x159   : > { %s1807_s12 = smov %s1409_s13  ;;  %s1808_s13 = smov %s1560_s9 }
 0x15a   : > { %s1809_s14 = smov %s1417_s15  ;;  %s1810_s15 = smov %s1557_s8 }
 0x15b   : > { %s1811_s16 = smov %s1425_s17  ;;  %s1812_s17 = smov %s1543_s30 }
 0x15c   : > { %s1813_s18 = smov %s1437_s20  ;;  %s1814_s19 = smov %s1441_s21 }
 0x15d   : > { %s1815_s20 = smov %s1805_s25  ;;  %13 = sbr.rel (!%p11_p6) target bundleno = 9 (0x9), region = 205 }
 0x15e   : > { %s1816_s21 = smov %s1806_s10 }

// kernel: _lambda_.31
= control target key start
LH: loop header
LB: loop body
LE: loop exit
PB: predicated region body
PF: predicated region fallthrough
CT: control target
= control target key end

     0   :  { %s1187_s12 = smov 0   ;;  %s1189_s13 = smov 0   ;;  %s1348_s0 = inlined_call_operand.vmem [shape: bf16[32,2304], index: 0, kind: input, shape index: {}]   ;;  %s1349_s1 = inlined_call_operand.vmem [shape: bf16[2304,256], index: 1, kind: input, shape index: {}]   ;;  %s1350_s2 = inlined_call_operand.vmem [shape: bf16[32,256], index: 2, kind: output, shape index: {0}]   ;;  %s1351_s3 = inlined_call_operand.vmem [shape: f32[8,256], index: 3, kind: output, shape index: {1}]  }
   0x1   :  { %s1191_s14 = smov 0   ;;  %s1193_s15 = smov 0  }
   0x2   :  { %s1195_s16 = smov 0  }
   0x3 LB: > { %s26_s17 = sadd.s32 1, %s1160_s15  ;;  %p49_p1 = scmp.ne.s32.totalorder %s1152_s13, %s1148_s12  ;;  %s1164_s16 = sphi %s1195_s16, %s14_s16   ;;  %s1160_s15 = sphi %s1193_s15, %s1355_s15   ;;  %s1156_s14 = sphi %s1191_s14, %s1354_s14   ;;  %s1152_s13 = sphi %s1189_s13, %s1353_s13   ;;  %s1148_s12 = sphi %s1187_s12, %s1352_s12  }
   0x4   : > { %p27_p0 = scmp.ge.s32.totalorder %s26_s17, 9  ;;  %p50_p2 = scmp.eq.s32.totalorder %s1164_s16, 0 }
   0x5   : > { %s42_s19 = sadd.s32 1, %s1152_s13  ;;  %p886_p5 = scmp.ge.s32.totalorder %s1164_s16, 9 }
   0x6   : > { %s1357_s17 = smov (%p27_p0, %s26_s17), 0  ;;  %p51_p3 = por %p50_p2, %p49_p1 }
   0x7   : > { %s38_s18 = ssub.s32 %s1160_s15, %s1357_s17  ;;  %159 = sbr.rel (%p886_p5) target bundleno = 20 (0x14), region = 16 }
   0x8   : > { %p40_p4 = scmp.eq.s32.totalorder %s38_s18, 0 }
   0xa   : > { %s1222_s20 = scalar_select %p40_p4, %s1152_s13, %s42_s19  }
   0xc   : > { %162 = sbr.rel (!%p51_p3) target bundleno = 20 (0x14), region = 20  ;;  %s164_s21 = sand.u32 (%p51_p3), 1, %s1152_s13  }
   0xd   : > { %s1047_s22 = sshll.u32 (%p51_p3), %s1160_s15, 3  ;;  %s887_s23 = sshll.u32 (%p51_p3), %s164_s21, 5 }
   0xe   : > { %s172_s26 = scalar_lea.vmem (%p51_p3), %s1348_s0, %s1047_s22  ;;  %s166_s27 = scalar_lea.vmem (%p51_p3), [#allocation3], %s887_s23 }
   0xf   : > { %v207_v0 = vld [vmem:[%s172_s26] sm:$0xff] (%p51_p3)  ;;  %v209_v1 = vld [vmem:[%s172_s26 + $0x48] sm:$0xff] (%p51_p3)  ;;  %v211_v2 = vld [vmem:[%s172_s26 + $0x90] sm:$0xff] (%p51_p3) }
  0x10   : > { %208 = vst [vmem:[%s166_s27] sm:$0xff] (%p51_p3), %v207_v0  ;;  %v213_v3 = vld [vmem:[%s172_s26 + $0xd8] sm:$0xff] (%p51_p3) }
  0x11   : > { %210 = vst [vmem:[%s166_s27 + $0x8] sm:$0xff] %v209_v1 }
  0x12   : > { %212 = vst [vmem:[%s166_s27 + $0x10] sm:$0xff] %v211_v2 }
  0x13   : > { %214 = vst [vmem:[%s166_s27 + $0x18] sm:$0xff] %v213_v3 }
  0x14 PF: > { %p890_p6 = scmp.ge.s32.totalorder %s1164_s16, 1  ;;  %p234_p7 = scmp.lt.s32.totalorder %s1164_s16, 10 }
  0x16   : > { %p235_p8 = pnand %p890_p6, %p234_p7 }
  0x17   : > { %s241_s28 = sand.u32 (!%p235_p8), 1, %s1148_s12   ;;  %s892_s29 = sshll.u32 (!%p235_p8), %s1156_s14, 5 }
  0x18   : > { %238 = sbr.rel (%p235_p8) target bundleno = 266 (0x10a), region = 62  ;;  %s891_s30 = sshll.u32 (!%p235_p8), %s241_s28, 5 }
  0x19   : > { %p292_p9 = scmp.lt.s32.totalorder (!%p235_p8), %s892_s29, 287  ;;  %s1239_s8 = scalar_lea.vmem (!%p235_p8), [#allocation3], %s891_s30 }
  0x1a   : > { %p895_p10 = scmp.ne.s32.totalorder (!%p235_p8), %s1156_s14, 0 }
  0x1d   : > { %s1359_s29 = smov (!%p292_p9, %s892_s29), 287  ;;  %327 = sbr.rel (%p895_p10) target bundleno = 43 (0x2b), region = 70 }
  0x1e   : > { %s1048_s4 = sshll.u32 %s1359_s29, 3 }
  0x1f   : > { %s1237_s7 = scalar_lea.vmem %s1349_s1, %s1048_s4 }
  0x22   : > { %v1166_v4 = vmov 0.0  }
  0x23   : > { %328 = vst [vmem:[#allocation2 + $0x30] sm:$0xff] %v1166_v4 }
  0x24   : > { %329 = vst [vmem:[#allocation2] sm:$0xff] %v1166_v4 }
  0x25   : > { %330 = vst [vmem:[#allocation2 + $0x18] sm:$0xff] %v1166_v4 }
  0x26   : > { %331 = vst [vmem:[#allocation2 + $0x10] sm:$0xff] %v1166_v4 }
  0x27   : > { %332 = vst [vmem:[#allocation2 + $0x8] sm:$0xff] %v1166_v4 }
  0x28   : > { %333 = vst [vmem:[#allocation2 + $0x20] sm:$0xff] %v1166_v4 }
  0x29   : > { %334 = vst [vmem:[#allocation2 + $0x28] sm:$0xff] %v1166_v4 }
  0x2a   : > { %335 = vst [vmem:[#allocation2 + $0x38] sm:$0xff] %v1166_v4 }
  0x2b PF: > { %v970_v5 = vld [vmem:[%s1237_s7 + $0x70] sm:$0xf]  ;;  %v1068_v6 = vld [vmem:[%s1237_s7 + $0x74] sm:$0xf0]  ;;  %v1067_v10 = vld [vmem:[%s1237_s7 + $0x74] sm:$0xf] }
  0x2c   : > { %v1034_v7 = vld [vmem:[%s1237_s7 + $0xf0] sm:$0xf]  ;;  %v971_v8 = vor.u32 %v1068_v6, %v970_v5  ;;  %v1084_v9 = vld [vmem:[%s1237_s7 + $0xf4] sm:$0xf0]  ;;  %v972_v11 = vld [vmem:[%s1237_s7 + $0x78] sm:$0xf0] }
  0x2d   : > { %v1035_v12 = vor.u32 %v1084_v9, %v1034_v7  ;;  %v975_v13 = vor.u32 %v1067_v10, %v972_v11  ;;  %v1083_v14 = vld [vmem:[%s1237_s7 + $0xf4] sm:$0xf]  ;;  %v1036_v15 = vld [vmem:[%s1237_s7 + $0xf8] sm:$0xf0]  ;;  %v962_v16 = vld [vmem:[%s1237_s7 + $0x60] sm:$0xf] }
  0x2e   : > { %560 = vmatpush.bf16.msra.mxu0 %v971_v8  ;;  %v1039_v17 = vor.u32 %v1083_v14, %v1036_v15  ;;  %v1066_v18 = vld [vmem:[%s1237_s7 + $0x64] sm:$0xf0]  ;;  %v1026_v19 = vld [vmem:[%s1237_s7 + $0xe0] sm:$0xf]  ;;  %v1065_v23 = vld [vmem:[%s1237_s7 + $0x64] sm:$0xf] }
  0x2f   : > { %v1082_v20 = vld [vmem:[%s1237_s7 + $0xe4] sm:$0xf0]  ;;  %579 = vmatpush.bf16.msra.mxu1 %v1035_v12  ;;  %598 = vmatpush.bf16.msra.mxu2 %v975_v13  ;;  %v963_v21 = vor.u32 %v1066_v18, %v962_v16  ;;  %v964_v24 = vld [vmem:[%s1237_s7 + $0x68] sm:$0xf0]  ;;  %v1081_v25 = vld [vmem:[%s1237_s7 + $0xe4] sm:$0xf] }
  0x30   : > { %v1027_v22 = vor.u32 %v1082_v20, %v1026_v19  ;;  %617 = vmatpush.bf16.msra.mxu3 %v1039_v17  ;;  %v967_v26 = vor.u32 %v1065_v23, %v964_v24  ;;  %v1028_v27 = vld [vmem:[%s1237_s7 + $0xe8] sm:$0xf0]  ;;  %v954_v28 = vld [vmem:[%s1237_s7 + $0x50] sm:$0xf]  ;;  %v1064_v29 = vld [vmem:[%s1237_s7 + $0x54] sm:$0xf0] }
  0x31   : > { %v1031_v30 = vor.u32 %v1081_v25, %v1028_v27  ;;  %v1018_v31 = vld [vmem:[%s1237_s7 + $0xd0] sm:$0xf]  ;;  %v1080_v32 = vld [vmem:[%s1237_s7 + $0xd4] sm:$0xf0]  ;;  %v1063_v33 = vld [vmem:[%s1237_s7 + $0x54] sm:$0xf]  ;;  %v955_v34 = vor.u32 %v1064_v29, %v954_v28 }
  0x32   : > { %561 = vmatpush.bf16.msra.mxu0 %v963_v21  ;;  %v956_v35 = vld [vmem:[%s1237_s7 + $0x58] sm:$0xf0]  ;;  %v1079_v36 = vld [vmem:[%s1237_s7 + $0xd4] sm:$0xf]  ;;  %v1019_v38 = vor.u32 %v1080_v32, %v1018_v31  ;;  %v946_v40 = vld [vmem:[%s1237_s7 + $0x40] sm:$0xf] }
  0x33   : > { %v1020_v37 = vld [vmem:[%s1237_s7 + $0xd8] sm:$0xf0]  ;;  %580 = vmatpush.bf16.msra.mxu1 %v1027_v22  ;;  %599 = vmatpush.bf16.msra.mxu2 %v967_v26  ;;  %v959_v39 = vor.u32 %v1063_v33, %v956_v35  ;;  %v1062_v41 = vld [vmem:[%s1237_s7 + $0x44] sm:$0xf0]  ;;  %v1010_v42 = vld [vmem:[%s1237_s7 + $0xc0] sm:$0xf] }
  0x34   : > { %618 = vmatpush.bf16.msra.mxu3 %v1031_v30  ;;  %v1023_v43 = vor.u32 %v1079_v36, %v1020_v37  ;;  %v1078_v44 = vld [vmem:[%s1237_s7 + $0xc4] sm:$0xf0]  ;;  %v1061_v45 = vld [vmem:[%s1237_s7 + $0x44] sm:$0xf]  ;;  %v948_v46 = vld [vmem:[%s1237_s7 + $0x48] sm:$0xf0]  ;;  %v947_v49 = vor.u32 %v1062_v41, %v946_v40 }
  0x35   : > { %v1077_v47 = vld [vmem:[%s1237_s7 + $0xc4] sm:$0xf]  ;;  %v1012_v48 = vld [vmem:[%s1237_s7 + $0xc8] sm:$0xf0]  ;;  %v1011_v50 = vor.u32 %v1078_v44, %v1010_v42  ;;  %v951_v51 = vor.u32 %v1061_v45, %v948_v46  ;;  %v938_v52 = vld [vmem:[%s1237_s7 + $0x30] sm:$0xf] }
  0x36   : > { %562 = vmatpush.bf16.msra.mxu0 %v955_v34  ;;  %v1060_v53 = vld [vmem:[%s1237_s7 + $0x34] sm:$0xf0]  ;;  %v1002_v54 = vld [vmem:[%s1237_s7 + $0xb0] sm:$0xf]  ;;  %v1015_v55 = vor.u32 %v1077_v47, %v1012_v48  ;;  %v1059_v57 = vld [vmem:[%s1237_s7 + $0x34] sm:$0xf] }
  0x37   : > { %581 = vmatpush.bf16.msra.mxu1 %v1019_v38  ;;  %600 = vmatpush.bf16.msra.mxu2 %v959_v39  ;;  %v1076_v56 = vld [vmem:[%s1237_s7 + $0xb4] sm:$0xf0]  ;;  %v940_v58 = vld [vmem:[%s1237_s7 + $0x38] sm:$0xf0]  ;;  %v1075_v59 = vld [vmem:[%s1237_s7 + $0xb4] sm:$0xf]  ;;  %v939_v61 = vor.u32 %v1060_v53, %v938_v52 }
  0x38   : > { %619 = vmatpush.bf16.msra.mxu3 %v1023_v43  ;;  %v1004_v60 = vld [vmem:[%s1237_s7 + $0xb8] sm:$0xf0]  ;;  %v1003_v62 = vor.u32 %v1076_v56, %v1002_v54  ;;  %v943_v63 = vor.u32 %v1059_v57, %v940_v58  ;;  %v930_v0 = vld [vmem:[%s1237_s7 + $0x20] sm:$0xf]  ;;  %v1058_v1 = vld [vmem:[%s1237_s7 + $0x24] sm:$0xf0] }
  0x39   : > { %v994_v2 = vld [vmem:[%s1237_s7 + $0xa0] sm:$0xf]  ;;  %v1007_v3 = vor.u32 %v1075_v59, %v1004_v60  ;;  %v1074_v4 = vld [vmem:[%s1237_s7 + $0xa4] sm:$0xf0]  ;;  %v1057_v5 = vld [vmem:[%s1237_s7 + $0x24] sm:$0xf]  ;;  %v931_v9 = vor.u32 %v1058_v1, %v930_v0 }
  0x3a   : > { %563 = vmatpush.bf16.msra.mxu0 %v947_v49  ;;  %v932_v6 = vld [vmem:[%s1237_s7 + $0x28] sm:$0xf0]  ;;  %v1073_v7 = vld [vmem:[%s1237_s7 + $0xa4] sm:$0xf]  ;;  %v995_v10 = vor.u32 %v1074_v4, %v994_v2  ;;  %v922_v12 = vld [vmem:[%s1237_s7 + $0x10] sm:$0xf] }
  0x3b   : > { %582 = vmatpush.bf16.msra.mxu1 %v1011_v50  ;;  %601 = vmatpush.bf16.msra.mxu2 %v951_v51  ;;  %v996_v8 = vld [vmem:[%s1237_s7 + $0xa8] sm:$0xf0]  ;;  %v935_v11 = vor.u32 %v1057_v5, %v932_v6  ;;  %v1056_v13 = vld [vmem:[%s1237_s7 + $0x14] sm:$0xf0]  ;;  %v986_v14 = vld [vmem:[%s1237_s7 + $0x90] sm:$0xf] }
  0x3c   : > { %620 = vmatpush.bf16.msra.mxu3 %v1015_v55  ;;  %v999_v15 = vor.u32 %v1073_v7, %v996_v8  ;;  %v1072_v16 = vld [vmem:[%s1237_s7 + $0x94] sm:$0xf0]  ;;  %v1055_v17 = vld [vmem:[%s1237_s7 + $0x14] sm:$0xf]  ;;  %v924_v18 = vld [vmem:[%s1237_s7 + $0x18] sm:$0xf0]  ;;  %v923_v21 = vor.u32 %v1056_v13, %v922_v12 }
  0x3d   : > { %v1071_v19 = vld [vmem:[%s1237_s7 + $0x94] sm:$0xf]  ;;  %v988_v20 = vld [vmem:[%s1237_s7 + $0x98] sm:$0xf0]  ;;  %v987_v22 = vor.u32 %v1072_v16, %v986_v14  ;;  %v927_v23 = vor.u32 %v1055_v17, %v924_v18  ;;  %v914_v24 = vld [vmem:[%s1237_s7] sm:$0xf] }
  0x3e   : > { %564 = vmatpush.bf16.msra.mxu0 %v939_v61  ;;  %v1054_v25 = vld [vmem:[%s1237_s7 + $0x4] sm:$0xf0]  ;;  %v978_v26 = vld [vmem:[%s1237_s7 + $0x80] sm:$0xf]  ;;  %v991_v27 = vor.u32 %v1071_v19, %v988_v20  ;;  %v1053_v29 = vld [vmem:[%s1237_s7 + $0x4] sm:$0xf] }
  0x3f   : > { %583 = vmatpush.bf16.msra.mxu1 %v1003_v62  ;;  %602 = vmatpush.bf16.msra.mxu2 %v943_v63  ;;  %v1070_v28 = vld [vmem:[%s1237_s7 + $0x84] sm:$0xf0]  ;;  %v916_v30 = vld [vmem:[%s1237_s7 + $0x8] sm:$0xf0]  ;;  %v1069_v31 = vld [vmem:[%s1237_s7 + $0x84] sm:$0xf]  ;;  %v915_v33 = vor.u32 %v1054_v25, %v914_v24 }
  0x40   : > { %621 = vmatpush.bf16.msra.mxu3 %v1007_v3  ;;  %v980_v32 = vld [vmem:[%s1237_s7 + $0x88] sm:$0xf0]  ;;  %v898_v34 = vld [vmem:[%s1239_s8] sm:$0xf]  ;;  %v1050_v35 = vld [vmem:[%s1239_s8 + $0x4] sm:$0xf0]  ;;  %v979_v36 = vor.u32 %v1070_v28, %v978_v26  ;;  %v919_v37 = vor.u32 %v1053_v29, %v916_v30 }
  0x41   : > { %v1049_v38 = vld [vmem:[%s1239_s8 + $0x4] sm:$0xf]  ;;  %v900_v39 = vld [vmem:[%s1239_s8 + $0x8] sm:$0xf0]  ;;  %v983_v40 = vor.u32 %v1069_v31, %v980_v32  ;;  %v899_v41 = vor.u32 %v1050_v35, %v898_v34  ;;  %v906_v43 = vld [vmem:[%s1239_s8 + $0x10] sm:$0xf] }
  0x42   : > { %565 = vmatpush.bf16.msra.mxu0 %v931_v9  ;;  %v903_v42 = vor.u32 %v1049_v38, %v900_v39  ;;  %v1052_v44 = vld [vmem:[%s1239_s8 + $0x14] sm:$0xf0]  ;;  %v1051_v45 = vld [vmem:[%s1239_s8 + $0x14] sm:$0xf]  ;;  %v908_v46 = vld [vmem:[%s1239_s8 + $0x18] sm:$0xf0] }
  0x43   : > { %584 = vmatpush.bf16.msra.mxu1 %v995_v10  ;;  %603 = vmatpush.bf16.msra.mxu2 %v935_v11  ;;  %v907_v47 = vor.u32 %v1052_v44, %v906_v43  ;;  %v911_v48 = vor.u32 %v1051_v45, %v908_v46  ;;  %v336_v50 = vld [vmem:[#allocation2 + $0x30] sm:$0xff]  ;;  %v337_v55 = vld [vmem:[#allocation2] sm:$0xff]  ;;  %v338_v59 = vld [vmem:[#allocation2 + $0x18] sm:$0xff]  ;;  %p1040_p11 = scmp.ne.s32.totalorder %s1156_s14, 8 }
  0x44   : > { %622 = vmatpush.bf16.msra.mxu3 %v999_v15  ;;  %v339_v1 = vld [vmem:[#allocation2 + $0x10] sm:$0xff]  ;;  %v340_v5 = vld [vmem:[#allocation2 + $0x8] sm:$0xff]  ;;  %v341_v11 = vld [vmem:[#allocation2 + $0x20] sm:$0xff] }
  0x45   : > { %v342_v15 = vld [vmem:[#allocation2 + $0x28] sm:$0xff] }
  0x46   : > { %566 = vmatpush.bf16.msra.mxu0 %v923_v21  ;;  %v343_v21 = vld [vmem:[#allocation2 + $0x38] sm:$0xff] }
  0x47   : > { %585 = vmatpush.bf16.msra.mxu1 %v987_v22  ;;  %604 = vmatpush.bf16.msra.mxu2 %v927_v23 }
  0x48   : > { %623 = vmatpush.bf16.msra.mxu3 %v991_v27 }
  0x4a   : > { %567 = vmatpush.bf16.msra.mxu0 %v915_v33 }
  0x4b   : > { %586 = vmatpush.bf16.msra.mxu1 %v979_v36  ;;  %605 = vmatpush.bf16.msra.mxu2 %v919_v37 }
  0x4c   : > { %624 = vmatpush.bf16.msra.mxu3 %v983_v40 }
  0x4d   : > { %568 = vmatmul.bf16.vlgmr.msra.gmra.mxu0 %v899_v41 }
  0x4e   : > { %587 = vmatmul.bf16.vlgmr.msra.gmra.mxu1 %v903_v42  ;;  %606 = vmatmul.bf16.vlgmr.msra.gmra.mxu2 %v899_v41 }
  0x4f   : > { %625 = vmatmul.bf16.vlgmr.msra.gmra.mxu3 %v903_v42 }
  0x5d   : > { %573 = vmatmul.bf16.gmra.mxu0 %v907_v47 }
  0x5e   : > { %592 = vmatmul.bf16.gmra.mxu1 %v911_v48  ;;  %611 = vmatmul.bf16.gmra.mxu2 %v907_v47 }
  0x5f   : > { %630 = vmatmul.bf16.gmra.mxu3 %v911_v48 }
  0xca   : > { %v569_v49 = vpop.f32.mrf.mxu0 }
  0xcb   : > { %v588_v51 = vpop.f32.mrf.mxu1 }
  0xcc   : > { %v589_v52 = vadd.f32 %v588_v51, %v569_v49 }
  0xce   : > { %v636_v53 = vadd.f32 %v589_v52, %v336_v50 }
  0xd0   : > { %644 = vst [vmem:[#allocation2 + $0x30] sm:$0xff] %v636_v53 }
  0xd1   : > { %v607_v54 = vpop.f32.mrf.mxu2 }
  0xd2   : > { %v626_v56 = vpop.f32.mrf.mxu3  ;;  %v571_v57 = vpop.f32.mrf.mxu0 }
  0xd3   : > { %v627_v58 = vadd.f32 %v626_v56, %v607_v54  ;;  %v590_v60 = vpop.f32.mrf.mxu1 }
  0xd4   : > { %v591_v61 = vadd.f32 %v590_v60, %v571_v57 }
  0xd5   : > { %v637_v62 = vadd.f32 %v627_v58, %v337_v55 }
  0xd6   : > { %v638_v63 = vadd.f32 %v591_v61, %v338_v59 }
  0xd7   : > { %645 = vst [vmem:[#allocation2] sm:$0xff] %v637_v62 }
  0xd8   : > { %646 = vst [vmem:[#allocation2 + $0x18] sm:$0xff] %v638_v63 }
  0xd9   : > { %v609_v0 = vpop.f32.mrf.mxu2 }
  0xda   : > { %v628_v2 = vpop.f32.mrf.mxu3  ;;  %v574_v3 = vpop.f32.mrf.mxu0 }
  0xdb   : > { %v629_v4 = vadd.f32 %v628_v2, %v609_v0  ;;  %v593_v6 = vpop.f32.mrf.mxu1 }
  0xdc   : > { %v594_v7 = vadd.f32 %v593_v6, %v574_v3 }
  0xdd   : > { %v639_v8 = vadd.f32 %v629_v4, %v339_v1 }
  0xde   : > { %v640_v9 = vadd.f32 %v594_v7, %v340_v5 }
  0xdf   : > { %647 = vst [vmem:[#allocation2 + $0x10] sm:$0xff] %v639_v8 }
  0xe0   : > { %648 = vst [vmem:[#allocation2 + $0x8] sm:$0xff] %v640_v9 }
  0xe1   : > { %v612_v10 = vpop.f32.mrf.mxu2 }
  0xe2   : > { %v631_v12 = vpop.f32.mrf.mxu3  ;;  %v576_v13 = vpop.f32.mrf.mxu0 }
  0xe3   : > { %v632_v14 = vadd.f32 %v631_v12, %v612_v10  ;;  %v595_v16 = vpop.f32.mrf.mxu1 }
  0xe4   : > { %v596_v17 = vadd.f32 %v595_v16, %v576_v13 }
  0xe5   : > { %v641_v18 = vadd.f32 %v632_v14, %v341_v11 }
  0xe6   : > { %v642_v19 = vadd.f32 %v596_v17, %v342_v15 }
  0xe7   : > { %649 = vst [vmem:[#allocation2 + $0x20] sm:$0xff] %v641_v18 }
  0xe8   : > { %650 = vst [vmem:[#allocation2 + $0x28] sm:$0xff] %v642_v19 }
  0xe9   : > { %v614_v20 = vpop.f32.mrf.mxu2 }
  0xea   : > { %v633_v22 = vpop.f32.mrf.mxu3 }
  0xeb   : > { %v634_v23 = vadd.f32 %v633_v22, %v614_v20  ;;  %655 = sbr.rel (%p1040_p11) target bundleno = 266 (0x10a), region = 74 }
  0xed   : > { %v643_v24 = vadd.f32 %v634_v23, %v343_v21 }
  0xef   : > { %651 = vst [vmem:[#allocation2 + $0x38] sm:$0xff] %v643_v24 }
  0xf0   : > { %v656_v25 = vld [vmem:[#allocation2 + $0x30] sm:$0xff]  ;;  %v657_v26 = vld [vmem:[#allocation2] sm:$0xff]  ;;  %v658_v27 = vld [vmem:[#allocation2 + $0x18] sm:$0xff]  ;;  %v716_v0 = vlaneseq }
  0xf1   : > { %v664_v28 = vpack.c.bf16 %v657_v26, %v656_v25  ;;  %v690_v29 = vmul.f32 %v656_v25, %v656_v25  ;;  %v691_v30 = vmul.f32 %v657_v26, %v657_v26  ;;  %v659_v31 = vld [vmem:[#allocation2 + $0x10] sm:$0xff]  ;;  %v672_v32 = vadd.f32 %v658_v27, %v656_v25  ;;  %v660_v33 = vld [vmem:[#allocation2 + $0x8] sm:$0xff]  ;;  %v661_v34 = vld [vmem:[#allocation2 + $0x20] sm:$0xff] }
  0xf2   : > { %v665_v35 = vpack.c.bf16 %v659_v31, %v658_v27  ;;  %v681_v36 = vadd.f32 %v659_v31, %v657_v26  ;;  %v692_v37 = vmul.f32 %v658_v27, %v658_v27  ;;  %v693_v38 = vmul.f32 %v659_v31, %v659_v31  ;;  %v662_v39 = vld [vmem:[#allocation2 + $0x28] sm:$0xff] }
  0xf3   : > { %668 = vst [vmem:[%s1350_s2] sm:$0xff] %v664_v28  ;;  %v666_v41 = vpack.c.bf16 %v661_v34, %v660_v33  ;;  %v673_v42 = vadd.f32 %v672_v32, %v660_v33  ;;  %v694_v43 = vmul.f32 %v660_v33, %v660_v33  ;;  %v695_v44 = vmul.f32 %v661_v34, %v661_v34 }
  0xf4   : > { %669 = vst [vmem:[%s1350_s2 + $0x8] sm:$0xff] %v665_v35  ;;  %v698_v45 = vadd.f32 %v692_v37, %v690_v29  ;;  %v707_v46 = vadd.f32 %v693_v38, %v691_v30  ;;  %v682_v47 = vadd.f32 %v681_v36, %v661_v34  ;;  %v696_v50 = vmul.f32 %v662_v39, %v662_v39 }
  0xf5   : > { %670 = vst [vmem:[%s1350_s2 + $0x10] sm:$0xff] %v666_v41  ;;  %v674_v49 = vadd.f32 %v673_v42, %v662_v39  ;;  %v717_v9 = vshrl.u32 %v716_v0, 7 }
  0xf6   : > { %v663_v40 = vld [vmem:[#allocation2 + $0x38] sm:$0xff]  ;;  %v699_v52 = vadd.f32 %v698_v45, %v694_v43  ;;  %v708_v53 = vadd.f32 %v707_v46, %v695_v44 }
  0xf7   : > { %v667_v48 = vpack.c.bf16 %v663_v40, %v662_v39  ;;  %v697_v51 = vmul.f32 %v663_v40, %v663_v40  ;;  %v683_v54 = vadd.f32 %v682_v47, %v663_v40  ;;  %v675_v55 = vrot.slane %v674_v49, 4 }
  0xf8   : > { %v700_v57 = vadd.f32 %v699_v52, %v696_v50  ;;  %vm719_vm0 = vcmp.eq.s32.totalorder %v717_v9, 1  ;;  %vm718_vm1 = vcmp.eq.s32.totalorder %v717_v9, 0 }
  0xf9   : > { %671 = vst [vmem:[%s1350_s2 + $0x18] sm:$0xff] %v667_v48  ;;  %v684_v56 = vrot.slane %v683_v54, 4  ;;  %v709_v58 = vadd.f32 %v708_v53, %v697_v51  ;;  %v676_v59 = vadd.f32 %v675_v55, %v674_v49 }
  0xfa   : > { %v701_v61 = vrot.slane %v700_v57, 4 }
  0xfb   : > { %v685_v60 = vadd.f32 %v684_v56, %v683_v54  ;;  %v710_v62 = vrot.slane %v709_v58, 4  ;;  %v677_v63 = vrot.slane %v676_v59, 2 }
  0xfc   : > { %v702_v1 = vadd.f32 %v701_v61, %v700_v57 }
  0xfd   : > { %v686_v2 = vrot.slane %v685_v60, 2  ;;  %v711_v3 = vadd.f32 %v710_v62, %v709_v58  ;;  %v678_v4 = vadd.f32 %v677_v63, %v676_v59 }
  0xfe   : > { %v703_v5 = vrot.slane %v702_v1, 2 }
  0xff   : > { %v687_v6 = vadd.f32 %v686_v2, %v685_v60  ;;  %v712_v7 = vrot.slane %v711_v3, 2  ;;  %v679_v8 = vrot.slane %v678_v4, 1 }
 0x100   : > { %v704_v10 = vadd.f32 %v703_v5, %v702_v1 }
 0x101   : > { %v688_v11 = vrot.slane %v687_v6, 1  ;;  %v713_v12 = vadd.f32 %v712_v7, %v711_v3  ;;  %v680_v15 = vadd.f32 %v679_v8, %v678_v4 }
 0x102   : > { %v705_v13 = vrot.slane %v704_v10, 1 }
 0x103   : > { %v714_v14 = vrot.slane %v713_v12, 1  ;;  %v689_v16 = vadd.f32 %v688_v11, %v687_v6 }
 0x104   : > { %v706_v17 = vadd.f32 %v705_v13, %v704_v10 }
 0x105   : > { %v715_v18 = vadd.f32 %v714_v14, %v713_v12 }
 0x106   : > { %v720_v19 = vsel %vm719_vm0, %v706_v17, 0.0 }
 0x107   : > { %v721_v20 = vsel %vm719_vm0, %v715_v18, 0.0  ;;  %v722_v21 = vsel %vm718_vm1, %v680_v15, %v720_v19 }
 0x108   : > { %v723_v22 = vsel %vm718_vm1, %v689_v16, %v721_v20  ;;  %724 = vst [vmem:[%s1351_s3] sm:$0xff] %v722_v21 }
 0x109   : > { %725 = vst [vmem:[%s1351_s3 + $0x8] sm:$0xff] %v723_v22 }
 0x10a PF: > { %s14_s16 = sadd.s32 1, %s1164_s16   ;;  %s1352_s12 = smov %s1152_s13 }
 0x10b   : > { %p11_p12 = scmp.ge.s32.totalorder %s14_s16, 11   ;;  %s1353_s13 = smov %s1222_s20 }
 0x10c   : > { %s1354_s14 = smov %s1160_s15  ;;  %s1355_s15 = smov %s1357_s17 }
 0x10d   :  { %13 = sbr.rel (!%p11_p12) target bundleno = 3 (0x3), region = 124 }

// kernel: _lambda_.32
= control target key start
LH: loop header
LB: loop body
LE: loop exit
PB: predicated region body
PF: predicated region fallthrough
CT: control target
= control target key end

     0   :  { %s164_s0 = inlined_call_operand.vmem [shape: bf16[32,256], index: 0, kind: input, shape index: {}]   ;;  %s165_s1 = inlined_call_operand.vmem [shape: f32[1,256], index: 1, kind: input, shape index: {}]   ;;  %s166_s2 = inlined_call_operand.vmem [shape: f32[1,256], index: 2, kind: input, shape index: {}]   ;;  %s167_s3 = inlined_call_operand.vmem [shape: bf16[32,256], index: 3, kind: input, shape index: {}]   ;;  %s168_s4 = inlined_call_operand.vmem [shape: bf16[32,256], index: 4, kind: output, shape index: {}]  }
   0x1   :  { %v17_v0 = vld [vmem:[%s164_s0] sm:$0xff]  ;;  %v18_v8 = vld [vmem:[%s164_s0 + $0x8] sm:$0xff]  ;;  %v19_v14 = vld [vmem:[%s164_s0 + $0x10] sm:$0xff] }
   0x2   :  { %v29_v1 = vld [vmem:[%s165_s1] sm:$0x3]  ;;  %v21_v3 = vunpack.c.l.bf16 %v17_v0  ;;  %v22_v4 = vunpack.c.h.bf16 %v17_v0  ;;  %v58_v9 = vld [vmem:[%s167_s3 + $0x8] sm:$0xff]  ;;  %v23_v17 = vunpack.c.l.bf16 %v18_v8  ;;  %v24_v18 = vunpack.c.h.bf16 %v18_v8  ;;  %v59_v19 = vld [vmem:[%s167_s3 + $0x10] sm:$0xff] }
   0x3   :  { %v43_v2 = vld [vmem:[%s166_s2] sm:$0x3]  ;;  %v31_v5 = vperm.slane %v29_v1, 0  ;;  %v32_v6 = vperm.slane %v29_v1, 1  ;;  %v63_v20 = vunpack.c.l.bf16 %v58_v9  ;;  %v64_v21 = vunpack.c.h.bf16 %v58_v9  ;;  %v20_v28 = vld [vmem:[%s164_s0 + $0x18] sm:$0xff] }
   0x4   :  { %v57_v7 = vld [vmem:[%s167_s3] sm:$0xff]  ;;  %v45_v10 = vperm.slane %v43_v2, 0  ;;  %v46_v11 = vperm.slane %v43_v2, 1  ;;  %v25_v22 = vunpack.c.l.bf16 %v19_v14  ;;  %v26_v23 = vunpack.c.h.bf16 %v19_v14  ;;  %v60_v41 = vld [vmem:[%s167_s3 + $0x18] sm:$0xff] }
   0x5   :  { %v61_v12 = vunpack.c.l.bf16 %v57_v7  ;;  %v62_v13 = vunpack.c.h.bf16 %v57_v7  ;;  %v35_v15 = vmul.f32 %v31_v5, %v21_v3  ;;  %v36_v16 = vmul.f32 %v32_v6, %v22_v4 }
   0x6   :  { %v37_v26 = vmul.f32 %v31_v5, %v23_v17  ;;  %v38_v27 = vmul.f32 %v32_v6, %v24_v18  ;;  %v39_v29 = vmul.f32 %v31_v5, %v25_v22  ;;  %v40_v30 = vmul.f32 %v32_v6, %v26_v23 }
   0x7   :  { %v49_v24 = vadd.f32 %v45_v10, %v35_v15  ;;  %v50_v25 = vadd.f32 %v46_v11, %v36_v16  ;;  %v65_v31 = vunpack.c.l.bf16 %v59_v19  ;;  %v66_v32 = vunpack.c.h.bf16 %v59_v19 }
   0x8   :  { %v51_v35 = vadd.f32 %v45_v10, %v37_v26  ;;  %v52_v36 = vadd.f32 %v46_v11, %v38_v27  ;;  %v53_v37 = vadd.f32 %v45_v10, %v39_v29  ;;  %v54_v38 = vadd.f32 %v46_v11, %v40_v30 }
   0x9   :  { %v69_v33 = vadd.f32 %v61_v12, %v49_v24  ;;  %v70_v34 = vadd.f32 %v62_v13, %v50_v25  ;;  %v27_v39 = vunpack.c.l.bf16 %v20_v28  ;;  %v28_v40 = vunpack.c.h.bf16 %v20_v28 }
   0xa   :  { %v71_v44 = vadd.f32 %v63_v20, %v51_v35  ;;  %v72_v45 = vadd.f32 %v64_v21, %v52_v36  ;;  %v73_v46 = vadd.f32 %v65_v31, %v53_v37  ;;  %v74_v47 = vadd.f32 %v66_v32, %v54_v38 }
   0xb   :  { %v77_v42 = vmax.f32 %v69_v33, 0.0  ;;  %v78_v43 = vmax.f32 %v70_v34, 0.0  ;;  %v41_v48 = vmul.f32 %v31_v5, %v27_v39  ;;  %v42_v49 = vmul.f32 %v32_v6, %v28_v40 }
   0xc   :  { %v79_v51 = vmax.f32 %v71_v44, 0.0  ;;  %v80_v52 = vmax.f32 %v72_v45, 0.0  ;;  %v67_v53 = vunpack.c.l.bf16 %v60_v41  ;;  %v81_v54 = vmax.f32 %v73_v46, 0.0 }
   0xd   :  { %v85_v50 = vpack.c.bf16 %v78_v43, %v77_v42  ;;  %v82_v55 = vmax.f32 %v74_v47, 0.0  ;;  %v55_v56 = vadd.f32 %v45_v10, %v41_v48  ;;  %v56_v57 = vadd.f32 %v46_v11, %v42_v49 }
   0xe   :  { %v86_v58 = vpack.c.bf16 %v80_v52, %v79_v51  ;;  %v68_v59 = vunpack.c.h.bf16 %v60_v41 }
   0xf   :  { %89 = vst [vmem:[%s168_s4] sm:$0xff] %v85_v50  ;;  %v87_v60 = vpack.c.bf16 %v82_v55, %v81_v54  ;;  %v75_v61 = vadd.f32 %v67_v53, %v55_v56 }
  0x10   :  { %90 = vst [vmem:[%s168_s4 + $0x8] sm:$0xff] %v86_v58  ;;  %v76_v62 = vadd.f32 %v68_v59, %v56_v57 }
  0x11   :  { %91 = vst [vmem:[%s168_s4 + $0x10] sm:$0xff] %v87_v60  ;;  %v83_v63 = vmax.f32 %v75_v61, 0.0 }
  0x12   :  { %v84_v0 = vmax.f32 %v76_v62, 0.0 }
  0x14   :  { %v88_v1 = vpack.c.bf16 %v84_v0, %v83_v63 }
  0x16   :  { %92 = vst [vmem:[%s168_s4 + $0x18] sm:$0xff] %v88_v1 }

// kernel: _lambda_.34
= control target key start
LH: loop header
LB: loop body
LE: loop exit
PB: predicated region body
PF: predicated region fallthrough
CT: control target
= control target key end

     0   :  { %v181_v14 = vmov 0   ;;  %s402_s0 = inlined_call_operand.vmem [shape: bf16[16,1024], index: 0, kind: input, shape index: {}]   ;;  %s403_s1 = inlined_call_operand.vmem [shape: f32[1,1024], index: 1, kind: input, shape index: {}]   ;;  %s404_s2 = inlined_call_operand.vmem [shape: f32[1,1024], index: 2, kind: input, shape index: {}]   ;;  %s405_s3 = inlined_call_operand.vmem [shape: f32[1,1024], index: 3, kind: input, shape index: {}]   ;;  %s406_s4 = inlined_call_operand.vmem [shape: bf16[16,1024], index: 4, kind: output, shape index: {}]  }
   0x1   :  { %v17_v0 = vld [vmem:[%s402_s0] sm:$0xff]  ;;  %v18_v8 = vld [vmem:[%s402_s0 + $0x8] sm:$0xff]  ;;  %v19_v25 = vld [vmem:[%s402_s0 + $0x10] sm:$0xff] }
   0x2   :  { %v213_v1 = vld [vmem:[%s403_s1] sm:$0xff]  ;;  %v25_v3 = vunpack.c.l.bf16 %v17_v0  ;;  %v26_v4 = vunpack.c.h.bf16 %v17_v0  ;;  %v27_v11 = vunpack.c.l.bf16 %v18_v8  ;;  %v28_v16 = vunpack.c.h.bf16 %v18_v8  ;;  %v20_v46 = vld [vmem:[%s402_s0 + $0x18] sm:$0xff] }
   0x3   :  { %v218_v2 = vld [vmem:[%s404_s2] sm:$0xff]  ;;  %v43_v5 = vperm.slane %v213_v1, 0  ;;  %v44_v6 = vperm.slane %v213_v1, 1  ;;  %v45_v19 = vperm.slane %v213_v1, 2  ;;  %v46_v20 = vperm.slane %v213_v1, 3 }
   0x4   :  { %v109_v7 = vld [vmem:[%s405_s3] sm:$0xff]  ;;  %v77_v9 = vperm.slane %v218_v2, 0  ;;  %v78_v10 = vperm.slane %v218_v2, 1  ;;  %v79_v23 = vperm.slane %v218_v2, 2  ;;  %v80_v24 = vperm.slane %v218_v2, 3 }
   0x5   :  { %vm110_vm0 = vcmp.gt.f32.partialorder %v109_v7, 0.0  ;;  %v59_v12 = vmul.f32 %v43_v5, %v25_v3  ;;  %v60_v13 = vmul.f32 %v44_v6, %v26_v4  ;;  %v61_v28 = vmul.f32 %v45_v19, %v27_v11  ;;  %v21_v63 = vld [vmem:[%s402_s0 + $0x20] sm:$0xff] }
   0x6   :  { %v234_v15 = vsel %vm110_vm0, 1, %v181_v14  ;;  %v62_v29 = vmul.f32 %v46_v20, %v28_v16  ;;  %v29_v36 = vunpack.c.l.bf16 %v19_v25  ;;  %v30_v37 = vunpack.c.h.bf16 %v19_v25 }
   0x7   :  { %v128_v17 = vperm.slane %v234_v15, 0  ;;  %v129_v18 = vperm.slane %v234_v15, 1  ;;  %v93_v21 = vadd.f32 %v77_v9, %v59_v12  ;;  %v94_v22 = vadd.f32 %v78_v10, %v60_v13 }
   0x8   :  { %v130_v32 = vperm.slane %v234_v15, 2  ;;  %v131_v33 = vperm.slane %v234_v15, 3  ;;  %v95_v34 = vadd.f32 %v79_v23, %v61_v28  ;;  %v96_v35 = vadd.f32 %v80_v24, %v62_v29 }
   0x9   :  { %vm249_vm1 = vcmp.eq.s32.totalorder %v128_v17, 1  ;;  %vm253_vm2 = vcmp.eq.s32.totalorder %v129_v18, 1  ;;  %v111_v30 = vmax.f32 %v93_v21, 0.0  ;;  %v112_v31 = vmax.f32 %v94_v22, 0.0 }
   0xa   :  { %vm271_vm3 = vcmp.eq.s32.totalorder %v130_v32, 1  ;;  %vm275_vm4 = vcmp.eq.s32.totalorder %v131_v33, 1  ;;  %v113_v43 = vmax.f32 %v95_v34, 0.0  ;;  %v114_v44 = vmax.f32 %v96_v35, 0.0 }
   0xb   :  { %v144_v38 = vsel %vm249_vm1, %v111_v30, %v93_v21  ;;  %v145_v39 = vsel %vm253_vm2, %v112_v31, %v94_v22  ;;  %v47_v45 = vperm.slane %v213_v1, 4  ;;  %v48_v47 = vperm.slane %v213_v1, 5  ;;  %v22_v21 = vld [vmem:[%s402_s0 + $0x28] sm:$0xff] }
   0xc   :  { %v160_v42 = vpack.c.bf16 %v145_v39, %v144_v38  ;;  %v81_v48 = vperm.slane %v218_v2, 4  ;;  %v82_v49 = vperm.slane %v218_v2, 5  ;;  %v132_v50 = vperm.slane %v234_v15, 4 }
   0xd   :  { %v146_v51 = vsel %vm271_vm3, %v113_v43, %v95_v34  ;;  %v147_v52 = vsel %vm275_vm4, %v114_v44, %v96_v35  ;;  %v63_v53 = vmul.f32 %v47_v45, %v29_v36  ;;  %v133_v54 = vperm.slane %v234_v15, 5 }
   0xe   :  { %168 = vst [vmem:[%s406_s4] sm:$0xff] %v160_v42  ;;  %v161_v55 = vpack.c.bf16 %v147_v52, %v146_v51  ;;  %v64_v56 = vmul.f32 %v48_v47, %v30_v37  ;;  %vm295_vm5 = vcmp.eq.s32.totalorder %v132_v50, 1  ;;  %v31_v58 = vunpack.c.l.bf16 %v20_v46 }
   0xf   :  { %v97_v59 = vadd.f32 %v81_v48, %v63_v53  ;;  %vm301_vm6 = vcmp.eq.s32.totalorder %v133_v54, 1  ;;  %v32_v61 = vunpack.c.h.bf16 %v20_v46  ;;  %v49_v62 = vperm.slane %v213_v1, 6 }
  0x10   :  { %169 = vst [vmem:[%s406_s4 + $0x8] sm:$0xff] %v161_v55  ;;  %v98_v0 = vadd.f32 %v82_v49, %v64_v56  ;;  %v50_v3 = vperm.slane %v213_v1, 7  ;;  %v83_v4 = vperm.slane %v218_v2, 6  ;;  %v84_v7 = vperm.slane %v218_v2, 7 }
  0x11   :  { %v115_v8 = vmax.f32 %v97_v59, 0.0  ;;  %v65_v11 = vmul.f32 %v49_v62, %v31_v58  ;;  %v134_v12 = vperm.slane %v234_v15, 6  ;;  %v135_v13 = vperm.slane %v234_v15, 7  ;;  %v23_v15 = vld [vmem:[%s402_s0 + $0x30] sm:$0xff] }
  0x12   :  { %v116_v14 = vmax.f32 %v98_v0, 0.0  ;;  %v66_v16 = vmul.f32 %v50_v3, %v32_v61  ;;  %v33_v17 = vunpack.c.l.bf16 %v21_v63  ;;  %v34_v18 = vunpack.c.h.bf16 %v21_v63 }
  0x13   :  { %v148_v22 = vsel %vm295_vm5, %v115_v8, %v97_v59  ;;  %v99_v25 = vadd.f32 %v83_v4, %v65_v11  ;;  %vm324_vm7 = vcmp.eq.s32.totalorder %v134_v12, 1  ;;  %vm328_vm8 = vcmp.eq.s32.totalorder %v135_v13, 1 }
  0x14   :  { %v149_v30 = vsel %vm301_vm6, %v116_v14, %v98_v0  ;;  %v100_v31 = vadd.f32 %v84_v7, %v66_v16  ;;  %v67_v32 = vmul.f32 %v43_v5, %v33_v17  ;;  %v68_v33 = vmul.f32 %v44_v6, %v34_v18 }
  0x15   :  { %v162_v34 = vpack.c.bf16 %v149_v30, %v148_v22  ;;  %v117_v35 = vmax.f32 %v99_v25, 0.0  ;;  %v35_v36 = vunpack.c.l.bf16 %v22_v21  ;;  %v36_v37 = vunpack.c.h.bf16 %v22_v21 }
  0x16   :  { %v118_v38 = vmax.f32 %v100_v31, 0.0  ;;  %v101_v39 = vadd.f32 %v77_v9, %v67_v32  ;;  %v102_v42 = vadd.f32 %v78_v10, %v68_v33  ;;  %v37_v43 = vunpack.c.l.bf16 %v23_v15  ;;  %v24_v9 = vld [vmem:[%s402_s0 + $0x38] sm:$0xff] }
  0x17   :  { %170 = vst [vmem:[%s406_s4 + $0x10] sm:$0xff] %v162_v34  ;;  %v150_v5 = vsel %vm324_vm7, %v117_v35, %v99_v25  ;;  %v69_v6 = vmul.f32 %v45_v19, %v35_v36  ;;  %v70_v44 = vmul.f32 %v46_v20, %v36_v37  ;;  %v38_v46 = vunpack.c.h.bf16 %v23_v15 }
  0x18   :  { %v151_v10 = vsel %vm328_vm8, %v118_v38, %v100_v31  ;;  %v119_v50 = vmax.f32 %v101_v39, 0.0  ;;  %v120_v51 = vmax.f32 %v102_v42, 0.0  ;;  %v71_v52 = vmul.f32 %v47_v45, %v37_v43 }
  0x19   :  { %v163_v53 = vpack.c.bf16 %v151_v10, %v150_v5  ;;  %v103_v54 = vadd.f32 %v79_v23, %v69_v6  ;;  %v104_v19 = vadd.f32 %v80_v24, %v70_v44  ;;  %v72_v1 = vmul.f32 %v48_v47, %v38_v46 }
  0x1a   :  { %v152_v20 = vsel %vm249_vm1, %v119_v50, %v101_v39  ;;  %v153_v55 = vsel %vm253_vm2, %v120_v51, %v102_v42  ;;  %v105_v56 = vadd.f32 %v81_v48, %v71_v52  ;;  %v39_v58 = vunpack.c.l.bf16 %v24_v9 }
  0x1b   :  { %171 = vst [vmem:[%s406_s4 + $0x18] sm:$0xff] %v163_v53  ;;  %v164_v45 = vpack.c.bf16 %v153_v55, %v152_v20  ;;  %v121_v23 = vmax.f32 %v103_v54, 0.0  ;;  %v122_v59 = vmax.f32 %v104_v19, 0.0  ;;  %v106_v24 = vadd.f32 %v82_v49, %v72_v1 }
  0x1c   :  { %v123_v47 = vmax.f32 %v105_v56, 0.0  ;;  %v40_v26 = vunpack.c.h.bf16 %v24_v9  ;;  %v73_v61 = vmul.f32 %v49_v62, %v39_v58 }
  0x1d   :  { %172 = vst [vmem:[%s406_s4 + $0x20] sm:$0xff] %v164_v45  ;;  %v154_v27 = vsel %vm271_vm3, %v121_v23, %v103_v54  ;;  %v155_v48 = vsel %vm275_vm4, %v122_v59, %v104_v19  ;;  %v124_v63 = vmax.f32 %v106_v24, 0.0 }
  0x1e   :  { %v165_v0 = vpack.c.bf16 %v155_v48, %v154_v27  ;;  %v156_v8 = vsel %vm295_vm5, %v123_v47, %v105_v56  ;;  %v74_v11 = vmul.f32 %v50_v3, %v40_v26  ;;  %v107_v49 = vadd.f32 %v83_v4, %v73_v61 }
  0x1f   :  { %v157_v62 = vsel %vm301_vm6, %v124_v63, %v106_v24 }
  0x20   :  { %173 = vst [vmem:[%s406_s4 + $0x28] sm:$0xff] %v165_v0  ;;  %v166_v12 = vpack.c.bf16 %v157_v62, %v156_v8  ;;  %v108_v40 = vadd.f32 %v84_v7, %v74_v11  ;;  %v125_v41 = vmax.f32 %v107_v49, 0.0 }
  0x22   :  { %174 = vst [vmem:[%s406_s4 + $0x30] sm:$0xff] %v166_v12  ;;  %v126_v57 = vmax.f32 %v108_v40, 0.0  ;;  %v158_v3 = vsel %vm324_vm7, %v125_v41, %v107_v49 }
  0x24   :  { %v159_v60 = vsel %vm328_vm8, %v126_v57, %v108_v40 }
  0x25   :  { %v167_v4 = vpack.c.bf16 %v159_v60, %v158_v3 }
  0x27   :  { %175 = vst [vmem:[%s406_s4 + $0x38] sm:$0xff] %v167_v4 }

// kernel: _lambda_.33
= control target key start
LH: loop header
LB: loop body
LE: loop exit
PB: predicated region body
PF: predicated region fallthrough
CT: control target
= control target key end

     0   :  { %s1688_s0 = inlined_call_operand.vmem [shape: bf16[16,2304], index: 0, kind: input, shape index: {}]   ;;  %s1689_s1 = inlined_call_operand.vmem [shape: bf16[2304,1024], index: 1, kind: input, shape index: {}]   ;;  %s1690_s2 = inlined_call_operand.vmem [shape: bf16[16,1024], index: 2, kind: output, shape index: {0}]   ;;  %s1691_s3 = inlined_call_operand.vmem [shape: f32[8,1024], index: 3, kind: output, shape index: {1}]  }
   0x1   :  { %1694 = sst [smem:[#allocation9_spill]] %s1688_s0 }
   0x2   :  { %s1374_s12 = smov 0   ;;  %s1376_s13 = smov 0  }
   0x3   :  { %s1378_s14 = smov 0   ;;  %s1380_s15 = smov 0  }
   0x4   :  { %s1382_s16 = smov 0   ;;  %s1384_s17 = smov 0  }
   0x5   :  { %s1386_s18 = smov 0   ;;  %s1388_s19 = smov 0  }
   0x6   :  { %s1390_s20 = smov 0   ;;  %s1392_s21 = smov 0  }
   0x7   :  { %s1394_s22 = smov 0  }
   0x8 LB: > { %s978_s23 = sadd.s32 4294967295, %s1351_s22   ;;  %s26_s24 = sadd.s32 1, %s1343_s20  ;;  %s1351_s22 = sphi %s1394_s22, %s14_s22   ;;  %s1347_s21 = sphi %s1392_s21, %s1714_s21   ;;  %s1343_s20 = sphi %s1390_s20, %s1713_s20   ;;  %s1339_s19 = sphi %s1388_s19, %s1712_s19   ;;  %s1335_s18 = sphi %s1386_s18, %s1711_s18   ;;  %s1331_s17 = sphi %s1384_s17, %s1710_s17   ;;  %s1327_s16 = sphi %s1382_s16, %s1709_s16   ;;  %s1323_s15 = sphi %s1380_s15, %s1708_s15   ;;  %s1319_s14 = sphi %s1378_s14, %s1707_s14   ;;  %s1315_s13 = sphi %s1376_s13, %s1706_s13   ;;  %s1311_s12 = sphi %s1374_s12, %s1705_s12  }
   0x9   : > { %p27_p0 = scmp.ge.s32.totalorder %s26_s24, 9  ;;  %s29_s25 = sadd.s32 1, %s1347_s21 }
   0xa   : > { %s42_s26 = sadd.s32 1, %s1331_s17  ;;  %p49_p1 = scmp.ne.s32.totalorder %s1331_s17, %s1327_s16 }
   0xb   : > { %s1716_s24 = smov (%p27_p0, %s26_s24), 0  ;;  %s1718_s25 = smov (!%p27_p0, %s29_s25), %s1347_s21 }
   0xc   : > { %1695 = sst [smem:[#allocation6_spill]] %s1716_s24  ;;  %s38_s27 = ssub.s32 %s1343_s20, %s1716_s24 }
   0xd   : > { %p50_p2 = scmp.eq.s32.totalorder %s1351_s22, 0  ;;  %p31_p3 = scmp.ge.s32.totalorder %s1718_s25, 4 }
   0xe   : > { %p40_p4 = scmp.eq.s32.totalorder %s38_s27, 0  ;;  %s70_s29 = sadd.s32 1, %s1323_s15 }
   0xf   : > { %p1441_p5 = por %p50_p2, %p49_p1  ;;  %s1720_s25 = smov (%p31_p3, %s1718_s25), 0 }
  0x10   : > { %1697 = sst [smem:[#allocation7_spill]] %s1720_s25  ;;  %s66_s4 = ssub.s32 %s1347_s21, %s1720_s25 }
  0x11   : > { %s1449_s30 = scalar_select %p40_p4, %s1331_s17, %s42_s26  }
  0x12   : > { %p77_p6 = scmp.ne.s32.totalorder %s1323_s15, %s1319_s14  ;;  %s67_s5 = sor.u32 %s66_s4, %s38_s27 }
  0x13   : > { %1698 = sst [smem:[#allocation8_spill]] %s1449_s30  ;;  %p96_p7 = scmp.eq.s32.totalorder %s66_s4, 0 }
  0x14   : > { %p68_p8 = scmp.eq.s32.totalorder %s67_s5, 0  ;;  %p1455_p9 = por %p77_p6, %p50_p2 }
  0x15   : > { %s98_s7 = sadd.s32 1, %s1315_s13  ;;  %p108_p10 = scmp.ne.s32.totalorder %s1315_s13, %s1311_s12 }
  0x16   : > { %s1463_s8 = scalar_select %p68_p8, %s1323_s15, %s70_s29  }
  0x17   : > { %s1466_s9 = scalar_select %p96_p7, %s1315_s13, %s98_s7  }
  0x18   : > { %p109_p11 = scmp.eq.s32.totalorder %s978_s23, 35  ;;  %p981_p13 = scmp.ge.s32.totalorder %s1351_s22, 36 }
  0x1a   : > { %p1468_p12 = por %p109_p11, %p108_p10  ;;  %159 = sbr.rel (%p981_p13) target bundleno = 82 (0x52), region = 16 }
  0x1f   : > { %162 = sbr.rel (!%p1441_p5) target bundleno = 43 (0x2b), region = 20  ;;  %s164_s11 = sand.u32 (%p1441_p5), 1, %s1331_s17  }
  0x20   : > { %s1139_s26 = sshll.u32 (%p1441_p5), %s1343_s20, 3  ;;  %s982_s27 = sshll.u32 (%p1441_p5), %s164_s11, 4 }
  0x21   : > { %s1701_s0 = sld [smem:[#allocation9_spill]] (%p1441_p5)  ;;  %s166_s23 = scalar_lea.vmem (%p1441_p5), [#allocation3], %s982_s27 }
  0x27   : > { %s172_s5 = scalar_lea.vmem %s1701_s0, %s1139_s26 }
  0x28   : > { %v203_v0 = vld [vmem:[%s172_s5] sm:$0xff]  ;;  %v205_v1 = vld [vmem:[%s172_s5 + $0x48] sm:$0xff] }
  0x29   : > { %204 = vst [vmem:[%s166_s23] sm:$0xff] %v203_v0 }
  0x2a   : > { %206 = vst [vmem:[%s166_s23 + $0x8] sm:$0xff] %v205_v1 }
  0x2b PF: > { %212 = sbr.rel (!%p1455_p9) target bundleno = 82 (0x52), region = 58  ;;  %s214_s28 = sand.u32 (%p1455_p9), 1, %s1323_s15  }
  0x2c   : > { %s987_s7 = sshll.u32 (%p1455_p9), %s1347_s21, 1  ;;  %s985_s25 = sshll.u32 (%p1455_p9), %s214_s28, 8 }
  0x2d   : > { %s1140_s11 = sshll.u32 (%p1455_p9), %s1343_s20, 8  ;;  %s1493_s6 = scalar_lea.vmem (%p1455_p9), [#allocation4], %s985_s25 }
  0x2e   : > { %s220_s24 = sadd.s32 (%p1455_p9), %s1140_s11, %s987_s7 }
  0x2f   : > { %s989_s30 = sshll.u32 (%p1455_p9), %s220_s24, 2 }
  0x30   : > { %s1488_s4 = scalar_lea.vmem %s1689_s1, %s989_s30 }
  0x31   : > { %v313_v2 = vld [vmem:[%s1488_s4] sm:$0xff] }
  0x32   : > { %v315_v3 = vld [vmem:[%s1488_s4 + $0x20] sm:$0xff]  ;;  %314 = vst [vmem:[%s1493_s6] sm:$0xff] %v313_v2 }
  0x33   : > { %v317_v4 = vld [vmem:[%s1488_s4 + $0x40] sm:$0xff]  ;;  %316 = vst [vmem:[%s1493_s6 + $0x8] sm:$0xff] %v315_v3 }
  0x34   : > { %v319_v5 = vld [vmem:[%s1488_s4 + $0x60] sm:$0xff]  ;;  %318 = vst [vmem:[%s1493_s6 + $0x10] sm:$0xff] %v317_v4 }
  0x35   : > { %v321_v6 = vld [vmem:[%s1488_s4 + $0x80] sm:$0xff]  ;;  %320 = vst [vmem:[%s1493_s6 + $0x18] sm:$0xff] %v319_v5 }
  0x36   : > { %v323_v7 = vld [vmem:[%s1488_s4 + $0xa0] sm:$0xff]  ;;  %322 = vst [vmem:[%s1493_s6 + $0x20] sm:$0xff] %v321_v6 }
  0x37   : > { %v325_v8 = vld [vmem:[%s1488_s4 + $0xc0] sm:$0xff]  ;;  %324 = vst [vmem:[%s1493_s6 + $0x28] sm:$0xff] %v323_v7 }
  0x38   : > { %v327_v9 = vld [vmem:[%s1488_s4 + $0xe0] sm:$0xff]  ;;  %326 = vst [vmem:[%s1493_s6 + $0x30] sm:$0xff] %v325_v8 }
  0x39   : > { %v329_v10 = vld [vmem:[%s1488_s4 + $0x100] sm:$0xff]  ;;  %328 = vst [vmem:[%s1493_s6 + $0x38] sm:$0xff] %v327_v9 }
  0x3a   : > { %v331_v11 = vld [vmem:[%s1488_s4 + $0x120] sm:$0xff]  ;;  %330 = vst [vmem:[%s1493_s6 + $0x40] sm:$0xff] %v329_v10 }
  0x3b   : > { %v333_v12 = vld [vmem:[%s1488_s4 + $0x140] sm:$0xff]  ;;  %332 = vst [vmem:[%s1493_s6 + $0x48] sm:$0xff] %v331_v11 }
  0x3c   : > { %v335_v13 = vld [vmem:[%s1488_s4 + $0x160] sm:$0xff]  ;;  %334 = vst [vmem:[%s1493_s6 + $0x50] sm:$0xff] %v333_v12 }
  0x3d   : > { %v337_v14 = vld [vmem:[%s1488_s4 + $0x180] sm:$0xff]  ;;  %336 = vst [vmem:[%s1493_s6 + $0x58] sm:$0xff] %v335_v13 }
  0x3e   : > { %v339_v15 = vld [vmem:[%s1488_s4 + $0x1a0] sm:$0xff]  ;;  %338 = vst [vmem:[%s1493_s6 + $0x60] sm:$0xff] %v337_v14 }
  0x3f   : > { %v341_v16 = vld [vmem:[%s1488_s4 + $0x1c0] sm:$0xff]  ;;  %340 = vst [vmem:[%s1493_s6 + $0x68] sm:$0xff] %v339_v15 }
  0x40   : > { %v343_v17 = vld [vmem:[%s1488_s4 + $0x1e0] sm:$0xff]  ;;  %342 = vst [vmem:[%s1493_s6 + $0x70] sm:$0xff] %v341_v16 }
  0x41   : > { %v345_v18 = vld [vmem:[%s1488_s4 + $0x200] sm:$0xff]  ;;  %344 = vst [vmem:[%s1493_s6 + $0x78] sm:$0xff] %v343_v17 }
  0x42   : > { %v347_v19 = vld [vmem:[%s1488_s4 + $0x220] sm:$0xff]  ;;  %346 = vst [vmem:[%s1493_s6 + $0x80] sm:$0xff] %v345_v18 }
  0x43   : > { %v349_v20 = vld [vmem:[%s1488_s4 + $0x240] sm:$0xff]  ;;  %348 = vst [vmem:[%s1493_s6 + $0x88] sm:$0xff] %v347_v19 }
  0x44   : > { %v351_v21 = vld [vmem:[%s1488_s4 + $0x260] sm:$0xff]  ;;  %350 = vst [vmem:[%s1493_s6 + $0x90] sm:$0xff] %v349_v20 }
  0x45   : > { %v353_v22 = vld [vmem:[%s1488_s4 + $0x280] sm:$0xff]  ;;  %352 = vst [vmem:[%s1493_s6 + $0x98] sm:$0xff] %v351_v21 }
  0x46   : > { %v355_v23 = vld [vmem:[%s1488_s4 + $0x2a0] sm:$0xff]  ;;  %354 = vst [vmem:[%s1493_s6 + $0xa0] sm:$0xff] %v353_v22 }
  0x47   : > { %v357_v24 = vld [vmem:[%s1488_s4 + $0x2c0] sm:$0xff]  ;;  %356 = vst [vmem:[%s1493_s6 + $0xa8] sm:$0xff] %v355_v23 }
  0x48   : > { %v359_v25 = vld [vmem:[%s1488_s4 + $0x2e0] sm:$0xff]  ;;  %358 = vst [vmem:[%s1493_s6 + $0xb0] sm:$0xff] %v357_v24 }
  0x49   : > { %v361_v26 = vld [vmem:[%s1488_s4 + $0x300] sm:$0xff]  ;;  %360 = vst [vmem:[%s1493_s6 + $0xb8] sm:$0xff] %v359_v25 }
  0x4a   : > { %v363_v27 = vld [vmem:[%s1488_s4 + $0x320] sm:$0xff]  ;;  %362 = vst [vmem:[%s1493_s6 + $0xc0] sm:$0xff] %v361_v26 }
  0x4b   : > { %v365_v28 = vld [vmem:[%s1488_s4 + $0x340] sm:$0xff]  ;;  %364 = vst [vmem:[%s1493_s6 + $0xc8] sm:$0xff] %v363_v27 }
  0x4c   : > { %v367_v29 = vld [vmem:[%s1488_s4 + $0x360] sm:$0xff]  ;;  %366 = vst [vmem:[%s1493_s6 + $0xd0] sm:$0xff] %v365_v28 }
  0x4d   : > { %v369_v30 = vld [vmem:[%s1488_s4 + $0x380] sm:$0xff]  ;;  %368 = vst [vmem:[%s1493_s6 + $0xd8] sm:$0xff] %v367_v29 }
  0x4e   : > { %v371_v31 = vld [vmem:[%s1488_s4 + $0x3a0] sm:$0xff]  ;;  %370 = vst [vmem:[%s1493_s6 + $0xe0] sm:$0xff] %v369_v30 }
  0x4f   : > { %v373_v32 = vld [vmem:[%s1488_s4 + $0x3c0] sm:$0xff]  ;;  %372 = vst [vmem:[%s1493_s6 + $0xe8] sm:$0xff] %v371_v31 }
  0x50   : > { %v375_v33 = vld [vmem:[%s1488_s4 + $0x3e0] sm:$0xff]  ;;  %374 = vst [vmem:[%s1493_s6 + $0xf0] sm:$0xff] %v373_v32 }
  0x51   : > { %376 = vst [vmem:[%s1493_s6 + $0xf8] sm:$0xff] %v375_v33 }
  0x52 PF: > { %p990_p0 = scmp.ge.s32.totalorder %s1351_s22, 1  ;;  %p381_p1 = scmp.lt.s32.totalorder %s1351_s22, 37 }
  0x54   : > { %p382_p2 = pnand %p990_p0, %p381_p1 }
  0x55   : > { %s388_s24 = sand.u32 (!%p382_p2), 1, %s1327_s16   ;;  %s395_s25 = sand.u32 (!%p382_p2), 1, %s1319_s14  }
  0x56   : > { %385 = sbr.rel (%p382_p2) target bundleno = 315 (0x13b), region = 96  ;;  %s991_s30 = sshll.u32 (!%p382_p2), %s388_s24, 4 }
  0x57   : > { %s992_s27 = sshll.u32 (!%p382_p2), %s395_s25, 8  ;;  %s416_s5 = sand.u32 (!%p382_p2), 1, %s1311_s12  }
  0x58   : > { %s994_s23 = sshll.u32 (!%p382_p2), %s1339_s19, 1  ;;  %s993_s28 = sshll.u32 (!%p382_p2), %s416_s5, 4 }
  0x59   : > { %p439_p3 = scmp.lt.s32.totalorder (!%p382_p2), %s994_s23, 7  ;;  %s1567_s4 = scalar_lea.vmem (!%p382_p2), [#allocation3], %s991_s30 }
  0x5a   : > { %s1569_s6 = scalar_lea.vmem (!%p382_p2), [#allocation4], %s992_s27  ;;  %s1571_s0 = scalar_lea.vmem (!%p382_p2), [#allocation5], %s993_s28 }
  0x5b   : > { %s1722_s23 = smov (!%p439_p3, %s994_s23), 7  ;;  %p996_p4 = scmp.ne.s32.totalorder %s1335_s18, 0 }
  0x5c   : > { %s995_s7 = sshll.u32 %s1722_s23, 3 }
  0x5d   : > { %s1565_s26 = scalar_lea.vmem %s1691_s3, %s995_s7  ;;  %449 = sbr.rel (%p996_p4) target bundleno = 103 (0x67), region = 108 }
  0x62   : > { %v1353_v34 = vmov 0.0  }
  0x63   : > { %450 = vst [vmem:[#allocation2 + $0x10] sm:$0xff] %v1353_v34 }
  0x64   : > { %451 = vst [vmem:[#allocation2] sm:$0xff] %v1353_v34 }
  0x65   : > { %452 = vst [vmem:[#allocation2 + $0x18] sm:$0xff] %v1353_v34 }
  0x66   : > { %453 = vst [vmem:[#allocation2 + $0x8] sm:$0xff] %v1353_v34 }
  0x67 PF: > { %v1063_v35 = vld [vmem:[%s1569_s6 + $0x70] sm:$0xf]  ;;  %v1158_v36 = vld [vmem:[%s1569_s6 + $0x74] sm:$0xf0]  ;;  %v1157_v40 = vld [vmem:[%s1569_s6 + $0x74] sm:$0xf] }
  0x68   : > { %v1127_v37 = vld [vmem:[%s1569_s6 + $0xf0] sm:$0xf]  ;;  %v1064_v38 = vor.u32 %v1158_v36, %v1063_v35  ;;  %v1174_v39 = vld [vmem:[%s1569_s6 + $0xf4] sm:$0xf0]  ;;  %v1065_v41 = vld [vmem:[%s1569_s6 + $0x78] sm:$0xf0] }
  0x69   : > { %v1128_v42 = vor.u32 %v1174_v39, %v1127_v37  ;;  %v1068_v43 = vor.u32 %v1157_v40, %v1065_v41  ;;  %v1173_v44 = vld [vmem:[%s1569_s6 + $0xf4] sm:$0xf]  ;;  %v1129_v45 = vld [vmem:[%s1569_s6 + $0xf8] sm:$0xf0]  ;;  %v1055_v46 = vld [vmem:[%s1569_s6 + $0x60] sm:$0xf] }
  0x6a   : > { %662 = vmatpush.bf16.msra.mxu0 %v1064_v38  ;;  %v1132_v47 = vor.u32 %v1173_v44, %v1129_v45  ;;  %v1156_v48 = vld [vmem:[%s1569_s6 + $0x64] sm:$0xf0]  ;;  %v1119_v49 = vld [vmem:[%s1569_s6 + $0xe0] sm:$0xf]  ;;  %v1155_v53 = vld [vmem:[%s1569_s6 + $0x64] sm:$0xf] }
  0x6b   : > { %v1172_v50 = vld [vmem:[%s1569_s6 + $0xe4] sm:$0xf0]  ;;  %676 = vmatpush.bf16.msra.mxu1 %v1128_v42  ;;  %690 = vmatpush.bf16.msra.mxu2 %v1068_v43  ;;  %v1056_v51 = vor.u32 %v1156_v48, %v1055_v46  ;;  %v1057_v54 = vld [vmem:[%s1569_s6 + $0x68] sm:$0xf0]  ;;  %v1171_v55 = vld [vmem:[%s1569_s6 + $0xe4] sm:$0xf] }
  0x6c   : > { %v1120_v52 = vor.u32 %v1172_v50, %v1119_v49  ;;  %704 = vmatpush.bf16.msra.mxu3 %v1132_v47  ;;  %v1060_v56 = vor.u32 %v1155_v53, %v1057_v54  ;;  %v1121_v57 = vld [vmem:[%s1569_s6 + $0xe8] sm:$0xf0]  ;;  %v1047_v58 = vld [vmem:[%s1569_s6 + $0x50] sm:$0xf]  ;;  %v1154_v59 = vld [vmem:[%s1569_s6 + $0x54] sm:$0xf0] }
  0x6d   : > { %v1124_v60 = vor.u32 %v1171_v55, %v1121_v57  ;;  %v1111_v61 = vld [vmem:[%s1569_s6 + $0xd0] sm:$0xf]  ;;  %v1170_v62 = vld [vmem:[%s1569_s6 + $0xd4] sm:$0xf0]  ;;  %v1153_v63 = vld [vmem:[%s1569_s6 + $0x54] sm:$0xf]  ;;  %v1048_v0 = vor.u32 %v1154_v59, %v1047_v58 }
  0x6e   : > { %663 = vmatpush.bf16.msra.mxu0 %v1056_v51  ;;  %v1049_v1 = vld [vmem:[%s1569_s6 + $0x58] sm:$0xf0]  ;;  %v1169_v2 = vld [vmem:[%s1569_s6 + $0xd4] sm:$0xf]  ;;  %v1112_v4 = vor.u32 %v1170_v62, %v1111_v61  ;;  %v1039_v6 = vld [vmem:[%s1569_s6 + $0x40] sm:$0xf] }
  0x6f   : > { %v1113_v3 = vld [vmem:[%s1569_s6 + $0xd8] sm:$0xf0]  ;;  %677 = vmatpush.bf16.msra.mxu1 %v1120_v52  ;;  %691 = vmatpush.bf16.msra.mxu2 %v1060_v56  ;;  %v1052_v5 = vor.u32 %v1153_v63, %v1049_v1  ;;  %v1152_v7 = vld [vmem:[%s1569_s6 + $0x44] sm:$0xf0]  ;;  %v1103_v8 = vld [vmem:[%s1569_s6 + $0xc0] sm:$0xf] }
  0x70   : > { %705 = vmatpush.bf16.msra.mxu3 %v1124_v60  ;;  %v1116_v9 = vor.u32 %v1169_v2, %v1113_v3  ;;  %v1168_v10 = vld [vmem:[%s1569_s6 + $0xc4] sm:$0xf0]  ;;  %v1151_v11 = vld [vmem:[%s1569_s6 + $0x44] sm:$0xf]  ;;  %v1041_v12 = vld [vmem:[%s1569_s6 + $0x48] sm:$0xf0]  ;;  %v1040_v15 = vor.u32 %v1152_v7, %v1039_v6 }
  0x71   : > { %v1167_v13 = vld [vmem:[%s1569_s6 + $0xc4] sm:$0xf]  ;;  %v1105_v14 = vld [vmem:[%s1569_s6 + $0xc8] sm:$0xf0]  ;;  %v1104_v16 = vor.u32 %v1168_v10, %v1103_v8  ;;  %v1044_v17 = vor.u32 %v1151_v11, %v1041_v12  ;;  %v1031_v18 = vld [vmem:[%s1569_s6 + $0x30] sm:$0xf] }
  0x72   : > { %664 = vmatpush.bf16.msra.mxu0 %v1048_v0  ;;  %v1150_v19 = vld [vmem:[%s1569_s6 + $0x34] sm:$0xf0]  ;;  %v1095_v20 = vld [vmem:[%s1569_s6 + $0xb0] sm:$0xf]  ;;  %v1108_v21 = vor.u32 %v1167_v13, %v1105_v14  ;;  %v1149_v23 = vld [vmem:[%s1569_s6 + $0x34] sm:$0xf] }
  0x73   : > { %678 = vmatpush.bf16.msra.mxu1 %v1112_v4  ;;  %692 = vmatpush.bf16.msra.mxu2 %v1052_v5  ;;  %v1166_v22 = vld [vmem:[%s1569_s6 + $0xb4] sm:$0xf0]  ;;  %v1033_v24 = vld [vmem:[%s1569_s6 + $0x38] sm:$0xf0]  ;;  %v1165_v25 = vld [vmem:[%s1569_s6 + $0xb4] sm:$0xf]  ;;  %v1032_v27 = vor.u32 %v1150_v19, %v1031_v18 }
  0x74   : > { %706 = vmatpush.bf16.msra.mxu3 %v1116_v9  ;;  %v1097_v26 = vld [vmem:[%s1569_s6 + $0xb8] sm:$0xf0]  ;;  %v1096_v28 = vor.u32 %v1166_v22, %v1095_v20  ;;  %v1036_v29 = vor.u32 %v1149_v23, %v1033_v24  ;;  %v1023_v30 = vld [vmem:[%s1569_s6 + $0x20] sm:$0xf]  ;;  %v1148_v31 = vld [vmem:[%s1569_s6 + $0x24] sm:$0xf0] }
  0x75   : > { %v1087_v32 = vld [vmem:[%s1569_s6 + $0xa0] sm:$0xf]  ;;  %v1100_v33 = vor.u32 %v1165_v25, %v1097_v26  ;;  %v1164_v34 = vld [vmem:[%s1569_s6 + $0xa4] sm:$0xf0]  ;;  %v1147_v35 = vld [vmem:[%s1569_s6 + $0x24] sm:$0xf]  ;;  %v1024_v39 = vor.u32 %v1148_v31, %v1023_v30 }
  0x76   : > { %665 = vmatpush.bf16.msra.mxu0 %v1040_v15  ;;  %v1025_v36 = vld [vmem:[%s1569_s6 + $0x28] sm:$0xf0]  ;;  %v1163_v37 = vld [vmem:[%s1569_s6 + $0xa4] sm:$0xf]  ;;  %v1088_v40 = vor.u32 %v1164_v34, %v1087_v32  ;;  %v1015_v42 = vld [vmem:[%s1569_s6 + $0x10] sm:$0xf] }
  0x77   : > { %679 = vmatpush.bf16.msra.mxu1 %v1104_v16  ;;  %693 = vmatpush.bf16.msra.mxu2 %v1044_v17  ;;  %v1089_v38 = vld [vmem:[%s1569_s6 + $0xa8] sm:$0xf0]  ;;  %v1028_v41 = vor.u32 %v1147_v35, %v1025_v36  ;;  %v1146_v43 = vld [vmem:[%s1569_s6 + $0x14] sm:$0xf0]  ;;  %v1079_v44 = vld [vmem:[%s1569_s6 + $0x90] sm:$0xf] }
  0x78   : > { %707 = vmatpush.bf16.msra.mxu3 %v1108_v21  ;;  %v1092_v45 = vor.u32 %v1163_v37, %v1089_v38  ;;  %v1162_v46 = vld [vmem:[%s1569_s6 + $0x94] sm:$0xf0]  ;;  %v1145_v47 = vld [vmem:[%s1569_s6 + $0x14] sm:$0xf]  ;;  %v1017_v48 = vld [vmem:[%s1569_s6 + $0x18] sm:$0xf0]  ;;  %v1016_v51 = vor.u32 %v1146_v43, %v1015_v42 }
  0x79   : > { %v1161_v49 = vld [vmem:[%s1569_s6 + $0x94] sm:$0xf]  ;;  %v1081_v50 = vld [vmem:[%s1569_s6 + $0x98] sm:$0xf0]  ;;  %v1080_v52 = vor.u32 %v1162_v46, %v1079_v44  ;;  %v1020_v53 = vor.u32 %v1145_v47, %v1017_v48  ;;  %v1007_v54 = vld [vmem:[%s1569_s6] sm:$0xf] }
  0x7a   : > { %666 = vmatpush.bf16.msra.mxu0 %v1032_v27  ;;  %v1144_v55 = vld [vmem:[%s1569_s6 + $0x4] sm:$0xf0]  ;;  %v1071_v56 = vld [vmem:[%s1569_s6 + $0x80] sm:$0xf]  ;;  %v1084_v57 = vor.u32 %v1161_v49, %v1081_v50  ;;  %v1143_v59 = vld [vmem:[%s1569_s6 + $0x4] sm:$0xf] }
  0x7b   : > { %680 = vmatpush.bf16.msra.mxu1 %v1096_v28  ;;  %694 = vmatpush.bf16.msra.mxu2 %v1036_v29  ;;  %v1160_v58 = vld [vmem:[%s1569_s6 + $0x84] sm:$0xf0]  ;;  %v1009_v60 = vld [vmem:[%s1569_s6 + $0x8] sm:$0xf0]  ;;  %v1159_v61 = vld [vmem:[%s1569_s6 + $0x84] sm:$0xf]  ;;  %v1008_v63 = vor.u32 %v1144_v55, %v1007_v54 }
  0x7c   : > { %708 = vmatpush.bf16.msra.mxu3 %v1100_v33  ;;  %v1073_v62 = vld [vmem:[%s1569_s6 + $0x88] sm:$0xf0]  ;;  %v999_v0 = vld [vmem:[%s1567_s4] sm:$0xf]  ;;  %v1142_v1 = vld [vmem:[%s1567_s4 + $0x4] sm:$0xf0]  ;;  %v1072_v2 = vor.u32 %v1160_v58, %v1071_v56  ;;  %v1012_v3 = vor.u32 %v1143_v59, %v1009_v60 }
  0x7d   : > { %v1141_v4 = vld [vmem:[%s1567_s4 + $0x4] sm:$0xf]  ;;  %v1001_v5 = vld [vmem:[%s1567_s4 + $0x8] sm:$0xf0]  ;;  %v1076_v6 = vor.u32 %v1159_v61, %v1073_v62  ;;  %v1000_v7 = vor.u32 %v1142_v1, %v999_v0  ;;  %p1133_p5 = scmp.ne.s32.totalorder %s1335_s18, 8 }
  0x7e   : > { %667 = vmatpush.bf16.msra.mxu0 %v1024_v39  ;;  %v1004_v8 = vor.u32 %v1141_v4, %v1001_v5  ;;  %v454_v10 = vld [vmem:[#allocation2 + $0x10] sm:$0xff]  ;;  %v455_v15 = vld [vmem:[#allocation2] sm:$0xff]  ;;  %v456_v19 = vld [vmem:[#allocation2 + $0x18] sm:$0xff] }
  0x7f   : > { %681 = vmatpush.bf16.msra.mxu1 %v1088_v40  ;;  %695 = vmatpush.bf16.msra.mxu2 %v1028_v41  ;;  %v457_v25 = vld [vmem:[#allocation2 + $0x8] sm:$0xff] }
  0x80   : > { %709 = vmatpush.bf16.msra.mxu3 %v1092_v45 }
  0x82   : > { %668 = vmatpush.bf16.msra.mxu0 %v1016_v51 }
  0x83   : > { %682 = vmatpush.bf16.msra.mxu1 %v1080_v52  ;;  %696 = vmatpush.bf16.msra.mxu2 %v1020_v53 }
  0x84   : > { %710 = vmatpush.bf16.msra.mxu3 %v1084_v57 }
  0x86   : > { %669 = vmatpush.bf16.msra.mxu0 %v1008_v63 }
  0x87   : > { %683 = vmatpush.bf16.msra.mxu1 %v1072_v2  ;;  %697 = vmatpush.bf16.msra.mxu2 %v1012_v3 }
  0x88   : > { %711 = vmatpush.bf16.msra.mxu3 %v1076_v6 }
  0x89   : > { %670 = vmatmul.bf16.vlgmr.msra.gmra.mxu0 %v1000_v7 }
  0x8a   : > { %684 = vmatmul.bf16.vlgmr.msra.gmra.mxu1 %v1004_v8  ;;  %698 = vmatmul.bf16.vlgmr.msra.gmra.mxu2 %v1000_v7 }
  0x8b   : > { %712 = vmatmul.bf16.vlgmr.msra.gmra.mxu3 %v1004_v8 }
 0x106   : > { %v671_v9 = vpop.f32.mrf.mxu0 }
 0x107   : > { %v685_v11 = vpop.f32.mrf.mxu1 }
 0x108   : > { %v686_v12 = vadd.f32 %v685_v11, %v671_v9 }
 0x10a   : > { %v718_v13 = vadd.f32 %v686_v12, %v454_v10 }
 0x10c   : > { %722 = vst [vmem:[#allocation2 + $0x10] sm:$0xff] %v718_v13 }
 0x10d   : > { %v699_v14 = vpop.f32.mrf.mxu2 }
 0x10e   : > { %v713_v16 = vpop.f32.mrf.mxu3  ;;  %v673_v17 = vpop.f32.mrf.mxu0 }
 0x10f   : > { %v714_v18 = vadd.f32 %v713_v16, %v699_v14  ;;  %v687_v20 = vpop.f32.mrf.mxu1 }
 0x110   : > { %v688_v21 = vadd.f32 %v687_v20, %v673_v17 }
 0x111   : > { %v719_v22 = vadd.f32 %v714_v18, %v455_v15 }
 0x112   : > { %v720_v23 = vadd.f32 %v688_v21, %v456_v19 }
 0x113   : > { %723 = vst [vmem:[#allocation2] sm:$0xff] %v719_v22 }
 0x114   : > { %724 = vst [vmem:[#allocation2 + $0x18] sm:$0xff] %v720_v23 }
 0x115   : > { %v701_v24 = vpop.f32.mrf.mxu2 }
 0x116   : > { %v715_v26 = vpop.f32.mrf.mxu3 }
 0x117   : > { %v716_v27 = vadd.f32 %v715_v26, %v701_v24  ;;  %729 = sbr.rel (%p1133_p5) target bundleno = 310 (0x136), region = 112 }
 0x119   : > { %v721_v28 = vadd.f32 %v716_v27, %v457_v25 }
 0x11b   : > { %725 = vst [vmem:[#allocation2 + $0x8] sm:$0xff] %v721_v28 }
 0x11c   : > { %v730_v29 = vld [vmem:[#allocation2 + $0x10] sm:$0xff]  ;;  %v732_v30 = vld [vmem:[#allocation2 + $0x18] sm:$0xff]  ;;  %v731_v31 = vld [vmem:[#allocation2] sm:$0xff]  ;;  %v770_v47 = vlaneseq }
 0x11d   : > { %v738_v32 = vadd.f32 %v732_v30, %v730_v29  ;;  %v752_v33 = vmul.f32 %v730_v29, %v730_v29  ;;  %v754_v34 = vmul.f32 %v732_v30, %v732_v30  ;;  %v734_v35 = vpack.c.bf16 %v731_v31, %v730_v29 }
 0x11e   : > { %v753_v37 = vmul.f32 %v731_v31, %v731_v31  ;;  %v771_v56 = vshrl.u32 %v770_v47, 7 }
 0x11f   : > { %v739_v40 = vrot.slane %v738_v32, 4  ;;  %v756_v41 = vadd.f32 %v754_v34, %v752_v33  ;;  %736 = vst [vmem:[%s1571_s0] sm:$0xff] %v734_v35 }
 0x120   : > { %vm773_vm0 = vcmp.eq.s32.totalorder %v771_v56, 1  ;;  %vm772_vm1 = vcmp.eq.s32.totalorder %v771_v56, 0 }
 0x121   : > { %v740_v44 = vadd.f32 %v739_v40, %v738_v32  ;;  %v757_v45 = vrot.slane %v756_v41, 4 }
 0x122   : > { %v733_v36 = vld [vmem:[#allocation2 + $0x8] sm:$0xff] }
 0x123   : > { %v735_v38 = vpack.c.bf16 %v733_v36, %v732_v30  ;;  %v745_v39 = vadd.f32 %v733_v36, %v731_v31  ;;  %v755_v42 = vmul.f32 %v733_v36, %v733_v36  ;;  %v741_v49 = vrot.slane %v740_v44, 2 }
 0x124   : > { %v758_v50 = vadd.f32 %v757_v45, %v756_v41 }
 0x125   : > { %737 = vst [vmem:[%s1571_s0 + $0x8] sm:$0xff] %v735_v38  ;;  %v746_v43 = vrot.slane %v745_v39, 4  ;;  %v763_v46 = vadd.f32 %v755_v42, %v753_v37  ;;  %v742_v53 = vadd.f32 %v741_v49, %v740_v44 }
 0x126   : > { %v759_v54 = vrot.slane %v758_v50, 2 }
 0x127   : > { %v747_v48 = vadd.f32 %v746_v43, %v745_v39  ;;  %v764_v51 = vrot.slane %v763_v46, 4  ;;  %v743_v58 = vrot.slane %v742_v53, 1 }
 0x128   : > { %v760_v59 = vadd.f32 %v759_v54, %v758_v50 }
 0x129   : > { %v748_v52 = vrot.slane %v747_v48, 2  ;;  %v765_v55 = vadd.f32 %v764_v51, %v763_v46  ;;  %v744_v0 = vadd.f32 %v743_v58, %v742_v53 }
 0x12a   : > { %v761_v62 = vrot.slane %v760_v59, 1 }
 0x12b   : > { %v749_v57 = vadd.f32 %v748_v52, %v747_v48  ;;  %v766_v60 = vrot.slane %v765_v55, 2 }
 0x12c   : > { %v762_v1 = vadd.f32 %v761_v62, %v760_v59 }
 0x12d   : > { %v750_v61 = vrot.slane %v749_v57, 1  ;;  %v767_v63 = vadd.f32 %v766_v60, %v765_v55 }
 0x12e   : > { %v774_v4 = vsel %vm773_vm0, %v762_v1, 0.0 }
 0x12f   : > { %v768_v2 = vrot.slane %v767_v63, 1  ;;  %v751_v3 = vadd.f32 %v750_v61, %v749_v57  ;;  %v776_v6 = vsel %vm772_vm1, %v744_v0, %v774_v4 }
 0x130   : > { %778 = vst [vmem:[%s1565_s26] sm:$0xff] %v776_v6 }
 0x131   : > { %v769_v5 = vadd.f32 %v768_v2, %v767_v63 }
 0x133   : > { %v775_v7 = vsel %vm773_vm0, %v769_v5, 0.0 }
 0x134   : > { %v777_v8 = vsel %vm772_vm1, %v751_v3, %v775_v7 }
 0x135   : > { %779 = vst [vmem:[%s1565_s26 + $0x8] sm:$0xff] %v777_v8 }
 0x136 PF: > { %795 = sbr.rel (!%p1468_p12) target bundleno = 315 (0x13b), region = 116  ;;  %s1175_s12 = sshll.u32 (%p1468_p12), %s1339_s19, 3  ;;  %v832_v9 = vld [vmem:[%s1571_s0] sm:$0xff] (%p1468_p12)  ;;  %v834_v10 = vld [vmem:[%s1571_s0 + $0x8] sm:$0xff] (%p1468_p12) }
 0x137   : > { %s801_s18 = scalar_lea.vmem (%p1468_p12), %s1690_s2, %s1175_s12 }
 0x138   : > { %833 = vst [vmem:[%s801_s18] sm:$0xff] (%p1468_p12), %v832_v9 }
 0x139   : > { %835 = vst [vmem:[%s801_s18 + $0x20] sm:$0xff] (%p1468_p12), %v834_v10 }
 0x13b PF: > { %s14_s22 = sadd.s32 1, %s1351_s22   ;;  %s1702_s10 = sld [smem:[#allocation8_spill]] }
 0x13c   : > { %p11_p6 = scmp.ge.s32.totalorder %s14_s22, 38   ;;  %s1703_s0 = sld [smem:[#allocation6_spill]] }
 0x13d   : > { %s1704_s24 = sld [smem:[#allocation7_spill]]  ;;  %s1705_s12 = smov %s1315_s13 }
 0x13e   : > { %s1706_s13 = smov %s1466_s9  ;;  %s1707_s14 = smov %s1323_s15 }
 0x13f   : > { %s1708_s15 = smov %s1463_s8  ;;  %s1709_s16 = smov %s1331_s17 }
 0x140   : > { %s1711_s18 = smov %s1343_s20  ;;  %s1712_s19 = smov %s1347_s21 }
 0x141   : > { %s1710_s17 = smov %s1702_s10  ;;  %13 = sbr.rel (!%p11_p6) target bundleno = 8 (0x8), region = 205 }
 0x142   : > { %s1713_s20 = smov %s1703_s0 }
 0x143   : > { %s1714_s21 = smov %s1704_s24 }

// kernel: _lambda_.36
= control target key start
LH: loop header
LB: loop body
LE: loop exit
PB: predicated region body
PF: predicated region fallthrough
CT: control target
= control target key end

     0   :  { %s172_s0 = inlined_call_operand.vmem [shape: bf16[16,512], index: 0, kind: input, shape index: {}]   ;;  %s173_s1 = inlined_call_operand.vmem [shape: f32[1,512], index: 1, kind: input, shape index: {}]   ;;  %s174_s2 = inlined_call_operand.vmem [shape: f32[1,512], index: 2, kind: input, shape index: {}]   ;;  %s175_s3 = inlined_call_operand.vmem [shape: bf16[16,512], index: 3, kind: input, shape index: {}]   ;;  %s176_s4 = inlined_call_operand.vmem [shape: bf16[16,512], index: 4, kind: output, shape index: {}]  }
   0x1   :  { %v17_v0 = vld [vmem:[%s172_s0] sm:$0xff]  ;;  %v18_v8 = vld [vmem:[%s172_s0 + $0x8] sm:$0xff]  ;;  %v19_v18 = vld [vmem:[%s172_s0 + $0x10] sm:$0xff] }
   0x2   :  { %v29_v1 = vld [vmem:[%s173_s1] sm:$0xf]  ;;  %v21_v3 = vunpack.c.l.bf16 %v17_v0  ;;  %v22_v4 = vunpack.c.h.bf16 %v17_v0  ;;  %v66_v13 = vld [vmem:[%s175_s3 + $0x8] sm:$0xff]  ;;  %v23_v16 = vunpack.c.l.bf16 %v18_v8  ;;  %v24_v17 = vunpack.c.h.bf16 %v18_v8  ;;  %v67_v23 = vld [vmem:[%s175_s3 + $0x10] sm:$0xff] }
   0x3   :  { %v47_v2 = vld [vmem:[%s174_s2] sm:$0xf]  ;;  %v31_v5 = vperm.slane %v29_v1, 0  ;;  %v32_v6 = vperm.slane %v29_v1, 1  ;;  %v33_v19 = vperm.slane %v29_v1, 2  ;;  %v34_v20 = vperm.slane %v29_v1, 3 }
   0x4   :  { %v65_v7 = vld [vmem:[%s175_s3] sm:$0xff]  ;;  %v49_v9 = vperm.slane %v47_v2, 0  ;;  %v50_v10 = vperm.slane %v47_v2, 1  ;;  %v51_v21 = vperm.slane %v47_v2, 2  ;;  %v52_v22 = vperm.slane %v47_v2, 3  ;;  %v20_v32 = vld [vmem:[%s172_s0 + $0x18] sm:$0xff] }
   0x5   :  { %v69_v11 = vunpack.c.l.bf16 %v65_v7  ;;  %v70_v12 = vunpack.c.h.bf16 %v65_v7  ;;  %v39_v14 = vmul.f32 %v31_v5, %v21_v3  ;;  %v40_v15 = vmul.f32 %v32_v6, %v22_v4  ;;  %v68_v41 = vld [vmem:[%s175_s3 + $0x18] sm:$0xff] }
   0x6   :  { %v71_v26 = vunpack.c.l.bf16 %v66_v13  ;;  %v72_v27 = vunpack.c.h.bf16 %v66_v13  ;;  %v41_v28 = vmul.f32 %v33_v19, %v23_v16  ;;  %v42_v29 = vmul.f32 %v34_v20, %v24_v17 }
   0x7   :  { %v57_v24 = vadd.f32 %v49_v9, %v39_v14  ;;  %v58_v25 = vadd.f32 %v50_v10, %v40_v15  ;;  %v25_v30 = vunpack.c.l.bf16 %v19_v18  ;;  %v26_v31 = vunpack.c.h.bf16 %v19_v18 }
   0x8   :  { %v73_v35 = vunpack.c.l.bf16 %v67_v23  ;;  %v74_v36 = vunpack.c.h.bf16 %v67_v23  ;;  %v59_v37 = vadd.f32 %v51_v21, %v41_v28  ;;  %v60_v38 = vadd.f32 %v52_v22, %v42_v29 }
   0x9   :  { %v77_v33 = vadd.f32 %v69_v11, %v57_v24  ;;  %v78_v34 = vadd.f32 %v70_v12, %v58_v25  ;;  %v43_v39 = vmul.f32 %v31_v5, %v25_v30  ;;  %v44_v40 = vmul.f32 %v32_v6, %v26_v31 }
   0xa   :  { %v27_v44 = vunpack.c.l.bf16 %v20_v32  ;;  %v28_v45 = vunpack.c.h.bf16 %v20_v32  ;;  %v79_v46 = vadd.f32 %v71_v26, %v59_v37  ;;  %v80_v47 = vadd.f32 %v72_v27, %v60_v38 }
   0xb   :  { %v85_v42 = vmax.f32 %v77_v33, 0.0  ;;  %v86_v43 = vmax.f32 %v78_v34, 0.0  ;;  %v61_v48 = vadd.f32 %v49_v9, %v43_v39  ;;  %v62_v49 = vadd.f32 %v50_v10, %v44_v40 }
   0xc   :  { %v45_v51 = vmul.f32 %v33_v19, %v27_v44  ;;  %v46_v52 = vmul.f32 %v34_v20, %v28_v45  ;;  %v75_v53 = vunpack.c.l.bf16 %v68_v41  ;;  %v87_v54 = vmax.f32 %v79_v46, 0.0 }
   0xd   :  { %v93_v50 = vpack.c.bf16 %v86_v43, %v85_v42  ;;  %v88_v55 = vmax.f32 %v80_v47, 0.0  ;;  %v81_v56 = vadd.f32 %v73_v35, %v61_v48  ;;  %v82_v57 = vadd.f32 %v74_v36, %v62_v49 }
   0xe   :  { %v63_v58 = vadd.f32 %v51_v21, %v45_v51  ;;  %v64_v59 = vadd.f32 %v52_v22, %v46_v52  ;;  %v76_v60 = vunpack.c.h.bf16 %v68_v41 }
   0xf   :  { %97 = vst [vmem:[%s176_s4] sm:$0xff] %v93_v50  ;;  %v94_v61 = vpack.c.bf16 %v88_v55, %v87_v54  ;;  %v89_v62 = vmax.f32 %v81_v56, 0.0  ;;  %v90_v63 = vmax.f32 %v82_v57, 0.0 }
  0x10   :  { %v83_v0 = vadd.f32 %v75_v53, %v63_v58  ;;  %v84_v1 = vadd.f32 %v76_v60, %v64_v59 }
  0x11   :  { %98 = vst [vmem:[%s176_s4 + $0x8] sm:$0xff] %v94_v61  ;;  %v95_v2 = vpack.c.bf16 %v90_v63, %v89_v62 }
  0x12   :  { %v91_v3 = vmax.f32 %v83_v0, 0.0  ;;  %v92_v4 = vmax.f32 %v84_v1, 0.0 }
  0x13   :  { %99 = vst [vmem:[%s176_s4 + $0x10] sm:$0xff] %v95_v2 }
  0x14   :  { %v96_v5 = vpack.c.bf16 %v92_v4, %v91_v3 }
  0x16   :  { %100 = vst [vmem:[%s176_s4 + $0x18] sm:$0xff] %v96_v5 }

// kernel: _lambda_.35
= control target key start
LH: loop header
LB: loop body
LE: loop exit
PB: predicated region body
PF: predicated region fallthrough
CT: control target
= control target key end

     0   :  { %s1688_s0 = inlined_call_operand.vmem [shape: bf16[16,4608], index: 0, kind: input, shape index: {}]   ;;  %s1689_s1 = inlined_call_operand.vmem [shape: bf16[4608,512], index: 1, kind: input, shape index: {}]   ;;  %s1690_s2 = inlined_call_operand.vmem [shape: bf16[16,512], index: 2, kind: output, shape index: {0}]   ;;  %s1691_s3 = inlined_call_operand.vmem [shape: f32[8,512], index: 3, kind: output, shape index: {1}]  }
   0x1   :  { %1694 = sst [smem:[#allocation9_spill]] %s1688_s0 }
   0x2   :  { %s1374_s12 = smov 0   ;;  %s1376_s13 = smov 0  }
   0x3   :  { %s1378_s14 = smov 0   ;;  %s1380_s15 = smov 0  }
   0x4   :  { %s1382_s16 = smov 0   ;;  %s1384_s17 = smov 0  }
   0x5   :  { %s1386_s18 = smov 0   ;;  %s1388_s19 = smov 0  }
   0x6   :  { %s1390_s20 = smov 0   ;;  %s1392_s21 = smov 0  }
   0x7   :  { %s1394_s22 = smov 0  }
   0x8 LB: > { %s978_s23 = sadd.s32 4294967295, %s1351_s22   ;;  %s26_s24 = sadd.s32 1, %s1343_s20  ;;  %s1351_s22 = sphi %s1394_s22, %s14_s22   ;;  %s1347_s21 = sphi %s1392_s21, %s1714_s21   ;;  %s1343_s20 = sphi %s1390_s20, %s1713_s20   ;;  %s1339_s19 = sphi %s1388_s19, %s1712_s19   ;;  %s1335_s18 = sphi %s1386_s18, %s1711_s18   ;;  %s1331_s17 = sphi %s1384_s17, %s1710_s17   ;;  %s1327_s16 = sphi %s1382_s16, %s1709_s16   ;;  %s1323_s15 = sphi %s1380_s15, %s1708_s15   ;;  %s1319_s14 = sphi %s1378_s14, %s1707_s14   ;;  %s1315_s13 = sphi %s1376_s13, %s1706_s13   ;;  %s1311_s12 = sphi %s1374_s12, %s1705_s12  }
   0x9   : > { %p27_p0 = scmp.ge.s32.totalorder %s26_s24, 18  ;;  %s29_s25 = sadd.s32 1, %s1347_s21 }
   0xa   : > { %s42_s26 = sadd.s32 1, %s1331_s17  ;;  %p49_p1 = scmp.ne.s32.totalorder %s1331_s17, %s1327_s16 }
   0xb   : > { %s1716_s24 = smov (%p27_p0, %s26_s24), 0  ;;  %s1718_s25 = smov (!%p27_p0, %s29_s25), %s1347_s21 }
   0xc   : > { %1695 = sst [smem:[#allocation6_spill]] %s1716_s24  ;;  %s38_s27 = ssub.s32 %s1343_s20, %s1716_s24 }
   0xd   : > { %p50_p2 = scmp.eq.s32.totalorder %s1351_s22, 0  ;;  %p31_p3 = scmp.ge.s32.totalorder %s1718_s25, 2 }
   0xe   : > { %p40_p4 = scmp.eq.s32.totalorder %s38_s27, 0  ;;  %s70_s29 = sadd.s32 1, %s1323_s15 }
   0xf   : > { %p1441_p5 = por %p50_p2, %p49_p1  ;;  %s1720_s25 = smov (%p31_p3, %s1718_s25), 0 }
  0x10   : > { %1697 = sst [smem:[#allocation7_spill]] %s1720_s25  ;;  %s66_s4 = ssub.s32 %s1347_s21, %s1720_s25 }
  0x11   : > { %s1449_s30 = scalar_select %p40_p4, %s1331_s17, %s42_s26  }
  0x12   : > { %p77_p6 = scmp.ne.s32.totalorder %s1323_s15, %s1319_s14  ;;  %s67_s5 = sor.u32 %s66_s4, %s38_s27 }
  0x13   : > { %1698 = sst [smem:[#allocation8_spill]] %s1449_s30  ;;  %p96_p7 = scmp.eq.s32.totalorder %s66_s4, 0 }
  0x14   : > { %p68_p8 = scmp.eq.s32.totalorder %s67_s5, 0  ;;  %p1455_p9 = por %p77_p6, %p50_p2 }
  0x15   : > { %s98_s7 = sadd.s32 1, %s1315_s13  ;;  %p108_p10 = scmp.ne.s32.totalorder %s1315_s13, %s1311_s12 }
  0x16   : > { %s1463_s8 = scalar_select %p68_p8, %s1323_s15, %s70_s29  }
  0x17   : > { %s1466_s9 = scalar_select %p96_p7, %s1315_s13, %s98_s7  }
  0x18   : > { %p109_p11 = scmp.eq.s32.totalorder %s978_s23, 35  ;;  %p981_p13 = scmp.ge.s32.totalorder %s1351_s22, 36 }
  0x1a   : > { %p1468_p12 = por %p109_p11, %p108_p10  ;;  %159 = sbr.rel (%p981_p13) target bundleno = 82 (0x52), region = 16 }
  0x1f   : > { %162 = sbr.rel (!%p1441_p5) target bundleno = 43 (0x2b), region = 20  ;;  %s164_s11 = sand.u32 (%p1441_p5), 1, %s1331_s17  }
  0x20   : > { %s1139_s26 = sshll.u32 (%p1441_p5), %s1343_s20, 3  ;;  %s982_s27 = sshll.u32 (%p1441_p5), %s164_s11, 4 }
  0x21   : > { %s1701_s0 = sld [smem:[#allocation9_spill]] (%p1441_p5)  ;;  %s166_s23 = scalar_lea.vmem (%p1441_p5), [#allocation3], %s982_s27 }
  0x27   : > { %s172_s5 = scalar_lea.vmem %s1701_s0, %s1139_s26 }
  0x28   : > { %v203_v0 = vld [vmem:[%s172_s5] sm:$0xff]  ;;  %v205_v1 = vld [vmem:[%s172_s5 + $0x90] sm:$0xff] }
  0x29   : > { %204 = vst [vmem:[%s166_s23] sm:$0xff] %v203_v0 }
  0x2a   : > { %206 = vst [vmem:[%s166_s23 + $0x8] sm:$0xff] %v205_v1 }
  0x2b PF: > { %212 = sbr.rel (!%p1455_p9) target bundleno = 82 (0x52), region = 58  ;;  %s214_s28 = sand.u32 (%p1455_p9), 1, %s1323_s15  }
  0x2c   : > { %s987_s7 = sshll.u32 (%p1455_p9), %s1347_s21, 1  ;;  %s985_s25 = sshll.u32 (%p1455_p9), %s214_s28, 8 }
  0x2d   : > { %s1140_s11 = sshll.u32 (%p1455_p9), %s1343_s20, 7  ;;  %s1493_s6 = scalar_lea.vmem (%p1455_p9), [#allocation4], %s985_s25 }
  0x2e   : > { %s220_s24 = sadd.s32 (%p1455_p9), %s1140_s11, %s987_s7 }
  0x2f   : > { %s989_s30 = sshll.u32 (%p1455_p9), %s220_s24, 2 }
  0x30   : > { %s1488_s4 = scalar_lea.vmem %s1689_s1, %s989_s30 }
  0x31   : > { %v313_v2 = vld [vmem:[%s1488_s4] sm:$0xff]  ;;  %v315_v3 = vld [vmem:[%s1488_s4 + $0x10] sm:$0xff] }
  0x32   : > { %v317_v4 = vld [vmem:[%s1488_s4 + $0x20] sm:$0xff]  ;;  %314 = vst [vmem:[%s1493_s6] sm:$0xff] %v313_v2  ;;  %v319_v5 = vld [vmem:[%s1488_s4 + $0x30] sm:$0xff] }
  0x33   : > { %316 = vst [vmem:[%s1493_s6 + $0x8] sm:$0xff] %v315_v3  ;;  %v321_v6 = vld [vmem:[%s1488_s4 + $0x40] sm:$0xff]  ;;  %v323_v7 = vld [vmem:[%s1488_s4 + $0x50] sm:$0xff] }
  0x34   : > { %318 = vst [vmem:[%s1493_s6 + $0x10] sm:$0xff] %v317_v4  ;;  %v325_v8 = vld [vmem:[%s1488_s4 + $0x60] sm:$0xff]  ;;  %v327_v9 = vld [vmem:[%s1488_s4 + $0x70] sm:$0xff] }
  0x35   : > { %320 = vst [vmem:[%s1493_s6 + $0x18] sm:$0xff] %v319_v5  ;;  %v329_v10 = vld [vmem:[%s1488_s4 + $0x80] sm:$0xff]  ;;  %v331_v11 = vld [vmem:[%s1488_s4 + $0x90] sm:$0xff] }
  0x36   : > { %322 = vst [vmem:[%s1493_s6 + $0x20] sm:$0xff] %v321_v6  ;;  %v333_v12 = vld [vmem:[%s1488_s4 + $0xa0] sm:$0xff]  ;;  %v335_v13 = vld [vmem:[%s1488_s4 + $0xb0] sm:$0xff] }
  0x37   : > { %324 = vst [vmem:[%s1493_s6 + $0x28] sm:$0xff] %v323_v7  ;;  %v337_v14 = vld [vmem:[%s1488_s4 + $0xc0] sm:$0xff]  ;;  %v339_v15 = vld [vmem:[%s1488_s4 + $0xd0] sm:$0xff] }
  0x38   : > { %326 = vst [vmem:[%s1493_s6 + $0x30] sm:$0xff] %v325_v8  ;;  %v341_v16 = vld [vmem:[%s1488_s4 + $0xe0] sm:$0xff]  ;;  %v343_v17 = vld [vmem:[%s1488_s4 + $0xf0] sm:$0xff] }
  0x39   : > { %328 = vst [vmem:[%s1493_s6 + $0x38] sm:$0xff] %v327_v9  ;;  %v345_v18 = vld [vmem:[%s1488_s4 + $0x100] sm:$0xff]  ;;  %v347_v19 = vld [vmem:[%s1488_s4 + $0x110] sm:$0xff] }
  0x3a   : > { %330 = vst [vmem:[%s1493_s6 + $0x40] sm:$0xff] %v329_v10  ;;  %v349_v20 = vld [vmem:[%s1488_s4 + $0x120] sm:$0xff]  ;;  %v351_v21 = vld [vmem:[%s1488_s4 + $0x130] sm:$0xff] }
  0x3b   : > { %332 = vst [vmem:[%s1493_s6 + $0x48] sm:$0xff] %v331_v11  ;;  %v353_v22 = vld [vmem:[%s1488_s4 + $0x140] sm:$0xff]  ;;  %v355_v23 = vld [vmem:[%s1488_s4 + $0x150] sm:$0xff] }
  0x3c   : > { %334 = vst [vmem:[%s1493_s6 + $0x50] sm:$0xff] %v333_v12  ;;  %v357_v24 = vld [vmem:[%s1488_s4 + $0x160] sm:$0xff]  ;;  %v359_v25 = vld [vmem:[%s1488_s4 + $0x170] sm:$0xff] }
  0x3d   : > { %336 = vst [vmem:[%s1493_s6 + $0x58] sm:$0xff] %v335_v13  ;;  %v361_v26 = vld [vmem:[%s1488_s4 + $0x180] sm:$0xff]  ;;  %v363_v27 = vld [vmem:[%s1488_s4 + $0x190] sm:$0xff] }
  0x3e   : > { %338 = vst [vmem:[%s1493_s6 + $0x60] sm:$0xff] %v337_v14  ;;  %v365_v28 = vld [vmem:[%s1488_s4 + $0x1a0] sm:$0xff]  ;;  %v367_v29 = vld [vmem:[%s1488_s4 + $0x1b0] sm:$0xff] }
  0x3f   : > { %340 = vst [vmem:[%s1493_s6 + $0x68] sm:$0xff] %v339_v15  ;;  %v369_v30 = vld [vmem:[%s1488_s4 + $0x1c0] sm:$0xff]  ;;  %v371_v31 = vld [vmem:[%s1488_s4 + $0x1d0] sm:$0xff] }
  0x40   : > { %342 = vst [vmem:[%s1493_s6 + $0x70] sm:$0xff] %v341_v16  ;;  %v373_v32 = vld [vmem:[%s1488_s4 + $0x1e0] sm:$0xff]  ;;  %v375_v33 = vld [vmem:[%s1488_s4 + $0x1f0] sm:$0xff] }
  0x41   : > { %344 = vst [vmem:[%s1493_s6 + $0x78] sm:$0xff] %v343_v17 }
  0x42   : > { %346 = vst [vmem:[%s1493_s6 + $0x80] sm:$0xff] %v345_v18 }
  0x43   : > { %348 = vst [vmem:[%s1493_s6 + $0x88] sm:$0xff] %v347_v19 }
  0x44   : > { %350 = vst [vmem:[%s1493_s6 + $0x90] sm:$0xff] %v349_v20 }
  0x45   : > { %352 = vst [vmem:[%s1493_s6 + $0x98] sm:$0xff] %v351_v21 }
  0x46   : > { %354 = vst [vmem:[%s1493_s6 + $0xa0] sm:$0xff] %v353_v22 }
  0x47   : > { %356 = vst [vmem:[%s1493_s6 + $0xa8] sm:$0xff] %v355_v23 }
  0x48   : > { %358 = vst [vmem:[%s1493_s6 + $0xb0] sm:$0xff] %v357_v24 }
  0x49   : > { %360 = vst [vmem:[%s1493_s6 + $0xb8] sm:$0xff] %v359_v25 }
  0x4a   : > { %362 = vst [vmem:[%s1493_s6 + $0xc0] sm:$0xff] %v361_v26 }
  0x4b   : > { %364 = vst [vmem:[%s1493_s6 + $0xc8] sm:$0xff] %v363_v27 }
  0x4c   : > { %366 = vst [vmem:[%s1493_s6 + $0xd0] sm:$0xff] %v365_v28 }
  0x4d   : > { %368 = vst [vmem:[%s1493_s6 + $0xd8] sm:$0xff] %v367_v29 }
  0x4e   : > { %370 = vst [vmem:[%s1493_s6 + $0xe0] sm:$0xff] %v369_v30 }
  0x4f   : > { %372 = vst [vmem:[%s1493_s6 + $0xe8] sm:$0xff] %v371_v31 }
  0x50   : > { %374 = vst [vmem:[%s1493_s6 + $0xf0] sm:$0xff] %v373_v32 }
  0x51   : > { %376 = vst [vmem:[%s1493_s6 + $0xf8] sm:$0xff] %v375_v33 }
  0x52 PF: > { %p990_p0 = scmp.ge.s32.totalorder %s1351_s22, 1  ;;  %p381_p1 = scmp.lt.s32.totalorder %s1351_s22, 37 }
  0x54   : > { %p382_p2 = pnand %p990_p0, %p381_p1 }
  0x55   : > { %s388_s24 = sand.u32 (!%p382_p2), 1, %s1327_s16   ;;  %s395_s25 = sand.u32 (!%p382_p2), 1, %s1319_s14  }
  0x56   : > { %385 = sbr.rel (%p382_p2) target bundleno = 315 (0x13b), region = 96  ;;  %s991_s30 = sshll.u32 (!%p382_p2), %s388_s24, 4 }
  0x57   : > { %s992_s27 = sshll.u32 (!%p382_p2), %s395_s25, 8  ;;  %s416_s5 = sand.u32 (!%p382_p2), 1, %s1311_s12  }
  0x58   : > { %s994_s23 = sshll.u32 (!%p382_p2), %s1339_s19, 1  ;;  %s993_s28 = sshll.u32 (!%p382_p2), %s416_s5, 4 }
  0x59   : > { %p439_p3 = scmp.lt.s32.totalorder (!%p382_p2), %s994_s23, 3  ;;  %s1567_s4 = scalar_lea.vmem (!%p382_p2), [#allocation3], %s991_s30 }
  0x5a   : > { %s1569_s6 = scalar_lea.vmem (!%p382_p2), [#allocation4], %s992_s27  ;;  %s1571_s0 = scalar_lea.vmem (!%p382_p2), [#allocation5], %s993_s28 }
  0x5b   : > { %s1722_s23 = smov (!%p439_p3, %s994_s23), 3  ;;  %p996_p4 = scmp.ne.s32.totalorder %s1335_s18, 0 }
  0x5c   : > { %s995_s7 = sshll.u32 %s1722_s23, 3 }
  0x5d   : > { %s1565_s26 = scalar_lea.vmem %s1691_s3, %s995_s7  ;;  %449 = sbr.rel (%p996_p4) target bundleno = 103 (0x67), region = 108 }
  0x62   : > { %v1353_v34 = vmov 0.0  }
  0x63   : > { %450 = vst [vmem:[#allocation2 + $0x10] sm:$0xff] %v1353_v34 }
  0x64   : > { %451 = vst [vmem:[#allocation2] sm:$0xff] %v1353_v34 }
  0x65   : > { %452 = vst [vmem:[#allocation2 + $0x18] sm:$0xff] %v1353_v34 }
  0x66   : > { %453 = vst [vmem:[#allocation2 + $0x8] sm:$0xff] %v1353_v34 }
  0x67 PF: > { %v1063_v35 = vld [vmem:[%s1569_s6 + $0x70] sm:$0xf]  ;;  %v1158_v36 = vld [vmem:[%s1569_s6 + $0x74] sm:$0xf0]  ;;  %v1157_v40 = vld [vmem:[%s1569_s6 + $0x74] sm:$0xf] }
  0x68   : > { %v1127_v37 = vld [vmem:[%s1569_s6 + $0xf0] sm:$0xf]  ;;  %v1064_v38 = vor.u32 %v1158_v36, %v1063_v35  ;;  %v1174_v39 = vld [vmem:[%s1569_s6 + $0xf4] sm:$0xf0]  ;;  %v1065_v41 = vld [vmem:[%s1569_s6 + $0x78] sm:$0xf0] }
  0x69   : > { %v1128_v42 = vor.u32 %v1174_v39, %v1127_v37  ;;  %v1068_v43 = vor.u32 %v1157_v40, %v1065_v41  ;;  %v1173_v44 = vld [vmem:[%s1569_s6 + $0xf4] sm:$0xf]  ;;  %v1129_v45 = vld [vmem:[%s1569_s6 + $0xf8] sm:$0xf0]  ;;  %v1055_v46 = vld [vmem:[%s1569_s6 + $0x60] sm:$0xf] }
  0x6a   : > { %662 = vmatpush.bf16.msra.mxu0 %v1064_v38  ;;  %v1132_v47 = vor.u32 %v1173_v44, %v1129_v45  ;;  %v1156_v48 = vld [vmem:[%s1569_s6 + $0x64] sm:$0xf0]  ;;  %v1119_v49 = vld [vmem:[%s1569_s6 + $0xe0] sm:$0xf]  ;;  %v1155_v53 = vld [vmem:[%s1569_s6 + $0x64] sm:$0xf] }
  0x6b   : > { %v1172_v50 = vld [vmem:[%s1569_s6 + $0xe4] sm:$0xf0]  ;;  %676 = vmatpush.bf16.msra.mxu1 %v1128_v42  ;;  %690 = vmatpush.bf16.msra.mxu2 %v1068_v43  ;;  %v1056_v51 = vor.u32 %v1156_v48, %v1055_v46  ;;  %v1057_v54 = vld [vmem:[%s1569_s6 + $0x68] sm:$0xf0]  ;;  %v1171_v55 = vld [vmem:[%s1569_s6 + $0xe4] sm:$0xf] }
  0x6c   : > { %v1120_v52 = vor.u32 %v1172_v50, %v1119_v49  ;;  %704 = vmatpush.bf16.msra.mxu3 %v1132_v47  ;;  %v1060_v56 = vor.u32 %v1155_v53, %v1057_v54  ;;  %v1121_v57 = vld [vmem:[%s1569_s6 + $0xe8] sm:$0xf0]  ;;  %v1047_v58 = vld [vmem:[%s1569_s6 + $0x50] sm:$0xf]  ;;  %v1154_v59 = vld [vmem:[%s1569_s6 + $0x54] sm:$0xf0] }
  0x6d   : > { %v1124_v60 = vor.u32 %v1171_v55, %v1121_v57  ;;  %v1111_v61 = vld [vmem:[%s1569_s6 + $0xd0] sm:$0xf]  ;;  %v1170_v62 = vld [vmem:[%s1569_s6 + $0xd4] sm:$0xf0]  ;;  %v1153_v63 = vld [vmem:[%s1569_s6 + $0x54] sm:$0xf]  ;;  %v1048_v0 = vor.u32 %v1154_v59, %v1047_v58 }
  0x6e   : > { %663 = vmatpush.bf16.msra.mxu0 %v1056_v51  ;;  %v1049_v1 = vld [vmem:[%s1569_s6 + $0x58] sm:$0xf0]  ;;  %v1169_v2 = vld [vmem:[%s1569_s6 + $0xd4] sm:$0xf]  ;;  %v1112_v4 = vor.u32 %v1170_v62, %v1111_v61  ;;  %v1039_v6 = vld [vmem:[%s1569_s6 + $0x40] sm:$0xf] }
  0x6f   : > { %v1113_v3 = vld [vmem:[%s1569_s6 + $0xd8] sm:$0xf0]  ;;  %677 = vmatpush.bf16.msra.mxu1 %v1120_v52  ;;  %691 = vmatpush.bf16.msra.mxu2 %v1060_v56  ;;  %v1052_v5 = vor.u32 %v1153_v63, %v1049_v1  ;;  %v1152_v7 = vld [vmem:[%s1569_s6 + $0x44] sm:$0xf0]  ;;  %v1103_v8 = vld [vmem:[%s1569_s6 + $0xc0] sm:$0xf] }
  0x70   : > { %705 = vmatpush.bf16.msra.mxu3 %v1124_v60  ;;  %v1116_v9 = vor.u32 %v1169_v2, %v1113_v3  ;;  %v1168_v10 = vld [vmem:[%s1569_s6 + $0xc4] sm:$0xf0]  ;;  %v1151_v11 = vld [vmem:[%s1569_s6 + $0x44] sm:$0xf]  ;;  %v1041_v12 = vld [vmem:[%s1569_s6 + $0x48] sm:$0xf0]  ;;  %v1040_v15 = vor.u32 %v1152_v7, %v1039_v6 }
  0x71   : > { %v1167_v13 = vld [vmem:[%s1569_s6 + $0xc4] sm:$0xf]  ;;  %v1105_v14 = vld [vmem:[%s1569_s6 + $0xc8] sm:$0xf0]  ;;  %v1104_v16 = vor.u32 %v1168_v10, %v1103_v8  ;;  %v1044_v17 = vor.u32 %v1151_v11, %v1041_v12  ;;  %v1031_v18 = vld [vmem:[%s1569_s6 + $0x30] sm:$0xf] }
  0x72   : > { %664 = vmatpush.bf16.msra.mxu0 %v1048_v0  ;;  %v1150_v19 = vld [vmem:[%s1569_s6 + $0x34] sm:$0xf0]  ;;  %v1095_v20 = vld [vmem:[%s1569_s6 + $0xb0] sm:$0xf]  ;;  %v1108_v21 = vor.u32 %v1167_v13, %v1105_v14  ;;  %v1149_v23 = vld [vmem:[%s1569_s6 + $0x34] sm:$0xf] }
  0x73   : > { %678 = vmatpush.bf16.msra.mxu1 %v1112_v4  ;;  %692 = vmatpush.bf16.msra.mxu2 %v1052_v5  ;;  %v1166_v22 = vld [vmem:[%s1569_s6 + $0xb4] sm:$0xf0]  ;;  %v1033_v24 = vld [vmem:[%s1569_s6 + $0x38] sm:$0xf0]  ;;  %v1165_v25 = vld [vmem:[%s1569_s6 + $0xb4] sm:$0xf]  ;;  %v1032_v27 = vor.u32 %v1150_v19, %v1031_v18 }
  0x74   : > { %706 = vmatpush.bf16.msra.mxu3 %v1116_v9  ;;  %v1097_v26 = vld [vmem:[%s1569_s6 + $0xb8] sm:$0xf0]  ;;  %v1096_v28 = vor.u32 %v1166_v22, %v1095_v20  ;;  %v1036_v29 = vor.u32 %v1149_v23, %v1033_v24  ;;  %v1023_v30 = vld [vmem:[%s1569_s6 + $0x20] sm:$0xf]  ;;  %v1148_v31 = vld [vmem:[%s1569_s6 + $0x24] sm:$0xf0] }
  0x75   : > { %v1087_v32 = vld [vmem:[%s1569_s6 + $0xa0] sm:$0xf]  ;;  %v1100_v33 = vor.u32 %v1165_v25, %v1097_v26  ;;  %v1164_v34 = vld [vmem:[%s1569_s6 + $0xa4] sm:$0xf0]  ;;  %v1147_v35 = vld [vmem:[%s1569_s6 + $0x24] sm:$0xf]  ;;  %v1024_v39 = vor.u32 %v1148_v31, %v1023_v30 }
  0x76   : > { %665 = vmatpush.bf16.msra.mxu0 %v1040_v15  ;;  %v1025_v36 = vld [vmem:[%s1569_s6 + $0x28] sm:$0xf0]  ;;  %v1163_v37 = vld [vmem:[%s1569_s6 + $0xa4] sm:$0xf]  ;;  %v1088_v40 = vor.u32 %v1164_v34, %v1087_v32  ;;  %v1015_v42 = vld [vmem:[%s1569_s6 + $0x10] sm:$0xf] }
  0x77   : > { %679 = vmatpush.bf16.msra.mxu1 %v1104_v16  ;;  %693 = vmatpush.bf16.msra.mxu2 %v1044_v17  ;;  %v1089_v38 = vld [vmem:[%s1569_s6 + $0xa8] sm:$0xf0]  ;;  %v1028_v41 = vor.u32 %v1147_v35, %v1025_v36  ;;  %v1146_v43 = vld [vmem:[%s1569_s6 + $0x14] sm:$0xf0]  ;;  %v1079_v44 = vld [vmem:[%s1569_s6 + $0x90] sm:$0xf] }
  0x78   : > { %707 = vmatpush.bf16.msra.mxu3 %v1108_v21  ;;  %v1092_v45 = vor.u32 %v1163_v37, %v1089_v38  ;;  %v1162_v46 = vld [vmem:[%s1569_s6 + $0x94] sm:$0xf0]  ;;  %v1145_v47 = vld [vmem:[%s1569_s6 + $0x14] sm:$0xf]  ;;  %v1017_v48 = vld [vmem:[%s1569_s6 + $0x18] sm:$0xf0]  ;;  %v1016_v51 = vor.u32 %v1146_v43, %v1015_v42 }
  0x79   : > { %v1161_v49 = vld [vmem:[%s1569_s6 + $0x94] sm:$0xf]  ;;  %v1081_v50 = vld [vmem:[%s1569_s6 + $0x98] sm:$0xf0]  ;;  %v1080_v52 = vor.u32 %v1162_v46, %v1079_v44  ;;  %v1020_v53 = vor.u32 %v1145_v47, %v1017_v48  ;;  %v1007_v54 = vld [vmem:[%s1569_s6] sm:$0xf] }
  0x7a   : > { %666 = vmatpush.bf16.msra.mxu0 %v1032_v27  ;;  %v1144_v55 = vld [vmem:[%s1569_s6 + $0x4] sm:$0xf0]  ;;  %v1071_v56 = vld [vmem:[%s1569_s6 + $0x80] sm:$0xf]  ;;  %v1084_v57 = vor.u32 %v1161_v49, %v1081_v50  ;;  %v1143_v59 = vld [vmem:[%s1569_s6 + $0x4] sm:$0xf] }
  0x7b   : > { %680 = vmatpush.bf16.msra.mxu1 %v1096_v28  ;;  %694 = vmatpush.bf16.msra.mxu2 %v1036_v29  ;;  %v1160_v58 = vld [vmem:[%s1569_s6 + $0x84] sm:$0xf0]  ;;  %v1009_v60 = vld [vmem:[%s1569_s6 + $0x8] sm:$0xf0]  ;;  %v1159_v61 = vld [vmem:[%s1569_s6 + $0x84] sm:$0xf]  ;;  %v1008_v63 = vor.u32 %v1144_v55, %v1007_v54 }
  0x7c   : > { %708 = vmatpush.bf16.msra.mxu3 %v1100_v33  ;;  %v1073_v62 = vld [vmem:[%s1569_s6 + $0x88] sm:$0xf0]  ;;  %v999_v0 = vld [vmem:[%s1567_s4] sm:$0xf]  ;;  %v1142_v1 = vld [vmem:[%s1567_s4 + $0x4] sm:$0xf0]  ;;  %v1072_v2 = vor.u32 %v1160_v58, %v1071_v56  ;;  %v1012_v3 = vor.u32 %v1143_v59, %v1009_v60 }
  0x7d   : > { %v1141_v4 = vld [vmem:[%s1567_s4 + $0x4] sm:$0xf]  ;;  %v1001_v5 = vld [vmem:[%s1567_s4 + $0x8] sm:$0xf0]  ;;  %v1076_v6 = vor.u32 %v1159_v61, %v1073_v62  ;;  %v1000_v7 = vor.u32 %v1142_v1, %v999_v0  ;;  %p1133_p5 = scmp.ne.s32.totalorder %s1335_s18, 17 }
  0x7e   : > { %667 = vmatpush.bf16.msra.mxu0 %v1024_v39  ;;  %v1004_v8 = vor.u32 %v1141_v4, %v1001_v5  ;;  %v454_v10 = vld [vmem:[#allocation2 + $0x10] sm:$0xff]  ;;  %v455_v15 = vld [vmem:[#allocation2] sm:$0xff]  ;;  %v456_v19 = vld [vmem:[#allocation2 + $0x18] sm:$0xff] }
  0x7f   : > { %681 = vmatpush.bf16.msra.mxu1 %v1088_v40  ;;  %695 = vmatpush.bf16.msra.mxu2 %v1028_v41  ;;  %v457_v25 = vld [vmem:[#allocation2 + $0x8] sm:$0xff] }
  0x80   : > { %709 = vmatpush.bf16.msra.mxu3 %v1092_v45 }
  0x82   : > { %668 = vmatpush.bf16.msra.mxu0 %v1016_v51 }
  0x83   : > { %682 = vmatpush.bf16.msra.mxu1 %v1080_v52  ;;  %696 = vmatpush.bf16.msra.mxu2 %v1020_v53 }
  0x84   : > { %710 = vmatpush.bf16.msra.mxu3 %v1084_v57 }
  0x86   : > { %669 = vmatpush.bf16.msra.mxu0 %v1008_v63 }
  0x87   : > { %683 = vmatpush.bf16.msra.mxu1 %v1072_v2  ;;  %697 = vmatpush.bf16.msra.mxu2 %v1012_v3 }
  0x88   : > { %711 = vmatpush.bf16.msra.mxu3 %v1076_v6 }
  0x89   : > { %670 = vmatmul.bf16.vlgmr.msra.gmra.mxu0 %v1000_v7 }
  0x8a   : > { %684 = vmatmul.bf16.vlgmr.msra.gmra.mxu1 %v1004_v8  ;;  %698 = vmatmul.bf16.vlgmr.msra.gmra.mxu2 %v1000_v7 }
  0x8b   : > { %712 = vmatmul.bf16.vlgmr.msra.gmra.mxu3 %v1004_v8 }
 0x106   : > { %v671_v9 = vpop.f32.mrf.mxu0 }
 0x107   : > { %v685_v11 = vpop.f32.mrf.mxu1 }
 0x108   : > { %v686_v12 = vadd.f32 %v685_v11, %v671_v9 }
 0x10a   : > { %v718_v13 = vadd.f32 %v686_v12, %v454_v10 }
 0x10c   : > { %722 = vst [vmem:[#allocation2 + $0x10] sm:$0xff] %v718_v13 }
 0x10d   : > { %v699_v14 = vpop.f32.mrf.mxu2 }
 0x10e   : > { %v713_v16 = vpop.f32.mrf.mxu3  ;;  %v673_v17 = vpop.f32.mrf.mxu0 }
 0x10f   : > { %v714_v18 = vadd.f32 %v713_v16, %v699_v14  ;;  %v687_v20 = vpop.f32.mrf.mxu1 }
 0x110   : > { %v688_v21 = vadd.f32 %v687_v20, %v673_v17 }
 0x111   : > { %v719_v22 = vadd.f32 %v714_v18, %v455_v15 }
 0x112   : > { %v720_v23 = vadd.f32 %v688_v21, %v456_v19 }
 0x113   : > { %723 = vst [vmem:[#allocation2] sm:$0xff] %v719_v22 }
 0x114   : > { %724 = vst [vmem:[#allocation2 + $0x18] sm:$0xff] %v720_v23 }
 0x115   : > { %v701_v24 = vpop.f32.mrf.mxu2 }
 0x116   : > { %v715_v26 = vpop.f32.mrf.mxu3 }
 0x117   : > { %v716_v27 = vadd.f32 %v715_v26, %v701_v24  ;;  %729 = sbr.rel (%p1133_p5) target bundleno = 310 (0x136), region = 112 }
 0x119   : > { %v721_v28 = vadd.f32 %v716_v27, %v457_v25 }
 0x11b   : > { %725 = vst [vmem:[#allocation2 + $0x8] sm:$0xff] %v721_v28 }
 0x11c   : > { %v730_v29 = vld [vmem:[#allocation2 + $0x10] sm:$0xff]  ;;  %v732_v30 = vld [vmem:[#allocation2 + $0x18] sm:$0xff]  ;;  %v731_v31 = vld [vmem:[#allocation2] sm:$0xff]  ;;  %v770_v47 = vlaneseq }
 0x11d   : > { %v738_v32 = vadd.f32 %v732_v30, %v730_v29  ;;  %v752_v33 = vmul.f32 %v730_v29, %v730_v29  ;;  %v754_v34 = vmul.f32 %v732_v30, %v732_v30  ;;  %v734_v35 = vpack.c.bf16 %v731_v31, %v730_v29 }
 0x11e   : > { %v753_v37 = vmul.f32 %v731_v31, %v731_v31  ;;  %v771_v56 = vshrl.u32 %v770_v47, 7 }
 0x11f   : > { %v739_v40 = vrot.slane %v738_v32, 4  ;;  %v756_v41 = vadd.f32 %v754_v34, %v752_v33  ;;  %736 = vst [vmem:[%s1571_s0] sm:$0xff] %v734_v35 }
 0x120   : > { %vm773_vm0 = vcmp.eq.s32.totalorder %v771_v56, 1  ;;  %vm772_vm1 = vcmp.eq.s32.totalorder %v771_v56, 0 }
 0x121   : > { %v740_v44 = vadd.f32 %v739_v40, %v738_v32  ;;  %v757_v45 = vrot.slane %v756_v41, 4 }
 0x122   : > { %v733_v36 = vld [vmem:[#allocation2 + $0x8] sm:$0xff] }
 0x123   : > { %v735_v38 = vpack.c.bf16 %v733_v36, %v732_v30  ;;  %v745_v39 = vadd.f32 %v733_v36, %v731_v31  ;;  %v755_v42 = vmul.f32 %v733_v36, %v733_v36  ;;  %v741_v49 = vrot.slane %v740_v44, 2 }
 0x124   : > { %v758_v50 = vadd.f32 %v757_v45, %v756_v41 }
 0x125   : > { %737 = vst [vmem:[%s1571_s0 + $0x8] sm:$0xff] %v735_v38  ;;  %v746_v43 = vrot.slane %v745_v39, 4  ;;  %v763_v46 = vadd.f32 %v755_v42, %v753_v37  ;;  %v742_v53 = vadd.f32 %v741_v49, %v740_v44 }
 0x126   : > { %v759_v54 = vrot.slane %v758_v50, 2 }
 0x127   : > { %v747_v48 = vadd.f32 %v746_v43, %v745_v39  ;;  %v764_v51 = vrot.slane %v763_v46, 4  ;;  %v743_v58 = vrot.slane %v742_v53, 1 }
 0x128   : > { %v760_v59 = vadd.f32 %v759_v54, %v758_v50 }
 0x129   : > { %v748_v52 = vrot.slane %v747_v48, 2  ;;  %v765_v55 = vadd.f32 %v764_v51, %v763_v46  ;;  %v744_v0 = vadd.f32 %v743_v58, %v742_v53 }
 0x12a   : > { %v761_v62 = vrot.slane %v760_v59, 1 }
 0x12b   : > { %v749_v57 = vadd.f32 %v748_v52, %v747_v48  ;;  %v766_v60 = vrot.slane %v765_v55, 2 }
 0x12c   : > { %v762_v1 = vadd.f32 %v761_v62, %v760_v59 }
 0x12d   : > { %v750_v61 = vrot.slane %v749_v57, 1  ;;  %v767_v63 = vadd.f32 %v766_v60, %v765_v55 }
 0x12e   : > { %v774_v4 = vsel %vm773_vm0, %v762_v1, 0.0 }
 0x12f   : > { %v768_v2 = vrot.slane %v767_v63, 1  ;;  %v751_v3 = vadd.f32 %v750_v61, %v749_v57  ;;  %v776_v6 = vsel %vm772_vm1, %v744_v0, %v774_v4 }
 0x130   : > { %778 = vst [vmem:[%s1565_s26] sm:$0xff] %v776_v6 }
 0x131   : > { %v769_v5 = vadd.f32 %v768_v2, %v767_v63 }
 0x133   : > { %v775_v7 = vsel %vm773_vm0, %v769_v5, 0.0 }
 0x134   : > { %v777_v8 = vsel %vm772_vm1, %v751_v3, %v775_v7 }
 0x135   : > { %779 = vst [vmem:[%s1565_s26 + $0x8] sm:$0xff] %v777_v8 }
 0x136 PF: > { %795 = sbr.rel (!%p1468_p12) target bundleno = 315 (0x13b), region = 116  ;;  %s1175_s12 = sshll.u32 (%p1468_p12), %s1339_s19, 3  ;;  %v832_v9 = vld [vmem:[%s1571_s0] sm:$0xff] (%p1468_p12)  ;;  %v834_v10 = vld [vmem:[%s1571_s0 + $0x8] sm:$0xff] (%p1468_p12) }
 0x137   : > { %s801_s18 = scalar_lea.vmem (%p1468_p12), %s1690_s2, %s1175_s12 }
 0x138   : > { %833 = vst [vmem:[%s801_s18] sm:$0xff] (%p1468_p12), %v832_v9 }
 0x139   : > { %835 = vst [vmem:[%s801_s18 + $0x10] sm:$0xff] (%p1468_p12), %v834_v10 }
 0x13b PF: > { %s14_s22 = sadd.s32 1, %s1351_s22   ;;  %s1702_s10 = sld [smem:[#allocation8_spill]] }
 0x13c   : > { %p11_p6 = scmp.ge.s32.totalorder %s14_s22, 38   ;;  %s1703_s0 = sld [smem:[#allocation6_spill]] }
 0x13d   : > { %s1704_s24 = sld [smem:[#allocation7_spill]]  ;;  %s1705_s12 = smov %s1315_s13 }
 0x13e   : > { %s1706_s13 = smov %s1466_s9  ;;  %s1707_s14 = smov %s1323_s15 }
 0x13f   : > { %s1708_s15 = smov %s1463_s8  ;;  %s1709_s16 = smov %s1331_s17 }
 0x140   : > { %s1711_s18 = smov %s1343_s20  ;;  %s1712_s19 = smov %s1347_s21 }
 0x141   : > { %s1710_s17 = smov %s1702_s10  ;;  %13 = sbr.rel (!%p11_p6) target bundleno = 8 (0x8), region = 205 }
 0x142   : > { %s1713_s20 = smov %s1703_s0 }
 0x143   : > { %s1714_s21 = smov %s1704_s24 }

// kernel: _lambda_.37
= control target key start
LH: loop header
LB: loop body
LE: loop exit
PB: predicated region body
PF: predicated region fallthrough
CT: control target
= control target key end

     0   :  { %vm143_vm0 = vcmask 1043456   ;;  %vm564_vm1 = vcmask 1041409   ;;  %vm566_vm2 = vcmask 1042434   ;;  %vm568_vm3 = vcmask 1043459   ;;  %s1450_s1 = inlined_call_operand.vmem [shape: bf16[512,128], index: 1, kind: input, shape index: {}]   ;;  %s1451_s0 = inlined_call_operand.vmem [shape: bf16[8,4,512], index: 0, kind: input, shape index: {}]   ;;  %s1452_s2 = inlined_call_operand.vmem [shape: f32[1,128], index: 2, kind: input, shape index: {}]   ;;  %s1453_s3 = inlined_call_operand.vmem [shape: bf16[128,128], index: 3, kind: input, shape index: {}]   ;;  %s1454_s4 = inlined_call_operand.vmem [shape: f32[1,128], index: 4, kind: input, shape index: {}]   ;;  %s1455_s5 = inlined_call_operand.vmem [shape: f32[8,128], index: 5, kind: output, shape index: {}]  }
   0x1   :  { %v1105_v0 = vld [vmem:[%s1450_s1 + $0x38] sm:$0xff]  ;;  %v1104_v4 = vld [vmem:[%s1450_s1 + $0x30] sm:$0xff]  ;;  %v1103_v8 = vld [vmem:[%s1450_s1 + $0x28] sm:$0xff]  ;;  %vm570_vm4 = vcmask 1044484   ;;  %vm572_vm5 = vcmask 1045509   ;;  %vm574_vm6 = vcmask 1046534  }
   0x2   :  { %v1113_v1 = vld [vmem:[%s1450_s1 + $0x78] sm:$0xff]  ;;  %799 = vmatpush.bf16.msra.mxu0 %v1105_v0  ;;  %v1112_v5 = vld [vmem:[%s1450_s1 + $0x70] sm:$0xff]  ;;  %v1111_v9 = vld [vmem:[%s1450_s1 + $0x68] sm:$0xff]  ;;  %vm576_vm7 = vcmask 1047559  }
   0x3   :  { %v1121_v2 = vld [vmem:[%s1450_s1 + $0xb8] sm:$0xff]  ;;  %812 = vmatpush.bf16.msra.mxu1 %v1113_v1  ;;  %v1120_v6 = vld [vmem:[%s1450_s1 + $0xb0] sm:$0xff]  ;;  %v1119_v10 = vld [vmem:[%s1450_s1 + $0xa8] sm:$0xff] }
   0x4   :  { %v1129_v3 = vld [vmem:[%s1450_s1 + $0xf8] sm:$0xff]  ;;  %825 = vmatpush.bf16.msra.mxu2 %v1121_v2  ;;  %v1128_v7 = vld [vmem:[%s1450_s1 + $0xf0] sm:$0xff]  ;;  %v1127_v11 = vld [vmem:[%s1450_s1 + $0xe8] sm:$0xff] }
   0x5   :  { %838 = vmatpush.bf16.msra.mxu3 %v1129_v3  ;;  %v1102_v12 = vld [vmem:[%s1450_s1 + $0x20] sm:$0xff]  ;;  %v21_v17 = vld [vmem:[%s1451_s0 + $0x8] sm:$0xff]  ;;  %v1101_v22 = vld [vmem:[%s1450_s1 + $0x18] sm:$0xff] }
   0x6   :  { %800 = vmatpush.bf16.msra.mxu0 %v1104_v4  ;;  %v1110_v13 = vld [vmem:[%s1450_s1 + $0x60] sm:$0xff]  ;;  %v30_v20 = vunpack.c.l.bf16 %v21_v17  ;;  %v31_v21 = vunpack.c.h.bf16 %v21_v17  ;;  %v1109_v23 = vld [vmem:[%s1450_s1 + $0x58] sm:$0xff]  ;;  %v22_v26 = vld [vmem:[%s1451_s0 + $0x10] sm:$0xff] }
   0x7   :  { %813 = vmatpush.bf16.msra.mxu1 %v1112_v5  ;;  %v20_v14 = vld [vmem:[%s1451_s0] sm:$0xff]  ;;  %v1117_v24 = vld [vmem:[%s1450_s1 + $0x98] sm:$0xff]  ;;  %v1100_v28 = vld [vmem:[%s1450_s1 + $0x10] sm:$0xff]  ;;  %v32_v30 = vunpack.c.l.bf16 %v22_v26  ;;  %v33_v42 = vunpack.c.h.bf16 %v22_v26 }
   0x8   :  { %826 = vmatpush.bf16.msra.mxu2 %v1120_v6  ;;  %v1118_v15 = vld [vmem:[%s1450_s1 + $0xa0] sm:$0xff]  ;;  %v28_v18 = vunpack.c.l.bf16 %v20_v14  ;;  %v29_v19 = vunpack.c.h.bf16 %v20_v14  ;;  %68 = vst [vmem:[#allocation1 + $0x20] ss:$2 sm:$0xff] %v30_v20  ;;  %v1125_v25 = vld [vmem:[%s1450_s1 + $0xd8] sm:$0xff]  ;;  %v1108_v29 = vld [vmem:[%s1450_s1 + $0x50] sm:$0xff] }
   0x9   :  { %839 = vmatpush.bf16.msra.mxu3 %v1128_v7  ;;  %v1126_v16 = vld [vmem:[%s1450_s1 + $0xe0] sm:$0xff]  ;;  %v23_v27 = vld [vmem:[%s1451_s0 + $0x18] sm:$0xff]  ;;  %70 = vst [vmem:[#allocation1 + $0x30] ss:$2 sm:$0xff] %v31_v21  ;;  %v1116_v31 = vld [vmem:[%s1450_s1 + $0x90] sm:$0xff] }
   0xa   :  { %801 = vmatpush.bf16.msra.mxu0 %v1103_v8  ;;  %60 = vst [vmem:[#allocation1] ss:$2 sm:$0xff] %v28_v18  ;;  %v1124_v32 = vld [vmem:[%s1450_s1 + $0xd0] sm:$0xff]  ;;  %v34_v33 = vunpack.c.l.bf16 %v23_v27  ;;  %v1099_v34 = vld [vmem:[%s1450_s1 + $0x8] sm:$0xff]  ;;  %v35_v43 = vunpack.c.h.bf16 %v23_v27  ;;  %v1269_v44 = vld [vmem:[%s1451_s0 + $0x20] sm:$0xff] }
   0xb   :  { %814 = vmatpush.bf16.msra.mxu1 %v1111_v9  ;;  %62 = vst [vmem:[#allocation1 + $0x10] ss:$2 sm:$0xff] %v29_v19  ;;  %v1107_v35 = vld [vmem:[%s1450_s1 + $0x48] sm:$0xff]  ;;  %v1098_v62 = vld [vmem:[%s1450_s1] sm:$0xff]  ;;  %v36_v2 = vunpack.c.l.bf16 %v1269_v44  ;;  %v1302_v6 = vld [vmem:[%s1451_s0 + $0x30] sm:$0xff]  ;;  %v37_v18 = vunpack.c.h.bf16 %v1269_v44 }
   0xc   :  { %827 = vmatpush.bf16.msra.mxu2 %v1119_v10  ;;  %v1115_v38 = vld [vmem:[%s1450_s1 + $0x88] sm:$0xff]  ;;  %v1106_v63 = vld [vmem:[%s1450_s1 + $0x40] sm:$0xff]  ;;  %v1307_v7 = vld [vmem:[%s1451_s0 + $0x38] sm:$0xff]  ;;  %v40_v26 = vunpack.c.l.bf16 %v1302_v6 }
   0xd   :  { %840 = vmatpush.bf16.msra.mxu3 %v1127_v11  ;;  %v1123_v39 = vld [vmem:[%s1450_s1 + $0xc8] sm:$0xff]  ;;  %v1114_v0 = vld [vmem:[%s1450_s1 + $0x80] sm:$0xff]  ;;  %v42_v27 = vunpack.c.l.bf16 %v1307_v7 }
   0xe   :  { %802 = vmatpush.bf16.msra.mxu0 %v1102_v12  ;;  %v1278_v49 = vld [vmem:[%s1451_s0 + $0x28] sm:$0xff]  ;;  %v1122_v1 = vld [vmem:[%s1450_s1 + $0xc0] sm:$0xff] }
   0xf   :  { %815 = vmatpush.bf16.msra.mxu1 %v1110_v13  ;;  %v71_v40 = vld.sshfl [vmem:[#allocation1 + $0x20] sm:$0xff pattern:$0x75316420]  ;;  %v72_v41 = vld.sshfl [vmem:[#allocation1 + $0x28] sm:$0xff pattern:$0x75316420]  ;;  %v38_v8 = vunpack.c.l.bf16 %v1278_v49 }
  0x10   :  { %828 = vmatpush.bf16.msra.mxu2 %v1118_v15  ;;  %v172_v46 = vsel %vm143_vm0, %v71_v40, 0.0  ;;  %v179_v48 = vsel %vm143_vm0, %v72_v41, 0.0  ;;  %81 = vst [vmem:[#allocation1 + $0x20] ss:$2 sm:$0xff] %v34_v33  ;;  %v39_v33 = vunpack.c.h.bf16 %v1278_v49 }
  0x11   :  { %841 = vmatpush.bf16.msra.mxu3 %v1126_v16  ;;  %v63_v36 = vld.sshfl [vmem:[#allocation1] sm:$0xff pattern:$0x75316420]  ;;  %v64_v37 = vld.sshfl [vmem:[#allocation1 + $0x8] sm:$0xff pattern:$0x75316420] }
  0x12   :  { %803 = vmatpush.bf16.msra.mxu0 %v1101_v22  ;;  %75 = vst [vmem:[#allocation1] ss:$2 sm:$0xff] %v32_v30  ;;  %v144_v45 = vsel %vm143_vm0, %v63_v36, 0.0  ;;  %v151_v47 = vsel %vm143_vm0, %v64_v37, 0.0  ;;  %v173_v51 = vrot.slane %v172_v46, 4  ;;  %v180_v53 = vrot.slane %v179_v48, 4 }
  0x13   :  { %816 = vmatpush.bf16.msra.mxu1 %v1109_v23  ;;  %v145_v50 = vrot.slane %v144_v45, 4  ;;  %v152_v52 = vrot.slane %v151_v47, 4  ;;  %v65_v54 = vld.sshfl [vmem:[#allocation1 + $0x10] sm:$0xff pattern:$0x75316420] }
  0x14   :  { %829 = vmatpush.bf16.msra.mxu2 %v1117_v24  ;;  %v1280_v55 = vld.sshfl [vmem:[#allocation1 + $0x18] sm:$0xff pattern:$0x75316420]  ;;  %v174_v57 = vadd.f32 %v173_v51, %v172_v46  ;;  %v181_v59 = vadd.f32 %v180_v53, %v179_v48  ;;  %v1282_v60 = vld.sshfl [vmem:[#allocation1 + $0x30] sm:$0xff pattern:$0x75316420]  ;;  %v43_v51 = vunpack.c.h.bf16 %v1307_v7 }
  0x15   :  { %842 = vmatpush.bf16.msra.mxu3 %v1125_v25  ;;  %v146_v56 = vadd.f32 %v145_v50, %v144_v45  ;;  %v153_v58 = vadd.f32 %v152_v52, %v151_v47  ;;  %v1284_v61 = vld.sshfl [vmem:[#allocation1 + $0x38] sm:$0xff pattern:$0x75316420]  ;;  %76 = vst [vmem:[#allocation1 + $0x10] ss:$2 sm:$0xff] %v33_v42  ;;  %v158_v10 = vsel %vm143_vm0, %v65_v54, 0.0 }
  0x16   :  { %804 = vmatpush.bf16.msra.mxu0 %v1100_v28  ;;  %v175_v4 = vrot.slane %v174_v57, 2  ;;  %82 = vst [vmem:[#allocation1 + $0x30] ss:$2 sm:$0xff] %v35_v43  ;;  %v182_v9 = vrot.slane %v181_v59, 2 }
  0x17   :  { %817 = vmatpush.bf16.msra.mxu1 %v1108_v29  ;;  %v147_v3 = vrot.slane %v146_v56, 2  ;;  %v154_v5 = vrot.slane %v153_v58, 2  ;;  %v83_v15 = vld.sshfl [vmem:[#allocation1 + $0x20] sm:$0xff pattern:$0x75316420] }
  0x18   :  { %830 = vmatpush.bf16.msra.mxu2 %v1116_v31  ;;  %v176_v14 = vadd.f32 %v175_v4, %v174_v57  ;;  %v1311_v16 = vld.sshfl [vmem:[#allocation1 + $0x28] sm:$0xff pattern:$0x75316420]  ;;  %v228_v22 = vsel %vm143_vm0, %v83_v15, 0.0  ;;  %v183_v25 = vadd.f32 %v182_v9, %v181_v59 }
  0x19   :  { %843 = vmatpush.bf16.msra.mxu3 %v1124_v32  ;;  %v77_v11 = vld.sshfl [vmem:[#allocation1] sm:$0xff pattern:$0x75316420]  ;;  %v78_v12 = vld.sshfl [vmem:[#allocation1 + $0x8] sm:$0xff pattern:$0x75316420]  ;;  %v148_v13 = vadd.f32 %v147_v3, %v146_v56  ;;  %v155_v17 = vadd.f32 %v154_v5, %v153_v58 }
  0x1a   :  { %805 = vmatpush.bf16.msra.mxu0 %v1099_v34  ;;  %87 = vst [vmem:[#allocation1] ss:$2 sm:$0xff] %v36_v2  ;;  %v177_v20 = vrot.slane %v176_v14, 1  ;;  %v200_v21 = vsel %vm143_vm0, %v77_v11, 0.0  ;;  %v229_v24 = vrot.slane %v228_v22, 4  ;;  %v184_v42 = vrot.slane %v183_v25, 1 }
  0x1b   :  { %818 = vmatpush.bf16.msra.mxu1 %v1107_v35  ;;  %v149_v19 = vrot.slane %v148_v13, 1  ;;  %93 = vst [vmem:[#allocation1 + $0x20] ss:$2 sm:$0xff] %v38_v8  ;;  %v201_v23 = vrot.slane %v200_v21, 4  ;;  %v159_v35 = vrot.slane %v158_v10, 4  ;;  %v207_v43 = vsel %vm143_vm0, %v78_v12, 0.0 }
  0x1c   :  { %831 = vmatpush.bf16.msra.mxu2 %v1115_v38  ;;  %v178_v29 = vadd.f32 %v177_v20, %v176_v14  ;;  %v1318_v30 = vld.sshfl [vmem:[#allocation1 + $0x10] sm:$0xff pattern:$0x75316420]  ;;  %v230_v32 = vadd.f32 %v229_v24, %v228_v22  ;;  %v1321_v34 = vld.sshfl [vmem:[#allocation1 + $0x18] sm:$0xff pattern:$0x75316420]  ;;  %v1332_v59 = vadd.f32 %v184_v42, %v183_v25 }
  0x1d   :  { %844 = vmatpush.bf16.msra.mxu3 %v1123_v39  ;;  %v150_v28 = vadd.f32 %v149_v19, %v148_v13  ;;  %v202_v31 = vadd.f32 %v201_v23, %v200_v21  ;;  %v156_v38 = vrot.slane %v155_v17, 1  ;;  %v41_v39 = vunpack.c.h.bf16 %v1302_v6  ;;  %88 = vst [vmem:[#allocation1 + $0x10] ss:$2 sm:$0xff] %v37_v18  ;;  %v1326_v52 = vld.sshfl [vmem:[#allocation1 + $0x30] sm:$0xff pattern:$0x75316420] }
  0x1e   :  { %806 = vmatpush.bf16.msra.mxu0 %v1098_v62  ;;  %v372_v37 = vmul.f32 0.25, %v178_v29  ;;  %v231_v41 = vrot.slane %v230_v32, 2  ;;  %v208_v46 = vrot.slane %v207_v43, 4  ;;  %v1328_v53 = vadd.f32 %v159_v35, %v158_v10  ;;  %v1339_v12 = vld.sshfl [vmem:[#allocation1 + $0x38] sm:$0xff pattern:$0x75316420] }
  0x1f   :  { %819 = vmatpush.bf16.msra.mxu1 %v1106_v63  ;;  %v368_v36 = vmul.f32 0.25, %v150_v28  ;;  %v203_v40 = vrot.slane %v202_v31, 2  ;;  %v1330_v58 = vadd.f32 %v156_v38, %v155_v17  ;;  %v235_v10 = vsel %vm143_vm0, %v1311_v16, 0.0  ;;  %94 = vst [vmem:[#allocation1 + $0x30] ss:$2 sm:$0xff] %v39_v33 }
  0x20   :  { %832 = vmatpush.bf16.msra.mxu2 %v1114_v0  ;;  %v404_v45 = vpack.c.bf16 %v372_v37, %v372_v37  ;;  %v232_v50 = vadd.f32 %v231_v41, %v230_v32  ;;  %v209_v62 = vadd.f32 %v208_v46, %v207_v43  ;;  %v236_v17 = vrot.slane %v235_v10, 4 }
  0x21   :  { %845 = vmatpush.bf16.msra.mxu3 %v1122_v1  ;;  %v400_v44 = vpack.c.bf16 %v368_v36, %v368_v36  ;;  %v89_v47 = vld.sshfl [vmem:[#allocation1] sm:$0xff pattern:$0x75316420]  ;;  %v90_v48 = vld.sshfl [vmem:[#allocation1 + $0x8] sm:$0xff pattern:$0x75316420]  ;;  %v204_v49 = vadd.f32 %v203_v40, %v202_v31 }
  0x22   :  { %v95_v54 = vld.sshfl [vmem:[#allocation1 + $0x20] sm:$0xff pattern:$0x75316420]  ;;  %v96_v56 = vld.sshfl [vmem:[#allocation1 + $0x28] sm:$0xff pattern:$0x75316420]  ;;  %v536_v5 = vunpack.c.l.b16 %v404_v45  ;;  %v237_v16 = vadd.f32 %v236_v17, %v235_v10 }
  0x23   :  { %v532_v57 = vunpack.c.l.b16 %v400_v44  ;;  %99 = vst [vmem:[#allocation1] ss:$2 sm:$0xff] %v40_v26  ;;  %v205_v63 = vrot.slane %v204_v49, 1  ;;  %v233_v0 = vrot.slane %v232_v50, 1  ;;  %v256_v1 = vsel %vm143_vm0, %v89_v47, 0.0 }
  0x24   :  { %v284_v2 = vsel %vm143_vm0, %v95_v54, 0.0  ;;  %105 = vst [vmem:[#allocation1 + $0x20] ss:$2 sm:$0xff] %v42_v27  ;;  %v257_v3 = vrot.slane %v256_v1, 4  ;;  %v210_v6 = vrot.slane %v209_v62, 2  ;;  %v263_v11 = vsel %vm143_vm0, %v90_v48, 0.0 }
  0x25   :  { %v285_v4 = vrot.slane %v284_v2, 4  ;;  %v206_v8 = vadd.f32 %v205_v63, %v204_v49  ;;  %v234_v9 = vadd.f32 %v233_v0, %v232_v50  ;;  %v1341_v18 = vld.sshfl [vmem:[#allocation1 + $0x10] sm:$0xff pattern:$0x75316420]  ;;  %v264_v21 = vrot.slane %v263_v11, 4 }
  0x26   :  { %v258_v13 = vadd.f32 %v257_v3, %v256_v1  ;;  %v211_v15 = vadd.f32 %v210_v6, %v209_v62  ;;  %v291_v22 = vsel %vm143_vm0, %v96_v56, 0.0  ;;  %v1344_v26 = vld.sshfl [vmem:[#allocation1 + $0x18] sm:$0xff pattern:$0x75316420]  ;;  %v565_v29 = vsel %vm564_vm1, %v536_v5, %v532_v57 }
  0x27   :  { %v286_v14 = vadd.f32 %v285_v4, %v284_v2  ;;  %v376_v19 = vmul.f32 0.25, %v206_v8  ;;  %v380_v20 = vmul.f32 0.25, %v234_v9  ;;  %v265_v31 = vadd.f32 %v264_v21, %v263_v11  ;;  %100 = vst [vmem:[#allocation1 + $0x10] ss:$2 sm:$0xff] %v41_v39 }
  0x28   :  { %v259_v23 = vrot.slane %v258_v13, 2  ;;  %v212_v25 = vrot.slane %v211_v15, 1  ;;  %v292_v37 = vrot.slane %v291_v22, 4  ;;  %v238_v43 = vrot.slane %v237_v16, 2 }
  0x29   :  { %v287_v24 = vrot.slane %v286_v14, 2  ;;  %v408_v27 = vpack.c.bf16 %v376_v19, %v376_v19  ;;  %v412_v28 = vpack.c.bf16 %v380_v20, %v380_v20  ;;  %v266_v54 = vrot.slane %v265_v31, 2  ;;  %v1353_v0 = vld.sshfl [vmem:[#allocation1 + $0x30] sm:$0xff pattern:$0x75316420] }
  0x2a   :  { %v101_v32 = vld.sshfl [vmem:[#allocation1] sm:$0xff pattern:$0x75316420]  ;;  %v260_v35 = vadd.f32 %v259_v23, %v258_v13  ;;  %v1347_v36 = vadd.f32 %v212_v25, %v211_v15  ;;  %v102_v49 = vld.sshfl [vmem:[#allocation1 + $0x8] sm:$0xff pattern:$0x75316420]  ;;  %v239_v50 = vadd.f32 %v238_v43, %v237_v16  ;;  %v293_v6 = vadd.f32 %v292_v37, %v291_v22 }
  0x2b   :  { %v288_v33 = vadd.f32 %v287_v24, %v286_v14  ;;  %v107_v38 = vld.sshfl [vmem:[#allocation1 + $0x20] sm:$0xff pattern:$0x75316420]  ;;  %v312_v40 = vsel %vm143_vm0, %v101_v32, 0.0  ;;  %v540_v41 = vunpack.c.l.b16 %v408_v27  ;;  %v544_v42 = vunpack.c.l.b16 %v412_v28 }
  0x2c   :  { %v261_v44 = vrot.slane %v260_v35, 1  ;;  %v313_v46 = vrot.slane %v312_v40, 4  ;;  %v340_v47 = vsel %vm143_vm0, %v107_v38, 0.0  ;;  %v1355_v1 = vld.sshfl [vmem:[#allocation1 + $0x38] sm:$0xff pattern:$0x75316420]  ;;  %v267_v5 = vadd.f32 %v266_v54, %v265_v31 }
  0x2d   :  { %v289_v45 = vrot.slane %v288_v33, 1  ;;  %v341_v39 = vrot.slane %v340_v47, 4  ;;  %v567_v48 = vsel %vm566_vm2, %v540_v41, %v565_v29  ;;  %v108_v3 = vld.sshfl [vmem:[#allocation1 + $0x28] sm:$0xff pattern:$0x75316420]  ;;  %v240_v4 = vrot.slane %v239_v50, 1 }
  0x2e   :  { %v262_v56 = vadd.f32 %v261_v44, %v260_v35  ;;  %v314_v62 = vadd.f32 %v313_v46, %v312_v40  ;;  %v569_v63 = vsel %vm568_vm3, %v544_v42, %v567_v48  ;;  %106 = vst [vmem:[#allocation1 + $0x30] ss:$2 sm:$0xff] %v43_v51  ;;  %v319_v11 = vsel %vm143_vm0, %v102_v49, 0.0 }
  0x2f   :  { %v290_v57 = vadd.f32 %v289_v45, %v288_v33  ;;  %v342_v2 = vadd.f32 %v341_v39, %v340_v47  ;;  %v241_v14 = vadd.f32 %v240_v4, %v239_v50  ;;  %v268_v15 = vrot.slane %v267_v5, 1 }
  0x30   :  { %v315_v8 = vrot.slane %v314_v62, 2  ;;  %v384_v9 = vmul.f32 0.25, %v262_v56  ;;  %v294_v17 = vrot.slane %v293_v6, 2  ;;  %v320_v23 = vrot.slane %v319_v11, 4 }
  0x31   :  { %v388_v10 = vmul.f32 0.25, %v290_v57  ;;  %v343_v13 = vrot.slane %v342_v2, 2  ;;  %v269_v25 = vadd.f32 %v268_v15, %v267_v5  ;;  %v347_v7 = vsel %vm143_vm0, %v108_v3, 0.0 }
  0x32   :  { %v316_v19 = vadd.f32 %v315_v8, %v314_v62  ;;  %v416_v20 = vpack.c.bf16 %v384_v9, %v384_v9  ;;  %v295_v22 = vadd.f32 %v294_v17, %v293_v6  ;;  %v321_v28 = vadd.f32 %v320_v23, %v319_v11 }
  0x33   :  { %v420_v21 = vpack.c.bf16 %v388_v10, %v388_v10  ;;  %v344_v24 = vadd.f32 %v343_v13, %v342_v2  ;;  %v348_v32 = vrot.slane %v347_v7, 4  ;;  %v369_v35 = vmul.f32 0.25, %v1330_v58 }
  0x34   :  { %v317_v51 = vrot.slane %v316_v19, 1  ;;  %v548_v16 = vunpack.c.l.b16 %v416_v20  ;;  %v296_v31 = vrot.slane %v295_v22, 1  ;;  %v322_v38 = vrot.slane %v321_v28, 2 }
  0x35   :  { %v552_v27 = vunpack.c.l.b16 %v420_v21  ;;  %v345_v29 = vrot.slane %v344_v24, 1  ;;  %v373_v40 = vmul.f32 0.25, %v1332_v59  ;;  %v349_v44 = vadd.f32 %v348_v32, %v347_v7 }
  0x36   :  { %v318_v33 = vadd.f32 %v317_v51, %v316_v19  ;;  %v571_v37 = vsel %vm570_vm4, %v548_v16, %v569_v63  ;;  %v297_v43 = vadd.f32 %v296_v31, %v295_v22  ;;  %v323_v46 = vadd.f32 %v322_v38, %v321_v28 }
  0x37   :  { %v346_v41 = vadd.f32 %v345_v29, %v344_v24  ;;  %v573_v42 = vsel %vm572_vm5, %v552_v27, %v571_v37  ;;  %v377_v47 = vmul.f32 0.25, %v1347_v36  ;;  %v381_v39 = vmul.f32 0.25, %v241_v14 }
  0x38   :  { %v392_v45 = vmul.f32 0.25, %v318_v33  ;;  %v350_v49 = vrot.slane %v349_v44, 2  ;;  %v385_v50 = vmul.f32 0.25, %v269_v25  ;;  %v389_v58 = vmul.f32 0.25, %v297_v43 }
  0x39   :  { %v396_v48 = vmul.f32 0.25, %v346_v41  ;;  %v324_v56 = vrot.slane %v323_v46, 1  ;;  %v401_v57 = vpack.c.bf16 %v369_v35, %v369_v35  ;;  %v405_v62 = vpack.c.bf16 %v373_v40, %v373_v40 }
  0x3a   :  { %v424_v54 = vpack.c.bf16 %v392_v45, %v392_v45  ;;  %v351_v59 = vadd.f32 %v350_v49, %v349_v44  ;;  %v409_v2 = vpack.c.bf16 %v377_v47, %v377_v47  ;;  %v413_v3 = vpack.c.bf16 %v381_v39, %v381_v39  ;;  %v109_v47 = vld.sshfl [vmem:[#allocation1 + $0x30] sm:$0xff pattern:$0x75316420] }
  0x3b   :  { %v428_v63 = vpack.c.bf16 %v396_v48, %v396_v48  ;;  %v325_v5 = vadd.f32 %v324_v56, %v323_v46  ;;  %v417_v6 = vpack.c.bf16 %v385_v50, %v385_v50  ;;  %v421_v8 = vpack.c.bf16 %v389_v58, %v389_v58 }
  0x3c   :  { %v556_v4 = vunpack.c.l.b16 %v424_v54  ;;  %v352_v10 = vrot.slane %v351_v59, 1  ;;  %v533_v36 = vunpack.c.l.b16 %v401_v57  ;;  %v537_v11 = vunpack.c.l.b16 %v405_v62 }
  0x3d   :  { %v560_v9 = vunpack.c.l.b16 %v428_v63  ;;  %v393_v14 = vmul.f32 0.25, %v325_v5  ;;  %v541_v15 = vunpack.c.l.b16 %v409_v2  ;;  %v545_v17 = vunpack.c.l.b16 %v413_v3 }
  0x3e   :  { %v575_v13 = vsel %vm574_vm6, %v556_v4, %v573_v42  ;;  %v353_v20 = vadd.f32 %v352_v10, %v351_v59  ;;  %v549_v21 = vunpack.c.l.b16 %v417_v6  ;;  %v553_v23 = vunpack.c.l.b16 %v421_v8 }
  0x3f   :  { %v577_v19 = vsel %vm576_vm7, %v560_v9, %v575_v13  ;;  %v425_v25 = vpack.c.bf16 %v393_v14, %v393_v14  ;;  %v578_v22 = vsel %vm564_vm1, %v537_v11, %v533_v36  ;;  %v161_v7 = vrot.slane %v1328_v53, 2 }
  0x40   :  { %v599_v24 = vpack.c.b16 %v577_v19, %v577_v19  ;;  %v397_v51 = vmul.f32 0.25, %v353_v20  ;;  %v579_v16 = vsel %vm566_vm2, %v541_v15, %v578_v22  ;;  %v186_v27 = vsel %vm143_vm0, %v1282_v60, 0.0  ;;  %v103_v60 = vld.sshfl [vmem:[#allocation1 + $0x10] sm:$0xff pattern:$0x75316420] }
  0x41   :  { %v214_v28 = vsel %vm143_vm0, %v1318_v30, 0.0  ;;  %v557_v29 = vunpack.c.l.b16 %v425_v25  ;;  %v580_v31 = vsel %vm568_vm3, %v545_v17, %v579_v16  ;;  %v162_v32 = vadd.f32 %v161_v7, %v1328_v53 }
  0x42   :  { %807 = vmatmul.bf16.vlgmr.msra.gmra.mxu0 %v599_v24  ;;  %v187_v35 = vrot.slane %v186_v27, 4  ;;  %v429_v33 = vpack.c.bf16 %v397_v51, %v397_v51  ;;  %v581_v37 = vsel %vm570_vm4, %v549_v21, %v580_v31  ;;  %v215_v38 = vrot.slane %v214_v28, 4 }
  0x43   :  { %v242_v40 = vsel %vm143_vm0, %v1326_v52, 0.0  ;;  %v582_v41 = vsel %vm572_vm5, %v553_v23, %v581_v37  ;;  %v163_v42 = vrot.slane %v162_v32, 1  ;;  %v270_v53 = vsel %vm143_vm0, %v1341_v18, 0.0 }
  0x44   :  { %v188_v43 = vadd.f32 %v187_v35, %v186_v27  ;;  %v243_v30 = vrot.slane %v242_v40, 4  ;;  %v561_v44 = vunpack.c.l.b16 %v429_v33  ;;  %v583_v45 = vsel %vm574_vm6, %v557_v29, %v582_v41 }
  0x45   :  { %v216_v46 = vadd.f32 %v215_v38, %v214_v28  ;;  %v164_v39 = vadd.f32 %v163_v42, %v162_v32  ;;  %v271_v50 = vrot.slane %v270_v53, 4  ;;  %v298_v54 = vsel %vm143_vm0, %v1353_v0, 0.0 }
  0x46   :  { %v189_v48 = vrot.slane %v188_v43, 2  ;;  %v244_v49 = vadd.f32 %v243_v30, %v242_v40  ;;  %v584_v52 = vsel %vm576_vm7, %v561_v44, %v583_v45  ;;  %v326_v56 = vsel %vm143_vm0, %v103_v60, 0.0 }
  0x47   :  { %v217_v58 = vrot.slane %v216_v46, 2  ;;  %v600_v57 = vpack.c.b16 %v584_v52, %v584_v52  ;;  %v272_v59 = vadd.f32 %v271_v50, %v270_v53  ;;  %v299_v3 = vrot.slane %v298_v54, 4 }
  0x48   :  { %v190_v62 = vadd.f32 %v189_v48, %v188_v43  ;;  %v245_v63 = vrot.slane %v244_v49, 2  ;;  %v327_v18 = vrot.slane %v326_v56, 4  ;;  %v354_v4 = vsel %vm143_vm0, %v109_v47, 0.0 }
  0x49   :  { %v218_v2 = vadd.f32 %v217_v58, %v216_v46  ;;  %820 = vmatmul.bf16.vlgmr.msra.gmra.mxu1 %v600_v57  ;;  %v273_v8 = vrot.slane %v272_v59, 2  ;;  %v355_v9 = vrot.slane %v354_v4, 4  ;;  %v300_v36 = vadd.f32 %v299_v3, %v298_v54 }
  0x4a   :  { %v191_v5 = vrot.slane %v190_v62, 1  ;;  %v246_v6 = vadd.f32 %v245_v63, %v244_v49  ;;  %v328_v11 = vadd.f32 %v327_v18, %v326_v56  ;;  %v370_v0 = vmul.f32 0.25, %v164_v39 }
  0x4b   :  { %v219_v10 = vrot.slane %v218_v2, 1  ;;  %v274_v15 = vadd.f32 %v273_v8, %v272_v59  ;;  %v356_v17 = vadd.f32 %v355_v9, %v354_v4  ;;  %v301_v20 = vrot.slane %v300_v36, 2 }
  0x4c   :  { %v192_v13 = vadd.f32 %v191_v5, %v190_v62  ;;  %v247_v14 = vrot.slane %v246_v6, 1  ;;  %v329_v21 = vrot.slane %v328_v11, 2  ;;  %v402_v23 = vpack.c.bf16 %v370_v0, %v370_v0  ;;  %v1137_v62 = vld [vmem:[%s1453_s3 + $0x38] sm:$0xff] }
  0x4d   :  { %v220_v19 = vadd.f32 %v219_v10, %v218_v2  ;;  %v275_v25 = vrot.slane %v274_v15, 1  ;;  %v357_v22 = vrot.slane %v356_v17, 2  ;;  %v302_v51 = vadd.f32 %v301_v20, %v300_v36  ;;  %920 = vmatpush.bf16.msrb.mxu0 %v1137_v62 }
  0x4e   :  { %v248_v24 = vadd.f32 %v247_v14, %v246_v6  ;;  %v374_v7 = vmul.f32 0.25, %v192_v13  ;;  %v330_v16 = vadd.f32 %v329_v21, %v328_v11  ;;  %v534_v28 = vunpack.c.l.b16 %v402_v23  ;;  %v110_v21 = vld.sshfl [vmem:[#allocation1 + $0x38] sm:$0xff pattern:$0x75316420] }
  0x4f   :  { %v378_v27 = vmul.f32 0.25, %v220_v19  ;;  %v276_v29 = vadd.f32 %v275_v25, %v274_v15  ;;  %v358_v31 = vadd.f32 %v357_v22, %v356_v17  ;;  %v303_v33 = vrot.slane %v302_v51, 1  ;;  %v104_v15 = vld.sshfl [vmem:[#allocation1 + $0x18] sm:$0xff pattern:$0x75316420]  ;;  %v1135_v22 = vld [vmem:[%s1453_s3 + $0x28] sm:$0xff] }
  0x50   :  { %v382_v32 = vmul.f32 0.25, %v248_v24  ;;  %v406_v35 = vpack.c.bf16 %v374_v7, %v374_v7  ;;  %v331_v37 = vrot.slane %v330_v16, 1  ;;  %v165_v40 = vsel %vm143_vm0, %v1280_v55, 0.0 }
  0x51   :  { %v410_v38 = vpack.c.bf16 %v378_v27, %v378_v27  ;;  %v359_v41 = vrot.slane %v358_v31, 1  ;;  %v386_v60 = vmul.f32 0.25, %v276_v29  ;;  %v304_v30 = vadd.f32 %v303_v33, %v302_v51 }
  0x52   :  { %v414_v42 = vpack.c.bf16 %v382_v32, %v382_v32  ;;  %v538_v43 = vunpack.c.l.b16 %v406_v35  ;;  %v332_v44 = vadd.f32 %v331_v37, %v330_v16  ;;  %v166_v46 = vrot.slane %v165_v40, 4 }
  0x53   :  { %v542_v45 = vunpack.c.l.b16 %v410_v38  ;;  %v360_v53 = vadd.f32 %v359_v41, %v358_v31  ;;  %v418_v47 = vpack.c.bf16 %v386_v60, %v386_v60  ;;  %v390_v49 = vmul.f32 0.25, %v304_v30  ;;  %v1134_v60 = vld [vmem:[%s1453_s3 + $0x20] sm:$0xff] }
  0x54   :  { %v546_v39 = vunpack.c.l.b16 %v414_v42  ;;  %v585_v48 = vsel %vm564_vm1, %v538_v43, %v534_v28  ;;  %v394_v50 = vmul.f32 0.25, %v332_v44  ;;  %v167_v58 = vadd.f32 %v166_v46, %v165_v40 }
  0x55   :  { %v586_v52 = vsel %vm566_vm2, %v542_v45, %v585_v48  ;;  %v398_v54 = vmul.f32 0.25, %v360_v53  ;;  %v550_v55 = vunpack.c.l.b16 %v418_v47  ;;  %v193_v57 = vsel %vm143_vm0, %v1284_v61, 0.0  ;;  %v1136_v61 = vld [vmem:[%s1453_s3 + $0x30] sm:$0xff] }
  0x56   :  { %v587_v56 = vsel %vm568_vm3, %v546_v39, %v586_v52  ;;  %v422_v63 = vpack.c.bf16 %v390_v49, %v390_v49  ;;  %v426_v59 = vpack.c.bf16 %v394_v50, %v394_v50  ;;  %v168_v2 = vrot.slane %v167_v58, 2  ;;  %921 = vmatpush.bf16.msrb.mxu0 %v1136_v61 }
  0x57   :  { %v194_v3 = vrot.slane %v193_v57, 4  ;;  %v430_v18 = vpack.c.bf16 %v398_v54, %v398_v54  ;;  %v588_v4 = vsel %vm570_vm4, %v550_v55, %v587_v56  ;;  %v221_v5 = vsel %vm143_vm0, %v1321_v34, 0.0  ;;  %v1133_v56 = vld [vmem:[%s1453_s3 + $0x18] sm:$0xff] }
  0x58   :  { %v249_v6 = vsel %vm143_vm0, %v1339_v12, 0.0  ;;  %v554_v8 = vunpack.c.l.b16 %v422_v63  ;;  %v558_v9 = vunpack.c.l.b16 %v426_v59  ;;  %v169_v10 = vadd.f32 %v168_v2, %v167_v58 }
  0x59   :  { %v195_v36 = vadd.f32 %v194_v3, %v193_v57  ;;  %v562_v11 = vunpack.c.l.b16 %v430_v18  ;;  %v222_v0 = vrot.slane %v221_v5, 4  ;;  %v250_v13 = vrot.slane %v249_v6, 4 }
  0x5a   :  { %v277_v14 = vsel %vm143_vm0, %v1344_v26, 0.0  ;;  %v589_v34 = vsel %vm572_vm5, %v554_v8, %v588_v4  ;;  %v170_v17 = vrot.slane %v169_v10, 1  ;;  %v305_v25 = vsel %vm143_vm0, %v1355_v1, 0.0  ;;  %922 = vmatpush.bf16.msrb.mxu0 %v1135_v22 }
  0x5b   :  { %v196_v12 = vrot.slane %v195_v36, 2  ;;  %v278_v19 = vrot.slane %v277_v14, 4  ;;  %v590_v20 = vsel %vm574_vm6, %v558_v9, %v589_v34  ;;  %v223_v23 = vadd.f32 %v222_v0, %v221_v5 }
  0x5c   :  { %v251_v24 = vadd.f32 %v250_v13, %v249_v6  ;;  %v591_v26 = vsel %vm576_vm7, %v562_v11, %v590_v20  ;;  %v171_v7 = vadd.f32 %v170_v17, %v169_v10  ;;  %v306_v31 = vrot.slane %v305_v25, 4 }
  0x5d   :  { %v197_v51 = vadd.f32 %v196_v12, %v195_v36  ;;  %v279_v16 = vadd.f32 %v278_v19, %v277_v14  ;;  %v601_v27 = vpack.c.b16 %v591_v26, %v591_v26  ;;  %v224_v28 = vrot.slane %v223_v23, 2 }
  0x5e   :  { %v252_v29 = vrot.slane %v251_v24, 2  ;;  %v333_v33 = vsel %vm143_vm0, %v104_v15, 0.0  ;;  %v361_v1 = vsel %vm143_vm0, %v110_v21, 0.0  ;;  %v307_v40 = vadd.f32 %v306_v31, %v305_v25  ;;  %923 = vmatpush.bf16.msrb.mxu0 %v1134_v60 }
  0x5f   :  { %v198_v32 = vrot.slane %v197_v51, 1  ;;  %v280_v35 = vrot.slane %v279_v16, 2  ;;  %833 = vmatmul.bf16.vlgmr.msra.gmra.mxu2 %v601_v27  ;;  %v225_v37 = vadd.f32 %v224_v28, %v223_v23  ;;  %v334_v41 = vrot.slane %v333_v33, 4 }
  0x60   :  { %v253_v38 = vadd.f32 %v252_v29, %v251_v24  ;;  %v362_v30 = vrot.slane %v361_v1, 4  ;;  %v371_v44 = vmul.f32 0.25, %v171_v7  ;;  %v308_v53 = vrot.slane %v307_v40, 2 }
  0x61   :  { %v199_v42 = vadd.f32 %v198_v32, %v197_v51  ;;  %v281_v43 = vadd.f32 %v280_v35, %v279_v16  ;;  %v226_v45 = vrot.slane %v225_v37, 1  ;;  %v335_v47 = vadd.f32 %v334_v41, %v333_v33  ;;  %v1132_v35 = vld [vmem:[%s1453_s3 + $0x10] sm:$0xff]  ;;  %v1130_v41 = vld [vmem:[%s1453_s3] sm:$0xff] }
  0x62   :  { %v254_v46 = vrot.slane %v253_v38, 1  ;;  %v363_v48 = vadd.f32 %v362_v30, %v361_v1  ;;  %v403_v50 = vpack.c.bf16 %v371_v44, %v371_v44  ;;  %v309_v54 = vadd.f32 %v308_v53, %v307_v40  ;;  %924 = vmatpush.bf16.msrb.mxu0 %v1133_v56  ;;  %v1131_v40 = vld [vmem:[%s1453_s3 + $0x8] sm:$0xff] }
  0x63   :  { %v282_v39 = vrot.slane %v281_v43, 1  ;;  %v375_v49 = vmul.f32 0.25, %v199_v42  ;;  %v227_v52 = vadd.f32 %v226_v45, %v225_v37  ;;  %v336_v55 = vrot.slane %v335_v47, 2  ;;  %v1138_v42 = vld [vmem:[%s1452_s2] ss:$0 sm:$0xff] }
  0x64   :  { %v255_v58 = vadd.f32 %v254_v46, %v253_v38  ;;  %v364_v62 = vrot.slane %v363_v48, 2  ;;  %v535_v59 = vunpack.c.l.b16 %v403_v50  ;;  %v310_v2 = vrot.slane %v309_v54, 1 }
  0x65   :  { %v283_v57 = vadd.f32 %v282_v39, %v281_v43  ;;  %v407_v63 = vpack.c.bf16 %v375_v49, %v375_v49  ;;  %v337_v3 = vadd.f32 %v336_v55, %v335_v47  ;;  %v379_v18 = vmul.f32 0.25, %v227_v52 }
  0x66   :  { %v383_v4 = vmul.f32 0.25, %v255_v58  ;;  %v365_v5 = vadd.f32 %v364_v62, %v363_v48  ;;  %v311_v8 = vadd.f32 %v310_v2, %v309_v54  ;;  %925 = vmatpush.bf16.msrb.mxu0 %v1132_v35  ;;  %v1139_v48 = vld [vmem:[%s1454_s4] ss:$0 sm:$0xff] }
  0x67   :  { %v387_v6 = vmul.f32 0.25, %v283_v57  ;;  %v539_v61 = vunpack.c.l.b16 %v407_v63  ;;  %v338_v9 = vrot.slane %v337_v3, 1  ;;  %v411_v10 = vpack.c.bf16 %v379_v18, %v379_v18 }
  0x68   :  { %v415_v36 = vpack.c.bf16 %v383_v4, %v383_v4  ;;  %v366_v11 = vrot.slane %v365_v5, 1  ;;  %v391_v34 = vmul.f32 0.25, %v311_v8 }
  0x69   :  { %v419_v0 = vpack.c.bf16 %v387_v6, %v387_v6  ;;  %v592_v13 = vsel %vm564_vm1, %v539_v61, %v535_v59  ;;  %v339_v14 = vadd.f32 %v338_v9, %v337_v3  ;;  %v543_v15 = vunpack.c.l.b16 %v411_v10 }
  0x6a   :  { %v547_v17 = vunpack.c.l.b16 %v415_v36  ;;  %v367_v12 = vadd.f32 %v366_v11, %v365_v5  ;;  %v423_v21 = vpack.c.bf16 %v391_v34, %v391_v34  ;;  %926 = vmatpush.bf16.msrb.mxu0 %v1131_v40 }
  0x6b   :  { %v551_v19 = vunpack.c.l.b16 %v419_v0  ;;  %v395_v20 = vmul.f32 0.25, %v339_v14  ;;  %v593_v23 = vsel %vm566_vm2, %v543_v15, %v592_v13 }
  0x6c   :  { %v399_v24 = vmul.f32 0.25, %v367_v12  ;;  %v594_v25 = vsel %vm568_vm3, %v547_v17, %v593_v23  ;;  %v555_v26 = vunpack.c.l.b16 %v423_v21 }
  0x6d   :  { %v427_v22 = vpack.c.bf16 %v395_v20, %v395_v20  ;;  %v595_v7 = vsel %vm570_vm4, %v551_v19, %v594_v25 }
  0x6e   :  { %v431_v51 = vpack.c.bf16 %v399_v24, %v399_v24  ;;  %v596_v27 = vsel %vm572_vm5, %v555_v26, %v595_v7  ;;  %927 = vmatpush.bf16.msrb.mxu0 %v1130_v41 }
  0x6f   :  { %v559_v16 = vunpack.c.l.b16 %v427_v22 }
  0x70   :  { %v563_v28 = vunpack.c.l.b16 %v431_v51 }
  0x71   :  { %v597_v29 = vsel %vm574_vm6, %v559_v16, %v596_v27 }
  0x72   :  { %v598_v31 = vsel %vm576_vm7, %v563_v28, %v597_v29 }
  0x73   :  { %v602_v32 = vpack.c.b16 %v598_v31, %v598_v31 }
  0x75   :  { %846 = vmatmul.bf16.vlgmr.msra.gmra.mxu3 %v602_v32 }
  0xbf   :  { %v808_v33 = vpop.f32.mrf.mxu0 }
  0xc0   :  { %v809_v30 = vadd.f32 %v1138_v42, %v808_v33 }
  0xc6   :  { %v821_v1 = vpop.f32.mrf.mxu1 }
  0xc7   :  { %v810_v37 = vpop.f32.mrf.mxu0  ;;  %v822_v44 = vadd.f32 %v821_v1, %v809_v30 }
  0xce   :  { %v823_v38 = vpop.f32.mrf.mxu1 }
  0xe2   :  { %v834_v60 = vpop.f32.mrf.mxu2 }
  0xe3   :  { %v835_v45 = vadd.f32 %v834_v60, %v822_v44 }
  0xea   :  { %v836_v43 = vpop.f32.mrf.mxu2 }
  0xf8   :  { %v847_v46 = vpop.f32.mrf.mxu3 }
  0xf9   :  { %v848_v53 = vadd.f32 %v847_v46, %v835_v45 }
  0xfb   :  { %v851_v47 = vpack.c.bf16 %v848_v53, %v848_v53 }
  0xfd   :  { %928 = vmatmul.bf16.vlgmr.msrb.gmra.mxu0 %v851_v47 }
 0x100   :  { %v849_v39 = vpop.f32.mrf.mxu3 }
 0x17a   :  { %v929_v49 = vpop.f32.mrf.mxu0 }
 0x17b   :  { %v930_v50 = vadd.f32 %v1139_v48, %v929_v49 }
 0x17d   :  { %933 = vst [vmem:[%s1455_s5] sm:$0xff] %v930_v50 }
 0x182   :  { %v931_v52 = vpop.f32.mrf.mxu0 }

</bundles_post_ra>
